<compile_context>
chip_gen: v5e
topology: v5e:2x2
jax: 0.10.0
libtpu: 0.0.40
codegen_flags: <defaults>
</compile_context>

<pallas_src>
import functools
import math

import jax
import jax.numpy as jnp
from jax import lax
from jax.experimental import pallas as pl
from jax.experimental.pallas import tpu as pltpu


# -----------------------------------------------------------------------------
# Model configuration (stand-in sizes for the torchvision model)
# -----------------------------------------------------------------------------
IMG = 32
BACKBONE_C = 32          # stand-in for ResNet-50 stem/stages
FPN_C = 64               # stand-in for FPN's 256 channels
NUM_ANCHORS = 3
ROI_SIZE = 7             # box_roi_pool output size
CROP = 14                # crop size pooled 2x2 -> 7x7
REPR = 128               # stand-in for TwoMLPHead's 1024 (box_predictor in_features)
N_CLASSES = 5            # settings['n_classes']
PROPOSALS_PER_IMG = 4
ANCHOR = 16.0

FC6_K = FPN_C * ROI_SIZE * ROI_SIZE          # 3136
RPN_OUT_PAD = 128                            # fused RPN head padded to 128 lanes
PRED_OUT_PAD = 128                           # fused predictor padded to 128 lanes
ROW_TILE = 256                               # conv dy-accumulator sub-tile rows
BBOX_XFORM_CLIP = math.log(1000.0 / 16.0)    # torchvision's dw/dh clamp

IMAGENET_MEAN = jnp.array([0.485, 0.456, 0.406], jnp.float32)
IMAGENET_STD = jnp.array([0.229, 0.224, 0.225], jnp.float32)

_IPS_CACHE = {}


def _images_per_step(n):
    """Images folded into one grid step.

    Single-TensorCore chips (v5e/v6e): one big step (grid steps are a
    sequential loop, ~0.35us each of pure overhead).  Multi-core chips (v7x):
    keep >= 2 parallel steps so both TensorCores get work.
    """
    if n in _IPS_CACHE:
        return _IPS_CACHE[n]
    kind = ""
    try:
        kind = jax.devices()[0].device_kind.lower()
    except Exception:  # pragma: no cover - detection is best-effort only
        pass
    single_tc = any(t in kind for t in
                    ("v5e", "v5 lite", "v5lite", "v6e", "v6 lite", "v6lite"))
    g = n if single_tc else max(1, n // 2)
    while n % g:
        g -= 1
    _IPS_CACHE[n] = g
    return g


# -----------------------------------------------------------------------------
# Pallas kernels
# -----------------------------------------------------------------------------
def _conv_fused_kernel(x_ref, w_ref, b_ref, pw_ref, pb_ref, o_ref, *, G, H, W,
                       row_tile):
    """Fused 3x3 conv + ReLU + 1x1 pointwise epilogue for G images.

    x_ref : (G*(H+2)*W, 3*Cin) bf16 -- dx-im2col slab flattened over (img, y, x)
    w_ref : (3, 3*Cin, Cmid)   bf16 -- one (3*Cin, Cmid) matrix per dy tap
    b_ref : (1, Cmid)          f32  -- conv bias (ReLU applied after)
    pw_ref: (Cmid, Cout)       bf16 -- epilogue 1x1 weights (FPN proj / RPN head)
    pb_ref: (1, Cout)          f32  -- epilogue bias (no activation)
    o_ref : (G*H*W, Cout)      bf16

    The 3 dy taps are accumulated in f32 over row_tile-row sub-tiles so the
    accumulator stays <= 16 vregs; each tap is an aligned sublane slice of the
    VMEM-resident input block.
    """
    hw = H * W
    rows_in = (H + 2) * W
    cmid = b_ref.shape[-1]
    b = b_ref[...]
    pw = pw_ref[...]
    pb = pb_ref[...]
    for g in range(G):                                   # static unroll
        for t in range(hw // row_tile):                  # static unroll
            r0 = t * row_tile
            acc = jnp.zeros((row_tile, cmid), jnp.float32)
            for dy in range(3):                          # static unroll
                s = g * rows_in + dy * W + r0
                patch = x_ref[s:s + row_tile, :]         # (row_tile, 3*Cin) bf16
                acc = acc + jnp.dot(patch, w_ref[dy],
                                    preferred_element_type=jnp.float32)
            h = jnp.maximum(acc + b, 0.0).astype(pw.dtype)          # conv ReLU
            out = jnp.dot(h, pw, preferred_element_type=jnp.float32) + pb
            o_ref[g * hw + r0:g * hw + r0 + row_tile, :] = out.astype(o_ref.dtype)


def _roi_head_kernel(x_ref, w6_ref, b6_ref, w7_ref, b7_ref, wp_ref, bp_ref,
                     o_ref):
    """Fused ROI head: fc6 -> ReLU -> fc7 -> ReLU -> predictor.

    All weights are VMEM-resident bf16; fc6 is a single full-K (3136) block,
    the predictor output is padded to 128 lanes (unmasked stores).
    """
    h6 = jnp.dot(x_ref[...], w6_ref[...],
                 preferred_element_type=jnp.float32) + b6_ref[...]
    h6 = jnp.maximum(h6, 0.0).astype(w7_ref.dtype)
    h7 = jnp.dot(h6, w7_ref[...],
                 preferred_element_type=jnp.float32) + b7_ref[...]
    h7 = jnp.maximum(h7, 0.0).astype(wp_ref.dtype)
    out = jnp.dot(h7, wp_ref[...],
                  preferred_element_type=jnp.float32) + bp_ref[...]
    o_ref[...] = out


# -----------------------------------------------------------------------------
# Pallas wrappers
# -----------------------------------------------------------------------------
def conv3x3_fused(x_slab, conv_w, conv_b, pw, pb, *, N, H, W,
                  row_tile=ROW_TILE, out_dtype=jnp.bfloat16):
    """3x3 conv (stride 1, pad 1) + ReLU + 1x1 pointwise epilogue.

    x_slab: (N*(H+2)*W, 3*Cin) bf16 dx-im2col slab.  Returns (N*H*W, Cout).
    """
    cin3 = x_slab.shape[-1]
    cmid = conv_w.shape[-1]
    cout = pw.shape[-1]
    assert conv_w.shape == (3, cin3, cmid) and conv_b.shape == (1, cmid)
    assert pw.shape == (cmid, cout) and pb.shape == (1, cout)
    row_tile = min(row_tile, H * W)
    assert (H * W) % row_tile == 0

    G = _images_per_step(N)          # images per grid step (per-generation)
    GS = N // G
    rows_in = (H + 2) * W

    return pl.pallas_call(
        functools.partial(_conv_fused_kernel, G=G, H=H, W=W, row_tile=row_tile),
        out_shape=jax.ShapeDtypeStruct((N * H * W, cout), out_dtype),
        grid=(GS,),
        in_specs=[
            pl.BlockSpec((G * rows_in, cin3), lambda i: (i, 0)),
            pl.BlockSpec((3, cin3, cmid), lambda i: (0, 0, 0)),
            pl.BlockSpec((1, cmid), lambda i: (0, 0)),
            pl.BlockSpec((cmid, cout), lambda i: (0, 0)),
            pl.BlockSpec((1, cout), lambda i: (0, 0)),
        ],
        out_specs=pl.BlockSpec((G * H * W, cout), lambda i: (i, 0)),
        compiler_params=pltpu.CompilerParams(
            dimension_semantics=("parallel",)),
    )(x_slab, conv_w, conv_b, pw, pb)


def pallas_roi_head(x, w6, b6, w7, b7, wp, bp):
    """Fused TwoMLPHead + FastRCNNPredictor.  x: (NK, FC6_K) bf16."""
    nk = x.shape[0]
    cout = wp.shape[1]

    def spec2d(a):
        return pl.BlockSpec(a.shape, lambda i: (0, 0))

    return pl.pallas_call(
        _roi_head_kernel,
        out_shape=jax.ShapeDtypeStruct((nk, cout), jnp.float32),
        grid=(1,),
        in_specs=[spec2d(x), spec2d(w6), spec2d(b6), spec2d(w7), spec2d(b7),
                  spec2d(wp), spec2d(bp)],
        out_specs=pl.BlockSpec((nk, cout), lambda i: (0, 0)),
    )(x, w6, b6, w7, b7, wp, bp)


def _im2col_dx(xp):
    """(N, H+2, W+2, Cin) -> (N*(H+2)*W, 3*Cin) bf16 dx-im2col slab."""
    # TODO(synk): this still materializes a 3x-wide dx slab via an XLA concat;
    # producer-side shifted stores (or in-kernel dx-tap formation) would remove
    # the extra HBM roundtrip.
    n, hp2, wp2, cin = xp.shape
    w = wp2 - 2
    xc = jnp.concatenate([xp[:, :, dx:dx + w, :] for dx in range(3)], axis=-1)
    return xc.astype(jnp.bfloat16).reshape(n * hp2 * w, 3 * cin)


# -----------------------------------------------------------------------------
# Parameters
# -----------------------------------------------------------------------------
def init_params(key):
    def dense(k, shape):
        return jax.random.normal(k, shape, jnp.float32) * 0.05

    ks = jax.random.split(key, 9)
    return {
        "backbone_w": dense(ks[0], (3, 3, 3, BACKBONE_C)),
        "backbone_b": jnp.zeros((BACKBONE_C,), jnp.float32),
        "fpn_w": dense(ks[1], (BACKBONE_C, FPN_C)),
        "fpn_b": jnp.zeros((FPN_C,), jnp.float32),
        "rpn_conv_w": dense(ks[2], (3, 3, FPN_C, FPN_C)),
        "rpn_conv_b": jnp.zeros((FPN_C,), jnp.float32),
        "rpn_cls_w": dense(ks[3], (FPN_C, NUM_ANCHORS)),
        "rpn_cls_b": jnp.zeros((NUM_ANCHORS,), jnp.float32),
        "rpn_bbox_w": dense(ks[4], (FPN_C, 4 * NUM_ANCHORS)),
        "rpn_bbox_b": jnp.zeros((4 * NUM_ANCHORS,), jnp.float32),
        "fc6_w": dense(ks[5], (FC6_K, REPR)),
        "fc6_b": jnp.zeros((REPR,), jnp.float32),
        "fc7_w": dense(ks[6], (REPR, REPR)),
        "fc7_b": jnp.zeros((REPR,), jnp.float32),
        "cls_score_w": dense(ks[7], (REPR, N_CLASSES)),
        "cls_score_b": jnp.zeros((N_CLASSES,), jnp.float32),
        "bbox_pred_w": dense(ks[8], (REPR, 4 * N_CLASSES)),
        "bbox_pred_b": jnp.zeros((4 * N_CLASSES,), jnp.float32),
    }


def prepare_params(params):
    """One-time (non-traced) weight preparation: fold normalization into the
    first conv, fuse + lane-pad the small heads, cast matmul weights to bf16,
    reshape conv weights for the dy-tap kernel, reshape biases to (1, N)."""
    mean = IMAGENET_MEAN
    inv_std = 1.0 / IMAGENET_STD

    # Fold (x - mean) / std into the backbone conv: w' = w/std, b' = b - sum w'*mean.
    bb_w = params["backbone_w"] * inv_std[None, None, :, None]     # (3,3,3,C)
    bb_b = params["backbone_b"] - jnp.einsum("yxio,i->o", bb_w, mean)

    def pad_cols(w, n):
        return jnp.zeros((w.shape[0], n), w.dtype).at[:, :w.shape[1]].set(w)

    # fused RPN head: [cls(3) | bbox(12) | zeros], padded to 128 lanes
    rpn_head_w = jnp.concatenate([params["rpn_cls_w"], params["rpn_bbox_w"]], axis=1)
    rpn_head_b = jnp.concatenate([params["rpn_cls_b"], params["rpn_bbox_b"]])[None, :]
    # fused predictor: [cls_score(5) | bbox_pred(20) | zeros], padded to 128 lanes
    pred_w = jnp.concatenate([params["cls_score_w"], params["bbox_pred_w"]], axis=1)
    pred_b = jnp.concatenate([params["cls_score_b"], params["bbox_pred_b"]])[None, :]

    return {
        "pad_mean": mean,  # pad raw image with mean == pad-after-normalize with 0
        "backbone_w": bb_w.reshape(3, 3 * 3, BACKBONE_C).astype(jnp.bfloat16),
        "backbone_b": bb_b.reshape(1, BACKBONE_C),
        "fpn_w": params["fpn_w"].astype(jnp.bfloat16),
        "fpn_b": params["fpn_b"].reshape(1, FPN_C),
        "rpn_conv_w": params["rpn_conv_w"].reshape(3, 3 * FPN_C, FPN_C)
                                          .astype(jnp.bfloat16),
        "rpn_conv_b": params["rpn_conv_b"].reshape(1, FPN_C),
        "rpn_head_w": pad_cols(rpn_head_w, RPN_OUT_PAD).astype(jnp.bfloat16),
        "rpn_head_b": pad_cols(rpn_head_b, RPN_OUT_PAD),
        # TODO(synk): fc6 rows assume an NHWC (y, x, c) ROI flatten; permute the
        # rows here if real torchvision (NCHW-flatten) fc6 weights are loaded.
        "fc6_w": params["fc6_w"].astype(jnp.bfloat16),
        "fc6_b": params["fc6_b"].reshape(1, REPR),
        "fc7_w": params["fc7_w"].astype(jnp.bfloat16),
        "fc7_b": params["fc7_b"].reshape(1, REPR),
        "predictor_w": pad_cols(pred_w, PRED_OUT_PAD).astype(jnp.bfloat16),
        "predictor_b": pad_cols(pred_b, PRED_OUT_PAD),
    }


# -----------------------------------------------------------------------------
# Detection glue (plain JAX)
# -----------------------------------------------------------------------------
def decode_boxes(proposals, deltas, img_hw):
    """torchvision-style box decoding (dx, dy, dw, dh on x1y1x2y2 boxes)."""
    H, W = img_hw
    w = proposals[:, 2] - proposals[:, 0]
    h = proposals[:, 3] - proposals[:, 1]
    cx = proposals[:, 0] + 0.5 * w
    cy = proposals[:, 1] + 0.5 * h
    dx, dy, dw, dh = deltas[:, 0], deltas[:, 1], deltas[:, 2], deltas[:, 3]
    pcx = dx * w + cx
    pcy = dy * h + cy
    pw = jnp.exp(jnp.minimum(dw, BBOX_XFORM_CLIP)) * w
    ph = jnp.exp(jnp.minimum(dh, BBOX_XFORM_CLIP)) * h
    x1 = jnp.clip(pcx - 0.5 * pw, 0.0, float(W))
    y1 = jnp.clip(pcy - 0.5 * ph, 0.0, float(H))
    x2 = jnp.clip(pcx + 0.5 * pw, 0.0, float(W))
    y2 = jnp.clip(pcy + 0.5 * ph, 0.0, float(H))
    return jnp.stack([x1, y1, x2, y2], axis=-1)


def _roi_pool_one(feat_img, sy, sx):
    # TODO(synk): bilinear RoIAlign replaced by fixed 14x14 crop + 2x2 avg pool;
    # moving this crop/pool into the fused ROI-head kernel (scalar-prefetched
    # sy/sx + manual DMA) would remove the remaining XLA gather/reduce ops.
    crop = lax.dynamic_slice(feat_img, (sy, sx, 0), (CROP, CROP, FPN_C))
    pooled = crop.astype(jnp.float32).reshape(
        ROI_SIZE, 2, ROI_SIZE, 2, FPN_C).mean(axis=(1, 3))
    return pooled.reshape(-1)


# -----------------------------------------------------------------------------
# Forward pass
# -----------------------------------------------------------------------------
def faster_rcnn_forward(prep, x_nchw):
    """Input is NCHW (PyTorch convention); returns torchvision-style list of
    per-image dicts with boxes / labels / scores."""
    N, C, H, W = x_nchw.shape
    x = jnp.transpose(x_nchw, (0, 2, 3, 1))  # NCHW -> NHWC

    # --- Backbone 3x3 conv (normalization folded into weights; the image is
    #     padded with the per-channel mean, i.e. normalize-then-zero-pad) +
    #     ReLU + FPN 1x1 projection, all in ONE Pallas kernel.
    # TODO(synk): image resize step of GeneralizedRCNNTransform omitted.
    xp = jnp.broadcast_to(prep["pad_mean"].astype(x.dtype).reshape(1, 1, 1, C),
                          (N, H + 2, W + 2, C))
    xp = xp.at[:, 1:H + 1, 1:W + 1, :].set(x)
    x_slab = _im2col_dx(xp)                                    # (N*(H+2)*W, 9) bf16
    feat = conv3x3_fused(x_slab, prep["backbone_w"], prep["backbone_b"],
                         prep["fpn_w"], prep["fpn_b"],
                         N=N, H=H, W=W)                        # (N*H*W, 64) bf16
    feat_nhwc = feat.reshape(N, H, W, FPN_C)

    # --- RPN: 3x3 conv + ReLU + fused cls/bbox head (padded to 128 lanes),
    #     all in ONE Pallas kernel.
    fpad = jnp.pad(feat_nhwc, ((0, 0), (1, 1), (1, 1), (0, 0)))
    f_slab = _im2col_dx(fpad)                                  # (N*(H+2)*W, 192) bf16
    rpn_out = conv3x3_fused(f_slab, prep["rpn_conv_w"], prep["rpn_conv_b"],
                            prep["rpn_head_w"], prep["rpn_head_b"],
                            N=N, H=H, W=W)                     # (N*H*W, 128) bf16
    objectness = rpn_out[:, :NUM_ANCHORS].astype(jnp.float32)
    # TODO(synk): RPN bbox deltas (rpn_out[:, NUM_ANCHORS:15]) not decoded
    # against anchors (anchor generation / NMS have no clean Pallas equivalent).

    # --- Proposals: top-K objectness locations (stand-in for anchors + NMS) --
    score_map = jnp.max(objectness.reshape(N, H * W, NUM_ANCHORS), axis=-1)
    _, top_idx = lax.top_k(score_map, PROPOSALS_PER_IMG)       # (N, K)
    cy = (top_idx // W).astype(jnp.float32)
    cx = (top_idx % W).astype(jnp.float32)
    half = ANCHOR / 2.0
    proposals = jnp.stack(
        [jnp.clip(cx - half, 0.0, float(W)), jnp.clip(cy - half, 0.0, float(H)),
         jnp.clip(cx + half, 0.0, float(W)), jnp.clip(cy + half, 0.0, float(H))],
        axis=-1)                                               # (N, K, 4)

    # --- RoI pooling (vmapped crop + 2x2 avg pool, XLA) -----------------------
    sy = jnp.clip((top_idx // W) - CROP // 2, 0, H - CROP)
    sx = jnp.clip((top_idx % W) - CROP // 2, 0, W - CROP)
    roi_fn = jax.vmap(jax.vmap(_roi_pool_one, in_axes=(None, 0, 0)),
                      in_axes=(0, 0, 0))
    roi_feats = roi_fn(feat_nhwc, sy, sx)                      # (N, K, 3136) f32
    roi_feats = roi_feats.reshape(N * PROPOSALS_PER_IMG, FC6_K).astype(jnp.bfloat16)

    # --- TwoMLPHead + FastRCNNPredictor: ONE fused Pallas kernel --------------
    pred = pallas_roi_head(roi_feats, prep["fc6_w"], prep["fc6_b"],
                           prep["fc7_w"], prep["fc7_b"],
                           prep["predictor_w"], prep["predictor_b"])  # (8, 128)
    cls_logits = pred[:, :N_CLASSES]
    bbox_deltas = pred[:, N_CLASSES:N_CLASSES + 4 * N_CLASSES]

    # --- Postprocess (glue) ---------------------------------------------------
    probs = jax.nn.softmax(cls_logits, axis=-1)
    labels = jnp.argmax(probs[:, 1:], axis=-1) + 1             # skip background
    scores = jnp.take_along_axis(probs, labels[:, None], axis=1)[:, 0]
    deltas = bbox_deltas.reshape(-1, N_CLASSES, 4)
    deltas = jnp.take_along_axis(deltas, labels[:, None, None], axis=1)[:, 0, :]
    boxes = decode_boxes(proposals.reshape(-1, 4), deltas, (H, W))

    boxes = boxes.reshape(N, PROPOSALS_PER_IMG, 4)
    labels = labels.reshape(N, PROPOSALS_PER_IMG)
    scores = scores.reshape(N, PROPOSALS_PER_IMG)
    return [{"boxes": boxes[i], "labels": labels[i], "scores": scores[i]}
            for i in range(N)]


if __name__ == "__main__":
    key = jax.random.PRNGKey(0)
    x = jax.random.uniform(key, (2, 3, IMG, IMG), dtype=jnp.float32)  # NCHW
    params = init_params(jax.random.PRNGKey(42))
    prep = prepare_params(params)          # one-time weight prep (outside jit)
    fwd = jax.jit(faster_rcnn_forward)
    out = fwd(prep, x)
    jax.block_until_ready(out)
    print("KERNEL_OK")
</pallas_src>

<mosaic_0001>
module attributes {stable_mosaic.version = 11 : i64} {
  func.func @_conv_fused_kernel(%arg0: i32, %arg1: memref<1088x9xbf16, #tpu.memory_space<vmem>>, %arg2: memref<3x9x32xbf16, #tpu.memory_space<vmem>>, %arg3: memref<1x32xf32, #tpu.memory_space<vmem>>, %arg4: memref<32x64xbf16, #tpu.memory_space<vmem>>, %arg5: memref<1x64xf32, #tpu.memory_space<vmem>>, %arg6: memref<1024x64xbf16, #tpu.memory_space<vmem>>) attributes {dimension_semantics = [#tpu.dimension_semantics<parallel>], iteration_bounds = array<i64: 2>, scalar_prefetch = 0 : i64, scratch_operands = 0 : i64, tpu.core_type = #tpu.core_type<tc>, window_params = [{transform_indices = @transform_0, window_bounds = array<i64: 1088, 9>}, {pipeline_mode = #tpu.pipeline_mode<synchronous>, transform_indices = @transform_1, window_bounds = array<i64: 3, 9, 32>}, {pipeline_mode = #tpu.pipeline_mode<synchronous>, transform_indices = @transform_2, window_bounds = array<i64: 1, 32>}, {pipeline_mode = #tpu.pipeline_mode<synchronous>, transform_indices = @transform_3, window_bounds = array<i64: 32, 64>}, {pipeline_mode = #tpu.pipeline_mode<synchronous>, transform_indices = @transform_4, window_bounds = array<i64: 1, 64>}, {transform_indices = @transform_5, window_bounds = array<i64: 1024, 64>}]} {
    %c0 = arith.constant 0 : index
    %c0_0 = arith.constant 0 : index
    %0 = vector.load %arg3[%c0, %c0_0] : memref<1x32xf32, #tpu.memory_space<vmem>>, vector<1x32xf32>
    %c0_1 = arith.constant 0 : index
    %c0_2 = arith.constant 0 : index
    %1 = vector.load %arg4[%c0_1, %c0_2] : memref<32x64xbf16, #tpu.memory_space<vmem>>, vector<32x64xbf16>
    %c0_3 = arith.constant 0 : index
    %c0_4 = arith.constant 0 : index
    %2 = vector.load %arg5[%c0_3, %c0_4] : memref<1x64xf32, #tpu.memory_space<vmem>>, vector<1x64xf32>
    %cst = arith.constant 0.000000e+00 : f32
    %3 = vector.broadcast %cst : f32 to vector<256x32xf32>
    %c0_5 = arith.constant 0 : index
    %c0_6 = arith.constant 0 : index
    %4 = vector.load %arg1[%c0_5, %c0_6] : memref<1088x9xbf16, #tpu.memory_space<vmem>>, vector<256x9xbf16>
    %c0_7 = arith.constant 0 : index
    %c0_8 = arith.constant 0 : index
    %c0_9 = arith.constant 0 : index
    %5 = vector.load %arg2[%c0_7, %c0_8, %c0_9] : memref<3x9x32xbf16, #tpu.memory_space<vmem>>, vector<1x9x32xbf16>
    %6 = vector.shape_cast %5 : vector<1x9x32xbf16> to vector<9x32xbf16>
    %cst_10 = arith.constant dense<0.000000e+00> : vector<256x32xf32>
    %7 = tpu.matmul %4, %6, %cst_10 {dimension_numbers = #tpu.dot_dimension_numbers<[1], [0], [0], [1], [0, 0, 1, 1], [], []>} : vector<256x9xbf16>, vector<9x32xbf16>, vector<256x32xf32> -> vector<256x32xf32>
    %8 = arith.addf %3, %7 : vector<256x32xf32>
    %c32 = arith.constant 32 : index
    %c0_11 = arith.constant 0 : index
    %9 = vector.load %arg1[%c32, %c0_11] : memref<1088x9xbf16, #tpu.memory_space<vmem>>, vector<256x9xbf16>
    %c1 = arith.constant 1 : index
    %c0_12 = arith.constant 0 : index
    %c0_13 = arith.constant 0 : index
    %10 = vector.load %arg2[%c1, %c0_12, %c0_13] : memref<3x9x32xbf16, #tpu.memory_space<vmem>>, vector<1x9x32xbf16>
    %11 = vector.shape_cast %10 : vector<1x9x32xbf16> to vector<9x32xbf16>
    %cst_14 = arith.constant dense<0.000000e+00> : vector<256x32xf32>
    %12 = tpu.matmul %9, %11, %cst_14 {dimension_numbers = #tpu.dot_dimension_numbers<[1], [0], [0], [1], [0, 0, 1, 1], [], []>} : vector<256x9xbf16>, vector<9x32xbf16>, vector<256x32xf32> -> vector<256x32xf32>
    %13 = arith.addf %8, %12 : vector<256x32xf32>
    %c64 = arith.constant 64 : index
    %c0_15 = arith.constant 0 : index
    %14 = vector.load %arg1[%c64, %c0_15] : memref<1088x9xbf16, #tpu.memory_space<vmem>>, vector<256x9xbf16>
    %c2 = arith.constant 2 : index
    %c0_16 = arith.constant 0 : index
    %c0_17 = arith.constant 0 : index
    %15 = vector.load %arg2[%c2, %c0_16, %c0_17] : memref<3x9x32xbf16, #tpu.memory_space<vmem>>, vector<1x9x32xbf16>
    %16 = vector.shape_cast %15 : vector<1x9x32xbf16> to vector<9x32xbf16>
    %cst_18 = arith.constant dense<0.000000e+00> : vector<256x32xf32>
    %17 = tpu.matmul %14, %16, %cst_18 {dimension_numbers = #tpu.dot_dimension_numbers<[1], [0], [0], [1], [0, 0, 1, 1], [], []>} : vector<256x9xbf16>, vector<9x32xbf16>, vector<256x32xf32> -> vector<256x32xf32>
    %18 = arith.addf %13, %17 : vector<256x32xf32>
    %19 = vector.broadcast %0 : vector<1x32xf32> to vector<256x32xf32>
    %20 = arith.addf %18, %19 : vector<256x32xf32>
    %cst_19 = arith.constant 0.000000e+00 : f32
    %21 = vector.broadcast %cst_19 : f32 to vector<256x32xf32>
    %22 = arith.maximumf %20, %21 : vector<256x32xf32>
    %23 = arith.truncf %22 : vector<256x32xf32> to vector<256x32xbf16>
    %cst_20 = arith.constant dense<0.000000e+00> : vector<256x64xf32>
    %24 = tpu.matmul %23, %1, %cst_20 {dimension_numbers = #tpu.dot_dimension_numbers<[1], [0], [0], [1], [0, 0, 1, 1], [], []>} : vector<256x32xbf16>, vector<32x64xbf16>, vector<256x64xf32> -> vector<256x64xf32>
    %25 = vector.broadcast %2 : vector<1x64xf32> to vector<256x64xf32>
    %26 = arith.addf %24, %25 : vector<256x64xf32>
    %27 = arith.truncf %26 : vector<256x64xf32> to vector<256x64xbf16>
    %c0_21 = arith.constant 0 : index
    %c0_22 = arith.constant 0 : index
    %28 = vector.load %arg6[%c0_21, %c0_22] : memref<1024x64xbf16, #tpu.memory_space<vmem>>, vector<256x64xbf16>
    tpu.vector_store %arg6[%c0_21, %c0_22], %27 {strides = array<i32>} : memref<1024x64xbf16, #tpu.memory_space<vmem>>, vector<256x64xbf16>,
    %cst_23 = arith.constant 0.000000e+00 : f32
    %29 = vector.broadcast %cst_23 : f32 to vector<256x32xf32>
    %c256 = arith.constant 256 : index
    %c0_24 = arith.constant 0 : index
    %30 = vector.load %arg1[%c256, %c0_24] : memref<1088x9xbf16, #tpu.memory_space<vmem>>, vector<256x9xbf16>
    %c0_25 = arith.constant 0 : index
    %c0_26 = arith.constant 0 : index
    %c0_27 = arith.constant 0 : index
    %31 = vector.load %arg2[%c0_25, %c0_26, %c0_27] : memref<3x9x32xbf16, #tpu.memory_space<vmem>>, vector<1x9x32xbf16>
    %32 = vector.shape_cast %31 : vector<1x9x32xbf16> to vector<9x32xbf16>
    %cst_28 = arith.constant dense<0.000000e+00> : vector<256x32xf32>
    %33 = tpu.matmul %30, %32, %cst_28 {dimension_numbers = #tpu.dot_dimension_numbers<[1], [0], [0], [1], [0, 0, 1, 1], [], []>} : vector<256x9xbf16>, vector<9x32xbf16>, vector<256x32xf32> -> vector<256x32xf32>
    %34 = arith.addf %29, %33 : vector<256x32xf32>
    %c288 = arith.constant 288 : index
    %c0_29 = arith.constant 0 : index
    %35 = vector.load %arg1[%c288, %c0_29] : memref<1088x9xbf16, #tpu.memory_space<vmem>>, vector<256x9xbf16>
    %c1_30 = arith.constant 1 : index
    %c0_31 = arith.constant 0 : index
    %c0_32 = arith.constant 0 : index
    %36 = vector.load %arg2[%c1_30, %c0_31, %c0_32] : memref<3x9x32xbf16, #tpu.memory_space<vmem>>, vector<1x9x32xbf16>
    %37 = vector.shape_cast %36 : vector<1x9x32xbf16> to vector<9x32xbf16>
    %cst_33 = arith.constant dense<0.000000e+00> : vector<256x32xf32>
    %38 = tpu.matmul %35, %37, %cst_33 {dimension_numbers = #tpu.dot_dimension_numbers<[1], [0], [0], [1], [0, 0, 1, 1], [], []>} : vector<256x9xbf16>, vector<9x32xbf16>, vector<256x32xf32> -> vector<256x32xf32>
    %39 = arith.addf %34, %38 : vector<256x32xf32>
    %c320 = arith.constant 320 : index
    %c0_34 = arith.constant 0 : index
    %40 = vector.load %arg1[%c320, %c0_34] : memref<1088x9xbf16, #tpu.memory_space<vmem>>, vector<256x9xbf16>
    %c2_35 = arith.constant 2 : index
    %c0_36 = arith.constant 0 : index
    %c0_37 = arith.constant 0 : index
    %41 = vector.load %arg2[%c2_35, %c0_36, %c0_37] : memref<3x9x32xbf16, #tpu.memory_space<vmem>>, vector<1x9x32xbf16>
    %42 = vector.shape_cast %41 : vector<1x9x32xbf16> to vector<9x32xbf16>
    %cst_38 = arith.constant dense<0.000000e+00> : vector<256x32xf32>
    %43 = tpu.matmul %40, %42, %cst_38 {dimension_numbers = #tpu.dot_dimension_numbers<[1], [0], [0], [1], [0, 0, 1, 1], [], []>} : vector<256x9xbf16>, vector<9x32xbf16>, vector<256x32xf32> -> vector<256x32xf32>
    %44 = arith.addf %39, %43 : vector<256x32xf32>
    %45 = vector.broadcast %0 : vector<1x32xf32> to vector<256x32xf32>
    %46 = arith.addf %44, %45 : vector<256x32xf32>
    %cst_39 = arith.constant 0.000000e+00 : f32
    %47 = vector.broadcast %cst_39 : f32 to vector<256x32xf32>
    %48 = arith.maximumf %46, %47 : vector<256x32xf32>
    %49 = arith.truncf %48 : vector<256x32xf32> to vector<256x32xbf16>
    %cst_40 = arith.constant dense<0.000000e+00> : vector<256x64xf32>
    %50 = tpu.matmul %49, %1, %cst_40 {dimension_numbers = #tpu.dot_dimension_numbers<[1], [0], [0], [1], [0, 0, 1, 1], [], []>} : vector<256x32xbf16>, vector<32x64xbf16>, vector<256x64xf32> -> vector<256x64xf32>
    %51 = vector.broadcast %2 : vector<1x64xf32> to vector<256x64xf32>
    %52 = arith.addf %50, %51 : vector<256x64xf32>
    %53 = arith.truncf %52 : vector<256x64xf32> to vector<256x64xbf16>
    %c256_41 = arith.constant 256 : index
    %c0_42 = arith.constant 0 : index
    %54 = vector.load %arg6[%c256_41, %c0_42] : memref<1024x64xbf16, #tpu.memory_space<vmem>>, vector<256x64xbf16>
    tpu.vector_store %arg6[%c256_41, %c0_42], %53 {strides = array<i32>} : memref<1024x64xbf16, #tpu.memory_space<vmem>>, vector<256x64xbf16>,
    %cst_43 = arith.constant 0.000000e+00 : f32
    %55 = vector.broadcast %cst_43 : f32 to vector<256x32xf32>
    %c512 = arith.constant 512 : index
    %c0_44 = arith.constant 0 : index
    %56 = vector.load %arg1[%c512, %c0_44] : memref<1088x9xbf16, #tpu.memory_space<vmem>>, vector<256x9xbf16>
    %c0_45 = arith.constant 0 : index
    %c0_46 = arith.constant 0 : index
    %c0_47 = arith.constant 0 : index
    %57 = vector.load %arg2[%c0_45, %c0_46, %c0_47] : memref<3x9x32xbf16, #tpu.memory_space<vmem>>, vector<1x9x32xbf16>
    %58 = vector.shape_cast %57 : vector<1x9x32xbf16> to vector<9x32xbf16>
    %cst_48 = arith.constant dense<0.000000e+00> : vector<256x32xf32>
    %59 = tpu.matmul %56, %58, %cst_48 {dimension_numbers = #tpu.dot_dimension_numbers<[1], [0], [0], [1], [0, 0, 1, 1], [], []>} : vector<256x9xbf16>, vector<9x32xbf16>, vector<256x32xf32> -> vector<256x32xf32>
    %60 = arith.addf %55, %59 : vector<256x32xf32>
    %c544 = arith.constant 544 : index
    %c0_49 = arith.constant 0 : index
    %61 = vector.load %arg1[%c544, %c0_49] : memref<1088x9xbf16, #tpu.memory_space<vmem>>, vector<256x9xbf16>
    %c1_50 = arith.constant 1 : index
    %c0_51 = arith.constant 0 : index
    %c0_52 = arith.constant 0 : index
    %62 = vector.load %arg2[%c1_50, %c0_51, %c0_52] : memref<3x9x32xbf16, #tpu.memory_space<vmem>>, vector<1x9x32xbf16>
    %63 = vector.shape_cast %62 : vector<1x9x32xbf16> to vector<9x32xbf16>
    %cst_53 = arith.constant dense<0.000000e+00> : vector<256x32xf32>
    %64 = tpu.matmul %61, %63, %cst_53 {dimension_numbers = #tpu.dot_dimension_numbers<[1], [0], [0], [1], [0, 0, 1, 1], [], []>} : vector<256x9xbf16>, vector<9x32xbf16>, vector<256x32xf32> -> vector<256x32xf32>
    %65 = arith.addf %60, %64 : vector<256x32xf32>
    %c576 = arith.constant 576 : index
    %c0_54 = arith.constant 0 : index
    %66 = vector.load %arg1[%c576, %c0_54] : memref<1088x9xbf16, #tpu.memory_space<vmem>>, vector<256x9xbf16>
    %c2_55 = arith.constant 2 : index
    %c0_56 = arith.constant 0 : index
    %c0_57 = arith.constant 0 : index
    %67 = vector.load %arg2[%c2_55, %c0_56, %c0_57] : memref<3x9x32xbf16, #tpu.memory_space<vmem>>, vector<1x9x32xbf16>
    %68 = vector.shape_cast %67 : vector<1x9x32xbf16> to vector<9x32xbf16>
    %cst_58 = arith.constant dense<0.000000e+00> : vector<256x32xf32>
    %69 = tpu.matmul %66, %68, %cst_58 {dimension_numbers = #tpu.dot_dimension_numbers<[1], [0], [0], [1], [0, 0, 1, 1], [], []>} : vector<256x9xbf16>, vector<9x32xbf16>, vector<256x32xf32> -> vector<256x32xf32>
    %70 = arith.addf %65, %69 : vector<256x32xf32>
    %71 = vector.broadcast %0 : vector<1x32xf32> to vector<256x32xf32>
    %72 = arith.addf %70, %71 : vector<256x32xf32>
    %cst_59 = arith.constant 0.000000e+00 : f32
    %73 = vector.broadcast %cst_59 : f32 to vector<256x32xf32>
    %74 = arith.maximumf %72, %73 : vector<256x32xf32>
    %75 = arith.truncf %74 : vector<256x32xf32> to vector<256x32xbf16>
    %cst_60 = arith.constant dense<0.000000e+00> : vector<256x64xf32>
    %76 = tpu.matmul %75, %1, %cst_60 {dimension_numbers = #tpu.dot_dimension_numbers<[1], [0], [0], [1], [0, 0, 1, 1], [], []>} : vector<256x32xbf16>, vector<32x64xbf16>, vector<256x64xf32> -> vector<256x64xf32>
    %77 = vector.broadcast %2 : vector<1x64xf32> to vector<256x64xf32>
    %78 = arith.addf %76, %77 : vector<256x64xf32>
    %79 = arith.truncf %78 : vector<256x64xf32> to vector<256x64xbf16>
    %c512_61 = arith.constant 512 : index
    %c0_62 = arith.constant 0 : index
    %80 = vector.load %arg6[%c512_61, %c0_62] : memref<1024x64xbf16, #tpu.memory_space<vmem>>, vector<256x64xbf16>
    tpu.vector_store %arg6[%c512_61, %c0_62], %79 {strides = array<i32>} : memref<1024x64xbf16, #tpu.memory_space<vmem>>, vector<256x64xbf16>,
    %cst_63 = arith.constant 0.000000e+00 : f32
    %81 = vector.broadcast %cst_63 : f32 to vector<256x32xf32>
    %c768 = arith.constant 768 : index
    %c0_64 = arith.constant 0 : index
    %82 = vector.load %arg1[%c768, %c0_64] : memref<1088x9xbf16, #tpu.memory_space<vmem>>, vector<256x9xbf16>
    %c0_65 = arith.constant 0 : index
    %c0_66 = arith.constant 0 : index
    %c0_67 = arith.constant 0 : index
    %83 = vector.load %arg2[%c0_65, %c0_66, %c0_67] : memref<3x9x32xbf16, #tpu.memory_space<vmem>>, vector<1x9x32xbf16>
    %84 = vector.shape_cast %83 : vector<1x9x32xbf16> to vector<9x32xbf16>
    %cst_68 = arith.constant dense<0.000000e+00> : vector<256x32xf32>
    %85 = tpu.matmul %82, %84, %cst_68 {dimension_numbers = #tpu.dot_dimension_numbers<[1], [0], [0], [1], [0, 0, 1, 1], [], []>} : vector<256x9xbf16>, vector<9x32xbf16>, vector<256x32xf32> -> vector<256x32xf32>
    %86 = arith.addf %81, %85 : vector<256x32xf32>
    %c800 = arith.constant 800 : index
    %c0_69 = arith.constant 0 : index
    %87 = vector.load %arg1[%c800, %c0_69] : memref<1088x9xbf16, #tpu.memory_space<vmem>>, vector<256x9xbf16>
    %c1_70 = arith.constant 1 : index
    %c0_71 = arith.constant 0 : index
    %c0_72 = arith.constant 0 : index
    %88 = vector.load %arg2[%c1_70, %c0_71, %c0_72] : memref<3x9x32xbf16, #tpu.memory_space<vmem>>, vector<1x9x32xbf16>
    %89 = vector.shape_cast %88 : vector<1x9x32xbf16> to vector<9x32xbf16>
    %cst_73 = arith.constant dense<0.000000e+00> : vector<256x32xf32>
    %90 = tpu.matmul %87, %89, %cst_73 {dimension_numbers = #tpu.dot_dimension_numbers<[1], [0], [0], [1], [0, 0, 1, 1], [], []>} : vector<256x9xbf16>, vector<9x32xbf16>, vector<256x32xf32> -> vector<256x32xf32>
    %91 = arith.addf %86, %90 : vector<256x32xf32>
    %c832 = arith.constant 832 : index
    %c0_74 = arith.constant 0 : index
    %92 = vector.load %arg1[%c832, %c0_74] : memref<1088x9xbf16, #tpu.memory_space<vmem>>, vector<256x9xbf16>
    %c2_75 = arith.constant 2 : index
    %c0_76 = arith.constant 0 : index
    %c0_77 = arith.constant 0 : index
    %93 = vector.load %arg2[%c2_75, %c0_76, %c0_77] : memref<3x9x32xbf16, #tpu.memory_space<vmem>>, vector<1x9x32xbf16>
    %94 = vector.shape_cast %93 : vector<1x9x32xbf16> to vector<9x32xbf16>
    %cst_78 = arith.constant dense<0.000000e+00> : vector<256x32xf32>
    %95 = tpu.matmul %92, %94, %cst_78 {dimension_numbers = #tpu.dot_dimension_numbers<[1], [0], [0], [1], [0, 0, 1, 1], [], []>} : vector<256x9xbf16>, vector<9x32xbf16>, vector<256x32xf32> -> vector<256x32xf32>
    %96 = arith.addf %91, %95 : vector<256x32xf32>
    %97 = vector.broadcast %0 : vector<1x32xf32> to vector<256x32xf32>
    %98 = arith.addf %96, %97 : vector<256x32xf32>
    %cst_79 = arith.constant 0.000000e+00 : f32
    %99 = vector.broadcast %cst_79 : f32 to vector<256x32xf32>
    %100 = arith.maximumf %98, %99 : vector<256x32xf32>
    %101 = arith.truncf %100 : vector<256x32xf32> to vector<256x32xbf16>
    %cst_80 = arith.constant dense<0.000000e+00> : vector<256x64xf32>
    %102 = tpu.matmul %101, %1, %cst_80 {dimension_numbers = #tpu.dot_dimension_numbers<[1], [0], [0], [1], [0, 0, 1, 1], [], []>} : vector<256x32xbf16>, vector<32x64xbf16>, vector<256x64xf32> -> vector<256x64xf32>
    %103 = vector.broadcast %2 : vector<1x64xf32> to vector<256x64xf32>
    %104 = arith.addf %102, %103 : vector<256x64xf32>
    %105 = arith.truncf %104 : vector<256x64xf32> to vector<256x64xbf16>
    %c768_81 = arith.constant 768 : index
    %c0_82 = arith.constant 0 : index
    %106 = vector.load %arg6[%c768_81, %c0_82] : memref<1024x64xbf16, #tpu.memory_space<vmem>>, vector<256x64xbf16>
    tpu.vector_store %arg6[%c768_81, %c0_82], %105 {strides = array<i32>} : memref<1024x64xbf16, #tpu.memory_space<vmem>>, vector<256x64xbf16>,
    return
  }
  func.func @transform_0(%arg0: i32) -> (i32, i32) {
    %c0_i32 = arith.constant 0 : i32
    %c0_i32_0 = arith.constant 0 : i32
    return %arg0, %c0_i32 : i32, i32
  }
  func.func @transform_1(%arg0: i32) -> (i32, i32, i32) {
    %c0_i32 = arith.constant 0 : i32
    %c0_i32_0 = arith.constant 0 : i32
    %c0_i32_1 = arith.constant 0 : i32
    %c0_i32_2 = arith.constant 0 : i32
    return %c0_i32, %c0_i32_0, %c0_i32_1 : i32, i32, i32
  }
  func.func @transform_2(%arg0: i32) -> (i32, i32) {
    %c0_i32 = arith.constant 0 : i32
    %c0_i32_0 = arith.constant 0 : i32
    %c0_i32_1 = arith.constant 0 : i32
    return %c0_i32, %c0_i32_0 : i32, i32
  }
  func.func @transform_3(%arg0: i32) -> (i32, i32) {
    %c0_i32 = arith.constant 0 : i32
    %c0_i32_0 = arith.constant 0 : i32
    %c0_i32_1 = arith.constant 0 : i32
    return %c0_i32, %c0_i32_0 : i32, i32
  }
  func.func @transform_4(%arg0: i32) -> (i32, i32) {
    %c0_i32 = arith.constant 0 : i32
    %c0_i32_0 = arith.constant 0 : i32
    %c0_i32_1 = arith.constant 0 : i32
    return %c0_i32, %c0_i32_0 : i32, i32
  }
  func.func @transform_5(%arg0: i32) -> (i32, i32) {
    %c0_i32 = arith.constant 0 : i32
    %c0_i32_0 = arith.constant 0 : i32
    return %arg0, %c0_i32 : i32, i32
  }
}

module attributes {stable_mosaic.version = 11 : i64} {
  func.func @_conv_fused_kernel(%arg0: i32, %arg1: memref<1088x192xbf16, #tpu.memory_space<vmem>>, %arg2: memref<3x192x64xbf16, #tpu.memory_space<vmem>>, %arg3: memref<1x64xf32, #tpu.memory_space<vmem>>, %arg4: memref<64x128xbf16, #tpu.memory_space<vmem>>, %arg5: memref<1x128xf32, #tpu.memory_space<vmem>>, %arg6: memref<1024x128xbf16, #tpu.memory_space<vmem>>) attributes {dimension_semantics = [#tpu.dimension_semantics<parallel>], iteration_bounds = array<i64: 2>, scalar_prefetch = 0 : i64, scratch_operands = 0 : i64, tpu.core_type = #tpu.core_type<tc>, window_params = [{transform_indices = @transform_0, window_bounds = array<i64: 1088, 192>}, {pipeline_mode = #tpu.pipeline_mode<synchronous>, transform_indices = @transform_1, window_bounds = array<i64: 3, 192, 64>}, {pipeline_mode = #tpu.pipeline_mode<synchronous>, transform_indices = @transform_2, window_bounds = array<i64: 1, 64>}, {pipeline_mode = #tpu.pipeline_mode<synchronous>, transform_indices = @transform_3, window_bounds = array<i64: 64, 128>}, {pipeline_mode = #tpu.pipeline_mode<synchronous>, transform_indices = @transform_4, window_bounds = array<i64: 1, 128>}, {transform_indices = @transform_5, window_bounds = array<i64: 1024, 128>}]} {
    %c0 = arith.constant 0 : index
    %c0_0 = arith.constant 0 : index
    %0 = vector.load %arg3[%c0, %c0_0] : memref<1x64xf32, #tpu.memory_space<vmem>>, vector<1x64xf32>
    %c0_1 = arith.constant 0 : index
    %c0_2 = arith.constant 0 : index
    %1 = vector.load %arg4[%c0_1, %c0_2] : memref<64x128xbf16, #tpu.memory_space<vmem>>, vector<64x128xbf16>
    %c0_3 = arith.constant 0 : index
    %c0_4 = arith.constant 0 : index
    %2 = vector.load %arg5[%c0_3, %c0_4] : memref<1x128xf32, #tpu.memory_space<vmem>>, vector<1x128xf32>
    %cst = arith.constant 0.000000e+00 : f32
    %3 = vector.broadcast %cst : f32 to vector<256x64xf32>
    %c0_5 = arith.constant 0 : index
    %c0_6 = arith.constant 0 : index
    %4 = vector.load %arg1[%c0_5, %c0_6] : memref<1088x192xbf16, #tpu.memory_space<vmem>>, vector<256x192xbf16>
    %c0_7 = arith.constant 0 : index
    %c0_8 = arith.constant 0 : index
    %c0_9 = arith.constant 0 : index
    %5 = vector.load %arg2[%c0_7, %c0_8, %c0_9] : memref<3x192x64xbf16, #tpu.memory_space<vmem>>, vector<1x192x64xbf16>
    %6 = vector.shape_cast %5 : vector<1x192x64xbf16> to vector<192x64xbf16>
    %cst_10 = arith.constant dense<0.000000e+00> : vector<256x64xf32>
    %7 = tpu.matmul %4, %6, %cst_10 {dimension_numbers = #tpu.dot_dimension_numbers<[1], [0], [0], [1], [0, 0, 1, 1], [], []>} : vector<256x192xbf16>, vector<192x64xbf16>, vector<256x64xf32> -> vector<256x64xf32>
    %8 = arith.addf %3, %7 : vector<256x64xf32>
    %c32 = arith.constant 32 : index
    %c0_11 = arith.constant 0 : index
    %9 = vector.load %arg1[%c32, %c0_11] : memref<1088x192xbf16, #tpu.memory_space<vmem>>, vector<256x192xbf16>
    %c1 = arith.constant 1 : index
    %c0_12 = arith.constant 0 : index
    %c0_13 = arith.constant 0 : index
    %10 = vector.load %arg2[%c1, %c0_12, %c0_13] : memref<3x192x64xbf16, #tpu.memory_space<vmem>>, vector<1x192x64xbf16>
    %11 = vector.shape_cast %10 : vector<1x192x64xbf16> to vector<192x64xbf16>
    %cst_14 = arith.constant dense<0.000000e+00> : vector<256x64xf32>
    %12 = tpu.matmul %9, %11, %cst_14 {dimension_numbers = #tpu.dot_dimension_numbers<[1], [0], [0], [1], [0, 0, 1, 1], [], []>} : vector<256x192xbf16>, vector<192x64xbf16>, vector<256x64xf32> -> vector<256x64xf32>
    %13 = arith.addf %8, %12 : vector<256x64xf32>
    %c64 = arith.constant 64 : index
    %c0_15 = arith.constant 0 : index
    %14 = vector.load %arg1[%c64, %c0_15] : memref<1088x192xbf16, #tpu.memory_space<vmem>>, vector<256x192xbf16>
    %c2 = arith.constant 2 : index
    %c0_16 = arith.constant 0 : index
    %c0_17 = arith.constant 0 : index
    %15 = vector.load %arg2[%c2, %c0_16, %c0_17] : memref<3x192x64xbf16, #tpu.memory_space<vmem>>, vector<1x192x64xbf16>
    %16 = vector.shape_cast %15 : vector<1x192x64xbf16> to vector<192x64xbf16>
    %cst_18 = arith.constant dense<0.000000e+00> : vector<256x64xf32>
    %17 = tpu.matmul %14, %16, %cst_18 {dimension_numbers = #tpu.dot_dimension_numbers<[1], [0], [0], [1], [0, 0, 1, 1], [], []>} : vector<256x192xbf16>, vector<192x64xbf16>, vector<256x64xf32> -> vector<256x64xf32>
    %18 = arith.addf %13, %17 : vector<256x64xf32>
    %19 = vector.broadcast %0 : vector<1x64xf32> to vector<256x64xf32>
    %20 = arith.addf %18, %19 : vector<256x64xf32>
    %cst_19 = arith.constant 0.000000e+00 : f32
    %21 = vector.broadcast %cst_19 : f32 to vector<256x64xf32>
    %22 = arith.maximumf %20, %21 : vector<256x64xf32>
    %23 = arith.truncf %22 : vector<256x64xf32> to vector<256x64xbf16>
    %cst_20 = arith.constant dense<0.000000e+00> : vector<256x128xf32>
    %24 = tpu.matmul %23, %1, %cst_20 {dimension_numbers = #tpu.dot_dimension_numbers<[1], [0], [0], [1], [0, 0, 1, 1], [], []>} : vector<256x64xbf16>, vector<64x128xbf16>, vector<256x128xf32> -> vector<256x128xf32>
    %25 = vector.broadcast %2 : vector<1x128xf32> to vector<256x128xf32>
    %26 = arith.addf %24, %25 : vector<256x128xf32>
    %27 = arith.truncf %26 : vector<256x128xf32> to vector<256x128xbf16>
    %c0_21 = arith.constant 0 : index
    %c0_22 = arith.constant 0 : index
    %28 = vector.load %arg6[%c0_21, %c0_22] : memref<1024x128xbf16, #tpu.memory_space<vmem>>, vector<256x128xbf16>
    tpu.vector_store %arg6[%c0_21, %c0_22], %27 {strides = array<i32>} : memref<1024x128xbf16, #tpu.memory_space<vmem>>, vector<256x128xbf16>,
    %cst_23 = arith.constant 0.000000e+00 : f32
    %29 = vector.broadcast %cst_23 : f32 to vector<256x64xf32>
    %c256 = arith.constant 256 : index
    %c0_24 = arith.constant 0 : index
    %30 = vector.load %arg1[%c256, %c0_24] : memref<1088x192xbf16, #tpu.memory_space<vmem>>, vector<256x192xbf16>
    %c0_25 = arith.constant 0 : index
    %c0_26 = arith.constant 0 : index
    %c0_27 = arith.constant 0 : index
    %31 = vector.load %arg2[%c0_25, %c0_26, %c0_27] : memref<3x192x64xbf16, #tpu.memory_space<vmem>>, vector<1x192x64xbf16>
    %32 = vector.shape_cast %31 : vector<1x192x64xbf16> to vector<192x64xbf16>
    %cst_28 = arith.constant dense<0.000000e+00> : vector<256x64xf32>
    %33 = tpu.matmul %30, %32, %cst_28 {dimension_numbers = #tpu.dot_dimension_numbers<[1], [0], [0], [1], [0, 0, 1, 1], [], []>} : vector<256x192xbf16>, vector<192x64xbf16>, vector<256x64xf32> -> vector<256x64xf32>
    %34 = arith.addf %29, %33 : vector<256x64xf32>
    %c288 = arith.constant 288 : index
    %c0_29 = arith.constant 0 : index
    %35 = vector.load %arg1[%c288, %c0_29] : memref<1088x192xbf16, #tpu.memory_space<vmem>>, vector<256x192xbf16>
    %c1_30 = arith.constant 1 : index
    %c0_31 = arith.constant 0 : index
    %c0_32 = arith.constant 0 : index
    %36 = vector.load %arg2[%c1_30, %c0_31, %c0_32] : memref<3x192x64xbf16, #tpu.memory_space<vmem>>, vector<1x192x64xbf16>
    %37 = vector.shape_cast %36 : vector<1x192x64xbf16> to vector<192x64xbf16>
    %cst_33 = arith.constant dense<0.000000e+00> : vector<256x64xf32>
    %38 = tpu.matmul %35, %37, %cst_33 {dimension_numbers = #tpu.dot_dimension_numbers<[1], [0], [0], [1], [0, 0, 1, 1], [], []>} : vector<256x192xbf16>, vector<192x64xbf16>, vector<256x64xf32> -> vector<256x64xf32>
    %39 = arith.addf %34, %38 : vector<256x64xf32>
    %c320 = arith.constant 320 : index
    %c0_34 = arith.constant 0 : index
    %40 = vector.load %arg1[%c320, %c0_34] : memref<1088x192xbf16, #tpu.memory_space<vmem>>, vector<256x192xbf16>
    %c2_35 = arith.constant 2 : index
    %c0_36 = arith.constant 0 : index
    %c0_37 = arith.constant 0 : index
    %41 = vector.load %arg2[%c2_35, %c0_36, %c0_37] : memref<3x192x64xbf16, #tpu.memory_space<vmem>>, vector<1x192x64xbf16>
    %42 = vector.shape_cast %41 : vector<1x192x64xbf16> to vector<192x64xbf16>
    %cst_38 = arith.constant dense<0.000000e+00> : vector<256x64xf32>
    %43 = tpu.matmul %40, %42, %cst_38 {dimension_numbers = #tpu.dot_dimension_numbers<[1], [0], [0], [1], [0, 0, 1, 1], [], []>} : vector<256x192xbf16>, vector<192x64xbf16>, vector<256x64xf32> -> vector<256x64xf32>
    %44 = arith.addf %39, %43 : vector<256x64xf32>
    %45 = vector.broadcast %0 : vector<1x64xf32> to vector<256x64xf32>
    %46 = arith.addf %44, %45 : vector<256x64xf32>
    %cst_39 = arith.constant 0.000000e+00 : f32
    %47 = vector.broadcast %cst_39 : f32 to vector<256x64xf32>
    %48 = arith.maximumf %46, %47 : vector<256x64xf32>
    %49 = arith.truncf %48 : vector<256x64xf32> to vector<256x64xbf16>
    %cst_40 = arith.constant dense<0.000000e+00> : vector<256x128xf32>
    %50 = tpu.matmul %49, %1, %cst_40 {dimension_numbers = #tpu.dot_dimension_numbers<[1], [0], [0], [1], [0, 0, 1, 1], [], []>} : vector<256x64xbf16>, vector<64x128xbf16>, vector<256x128xf32> -> vector<256x128xf32>
    %51 = vector.broadcast %2 : vector<1x128xf32> to vector<256x128xf32>
    %52 = arith.addf %50, %51 : vector<256x128xf32>
    %53 = arith.truncf %52 : vector<256x128xf32> to vector<256x128xbf16>
    %c256_41 = arith.constant 256 : index
    %c0_42 = arith.constant 0 : index
    %54 = vector.load %arg6[%c256_41, %c0_42] : memref<1024x128xbf16, #tpu.memory_space<vmem>>, vector<256x128xbf16>
    tpu.vector_store %arg6[%c256_41, %c0_42], %53 {strides = array<i32>} : memref<1024x128xbf16, #tpu.memory_space<vmem>>, vector<256x128xbf16>,
    %cst_43 = arith.constant 0.000000e+00 : f32
    %55 = vector.broadcast %cst_43 : f32 to vector<256x64xf32>
    %c512 = arith.constant 512 : index
    %c0_44 = arith.constant 0 : index
    %56 = vector.load %arg1[%c512, %c0_44] : memref<1088x192xbf16, #tpu.memory_space<vmem>>, vector<256x192xbf16>
    %c0_45 = arith.constant 0 : index
    %c0_46 = arith.constant 0 : index
    %c0_47 = arith.constant 0 : index
    %57 = vector.load %arg2[%c0_45, %c0_46, %c0_47] : memref<3x192x64xbf16, #tpu.memory_space<vmem>>, vector<1x192x64xbf16>
    %58 = vector.shape_cast %57 : vector<1x192x64xbf16> to vector<192x64xbf16>
    %cst_48 = arith.constant dense<0.000000e+00> : vector<256x64xf32>
    %59 = tpu.matmul %56, %58, %cst_48 {dimension_numbers = #tpu.dot_dimension_numbers<[1], [0], [0], [1], [0, 0, 1, 1], [], []>} : vector<256x192xbf16>, vector<192x64xbf16>, vector<256x64xf32> -> vector<256x64xf32>
    %60 = arith.addf %55, %59 : vector<256x64xf32>
    %c544 = arith.constant 544 : index
    %c0_49 = arith.constant 0 : index
    %61 = vector.load %arg1[%c544, %c0_49] : memref<1088x192xbf16, #tpu.memory_space<vmem>>, vector<256x192xbf16>
    %c1_50 = arith.constant 1 : index
    %c0_51 = arith.constant 0 : index
    %c0_52 = arith.constant 0 : index
    %62 = vector.load %arg2[%c1_50, %c0_51, %c0_52] : memref<3x192x64xbf16, #tpu.memory_space<vmem>>, vector<1x192x64xbf16>
    %63 = vector.shape_cast %62 : vector<1x192x64xbf16> to vector<192x64xbf16>
    %cst_53 = arith.constant dense<0.000000e+00> : vector<256x64xf32>
    %64 = tpu.matmul %61, %63, %cst_53 {dimension_numbers = #tpu.dot_dimension_numbers<[1], [0], [0], [1], [0, 0, 1, 1], [], []>} : vector<256x192xbf16>, vector<192x64xbf16>, vector<256x64xf32> -> vector<256x64xf32>
    %65 = arith.addf %60, %64 : vector<256x64xf32>
    %c576 = arith.constant 576 : index
    %c0_54 = arith.constant 0 : index
    %66 = vector.load %arg1[%c576, %c0_54] : memref<1088x192xbf16, #tpu.memory_space<vmem>>, vector<256x192xbf16>
    %c2_55 = arith.constant 2 : index
    %c0_56 = arith.constant 0 : index
    %c0_57 = arith.constant 0 : index
    %67 = vector.load %arg2[%c2_55, %c0_56, %c0_57] : memref<3x192x64xbf16, #tpu.memory_space<vmem>>, vector<1x192x64xbf16>
    %68 = vector.shape_cast %67 : vector<1x192x64xbf16> to vector<192x64xbf16>
    %cst_58 = arith.constant dense<0.000000e+00> : vector<256x64xf32>
    %69 = tpu.matmul %66, %68, %cst_58 {dimension_numbers = #tpu.dot_dimension_numbers<[1], [0], [0], [1], [0, 0, 1, 1], [], []>} : vector<256x192xbf16>, vector<192x64xbf16>, vector<256x64xf32> -> vector<256x64xf32>
    %70 = arith.addf %65, %69 : vector<256x64xf32>
    %71 = vector.broadcast %0 : vector<1x64xf32> to vector<256x64xf32>
    %72 = arith.addf %70, %71 : vector<256x64xf32>
    %cst_59 = arith.constant 0.000000e+00 : f32
    %73 = vector.broadcast %cst_59 : f32 to vector<256x64xf32>
    %74 = arith.maximumf %72, %73 : vector<256x64xf32>
    %75 = arith.truncf %74 : vector<256x64xf32> to vector<256x64xbf16>
    %cst_60 = arith.constant dense<0.000000e+00> : vector<256x128xf32>
    %76 = tpu.matmul %75, %1, %cst_60 {dimension_numbers = #tpu.dot_dimension_numbers<[1], [0], [0], [1], [0, 0, 1, 1], [], []>} : vector<256x64xbf16>, vector<64x128xbf16>, vector<256x128xf32> -> vector<256x128xf32>
    %77 = vector.broadcast %2 : vector<1x128xf32> to vector<256x128xf32>
    %78 = arith.addf %76, %77 : vector<256x128xf32>
    %79 = arith.truncf %78 : vector<256x128xf32> to vector<256x128xbf16>
    %c512_61 = arith.constant 512 : index
    %c0_62 = arith.constant 0 : index
    %80 = vector.load %arg6[%c512_61, %c0_62] : memref<1024x128xbf16, #tpu.memory_space<vmem>>, vector<256x128xbf16>
    tpu.vector_store %arg6[%c512_61, %c0_62], %79 {strides = array<i32>} : memref<1024x128xbf16, #tpu.memory_space<vmem>>, vector<256x128xbf16>,
    %cst_63 = arith.constant 0.000000e+00 : f32
    %81 = vector.broadcast %cst_63 : f32 to vector<256x64xf32>
    %c768 = arith.constant 768 : index
    %c0_64 = arith.constant 0 : index
    %82 = vector.load %arg1[%c768, %c0_64] : memref<1088x192xbf16, #tpu.memory_space<vmem>>, vector<256x192xbf16>
    %c0_65 = arith.constant 0 : index
    %c0_66 = arith.constant 0 : index
    %c0_67 = arith.constant 0 : index
    %83 = vector.load %arg2[%c0_65, %c0_66, %c0_67] : memref<3x192x64xbf16, #tpu.memory_space<vmem>>, vector<1x192x64xbf16>
    %84 = vector.shape_cast %83 : vector<1x192x64xbf16> to vector<192x64xbf16>
    %cst_68 = arith.constant dense<0.000000e+00> : vector<256x64xf32>
    %85 = tpu.matmul %82, %84, %cst_68 {dimension_numbers = #tpu.dot_dimension_numbers<[1], [0], [0], [1], [0, 0, 1, 1], [], []>} : vector<256x192xbf16>, vector<192x64xbf16>, vector<256x64xf32> -> vector<256x64xf32>
    %86 = arith.addf %81, %85 : vector<256x64xf32>
    %c800 = arith.constant 800 : index
    %c0_69 = arith.constant 0 : index
    %87 = vector.load %arg1[%c800, %c0_69] : memref<1088x192xbf16, #tpu.memory_space<vmem>>, vector<256x192xbf16>
    %c1_70 = arith.constant 1 : index
    %c0_71 = arith.constant 0 : index
    %c0_72 = arith.constant 0 : index
    %88 = vector.load %arg2[%c1_70, %c0_71, %c0_72] : memref<3x192x64xbf16, #tpu.memory_space<vmem>>, vector<1x192x64xbf16>
    %89 = vector.shape_cast %88 : vector<1x192x64xbf16> to vector<192x64xbf16>
    %cst_73 = arith.constant dense<0.000000e+00> : vector<256x64xf32>
    %90 = tpu.matmul %87, %89, %cst_73 {dimension_numbers = #tpu.dot_dimension_numbers<[1], [0], [0], [1], [0, 0, 1, 1], [], []>} : vector<256x192xbf16>, vector<192x64xbf16>, vector<256x64xf32> -> vector<256x64xf32>
    %91 = arith.addf %86, %90 : vector<256x64xf32>
    %c832 = arith.constant 832 : index
    %c0_74 = arith.constant 0 : index
    %92 = vector.load %arg1[%c832, %c0_74] : memref<1088x192xbf16, #tpu.memory_space<vmem>>, vector<256x192xbf16>
    %c2_75 = arith.constant 2 : index
    %c0_76 = arith.constant 0 : index
    %c0_77 = arith.constant 0 : index
    %93 = vector.load %arg2[%c2_75, %c0_76, %c0_77] : memref<3x192x64xbf16, #tpu.memory_space<vmem>>, vector<1x192x64xbf16>
    %94 = vector.shape_cast %93 : vector<1x192x64xbf16> to vector<192x64xbf16>
    %cst_78 = arith.constant dense<0.000000e+00> : vector<256x64xf32>
    %95 = tpu.matmul %92, %94, %cst_78 {dimension_numbers = #tpu.dot_dimension_numbers<[1], [0], [0], [1], [0, 0, 1, 1], [], []>} : vector<256x192xbf16>, vector<192x64xbf16>, vector<256x64xf32> -> vector<256x64xf32>
    %96 = arith.addf %91, %95 : vector<256x64xf32>
    %97 = vector.broadcast %0 : vector<1x64xf32> to vector<256x64xf32>
    %98 = arith.addf %96, %97 : vector<256x64xf32>
    %cst_79 = arith.constant 0.000000e+00 : f32
    %99 = vector.broadcast %cst_79 : f32 to vector<256x64xf32>
    %100 = arith.maximumf %98, %99 : vector<256x64xf32>
    %101 = arith.truncf %100 : vector<256x64xf32> to vector<256x64xbf16>
    %cst_80 = arith.constant dense<0.000000e+00> : vector<256x128xf32>
    %102 = tpu.matmul %101, %1, %cst_80 {dimension_numbers = #tpu.dot_dimension_numbers<[1], [0], [0], [1], [0, 0, 1, 1], [], []>} : vector<256x64xbf16>, vector<64x128xbf16>, vector<256x128xf32> -> vector<256x128xf32>
    %103 = vector.broadcast %2 : vector<1x128xf32> to vector<256x128xf32>
    %104 = arith.addf %102, %103 : vector<256x128xf32>
    %105 = arith.truncf %104 : vector<256x128xf32> to vector<256x128xbf16>
    %c768_81 = arith.constant 768 : index
    %c0_82 = arith.constant 0 : index
    %106 = vector.load %arg6[%c768_81, %c0_82] : memref<1024x128xbf16, #tpu.memory_space<vmem>>, vector<256x128xbf16>
    tpu.vector_store %arg6[%c768_81, %c0_82], %105 {strides = array<i32>} : memref<1024x128xbf16, #tpu.memory_space<vmem>>, vector<256x128xbf16>,
    return
  }
  func.func @transform_0(%arg0: i32) -> (i32, i32) {
    %c0_i32 = arith.constant 0 : i32
    %c0_i32_0 = arith.constant 0 : i32
    return %arg0, %c0_i32 : i32, i32
  }
  func.func @transform_1(%arg0: i32) -> (i32, i32, i32) {
    %c0_i32 = arith.constant 0 : i32
    %c0_i32_0 = arith.constant 0 : i32
    %c0_i32_1 = arith.constant 0 : i32
    %c0_i32_2 = arith.constant 0 : i32
    return %c0_i32, %c0_i32_0, %c0_i32_1 : i32, i32, i32
  }
  func.func @transform_2(%arg0: i32) -> (i32, i32) {
    %c0_i32 = arith.constant 0 : i32
    %c0_i32_0 = arith.constant 0 : i32
    %c0_i32_1 = arith.constant 0 : i32
    return %c0_i32, %c0_i32_0 : i32, i32
  }
  func.func @transform_3(%arg0: i32) -> (i32, i32) {
    %c0_i32 = arith.constant 0 : i32
    %c0_i32_0 = arith.constant 0 : i32
    %c0_i32_1 = arith.constant 0 : i32
    return %c0_i32, %c0_i32_0 : i32, i32
  }
  func.func @transform_4(%arg0: i32) -> (i32, i32) {
    %c0_i32 = arith.constant 0 : i32
    %c0_i32_0 = arith.constant 0 : i32
    %c0_i32_1 = arith.constant 0 : i32
    return %c0_i32, %c0_i32_0 : i32, i32
  }
  func.func @transform_5(%arg0: i32) -> (i32, i32) {
    %c0_i32 = arith.constant 0 : i32
    %c0_i32_0 = arith.constant 0 : i32
    return %arg0, %c0_i32 : i32, i32
  }
}

module attributes {stable_mosaic.version = 11 : i64} {
  func.func @_roi_head_kernel(%arg0: i32, %arg1: memref<8x3136xbf16, #tpu.memory_space<vmem>>, %arg2: memref<3136x128xbf16, #tpu.memory_space<vmem>>, %arg3: memref<1x128xf32, #tpu.memory_space<vmem>>, %arg4: memref<128x128xbf16, #tpu.memory_space<vmem>>, %arg5: memref<1x128xf32, #tpu.memory_space<vmem>>, %arg6: memref<128x128xbf16, #tpu.memory_space<vmem>>, %arg7: memref<1x128xf32, #tpu.memory_space<vmem>>, %arg8: memref<8x128xf32, #tpu.memory_space<vmem>>) attributes {dimension_semantics = [#tpu.dimension_semantics<arbitrary>], iteration_bounds = array<i64: 1>, scalar_prefetch = 0 : i64, scratch_operands = 0 : i64, tpu.core_type = #tpu.core_type<tc>, window_params = [{pipeline_mode = #tpu.pipeline_mode<synchronous>, transform_indices = @transform_0, window_bounds = array<i64: 8, 3136>}, {pipeline_mode = #tpu.pipeline_mode<synchronous>, transform_indices = @transform_1, window_bounds = array<i64: 3136, 128>}, {pipeline_mode = #tpu.pipeline_mode<synchronous>, transform_indices = @transform_2, window_bounds = array<i64: 1, 128>}, {pipeline_mode = #tpu.pipeline_mode<synchronous>, transform_indices = @transform_3, window_bounds = array<i64: 128, 128>}, {pipeline_mode = #tpu.pipeline_mode<synchronous>, transform_indices = @transform_4, window_bounds = array<i64: 1, 128>}, {pipeline_mode = #tpu.pipeline_mode<synchronous>, transform_indices = @transform_5, window_bounds = array<i64: 128, 128>}, {pipeline_mode = #tpu.pipeline_mode<synchronous>, transform_indices = @transform_6, window_bounds = array<i64: 1, 128>}, {pipeline_mode = #tpu.pipeline_mode<synchronous>, transform_indices = @transform_7, window_bounds = array<i64: 8, 128>}]} {
    %c0 = arith.constant 0 : index
    %c0_0 = arith.constant 0 : index
    %0 = vector.load %arg1[%c0, %c0_0] : memref<8x3136xbf16, #tpu.memory_space<vmem>>, vector<8x3136xbf16>
    %c0_1 = arith.constant 0 : index
    %c0_2 = arith.constant 0 : index
    %1 = vector.load %arg2[%c0_1, %c0_2] : memref<3136x128xbf16, #tpu.memory_space<vmem>>, vector<3136x128xbf16>
    %cst = arith.constant dense<0.000000e+00> : vector<8x128xf32>
    %2 = tpu.matmul %0, %1, %cst {dimension_numbers = #tpu.dot_dimension_numbers<[1], [0], [0], [1], [0, 0, 1, 1], [], []>} : vector<8x3136xbf16>, vector<3136x128xbf16>, vector<8x128xf32> -> vector<8x128xf32>
    %c0_3 = arith.constant 0 : index
    %c0_4 = arith.constant 0 : index
    %3 = vector.load %arg3[%c0_3, %c0_4] : memref<1x128xf32, #tpu.memory_space<vmem>>, vector<1x128xf32>
    %4 = vector.broadcast %3 : vector<1x128xf32> to vector<8x128xf32>
    %5 = arith.addf %2, %4 : vector<8x128xf32>
    %cst_5 = arith.constant 0.000000e+00 : f32
    %6 = vector.broadcast %cst_5 : f32 to vector<8x128xf32>
    %7 = arith.maximumf %5, %6 : vector<8x128xf32>
    %8 = arith.truncf %7 : vector<8x128xf32> to vector<8x128xbf16>
    %c0_6 = arith.constant 0 : index
    %c0_7 = arith.constant 0 : index
    %9 = vector.load %arg4[%c0_6, %c0_7] : memref<128x128xbf16, #tpu.memory_space<vmem>>, vector<128x128xbf16>
    %cst_8 = arith.constant dense<0.000000e+00> : vector<8x128xf32>
    %10 = tpu.matmul %8, %9, %cst_8 {dimension_numbers = #tpu.dot_dimension_numbers<[1], [0], [0], [1], [0, 0, 1, 1], [], []>} : vector<8x128xbf16>, vector<128x128xbf16>, vector<8x128xf32> -> vector<8x128xf32>
    %c0_9 = arith.constant 0 : index
    %c0_10 = arith.constant 0 : index
    %11 = vector.load %arg5[%c0_9, %c0_10] : memref<1x128xf32, #tpu.memory_space<vmem>>, vector<1x128xf32>
    %12 = vector.broadcast %11 : vector<1x128xf32> to vector<8x128xf32>
    %13 = arith.addf %10, %12 : vector<8x128xf32>
    %cst_11 = arith.constant 0.000000e+00 : f32
    %14 = vector.broadcast %cst_11 : f32 to vector<8x128xf32>
    %15 = arith.maximumf %13, %14 : vector<8x128xf32>
    %16 = arith.truncf %15 : vector<8x128xf32> to vector<8x128xbf16>
    %c0_12 = arith.constant 0 : index
    %c0_13 = arith.constant 0 : index
    %17 = vector.load %arg6[%c0_12, %c0_13] : memref<128x128xbf16, #tpu.memory_space<vmem>>, vector<128x128xbf16>
    %cst_14 = arith.constant dense<0.000000e+00> : vector<8x128xf32>
    %18 = tpu.matmul %16, %17, %cst_14 {dimension_numbers = #tpu.dot_dimension_numbers<[1], [0], [0], [1], [0, 0, 1, 1], [], []>} : vector<8x128xbf16>, vector<128x128xbf16>, vector<8x128xf32> -> vector<8x128xf32>
    %c0_15 = arith.constant 0 : index
    %c0_16 = arith.constant 0 : index
    %19 = vector.load %arg7[%c0_15, %c0_16] : memref<1x128xf32, #tpu.memory_space<vmem>>, vector<1x128xf32>
    %20 = vector.broadcast %19 : vector<1x128xf32> to vector<8x128xf32>
    %21 = arith.addf %18, %20 : vector<8x128xf32>
    %c0_17 = arith.constant 0 : index
    %c0_18 = arith.constant 0 : index
    %22 = vector.load %arg8[%c0_17, %c0_18] : memref<8x128xf32, #tpu.memory_space<vmem>>, vector<8x128xf32>
    tpu.vector_store %arg8[%c0_17, %c0_18], %21 {strides = array<i32>} : memref<8x128xf32, #tpu.memory_space<vmem>>, vector<8x128xf32>,
    return
  }
  func.func @transform_0(%arg0: i32) -> (i32, i32) {
    %c0_i32 = arith.constant 0 : i32
    %c0_i32_0 = arith.constant 0 : i32
    %c0_i32_1 = arith.constant 0 : i32
    return %c0_i32, %c0_i32_0 : i32, i32
  }
  func.func @transform_1(%arg0: i32) -> (i32, i32) {
    %c0_i32 = arith.constant 0 : i32
    %c0_i32_0 = arith.constant 0 : i32
    %c0_i32_1 = arith.constant 0 : i32
    return %c0_i32, %c0_i32_0 : i32, i32
  }
  func.func @transform_2(%arg0: i32) -> (i32, i32) {
    %c0_i32 = arith.constant 0 : i32
    %c0_i32_0 = arith.constant 0 : i32
    %c0_i32_1 = arith.constant 0 : i32
    return %c0_i32, %c0_i32_0 : i32, i32
  }
  func.func @transform_3(%arg0: i32) -> (i32, i32) {
    %c0_i32 = arith.constant 0 : i32
    %c0_i32_0 = arith.constant 0 : i32
    %c0_i32_1 = arith.constant 0 : i32
    return %c0_i32, %c0_i32_0 : i32, i32
  }
  func.func @transform_4(%arg0: i32) -> (i32, i32) {
    %c0_i32 = arith.constant 0 : i32
    %c0_i32_0 = arith.constant 0 : i32
    %c0_i32_1 = arith.constant 0 : i32
    return %c0_i32, %c0_i32_0 : i32, i32
  }
  func.func @transform_5(%arg0: i32) -> (i32, i32) {
    %c0_i32 = arith.constant 0 : i32
    %c0_i32_0 = arith.constant 0 : i32
    %c0_i32_1 = arith.constant 0 : i32
    return %c0_i32, %c0_i32_0 : i32, i32
  }
  func.func @transform_6(%arg0: i32) -> (i32, i32) {
    %c0_i32 = arith.constant 0 : i32
    %c0_i32_0 = arith.constant 0 : i32
    %c0_i32_1 = arith.constant 0 : i32
    return %c0_i32, %c0_i32_0 : i32, i32
  }
  func.func @transform_7(%arg0: i32) -> (i32, i32) {
    %c0_i32 = arith.constant 0 : i32
    %c0_i32_0 = arith.constant 0 : i32
    %c0_i32_1 = arith.constant 0 : i32
    return %c0_i32, %c0_i32_0 : i32, i32
  }
}

</mosaic_0001>

<bundles_post_ra>
// kernel: faster_rcnn_forward.3
= control target key start
LH: loop header
LB: loop body
LE: loop exit
PB: predicated region body
PF: predicated region fallthrough
CT: control target
= control target key end

     0   :  { %s5206_s18 = smov 0   ;;  %s6451_s0 = inlined_call_operand.vmem [shape: bf16[2176,9], index: 0, kind: input, shape index: {}]   ;;  %s6452_s1 = inlined_call_operand.vmem [shape: bf16[3,9,32], index: 1, kind: input, shape index: {}]   ;;  %s6453_s2 = inlined_call_operand.vmem [shape: f32[1,32], index: 2, kind: input, shape index: {}]   ;;  %s6454_s3 = inlined_call_operand.vmem [shape: bf16[32,64], index: 3, kind: input, shape index: {}]   ;;  %s6455_s4 = inlined_call_operand.vmem [shape: f32[1,64], index: 4, kind: input, shape index: {}]   ;;  %s6456_s5 = inlined_call_operand.vmem [shape: bf16[2048,64], index: 5, kind: output, shape index: {}]  }
   0x1 LB: > { %s4118_s19 = sadd.s32 4294967295, %s5173_s18   ;;  %p4122_p0 = scmp.ge.s32.totalorder %s5173_s18, 1  ;;  %s5173_s18 = sphi %s5206_s18, %s15_s18  }
   0x2   : > { %p188_p1 = scmp.lt.s32.totalorder %s5173_s18, 3 }
   0x4   : > { %p189_p2 = pnand %p4122_p0, %p188_p1 }
   0x5   : > { %s216_s28 = smul.u32 (!%p189_p2), 136, %s4118_s19  ;;  %s4124_s21 = sshll.u32 (!%p189_p2), %s4118_s19, 7 }
   0x6   : > { %192 = sbr.rel (%p189_p2) target bundleno = 1324 (0x52c), region = 40  ;;  %p223_p4 = scmp.lt.s32.totalorder (!%p189_p2), %s4124_s21, 255 }
   0x7   : > { %p217_p3 = scmp.lt.s32.totalorder (!%p189_p2), %s216_s28, 271 }
   0xb   : > { %v4194_v0 = vld [vmem:[%s6452_s1 + $0x8] sm:$0xf]  ;;  %v5021_v1 = vld [vmem:[%s6452_s1 + $0x8] sm:$0x10]  ;;  %vm410_vm0 = vcmask 1043456   ;;  %vm411_vm1 = vcmask 1044480  }
   0xc   : > { %v4195_v2 = vor.u32 %v5021_v1, %v4194_v0  ;;  %v4222_v3 = vld [vmem:[%s6452_s1] sm:$0xf]  ;;  %v5018_v4 = vld [vmem:[%s6452_s1] sm:$0x10]  ;;  %v5175_v5 = vmov 65535   ;;  %s6458_s28 = smov (!%p217_p3, %s216_s28), 271 }
   0xd   : > { %v412_v6 = vsel %vm410_vm0, 4294967295, %v5175_v5  ;;  %v4223_v7 = vor.u32 %v5018_v4, %v4222_v3  ;;  %v4308_v8 = vld [vmem:[%s6452_s1 + $0x10] sm:$0xf]  ;;  %v5038_v9 = vld [vmem:[%s6452_s1 + $0x10] sm:$0x10]  ;;  %s4123_s22 = sshll.u32 %s6458_s28, 2 }
   0xe   : > { %v5234_v10 = vsel %vm411_vm1, %v412_v6, 0  ;;  %v4309_v11 = vor.u32 %v5038_v9, %v4308_v8  ;;  %v4532_v12 = vld [vmem:[%s6452_s1 + $0x10] sm:$0xf]  ;;  %v5075_v13 = vld [vmem:[%s6452_s1 + $0x10] sm:$0x10]  ;;  %s5262_s25 = scalar_lea.vmem %s6451_s0, %s4123_s22  ;;  %vm361_vm2 = vcmask 72704  }
   0xf   : > { %v415_v14 = vand.u32 %v4195_v2, %v5234_v10  ;;  %v528_v15 = vand.u32 %v4223_v7, %v5234_v10  ;;  %v4533_v16 = vor.u32 %v5075_v13, %v4532_v12  ;;  %v4418_v17 = vld [vmem:[%s6452_s1 + $0x8] sm:$0xf]  ;;  %v5058_v18 = vld [vmem:[%s6452_s1 + $0x8] sm:$0x10]  ;;  %v4446_v19 = vld [vmem:[%s6452_s1] sm:$0xf] }
  0x10   : > { %v788_v20 = vand.u32 %v4309_v11, %v5234_v10  ;;  %v4419_v21 = vor.u32 %v5058_v18, %v4418_v17  ;;  %v5055_v22 = vld [vmem:[%s6452_s1] sm:$0x10]  ;;  %v5004_v27 = vld [vmem:[%s5262_s25 + $0x10] sm:$0xff]  ;;  %v5005_v30 = vld [vmem:[%s5262_s25 + $0x18] sm:$0xff]  ;;  %vm1009_vm3 = vcmask 261120   ;;  %s6460_s21 = smov (!%p223_p4, %s4124_s21), 255 }
  0x11   : > { %424 = vmatpush.bf16.msra.mxu0 %v415_v14  ;;  %537 = vmatpush.bf16.msra.mxu1 %v528_v15  ;;  %v1758_v23 = vand.u32 %v4533_v16, %v5234_v10  ;;  %v4447_v24 = vor.u32 %v5055_v22, %v4446_v19  ;;  %v5002_v28 = vld [vmem:[%s5262_s25] sm:$0xff]  ;;  %v5003_v31 = vld [vmem:[%s5262_s25 + $0x8] sm:$0xff]  ;;  %v5024_v34 = vld [vmem:[%s5262_s25 + $0x30] sm:$0xff]  ;;  %s4125_s23 = sshll.u32 %s6460_s21, 2  ;;  %vm1179_vm4 = vcmask 519168  }
  0x12   : > { %797 = vmatpush.bf16.msra.mxu2 %v788_v20  ;;  %v1386_v25 = vand.u32 %v4419_v21, %v5234_v10  ;;  %v5022_v29 = vld [vmem:[%s5262_s25 + $0x20] sm:$0xff]  ;;  %v5023_v32 = vld [vmem:[%s5262_s25 + $0x28] sm:$0xff]  ;;  %v5025_v36 = vld [vmem:[%s5262_s25 + $0x38] sm:$0xff]  ;;  %s5449_s27 = scalar_lea.vmem %s6456_s5, %s4125_s23 }
  0x13   : > { %v1499_v26 = vand.u32 %v4447_v24, %v5234_v10  ;;  %v5006_v33 = vld [vmem:[%s5262_s25 + $0x20] sm:$0xff]  ;;  %v5007_v35 = vld [vmem:[%s5262_s25 + $0x28] sm:$0xff]  ;;  %v5008_v37 = vld [vmem:[%s5262_s25 + $0x30] sm:$0xff] }
  0x14   : > { %4196 = vmatmul.msk.bf16.vlgmr.msra.gmra.mxu0 %vm361_vm2, %v5004_v27  ;;  %4224 = vmatmul.msk.bf16.vlgmr.msra.gmra.mxu1 %vm361_vm2, %v5002_v28  ;;  %v5026_v38 = vld [vmem:[%s5262_s25 + $0x40] sm:$0xff]  ;;  %v5009_v39 = vld [vmem:[%s5262_s25 + $0x38] sm:$0xff]  ;;  %v5027_v40 = vld [vmem:[%s5262_s25 + $0x48] sm:$0xff] }
  0x15   : > { %1395 = vmatpush.bf16.msrb.mxu0 %v1386_v25  ;;  %1508 = vmatpush.bf16.msrb.mxu1 %v1499_v26  ;;  %v5010_v41 = vld [vmem:[%s5262_s25 + $0x40] sm:$0xff]  ;;  %v5028_v42 = vld [vmem:[%s5262_s25 + $0x50] sm:$0xff]  ;;  %v5011_v43 = vld [vmem:[%s5262_s25 + $0x48] sm:$0xff] }
  0x16   : > { %1767 = vmatpush.bf16.msrb.mxu2 %v1758_v23  ;;  %v5306_v44 = vld [vmem:[%s6454_s3 + $0x8] sm:$0xff]  ;;  %v5029_v45 = vld [vmem:[%s5262_s25 + $0x58] sm:$0xff]  ;;  %v5315_v46 = vld [vmem:[%s6454_s3] sm:$0xff] }
  0x17   : > { %4310 = vmatmul.msk.bf16.vlgmr.msra.gmra.mxu2 %vm361_vm2, %v5022_v29  ;;  %1064 = vmatpush.bf16.msra.mxu3 %v5306_v44  ;;  %v5012_v47 = vld [vmem:[%s5262_s25 + $0x50] sm:$0xff]  ;;  %v5030_v50 = vld [vmem:[%s5262_s25 + $0x60] sm:$0xff]  ;;  %v5013_v59 = vld [vmem:[%s5262_s25 + $0x58] sm:$0xff] }
  0x18   : > { %v5329_v56 = vld [vmem:[%s6453_s2] ss:$0 sm:$0xff]  ;;  %v5031_v0 = vld [vmem:[%s5262_s25 + $0x68] sm:$0xff]  ;;  %v5032_v18 = vld [vmem:[%s5262_s25 + $0x70] sm:$0xff] }
  0x19   : > { %v5014_v13 = vld [vmem:[%s5262_s25 + $0x60] sm:$0xff] }
  0x1b   : > { %1065 = vmatpush.bf16.msra.mxu3 %v5315_v46 }
  0x1f   : > { %2015 = vmatpush.bf16.msrb.mxu3 %v5306_v44 }
  0x23   : > { %2016 = vmatpush.bf16.msrb.mxu3 %v5315_v46 }
  0x24   : > { %4197 = vmatmul.msk.bf16.gmra.mxu0 %vm361_vm2, %v5005_v30  ;;  %4225 = vmatmul.msk.bf16.gmra.mxu1 %vm361_vm2, %v5003_v31 }
  0x27   : > { %4311 = vmatmul.msk.bf16.gmra.mxu2 %vm361_vm2, %v5023_v32 }
  0x34   : > { %4198 = vmatmul.msk.bf16.gmra.mxu0 %vm361_vm2, %v5006_v33  ;;  %4226 = vmatmul.msk.bf16.gmra.mxu1 %vm361_vm2, %v5004_v27 }
  0x37   : > { %4312 = vmatmul.msk.bf16.gmra.mxu2 %vm361_vm2, %v5024_v34 }
  0x44   : > { %4199 = vmatmul.msk.bf16.gmra.mxu0 %vm361_vm2, %v5007_v35  ;;  %4227 = vmatmul.msk.bf16.gmra.mxu1 %vm361_vm2, %v5005_v30  ;;  %v5015_v30 = vld [vmem:[%s5262_s25 + $0x68] sm:$0xff] }
  0x47   : > { %4313 = vmatmul.msk.bf16.gmra.mxu2 %vm361_vm2, %v5025_v36 }
  0x54   : > { %4200 = vmatmul.msk.bf16.gmra.mxu0 %vm361_vm2, %v5008_v37  ;;  %4228 = vmatmul.msk.bf16.gmra.mxu1 %vm361_vm2, %v5006_v33 }
  0x57   : > { %4314 = vmatmul.msk.bf16.gmra.mxu2 %vm361_vm2, %v5026_v38 }
  0x64   : > { %4201 = vmatmul.msk.bf16.gmra.mxu0 %vm361_vm2, %v5009_v39  ;;  %4229 = vmatmul.msk.bf16.gmra.mxu1 %vm361_vm2, %v5007_v35  ;;  %v5033_v35 = vld [vmem:[%s5262_s25 + $0x78] sm:$0xff] }
  0x67   : > { %4315 = vmatmul.msk.bf16.gmra.mxu2 %vm361_vm2, %v5027_v40 }
  0x74   : > { %4202 = vmatmul.msk.bf16.gmra.mxu0 %vm361_vm2, %v5010_v41  ;;  %4230 = vmatmul.msk.bf16.gmra.mxu1 %vm361_vm2, %v5008_v37 }
  0x77   : > { %4316 = vmatmul.msk.bf16.gmra.mxu2 %vm361_vm2, %v5028_v42 }
  0x84   : > { %4203 = vmatmul.msk.bf16.gmra.mxu0 %vm361_vm2, %v5011_v43  ;;  %4231 = vmatmul.msk.bf16.gmra.mxu1 %vm361_vm2, %v5009_v39 }
  0x87   : > { %4317 = vmatmul.msk.bf16.gmra.mxu2 %vm361_vm2, %v5029_v45 }
  0x91   : > { %v426_v48 = vpop.f32.mrf.mxu0  ;;  %v539_v49 = vpop.f32.mrf.mxu1 }
  0x92   : > { %v540_v52 = vadd.f32 %v539_v49, %v426_v48  ;;  %v5016_v49 = vld [vmem:[%s5262_s25 + $0x70] sm:$0xff] }
  0x94   : > { %4204 = vmatmul.msk.bf16.gmra.mxu0 %vm361_vm2, %v5012_v47  ;;  %4232 = vmatmul.msk.bf16.gmra.mxu1 %vm361_vm2, %v5010_v41 }
  0x97   : > { %4318 = vmatmul.msk.bf16.gmra.mxu2 %vm361_vm2, %v5030_v50 }
  0x99   : > { %v428_v53 = vpop.f32.mrf.mxu0  ;;  %v541_v54 = vpop.f32.mrf.mxu1 }
  0x9a   : > { %v799_v51 = vpop.f32.mrf.mxu2  ;;  %v542_v57 = vadd.f32 %v541_v54, %v428_v53  ;;  %v5034_v54 = vld [vmem:[%s5262_s25 + $0x80] sm:$0xff] }
  0x9b   : > { %v879_v55 = vadd.f32 %v799_v51, %v540_v52 }
  0x9d   : > { %v914_v60 = vadd.f32 %v5329_v56, %v879_v55 }
  0x9f   : > { %v946_v2 = vmax.f32 %v914_v60, 0.0 }
  0xa1   : > { %v431_v62 = vpop.f32.mrf.mxu0  ;;  %v544_v63 = vpop.f32.mrf.mxu1 }
  0xa2   : > { %v801_v58 = vpop.f32.mrf.mxu2  ;;  %v545_v6 = vadd.f32 %v544_v63, %v431_v62 }
  0xa3   : > { %v880_v61 = vadd.f32 %v801_v58, %v542_v57 }
  0xa4   : > { %4205 = vmatmul.msk.bf16.gmra.mxu0 %vm361_vm2, %v5013_v59  ;;  %4233 = vmatmul.msk.bf16.gmra.mxu1 %vm361_vm2, %v5011_v43 }
  0xa5   : > { %v915_v1 = vadd.f32 %v5329_v56, %v880_v61 }
  0xa7   : > { %v947_v3 = vmax.f32 %v915_v1, 0.0  ;;  %4319 = vmatmul.msk.bf16.gmra.mxu2 %vm361_vm2, %v5031_v0 }
  0xa9   : > { %v978_v4 = vpack.c.bf16 %v947_v3, %v946_v2  ;;  %v433_v7 = vpop.f32.mrf.mxu0  ;;  %v546_v8 = vpop.f32.mrf.mxu1  ;;  %v5366_v3 = vld [vmem:[%s5262_s25 + $0x78] sm:$0xff] }
  0xaa   : > { %v804_v5 = vpop.f32.mrf.mxu2  ;;  %v547_v11 = vadd.f32 %v546_v8, %v433_v7  ;;  %v5035_v8 = vld [vmem:[%s5262_s25 + $0x88] sm:$0xff] }
  0xab   : > { %4334 = vmatmul.msk.bf16.vlgmr.msra.gmra.mxu3 %vm1009_vm3, %v978_v4  ;;  %v881_v9 = vadd.f32 %v804_v5, %v545_v6 }
  0xac   : > { %2965 = vmatpush.bf16.msra.mxu3 %v5306_v44 }
  0xad   : > { %v916_v14 = vadd.f32 %v5329_v56, %v881_v9 }
  0xaf   : > { %v948_v20 = vmax.f32 %v916_v14, 0.0 }
  0xb0   : > { %2966 = vmatpush.bf16.msra.mxu3 %v5315_v46 }
  0xb1   : > { %v436_v16 = vpop.f32.mrf.mxu0  ;;  %v549_v17 = vpop.f32.mrf.mxu1 }
  0xb2   : > { %v806_v12 = vpop.f32.mrf.mxu2  ;;  %v550_v24 = vadd.f32 %v549_v17, %v436_v16 }
  0xb3   : > { %v882_v15 = vadd.f32 %v806_v12, %v547_v11 }
  0xb4   : > { %4206 = vmatmul.msk.bf16.gmra.mxu0 %vm361_vm2, %v5014_v13  ;;  %4234 = vmatmul.msk.bf16.gmra.mxu1 %vm361_vm2, %v5012_v47 }
  0xb5   : > { %v917_v19 = vadd.f32 %v5329_v56, %v882_v15 }
  0xb7   : > { %v949_v21 = vmax.f32 %v917_v19, 0.0  ;;  %4320 = vmatmul.msk.bf16.gmra.mxu2 %vm361_vm2, %v5032_v18 }
  0xb9   : > { %v979_v22 = vpack.c.bf16 %v949_v21, %v948_v20  ;;  %v438_v25 = vpop.f32.mrf.mxu0  ;;  %v551_v26 = vpop.f32.mrf.mxu1  ;;  %v5019_v21 = vld [vmem:[%s5262_s25 + $0x80] sm:$0xff] }
  0xba   : > { %v809_v23 = vpop.f32.mrf.mxu2  ;;  %v552_v28 = vadd.f32 %v551_v26, %v438_v25  ;;  %v5036_v26 = vld [vmem:[%s5262_s25 + $0x90] sm:$0xff] }
  0xbb   : > { %4335 = vmatmul.msk.bf16.gmra.mxu3 %vm1009_vm3, %v979_v22  ;;  %v883_v27 = vadd.f32 %v809_v23, %v550_v24 }
  0xbd   : > { %v918_v31 = vadd.f32 %v5329_v56, %v883_v27 }
  0xbf   : > { %v950_v37 = vmax.f32 %v918_v31, 0.0  ;;  %v5112_v31 = vld [vmem:[%s6452_s1 + $0x10] sm:$0x10] }
  0xc1   : > { %v441_v33 = vpop.f32.mrf.mxu0  ;;  %v554_v34 = vpop.f32.mrf.mxu1 }
  0xc2   : > { %v811_v29 = vpop.f32.mrf.mxu2  ;;  %v555_v41 = vadd.f32 %v554_v34, %v441_v33 }
  0xc3   : > { %v884_v32 = vadd.f32 %v811_v29, %v552_v28 }
  0xc4   : > { %4207 = vmatmul.msk.bf16.gmra.mxu0 %vm361_vm2, %v5015_v30  ;;  %4235 = vmatmul.msk.bf16.gmra.mxu1 %vm361_vm2, %v5013_v59 }
  0xc5   : > { %v919_v36 = vadd.f32 %v5329_v56, %v884_v32 }
  0xc7   : > { %v951_v38 = vmax.f32 %v919_v36, 0.0  ;;  %4321 = vmatmul.msk.bf16.gmra.mxu2 %vm361_vm2, %v5033_v35 }
  0xc9   : > { %v980_v39 = vpack.c.bf16 %v951_v38, %v950_v37  ;;  %v443_v42 = vpop.f32.mrf.mxu0  ;;  %v556_v43 = vpop.f32.mrf.mxu1 }
  0xca   : > { %v814_v40 = vpop.f32.mrf.mxu2  ;;  %v557_v47 = vadd.f32 %v556_v43, %v443_v42  ;;  %v4662_v43 = vld [vmem:[%s6452_s1] sm:$0xf] }
  0xcb   : > { %4336 = vmatmul.msk.bf16.gmra.mxu3 %vm1009_vm3, %v980_v39  ;;  %v885_v45 = vadd.f32 %v814_v40, %v555_v41  ;;  %v4634_v40 = vld [vmem:[%s6452_s1 + $0x8] sm:$0xf]  ;;  %v5095_v41 = vld [vmem:[%s6452_s1 + $0x8] sm:$0x10] }
  0xcc   : > { %v4635_v42 = vor.u32 %v5095_v41, %v4634_v40  ;;  %v5443_v40 = vld [vmem:[%s6455_s4] ss:$0 sm:$0xff] }
  0xcd   : > { %v920_v50 = vadd.f32 %v5329_v56, %v885_v45  ;;  %v5092_v45 = vld [vmem:[%s6452_s1] sm:$0x10] }
  0xcf   : > { %v952_v57 = vmax.f32 %v920_v50, 0.0  ;;  %v5020_v50 = vld [vmem:[%s5262_s25 + $0x88] sm:$0xff] }
  0xd1   : > { %v446_v52 = vpop.f32.mrf.mxu0  ;;  %v559_v53 = vpop.f32.mrf.mxu1 }
  0xd2   : > { %v816_v48 = vpop.f32.mrf.mxu2  ;;  %v560_v61 = vadd.f32 %v559_v53, %v446_v52 }
  0xd3   : > { %v886_v51 = vadd.f32 %v816_v48, %v557_v47  ;;  %v4663_v48 = vor.u32 %v5092_v45, %v4662_v43 }
  0xd4   : > { %4208 = vmatmul.msk.bf16.gmra.mxu0 %vm361_vm2, %v5016_v49  ;;  %4236 = vmatmul.msk.bf16.gmra.mxu1 %vm361_vm2, %v5014_v13 }
  0xd5   : > { %v921_v55 = vadd.f32 %v5329_v56, %v886_v51  ;;  %v2336_v51 = vand.u32 %v4635_v42, %v5234_v10 }
  0xd7   : > { %v953_v58 = vmax.f32 %v921_v55, 0.0  ;;  %4322 = vmatmul.msk.bf16.gmra.mxu2 %vm361_vm2, %v5034_v54  ;;  %2345 = vmatpush.bf16.msra.mxu0 %v2336_v51 }
  0xd9   : > { %v981_v59 = vpack.c.bf16 %v953_v58, %v952_v57  ;;  %v448_v62 = vpop.f32.mrf.mxu0  ;;  %v561_v63 = vpop.f32.mrf.mxu1  ;;  %v5037_v57 = vld [vmem:[%s5262_s25 + $0x98] sm:$0xff]  ;;  %v2449_v58 = vand.u32 %v4663_v48, %v5234_v10 }
  0xda   : > { %v819_v60 = vpop.f32.mrf.mxu2  ;;  %v562_v1 = vadd.f32 %v561_v63, %v448_v62 }
  0xdb   : > { %4337 = vmatmul.msk.bf16.gmra.mxu3 %vm1009_vm3, %v981_v59  ;;  %v887_v0 = vadd.f32 %v819_v60, %v560_v61  ;;  %2458 = vmatpush.bf16.msra.mxu1 %v2449_v58 }
  0xdd   : > { %v922_v4 = vadd.f32 %v5329_v56, %v887_v0 }
  0xdf   : > { %v954_v11 = vmax.f32 %v922_v4, 0.0 }
  0xe1   : > { %v451_v6 = vpop.f32.mrf.mxu0  ;;  %v564_v7 = vpop.f32.mrf.mxu1 }
  0xe2   : > { %v821_v2 = vpop.f32.mrf.mxu2  ;;  %v565_v15 = vadd.f32 %v564_v7, %v451_v6  ;;  %v5415_v7 = vld [vmem:[%s5262_s25 + $0x90] sm:$0xff] }
  0xe3   : > { %v888_v5 = vadd.f32 %v821_v2, %v562_v1 }
  0xe4   : > { %4209 = vmatmul.msk.bf16.gmra.mxu0 %vm361_vm2, %v5366_v3  ;;  %4237 = vmatmul.msk.bf16.gmra.mxu1 %vm361_vm2, %v5015_v30  ;;  %v4748_v30 = vld [vmem:[%s6452_s1 + $0x10] sm:$0xf] }
  0xe5   : > { %v923_v9 = vadd.f32 %v5329_v56, %v888_v5  ;;  %v4749_v32 = vor.u32 %v5112_v31, %v4748_v30  ;;  %v5060_v31 = vld [vmem:[%s5262_s25 + $0xa8] sm:$0xff] }
  0xe7   : > { %v955_v12 = vmax.f32 %v923_v9, 0.0  ;;  %4323 = vmatmul.msk.bf16.gmra.mxu2 %vm361_vm2, %v5035_v8  ;;  %v2708_v35 = vand.u32 %v4749_v32, %v5234_v10  ;;  %v5039_v8 = vld [vmem:[%s5262_s25 + $0x80] sm:$0xff] }
  0xe9   : > { %v982_v13 = vpack.c.bf16 %v955_v12, %v954_v11  ;;  %v453_v16 = vpop.f32.mrf.mxu0  ;;  %v566_v17 = vpop.f32.mrf.mxu1  ;;  %2717 = vmatpush.bf16.msra.mxu2 %v2708_v35 }
  0xea   : > { %v824_v14 = vpop.f32.mrf.mxu2  ;;  %v567_v19 = vadd.f32 %v566_v17, %v453_v16 }
  0xeb   : > { %4338 = vmatmul.msk.bf16.gmra.mxu3 %vm1009_vm3, %v982_v13  ;;  %v889_v18 = vadd.f32 %v824_v14, %v565_v15  ;;  %v5059_v13 = vld [vmem:[%s5262_s25 + $0xa0] sm:$0xff] }
  0xed   : > { %v924_v22 = vadd.f32 %v5329_v56, %v889_v18 }
  0xef   : > { %v956_v28 = vmax.f32 %v924_v22, 0.0 }
  0xf1   : > { %v456_v24 = vpop.f32.mrf.mxu0  ;;  %v569_v25 = vpop.f32.mrf.mxu1 }
  0xf2   : > { %v826_v20 = vpop.f32.mrf.mxu2  ;;  %v570_v36 = vadd.f32 %v569_v25, %v456_v24  ;;  %v5427_v25 = vld [vmem:[%s5262_s25 + $0x98] sm:$0xff] }
  0xf3   : > { %v890_v23 = vadd.f32 %v826_v20, %v567_v19 }
  0xf4   : > { %4210 = vmatmul.msk.bf16.gmra.mxu0 %vm361_vm2, %v5019_v21  ;;  %4238 = vmatmul.msk.bf16.gmra.mxu1 %vm361_vm2, %v5016_v49 }
  0xf5   : > { %v925_v27 = vadd.f32 %v5329_v56, %v890_v23 }
  0xf7   : > { %v957_v29 = vmax.f32 %v925_v27, 0.0  ;;  %4324 = vmatmul.msk.bf16.gmra.mxu2 %vm361_vm2, %v5036_v26  ;;  %v5040_v26 = vld [vmem:[%s5262_s25 + $0x88] sm:$0xff] }
  0xf9   : > { %v983_v33 = vpack.c.bf16 %v957_v29, %v956_v28  ;;  %v458_v37 = vpop.f32.mrf.mxu0  ;;  %v571_v38 = vpop.f32.mrf.mxu1 }
  0xfa   : > { %v829_v34 = vpop.f32.mrf.mxu2  ;;  %v572_v47 = vadd.f32 %v571_v38, %v458_v37 }
  0xfb   : > { %4339 = vmatmul.msk.bf16.gmra.mxu3 %vm1009_vm3, %v983_v33  ;;  %v891_v39 = vadd.f32 %v829_v34, %v570_v36 }
  0xfd   : > { %v926_v52 = vadd.f32 %v5329_v56, %v891_v39 }
  0xff   : > { %v958_v60 = vmax.f32 %v926_v52, 0.0 }
 0x101   : > { %v461_v54 = vpop.f32.mrf.mxu0  ;;  %v574_v55 = vpop.f32.mrf.mxu1 }
 0x102   : > { %v831_v49 = vpop.f32.mrf.mxu2  ;;  %v575_v0 = vadd.f32 %v574_v55, %v461_v54  ;;  %v5061_v54 = vld [vmem:[%s5262_s25 + $0xb0] sm:$0xff] }
 0x103   : > { %v892_v53 = vadd.f32 %v831_v49, %v572_v47  ;;  %v5452_v49 = vld [vmem:[%s5262_s25 + $0xa0] sm:$0xff] }
 0x104   : > { %4211 = vmatmul.msk.bf16.gmra.mxu0 %vm361_vm2, %v5020_v50  ;;  %4239 = vmatmul.msk.bf16.gmra.mxu1 %vm361_vm2, %v5366_v3 }
 0x105   : > { %v927_v59 = vadd.f32 %v5329_v56, %v892_v53 }
 0x107   : > { %v959_v61 = vmax.f32 %v927_v59, 0.0  ;;  %4325 = vmatmul.msk.bf16.gmra.mxu2 %vm361_vm2, %v5037_v57 }
 0x109   : > { %v984_v62 = vpack.c.bf16 %v959_v61, %v958_v60  ;;  %v463_v1 = vpop.f32.mrf.mxu0  ;;  %v576_v2 = vpop.f32.mrf.mxu1 }
 0x10a   : > { %v834_v63 = vpop.f32.mrf.mxu2  ;;  %v577_v5 = vadd.f32 %v576_v2, %v463_v1 }
 0x10b   : > { %4340 = vmatmul.msk.bf16.gmra.mxu3 %vm1009_vm3, %v984_v62  ;;  %v893_v4 = vadd.f32 %v834_v63, %v575_v0 }
 0x10d   : > { %v928_v3 = vadd.f32 %v5329_v56, %v893_v4 }
 0x10f   : > { %v960_v15 = vmax.f32 %v928_v3, 0.0 }
 0x111   : > { %v466_v11 = vpop.f32.mrf.mxu0  ;;  %v579_v12 = vpop.f32.mrf.mxu1 }
 0x112   : > { %v836_v6 = vpop.f32.mrf.mxu2  ;;  %v580_v19 = vadd.f32 %v579_v12, %v466_v11 }
 0x113   : > { %v894_v9 = vadd.f32 %v836_v6, %v577_v5 }
 0x114   : > { %4420 = vmatmul.msk.bf16.vlgmr.msrb.gmra.mxu0 %vm361_vm2, %v5415_v7  ;;  %4448 = vmatmul.msk.bf16.vlgmr.msrb.gmra.mxu1 %vm361_vm2, %v5039_v8 }
 0x115   : > { %v929_v14 = vadd.f32 %v5329_v56, %v894_v9  ;;  %v5470_v9 = vld [vmem:[%s5262_s25 + $0xa8] sm:$0xff] }
 0x117   : > { %v961_v16 = vmax.f32 %v929_v14, 0.0  ;;  %4534 = vmatmul.msk.bf16.vlgmr.msrb.gmra.mxu2 %vm361_vm2, %v5059_v13 }
 0x119   : > { %v985_v17 = vpack.c.bf16 %v961_v16, %v960_v15  ;;  %v468_v20 = vpop.f32.mrf.mxu0  ;;  %v581_v21 = vpop.f32.mrf.mxu1  ;;  %v5062_v15 = vld [vmem:[%s5262_s25 + $0xb8] sm:$0xff] }
 0x11a   : > { %v839_v18 = vpop.f32.mrf.mxu2  ;;  %v582_v23 = vadd.f32 %v581_v21, %v468_v20 }
 0x11b   : > { %4341 = vmatmul.msk.bf16.gmra.mxu3 %vm1009_vm3, %v985_v17  ;;  %v895_v22 = vadd.f32 %v839_v18, %v580_v19 }
 0x11d   : > { %v930_v27 = vadd.f32 %v5329_v56, %v895_v22 }
 0x11f   : > { %v962_v33 = vmax.f32 %v930_v27, 0.0 }
 0x121   : > { %v471_v29 = vpop.f32.mrf.mxu0  ;;  %v584_v30 = vpop.f32.mrf.mxu1 }
 0x122   : > { %v841_v24 = vpop.f32.mrf.mxu2  ;;  %v585_v37 = vadd.f32 %v584_v30, %v471_v29 }
 0x123   : > { %v896_v28 = vadd.f32 %v841_v24, %v582_v23 }
 0x124   : > { %4421 = vmatmul.msk.bf16.gmra.mxu0 %vm361_vm2, %v5427_v25  ;;  %4449 = vmatmul.msk.bf16.gmra.mxu1 %vm361_vm2, %v5040_v26 }
 0x125   : > { %v931_v32 = vadd.f32 %v5329_v56, %v896_v28 }
 0x127   : > { %v963_v34 = vmax.f32 %v931_v32, 0.0  ;;  %4535 = vmatmul.msk.bf16.gmra.mxu2 %vm361_vm2, %v5060_v31 }
 0x129   : > { %v986_v35 = vpack.c.bf16 %v963_v34, %v962_v33  ;;  %v473_v38 = vpop.f32.mrf.mxu0  ;;  %v586_v39 = vpop.f32.mrf.mxu1  ;;  %v5488_v33 = vld [vmem:[%s5262_s25 + $0xb0] sm:$0xff] }
 0x12a   : > { %v844_v36 = vpop.f32.mrf.mxu2  ;;  %v587_v45 = vadd.f32 %v586_v39, %v473_v38  ;;  %v5063_v38 = vld [vmem:[%s5262_s25 + $0xc0] sm:$0xff] }
 0x12b   : > { %4342 = vmatmul.msk.bf16.gmra.mxu3 %vm1009_vm3, %v986_v35  ;;  %v897_v42 = vadd.f32 %v844_v36, %v585_v37 }
 0x12d   : > { %v932_v50 = vadd.f32 %v5329_v56, %v897_v42 }
 0x12e   : > { %v1067_v41 = vpop.f32.mrf.mxu3 }
 0x12f   : > { %v1068_v43 = vadd.f32 %v5443_v40, %v1067_v41  ;;  %v964_v58 = vmax.f32 %v932_v50, 0.0 }
 0x131   : > { %v1147_v47 = vpack.c.bf16 %v1068_v43, %v1068_v43  ;;  %v476_v52 = vpop.f32.mrf.mxu0  ;;  %v589_v53 = vpop.f32.mrf.mxu1 }
 0x132   : > { %v846_v48 = vpop.f32.mrf.mxu2  ;;  %v590_v0 = vadd.f32 %v589_v53, %v476_v52 }
 0x133   : > { %1180 = vst.msk [vmem:[%s5449_s27] sm:$0xf] %vm1179_vm4, %v1147_v47  ;;  %v898_v51 = vadd.f32 %v846_v48, %v587_v45 }
 0x134   : > { %4422 = vmatmul.msk.bf16.gmra.mxu0 %vm361_vm2, %v5452_v49  ;;  %4450 = vmatmul.msk.bf16.gmra.mxu1 %vm361_vm2, %v5415_v7 }
 0x135   : > { %v933_v55 = vadd.f32 %v5329_v56, %v898_v51 }
 0x136   : > { %v1069_v57 = vpop.f32.mrf.mxu3 }
 0x137   : > { %v965_v59 = vmax.f32 %v933_v55, 0.0  ;;  %v1070_v60 = vadd.f32 %v5443_v40, %v1069_v57  ;;  %4536 = vmatmul.msk.bf16.gmra.mxu2 %vm361_vm2, %v5061_v54 }
 0x139   : > { %v1148_v61 = vpack.c.bf16 %v1070_v60, %v1070_v60  ;;  %v987_v62 = vpack.c.bf16 %v965_v59, %v964_v58  ;;  %v478_v1 = vpop.f32.mrf.mxu0  ;;  %v591_v2 = vpop.f32.mrf.mxu1  ;;  %v5506_v60 = vld [vmem:[%s5262_s25 + $0xb8] sm:$0xff] }
 0x13a   : > { %v849_v63 = vpop.f32.mrf.mxu2  ;;  %v592_v7 = vadd.f32 %v591_v2, %v478_v1  ;;  %v5064_v1 = vld [vmem:[%s5262_s25 + $0xc8] sm:$0xff] }
 0x13b   : > { %1181 = vst.msk [vmem:[%s5449_s27 + $0x4] sm:$0xf] %vm1179_vm4, %v1148_v61  ;;  %4343 = vmatmul.msk.bf16.gmra.mxu3 %vm1009_vm3, %v987_v62  ;;  %v899_v5 = vadd.f32 %v849_v63, %v590_v0 }
 0x13d   : > { %v934_v11 = vadd.f32 %v5329_v56, %v899_v5 }
 0x13e   : > { %v1072_v4 = vpop.f32.mrf.mxu3 }
 0x13f   : > { %v1073_v6 = vadd.f32 %v5443_v40, %v1072_v4  ;;  %v966_v18 = vmax.f32 %v934_v11, 0.0 }
 0x141   : > { %v1149_v8 = vpack.c.bf16 %v1073_v6, %v1073_v6  ;;  %v481_v13 = vpop.f32.mrf.mxu0  ;;  %v594_v14 = vpop.f32.mrf.mxu1 }
 0x142   : > { %v851_v3 = vpop.f32.mrf.mxu2  ;;  %v595_v24 = vadd.f32 %v594_v14, %v481_v13 }
 0x143   : > { %1182 = vst.msk [vmem:[%s5449_s27 + $0x8] sm:$0xf] %vm1179_vm4, %v1149_v8  ;;  %v900_v12 = vadd.f32 %v851_v3, %v592_v7 }
 0x144   : > { %4423 = vmatmul.msk.bf16.gmra.mxu0 %vm361_vm2, %v5470_v9  ;;  %4451 = vmatmul.msk.bf16.gmra.mxu1 %vm361_vm2, %v5427_v25 }
 0x145   : > { %v935_v16 = vadd.f32 %v5329_v56, %v900_v12 }
 0x146   : > { %v1074_v17 = vpop.f32.mrf.mxu3 }
 0x147   : > { %v967_v19 = vmax.f32 %v935_v16, 0.0  ;;  %v1075_v20 = vadd.f32 %v5443_v40, %v1074_v17  ;;  %4537 = vmatmul.msk.bf16.gmra.mxu2 %vm361_vm2, %v5062_v15 }
 0x149   : > { %v1150_v21 = vpack.c.bf16 %v1075_v20, %v1075_v20  ;;  %v988_v22 = vpack.c.bf16 %v967_v19, %v966_v18  ;;  %v483_v26 = vpop.f32.mrf.mxu0  ;;  %v596_v27 = vpop.f32.mrf.mxu1  ;;  %v5524_v20 = vld [vmem:[%s5262_s25 + $0xc0] sm:$0xff] }
 0x14a   : > { %v854_v23 = vpop.f32.mrf.mxu2  ;;  %v597_v30 = vadd.f32 %v596_v27, %v483_v26  ;;  %v5065_v26 = vld [vmem:[%s5262_s25 + $0xd0] sm:$0xff] }
 0x14b   : > { %1183 = vst.msk [vmem:[%s5449_s27 + $0xc] sm:$0xf] %vm1179_vm4, %v1150_v21  ;;  %4344 = vmatmul.msk.bf16.gmra.mxu3 %vm1009_vm3, %v988_v22  ;;  %v901_v28 = vadd.f32 %v854_v23, %v595_v24 }
 0x14d   : > { %v936_v34 = vadd.f32 %v5329_v56, %v901_v28 }
 0x14e   : > { %v1077_v25 = vpop.f32.mrf.mxu3 }
 0x14f   : > { %v1078_v29 = vadd.f32 %v5443_v40, %v1077_v25  ;;  %v968_v42 = vmax.f32 %v936_v34, 0.0 }
 0x151   : > { %v1151_v31 = vpack.c.bf16 %v1078_v29, %v1078_v29  ;;  %v486_v36 = vpop.f32.mrf.mxu0  ;;  %v599_v37 = vpop.f32.mrf.mxu1 }
 0x152   : > { %v856_v32 = vpop.f32.mrf.mxu2  ;;  %v600_v51 = vadd.f32 %v599_v37, %v486_v36 }
 0x153   : > { %1184 = vst.msk [vmem:[%s5449_s27 + $0x10] sm:$0xf] %vm1179_vm4, %v1151_v31  ;;  %v902_v35 = vadd.f32 %v856_v32, %v597_v30 }
 0x154   : > { %4424 = vmatmul.msk.bf16.gmra.mxu0 %vm361_vm2, %v5488_v33  ;;  %4452 = vmatmul.msk.bf16.gmra.mxu1 %vm361_vm2, %v5452_v49 }
 0x155   : > { %v937_v39 = vadd.f32 %v5329_v56, %v902_v35 }
 0x156   : > { %v1079_v41 = vpop.f32.mrf.mxu3 }
 0x157   : > { %v969_v43 = vmax.f32 %v937_v39, 0.0  ;;  %v1080_v45 = vadd.f32 %v5443_v40, %v1079_v41  ;;  %4538 = vmatmul.msk.bf16.gmra.mxu2 %vm361_vm2, %v5063_v38 }
 0x159   : > { %v1152_v47 = vpack.c.bf16 %v1080_v45, %v1080_v45  ;;  %v989_v48 = vpack.c.bf16 %v969_v43, %v968_v42  ;;  %v488_v52 = vpop.f32.mrf.mxu0  ;;  %v601_v53 = vpop.f32.mrf.mxu1  ;;  %v5542_v45 = vld [vmem:[%s5262_s25 + $0xc8] sm:$0xff] }
 0x15a   : > { %v859_v50 = vpop.f32.mrf.mxu2  ;;  %v602_v57 = vadd.f32 %v601_v53, %v488_v52  ;;  %v5066_v52 = vld [vmem:[%s5262_s25 + $0xd8] sm:$0xff] }
 0x15b   : > { %1185 = vst.msk [vmem:[%s5449_s27 + $0x14] sm:$0xf] %vm1179_vm4, %v1152_v47  ;;  %4345 = vmatmul.msk.bf16.gmra.mxu3 %vm1009_vm3, %v989_v48  ;;  %v903_v54 = vadd.f32 %v859_v50, %v600_v51 }
 0x15d   : > { %v938_v61 = vadd.f32 %v5329_v56, %v903_v54 }
 0x15e   : > { %v1082_v49 = vpop.f32.mrf.mxu3 }
 0x15f   : > { %v1083_v55 = vadd.f32 %v5443_v40, %v1082_v49  ;;  %v970_v5 = vmax.f32 %v938_v61, 0.0 }
 0x161   : > { %v1153_v58 = vpack.c.bf16 %v1083_v55, %v1083_v55  ;;  %v491_v63 = vpop.f32.mrf.mxu0  ;;  %v604_v0 = vpop.f32.mrf.mxu1 }
 0x162   : > { %v861_v59 = vpop.f32.mrf.mxu2  ;;  %v605_v12 = vadd.f32 %v604_v0, %v491_v63 }
 0x163   : > { %1186 = vst.msk [vmem:[%s5449_s27 + $0x18] sm:$0xf] %vm1179_vm4, %v1153_v58  ;;  %v904_v62 = vadd.f32 %v861_v59, %v602_v57 }
 0x164   : > { %4425 = vmatmul.msk.bf16.gmra.mxu0 %vm361_vm2, %v5506_v60  ;;  %4453 = vmatmul.msk.bf16.gmra.mxu1 %vm361_vm2, %v5470_v9 }
 0x165   : > { %v939_v2 = vadd.f32 %v5329_v56, %v904_v62 }
 0x166   : > { %v1084_v4 = vpop.f32.mrf.mxu3 }
 0x167   : > { %v971_v6 = vmax.f32 %v939_v2, 0.0  ;;  %v1085_v7 = vadd.f32 %v5443_v40, %v1084_v4  ;;  %4539 = vmatmul.msk.bf16.gmra.mxu2 %vm361_vm2, %v5064_v1 }
 0x169   : > { %v990_v8 = vpack.c.bf16 %v971_v6, %v970_v5  ;;  %v1154_v3 = vpack.c.bf16 %v1085_v7, %v1085_v7  ;;  %v493_v13 = vpop.f32.mrf.mxu0  ;;  %v606_v14 = vpop.f32.mrf.mxu1  ;;  %v5560_v7 = vld [vmem:[%s5262_s25 + $0xd0] sm:$0xff] }
 0x16a   : > { %v864_v11 = vpop.f32.mrf.mxu2  ;;  %v607_v17 = vadd.f32 %v606_v14, %v493_v13  ;;  %v5067_v13 = vld [vmem:[%s5262_s25 + $0xe0] sm:$0xff] }
 0x16b   : > { %1187 = vst.msk [vmem:[%s5449_s27 + $0x1c] sm:$0xf] %vm1179_vm4, %v1154_v3  ;;  %4346 = vmatmul.msk.bf16.gmra.mxu3 %vm1009_vm3, %v990_v8  ;;  %v905_v15 = vadd.f32 %v864_v11, %v605_v12 }
 0x16d   : > { %v940_v21 = vadd.f32 %v5329_v56, %v905_v15 }
 0x16e   : > { %v1087_v9 = vpop.f32.mrf.mxu3 }
 0x16f   : > { %v1088_v16 = vadd.f32 %v5443_v40, %v1087_v9  ;;  %v972_v28 = vmax.f32 %v940_v21, 0.0 }
 0x171   : > { %v1155_v18 = vpack.c.bf16 %v1088_v16, %v1088_v16  ;;  %v496_v23 = vpop.f32.mrf.mxu0  ;;  %v609_v24 = vpop.f32.mrf.mxu1 }
 0x172   : > { %v866_v19 = vpop.f32.mrf.mxu2  ;;  %v610_v35 = vadd.f32 %v609_v24, %v496_v23 }
 0x173   : > { %1188 = vst.msk [vmem:[%s5449_s27 + $0x20] sm:$0xf] %vm1179_vm4, %v1155_v18  ;;  %v906_v22 = vadd.f32 %v866_v19, %v607_v17 }
 0x174   : > { %4426 = vmatmul.msk.bf16.gmra.mxu0 %vm361_vm2, %v5524_v20  ;;  %4454 = vmatmul.msk.bf16.gmra.mxu1 %vm361_vm2, %v5488_v33 }
 0x175   : > { %v941_v27 = vadd.f32 %v5329_v56, %v906_v22 }
 0x176   : > { %v1089_v25 = vpop.f32.mrf.mxu3 }
 0x177   : > { %v973_v29 = vmax.f32 %v941_v27, 0.0  ;;  %v1090_v30 = vadd.f32 %v5443_v40, %v1089_v25  ;;  %4540 = vmatmul.msk.bf16.gmra.mxu2 %vm361_vm2, %v5065_v26 }
 0x179   : > { %v991_v31 = vpack.c.bf16 %v973_v29, %v972_v28  ;;  %v1156_v32 = vpack.c.bf16 %v1090_v30, %v1090_v30  ;;  %v498_v36 = vpop.f32.mrf.mxu0  ;;  %v611_v37 = vpop.f32.mrf.mxu1  ;;  %v5578_v30 = vld [vmem:[%s5262_s25 + $0xd8] sm:$0xff] }
 0x17a   : > { %v869_v34 = vpop.f32.mrf.mxu2  ;;  %v612_v41 = vadd.f32 %v611_v37, %v498_v36  ;;  %v5068_v36 = vld [vmem:[%s5262_s25 + $0xe8] sm:$0xff] }
 0x17b   : > { %1189 = vst.msk [vmem:[%s5449_s27 + $0x24] sm:$0xf] %vm1179_vm4, %v1156_v32  ;;  %4347 = vmatmul.msk.bf16.gmra.mxu3 %vm1009_vm3, %v991_v31  ;;  %v907_v38 = vadd.f32 %v869_v34, %v610_v35 }
 0x17d   : > { %v942_v47 = vadd.f32 %v5329_v56, %v907_v38 }
 0x17e   : > { %v1092_v33 = vpop.f32.mrf.mxu3 }
 0x17f   : > { %v1093_v39 = vadd.f32 %v5443_v40, %v1092_v33  ;;  %v974_v54 = vmax.f32 %v942_v47, 0.0 }
 0x181   : > { %v1157_v42 = vpack.c.bf16 %v1093_v39, %v1093_v39  ;;  %v501_v50 = vpop.f32.mrf.mxu0  ;;  %v614_v51 = vpop.f32.mrf.mxu1 }
 0x182   : > { %v871_v43 = vpop.f32.mrf.mxu2  ;;  %v615_v62 = vadd.f32 %v614_v51, %v501_v50 }
 0x183   : > { %1190 = vst.msk [vmem:[%s5449_s27 + $0x28] sm:$0xf] %vm1179_vm4, %v1157_v42  ;;  %v908_v48 = vadd.f32 %v871_v43, %v612_v41 }
 0x184   : > { %4427 = vmatmul.msk.bf16.gmra.mxu0 %vm361_vm2, %v5542_v45  ;;  %4455 = vmatmul.msk.bf16.gmra.mxu1 %vm361_vm2, %v5506_v60 }
 0x185   : > { %v943_v53 = vadd.f32 %v5329_v56, %v908_v48 }
 0x186   : > { %v1094_v49 = vpop.f32.mrf.mxu3 }
 0x187   : > { %v975_v55 = vmax.f32 %v943_v53, 0.0  ;;  %v1095_v57 = vadd.f32 %v5443_v40, %v1094_v49  ;;  %4541 = vmatmul.msk.bf16.gmra.mxu2 %vm361_vm2, %v5066_v52 }
 0x189   : > { %v992_v58 = vpack.c.bf16 %v975_v55, %v974_v54  ;;  %v1158_v59 = vpack.c.bf16 %v1095_v57, %v1095_v57  ;;  %v503_v63 = vpop.f32.mrf.mxu0  ;;  %v616_v0 = vpop.f32.mrf.mxu1  ;;  %v5598_v57 = vld [vmem:[%s5262_s25 + $0xe0] sm:$0xff] }
 0x18a   : > { %v874_v61 = vpop.f32.mrf.mxu2  ;;  %v617_v4 = vadd.f32 %v616_v0, %v503_v63 }
 0x18b   : > { %1191 = vst.msk [vmem:[%s5449_s27 + $0x2c] sm:$0xf] %vm1179_vm4, %v1158_v59  ;;  %4348 = vmatmul.msk.bf16.gmra.mxu3 %vm1009_vm3, %v992_v58  ;;  %v909_v1 = vadd.f32 %v874_v61, %v615_v62 }
 0x18d   : > { %v944_v8 = vadd.f32 %v5329_v56, %v909_v1 }
 0x18e   : > { %v1097_v60 = vpop.f32.mrf.mxu3 }
 0x18f   : > { %v1098_v2 = vadd.f32 %v5443_v40, %v1097_v60  ;;  %v976_v15 = vmax.f32 %v944_v8, 0.0 }
 0x191   : > { %v1159_v5 = vpack.c.bf16 %v1098_v2, %v1098_v2  ;;  %v1397_v11 = vpop.f32.mrf.mxu0  ;;  %v1510_v12 = vpop.f32.mrf.mxu1 }
 0x192   : > { %v876_v6 = vpop.f32.mrf.mxu2  ;;  %v1511_v22 = vadd.f32 %v1510_v12, %v1397_v11 }
 0x193   : > { %1192 = vst.msk [vmem:[%s5449_s27 + $0x30] sm:$0xf] %vm1179_vm4, %v1159_v5  ;;  %v910_v3 = vadd.f32 %v876_v6, %v617_v4 }
 0x194   : > { %4428 = vmatmul.msk.bf16.gmra.mxu0 %vm361_vm2, %v5560_v7  ;;  %4456 = vmatmul.msk.bf16.gmra.mxu1 %vm361_vm2, %v5524_v20 }
 0x195   : > { %v945_v14 = vadd.f32 %v5329_v56, %v910_v3 }
 0x196   : > { %v1099_v9 = vpop.f32.mrf.mxu3 }
 0x197   : > { %v977_v16 = vmax.f32 %v945_v14, 0.0  ;;  %v1100_v17 = vadd.f32 %v5443_v40, %v1099_v9  ;;  %4542 = vmatmul.msk.bf16.gmra.mxu2 %vm361_vm2, %v5067_v13 }
 0x199   : > { %v993_v18 = vpack.c.bf16 %v977_v16, %v976_v15  ;;  %v1160_v19 = vpack.c.bf16 %v1100_v17, %v1100_v17  ;;  %v1399_v23 = vpop.f32.mrf.mxu0  ;;  %v1512_v24 = vpop.f32.mrf.mxu1  ;;  %v5616_v15 = vld [vmem:[%s5262_s25 + $0xe8] sm:$0xff] }
 0x19a   : > { %v1769_v21 = vpop.f32.mrf.mxu2  ;;  %v1513_v25 = vadd.f32 %v1512_v24, %v1399_v23 }
 0x19b   : > { %1193 = vst.msk [vmem:[%s5449_s27 + $0x34] sm:$0xf] %vm1179_vm4, %v1160_v19  ;;  %4349 = vmatmul.msk.bf16.gmra.mxu3 %vm1009_vm3, %v993_v18  ;;  %v1849_v26 = vadd.f32 %v1769_v21, %v1511_v22  ;;  %v5070_v21 = vld [vmem:[%s5262_s25 + $0xf8] sm:$0xff] }
 0x19d   : > { %v1881_v31 = vadd.f32 %v5329_v56, %v1849_v26 }
 0x19e   : > { %v1102_v20 = vpop.f32.mrf.mxu3 }
 0x19f   : > { %v1103_v27 = vadd.f32 %v5443_v40, %v1102_v20  ;;  %v1913_v38 = vmax.f32 %v1881_v31, 0.0 }
 0x1a1   : > { %v1161_v28 = vpack.c.bf16 %v1103_v27, %v1103_v27  ;;  %v1402_v34 = vpop.f32.mrf.mxu0  ;;  %v1515_v35 = vpop.f32.mrf.mxu1 }
 0x1a2   : > { %v1771_v29 = vpop.f32.mrf.mxu2  ;;  %v1516_v48 = vadd.f32 %v1515_v35, %v1402_v34 }
 0x1a3   : > { %1194 = vst.msk [vmem:[%s5449_s27 + $0x38] sm:$0xf] %vm1179_vm4, %v1161_v28  ;;  %v1850_v32 = vadd.f32 %v1771_v29, %v1513_v25 }
 0x1a4   : > { %4429 = vmatmul.msk.bf16.gmra.mxu0 %vm361_vm2, %v5578_v30  ;;  %4457 = vmatmul.msk.bf16.gmra.mxu1 %vm361_vm2, %v5542_v45 }
 0x1a5   : > { %v1882_v37 = vadd.f32 %v5329_v56, %v1850_v32 }
 0x1a6   : > { %v1104_v33 = vpop.f32.mrf.mxu3 }
 0x1a7   : > { %v1914_v39 = vmax.f32 %v1882_v37, 0.0  ;;  %v1105_v41 = vadd.f32 %v5443_v40, %v1104_v33  ;;  %4543 = vmatmul.msk.bf16.gmra.mxu2 %vm361_vm2, %v5068_v36  ;;  %v5634_v33 = vld [vmem:[%s5262_s25 + $0xf0] sm:$0xff] }
 0x1a9   : > { %v1945_v42 = vpack.c.bf16 %v1914_v39, %v1913_v38  ;;  %v1162_v43 = vpack.c.bf16 %v1105_v41, %v1105_v41  ;;  %v1404_v50 = vpop.f32.mrf.mxu0  ;;  %v1517_v51 = vpop.f32.mrf.mxu1  ;;  %v5639_v38 = vld [vmem:[%s6453_s2] ss:$0 sm:$0xff] }
 0x1aa   : > { %v1774_v47 = vpop.f32.mrf.mxu2  ;;  %v1518_v49 = vadd.f32 %v1517_v51, %v1404_v50 }
 0x1ab   : > { %1195 = vst.msk [vmem:[%s5449_s27 + $0x3c] sm:$0xf] %vm1179_vm4, %v1162_v43  ;;  %4550 = vmatmul.msk.bf16.vlgmr.msrb.gmra.mxu3 %vm1009_vm3, %v1945_v42  ;;  %v1851_v52 = vadd.f32 %v1774_v47, %v1516_v48  ;;  %v5071_v47 = vld [vmem:[%s5262_s25 + $0x100] sm:$0xff] }
 0x1ac   : > { %3915 = vmatpush.bf16.msrb.mxu3 %v5306_v44  ;;  %v5069_v44 = vld [vmem:[%s5262_s25 + $0xf0] sm:$0xff] }
 0x1ad   : > { %v1883_v58 = vadd.f32 %v5329_v56, %v1851_v52 }
 0x1ae   : > { %v1107_v45 = vpop.f32.mrf.mxu3 }
 0x1af   : > { %v1108_v53 = vadd.f32 %v5443_v40, %v1107_v45 }
 0x1b0   : > { %3916 = vmatpush.bf16.msrb.mxu3 %v5315_v46  ;;  %v1915_v46 = vmax.f32 %v1883_v58, 0.0 }
 0x1b1   : > { %v1163_v54 = vpack.c.bf16 %v1108_v53, %v1108_v53  ;;  %v1407_v61 = vpop.f32.mrf.mxu0  ;;  %v1520_v62 = vpop.f32.mrf.mxu1 }
 0x1b2   : > { %v1776_v55 = vpop.f32.mrf.mxu2  ;;  %v1521_v6 = vadd.f32 %v1520_v62, %v1407_v61 }
 0x1b3   : > { %1196 = vst.msk [vmem:[%s5449_s27 + $0x40] sm:$0xf] %vm1179_vm4, %v1163_v54  ;;  %v1852_v59 = vadd.f32 %v1776_v55, %v1518_v49 }
 0x1b4   : > { %4430 = vmatmul.msk.bf16.gmra.mxu0 %vm361_vm2, %v5598_v57  ;;  %4458 = vmatmul.msk.bf16.gmra.mxu1 %vm361_vm2, %v5560_v7 }
 0x1b5   : > { %v1884_v63 = vadd.f32 %v5329_v56, %v1852_v59 }
 0x1b6   : > { %v1109_v0 = vpop.f32.mrf.mxu3 }
 0x1b7   : > { %v1916_v60 = vmax.f32 %v1884_v63, 0.0  ;;  %v1110_v1 = vadd.f32 %v5443_v40, %v1109_v0  ;;  %4544 = vmatmul.msk.bf16.gmra.mxu2 %vm361_vm2, %v5069_v44 }
 0x1b9   : > { %v1946_v2 = vpack.c.bf16 %v1916_v60, %v1915_v46  ;;  %v1164_v4 = vpack.c.bf16 %v1110_v1, %v1110_v1  ;;  %v1409_v8 = vpop.f32.mrf.mxu0  ;;  %v1522_v3 = vpop.f32.mrf.mxu1  ;;  %v5657_v46 = vld [vmem:[%s5262_s25 + $0xf8] sm:$0xff] }
 0x1ba   : > { %v1779_v5 = vpop.f32.mrf.mxu2  ;;  %v1523_v13 = vadd.f32 %v1522_v3, %v1409_v8 }
 0x1bb   : > { %1197 = vst.msk [vmem:[%s5449_s27 + $0x44] sm:$0xf] %vm1179_vm4, %v1164_v4  ;;  %4551 = vmatmul.msk.bf16.gmra.mxu3 %vm1009_vm3, %v1946_v2  ;;  %v1853_v11 = vadd.f32 %v1779_v5, %v1521_v6  ;;  %v5072_v5 = vld [vmem:[%s5262_s25 + $0x108] sm:$0xff] }
 0x1bd   : > { %v1885_v16 = vadd.f32 %v5329_v56, %v1853_v11 }
 0x1be   : > { %v1112_v7 = vpop.f32.mrf.mxu3 }
 0x1bf   : > { %v1113_v12 = vadd.f32 %v5443_v40, %v1112_v7  ;;  %v1917_v24 = vmax.f32 %v1885_v16, 0.0 }
 0x1c1   : > { %v1165_v14 = vpack.c.bf16 %v1113_v12, %v1113_v12  ;;  %v1412_v18 = vpop.f32.mrf.mxu0  ;;  %v1525_v19 = vpop.f32.mrf.mxu1 }
 0x1c2   : > { %v1781_v9 = vpop.f32.mrf.mxu2  ;;  %v1526_v29 = vadd.f32 %v1525_v19, %v1412_v18 }
 0x1c3   : > { %1198 = vst.msk [vmem:[%s5449_s27 + $0x48] sm:$0xf] %vm1179_vm4, %v1165_v14  ;;  %v1854_v17 = vadd.f32 %v1781_v9, %v1523_v13 }
 0x1c4   : > { %4431 = vmatmul.msk.bf16.gmra.mxu0 %vm361_vm2, %v5616_v15  ;;  %4459 = vmatmul.msk.bf16.gmra.mxu1 %vm361_vm2, %v5578_v30 }
 0x1c5   : > { %v1886_v22 = vadd.f32 %v5329_v56, %v1854_v17 }
 0x1c6   : > { %v1114_v23 = vpop.f32.mrf.mxu3 }
 0x1c7   : > { %v1918_v20 = vmax.f32 %v1886_v22, 0.0  ;;  %v1115_v26 = vadd.f32 %v5443_v40, %v1114_v23  ;;  %4545 = vmatmul.msk.bf16.gmra.mxu2 %vm361_vm2, %v5070_v21 }
 0x1c9   : > { %v1947_v27 = vpack.c.bf16 %v1918_v20, %v1917_v24  ;;  %v1166_v25 = vpack.c.bf16 %v1115_v26, %v1115_v26  ;;  %v1414_v56 = vpop.f32.mrf.mxu0  ;;  %v1527_v31 = vpop.f32.mrf.mxu1  ;;  %v5056_v24 = vld [vmem:[%s5262_s25 + $0x100] sm:$0xff] }
 0x1ca   : > { %v1784_v28 = vpop.f32.mrf.mxu2  ;;  %v1528_v35 = vadd.f32 %v1527_v31, %v1414_v56 }
 0x1cb   : > { %1199 = vst.msk [vmem:[%s5449_s27 + $0x4c] sm:$0xf] %vm1179_vm4, %v1166_v25  ;;  %4552 = vmatmul.msk.bf16.gmra.mxu3 %vm1009_vm3, %v1947_v27  ;;  %v1855_v32 = vadd.f32 %v1784_v28, %v1526_v29  ;;  %v5073_v28 = vld [vmem:[%s5262_s25 + $0x110] sm:$0xff] }
 0x1cd   : > { %v1887_v39 = vadd.f32 %v5639_v38, %v1855_v32 }
 0x1ce   : > { %v1117_v30 = vpop.f32.mrf.mxu3 }
 0x1cf   : > { %v1118_v34 = vadd.f32 %v5443_v40, %v1117_v30  ;;  %v1919_v51 = vmax.f32 %v1887_v39, 0.0 }
 0x1d1   : > { %v1167_v36 = vpack.c.bf16 %v1118_v34, %v1118_v34  ;;  %v1417_v42 = vpop.f32.mrf.mxu0  ;;  %v1530_v43 = vpop.f32.mrf.mxu1 }
 0x1d2   : > { %v1786_v37 = vpop.f32.mrf.mxu2  ;;  %v1531_v55 = vadd.f32 %v1530_v43, %v1417_v42  ;;  %v5149_v42 = vld [vmem:[%s6452_s1 + $0x10] sm:$0x10] }
 0x1d3   : > { %1200 = vst.msk [vmem:[%s5449_s27 + $0x50] sm:$0xf] %vm1179_vm4, %v1167_v36  ;;  %v1856_v41 = vadd.f32 %v1786_v37, %v1528_v35 }
 0x1d4   : > { %4432 = vmatmul.msk.bf16.gmra.mxu0 %vm361_vm2, %v5634_v33  ;;  %4460 = vmatmul.msk.bf16.gmra.mxu1 %vm361_vm2, %v5598_v57 }
 0x1d5   : > { %v1888_v48 = vadd.f32 %v5639_v38, %v1856_v41 }
 0x1d6   : > { %v1119_v50 = vpop.f32.mrf.mxu3 }
 0x1d7   : > { %v1920_v45 = vmax.f32 %v1888_v48, 0.0  ;;  %v1120_v52 = vadd.f32 %v5443_v40, %v1119_v50  ;;  %4546 = vmatmul.msk.bf16.gmra.mxu2 %vm361_vm2, %v5071_v47 }
 0x1d9   : > { %v1948_v53 = vpack.c.bf16 %v1920_v45, %v1919_v51  ;;  %v1168_v49 = vpack.c.bf16 %v1120_v52, %v1120_v52  ;;  %v1419_v58 = vpop.f32.mrf.mxu0  ;;  %v1532_v59 = vpop.f32.mrf.mxu1  ;;  %v4850_v45 = vld [vmem:[%s6452_s1 + $0x8] sm:$0xf]  ;;  %v5132_v52 = vld [vmem:[%s6452_s1 + $0x8] sm:$0x10] }
 0x1da   : > { %v1789_v54 = vpop.f32.mrf.mxu2  ;;  %v1533_v44 = vadd.f32 %v1532_v59, %v1419_v58 }
 0x1db   : > { %1201 = vst.msk [vmem:[%s5449_s27 + $0x54] sm:$0xf] %vm1179_vm4, %v1168_v49  ;;  %4553 = vmatmul.msk.bf16.gmra.mxu3 %vm1009_vm3, %v1948_v53  ;;  %v1857_v61 = vadd.f32 %v1789_v54, %v1531_v55  ;;  %v4851_v53 = vor.u32 %v5132_v52, %v4850_v45  ;;  %v4878_v49 = vld [vmem:[%s6452_s1] sm:$0xf]  ;;  %v5129_v54 = vld [vmem:[%s6452_s1] sm:$0x10] }
 0x1dc   : > { %v4879_v59 = vor.u32 %v5129_v54, %v4878_v49 }
 0x1dd   : > { %v1889_v60 = vadd.f32 %v5639_v38, %v1857_v61  ;;  %v5057_v61 = vld [vmem:[%s5262_s25 + $0x108] sm:$0xff] }
 0x1de   : > { %v1122_v57 = vpop.f32.mrf.mxu3 }
 0x1df   : > { %v1123_v62 = vadd.f32 %v5443_v40, %v1122_v57  ;;  %v1921_v3 = vmax.f32 %v1889_v60, 0.0 }
 0x1e1   : > { %v1169_v63 = vpack.c.bf16 %v1123_v62, %v1123_v62  ;;  %v1422_v2 = vpop.f32.mrf.mxu0  ;;  %v1535_v4 = vpop.f32.mrf.mxu1  ;;  %v3286_v62 = vand.u32 %v4851_v53, %v5234_v10  ;;  %v5097_v53 = vld [vmem:[%s5262_s25 + $0x128] sm:$0xff] }
 0x1e2   : > { %v1791_v0 = vpop.f32.mrf.mxu2  ;;  %v1536_v9 = vadd.f32 %v1535_v4, %v1422_v2  ;;  %v3399_v2 = vand.u32 %v4879_v59, %v5234_v10 }
 0x1e3   : > { %1202 = vst.msk [vmem:[%s5449_s27 + $0x58] sm:$0xf] %vm1179_vm4, %v1169_v63  ;;  %v1858_v1 = vadd.f32 %v1791_v0, %v1533_v44  ;;  %3295 = vmatpush.bf16.msrb.mxu0 %v3286_v62 }
 0x1e4   : > { %4433 = vmatmul.msk.bf16.gmra.mxu0 %vm361_vm2, %v5657_v46  ;;  %4461 = vmatmul.msk.bf16.gmra.mxu1 %vm361_vm2, %v5616_v15 }
 0x1e5   : > { %v1890_v6 = vadd.f32 %v5639_v38, %v1858_v1  ;;  %v5074_v1 = vld [vmem:[%s5262_s25 + $0x118] sm:$0xff]  ;;  %3408 = vmatpush.bf16.msrb.mxu1 %v3399_v2 }
 0x1e6   : > { %v1124_v8 = vpop.f32.mrf.mxu3 }
 0x1e7   : > { %v1922_v7 = vmax.f32 %v1890_v6, 0.0  ;;  %v1125_v11 = vadd.f32 %v5443_v40, %v1124_v8  ;;  %4547 = vmatmul.msk.bf16.gmra.mxu2 %vm361_vm2, %v5072_v5 }
 0x1e9   : > { %v1949_v12 = vpack.c.bf16 %v1922_v7, %v1921_v3  ;;  %v1170_v13 = vpack.c.bf16 %v1125_v11, %v1125_v11  ;;  %v1424_v16 = vpop.f32.mrf.mxu0  ;;  %v1537_v17 = vpop.f32.mrf.mxu1 }
 0x1ea   : > { %v1794_v14 = vpop.f32.mrf.mxu2  ;;  %v1538_v21 = vadd.f32 %v1537_v17, %v1424_v16 }
 0x1eb   : > { %1203 = vst.msk [vmem:[%s5449_s27 + $0x5c] sm:$0xf] %vm1179_vm4, %v1170_v13  ;;  %4554 = vmatmul.msk.bf16.gmra.mxu3 %vm1009_vm3, %v1949_v12  ;;  %v1859_v18 = vadd.f32 %v1794_v14, %v1536_v9 }
 0x1ed   : > { %v1891_v20 = vadd.f32 %v5639_v38, %v1859_v18 }
 0x1ee   : > { %v1127_v15 = vpop.f32.mrf.mxu3 }
 0x1ef   : > { %v1128_v19 = vadd.f32 %v5443_v40, %v1127_v15  ;;  %v1923_v31 = vmax.f32 %v1891_v20, 0.0 }
 0x1f1   : > { %v1171_v22 = vpack.c.bf16 %v1128_v19, %v1128_v19  ;;  %v1427_v27 = vpop.f32.mrf.mxu0  ;;  %v1540_v25 = vpop.f32.mrf.mxu1  ;;  %v5726_v19 = vld [vmem:[%s5262_s25 + $0x110] sm:$0xff] }
 0x1f2   : > { %v1796_v23 = vpop.f32.mrf.mxu2  ;;  %v1541_v37 = vadd.f32 %v1540_v25, %v1427_v27 }
 0x1f3   : > { %1204 = vst.msk [vmem:[%s5449_s27 + $0x60] sm:$0xf] %vm1179_vm4, %v1171_v22  ;;  %v1860_v26 = vadd.f32 %v1796_v23, %v1538_v21  ;;  %v5076_v21 = vld [vmem:[%s5262_s25 + $0x100] sm:$0xff] }
 0x1f4   : > { %4434 = vmatmul.msk.bf16.gmra.mxu0 %vm361_vm2, %v5056_v24  ;;  %4462 = vmatmul.msk.bf16.gmra.mxu1 %vm361_vm2, %v5634_v33  ;;  %v4964_v33 = vld [vmem:[%s6452_s1 + $0x10] sm:$0xf] }
 0x1f5   : > { %v1892_v29 = vadd.f32 %v5639_v38, %v1860_v26  ;;  %v4965_v43 = vor.u32 %v5149_v42, %v4964_v33  ;;  %v5096_v26 = vld [vmem:[%s5262_s25 + $0x120] sm:$0xff] }
 0x1f6   : > { %v1129_v56 = vpop.f32.mrf.mxu3 }
 0x1f7   : > { %v1924_v30 = vmax.f32 %v1892_v29, 0.0  ;;  %v1130_v32 = vadd.f32 %v5443_v40, %v1129_v56  ;;  %4548 = vmatmul.msk.bf16.gmra.mxu2 %vm361_vm2, %v5073_v28  ;;  %v3658_v48 = vand.u32 %v4965_v43, %v5234_v10 }
 0x1f9   : > { %v1950_v34 = vpack.c.bf16 %v1924_v30, %v1923_v31  ;;  %v1172_v35 = vpack.c.bf16 %v1130_v32, %v1130_v32  ;;  %v1429_v39 = vpop.f32.mrf.mxu0  ;;  %v1542_v41 = vpop.f32.mrf.mxu1  ;;  %3667 = vmatpush.bf16.msrb.mxu2 %v3658_v48  ;;  %v5077_v48 = vld [vmem:[%s5262_s25 + $0x108] sm:$0xff] }
 0x1fa   : > { %v1799_v36 = vpop.f32.mrf.mxu2  ;;  %v1543_v55 = vadd.f32 %v1542_v41, %v1429_v39 }
 0x1fb   : > { %1205 = vst.msk [vmem:[%s5449_s27 + $0x64] sm:$0xf] %vm1179_vm4, %v1172_v35  ;;  %4555 = vmatmul.msk.bf16.gmra.mxu3 %vm1009_vm3, %v1950_v34  ;;  %v1861_v50 = vadd.f32 %v1799_v36, %v1541_v37 }
 0x1fd   : > { %v1893_v44 = vadd.f32 %v5639_v38, %v1861_v50 }
 0x1fe   : > { %v1132_v47 = vpop.f32.mrf.mxu3 }
 0x1ff   : > { %v1133_v51 = vadd.f32 %v5443_v40, %v1132_v47  ;;  %v1925_v6 = vmax.f32 %v1893_v44, 0.0  ;;  %v5744_v47 = vld [vmem:[%s5262_s25 + $0x118] sm:$0xff] }
 0x201   : > { %v1173_v58 = vpack.c.bf16 %v1133_v51, %v1133_v51  ;;  %v1432_v0 = vpop.f32.mrf.mxu0  ;;  %v1545_v60 = vpop.f32.mrf.mxu1 }
 0x202   : > { %v1801_v57 = vpop.f32.mrf.mxu2  ;;  %v1546_v12 = vadd.f32 %v1545_v60, %v1432_v0 }
 0x203   : > { %1206 = vst.msk [vmem:[%s5449_s27 + $0x68] sm:$0xf] %vm1179_vm4, %v1173_v58  ;;  %v1862_v63 = vadd.f32 %v1801_v57, %v1543_v55 }
 0x204   : > { %4435 = vmatmul.msk.bf16.gmra.mxu0 %vm361_vm2, %v5057_v61  ;;  %4463 = vmatmul.msk.bf16.gmra.mxu1 %vm361_vm2, %v5657_v46 }
 0x205   : > { %v1894_v4 = vadd.f32 %v5639_v38, %v1862_v63 }
 0x206   : > { %v1134_v5 = vpop.f32.mrf.mxu3 }
 0x207   : > { %v1926_v8 = vmax.f32 %v1894_v4, 0.0  ;;  %v1135_v3 = vadd.f32 %v5443_v40, %v1134_v5  ;;  %4549 = vmatmul.msk.bf16.gmra.mxu2 %vm361_vm2, %v5074_v1 }
 0x209   : > { %v1951_v7 = vpack.c.bf16 %v1926_v8, %v1925_v6  ;;  %v1174_v10 = vpack.c.bf16 %v1135_v3, %v1135_v3  ;;  %v1434_v13 = vpop.f32.mrf.mxu0  ;;  %v1547_v46 = vpop.f32.mrf.mxu1  ;;  %v5762_v8 = vld [vmem:[%s5262_s25 + $0x120] sm:$0xff] }
 0x20a   : > { %v1804_v11 = vpop.f32.mrf.mxu2  ;;  %v1548_v17 = vadd.f32 %v1547_v46, %v1434_v13 }
 0x20b   : > { %1207 = vst.msk [vmem:[%s5449_s27 + $0x6c] sm:$0xf] %vm1179_vm4, %v1174_v10  ;;  %4556 = vmatmul.msk.bf16.gmra.mxu3 %vm1009_vm3, %v1951_v7  ;;  %v1863_v9 = vadd.f32 %v1804_v11, %v1546_v12  ;;  %v5098_v12 = vld [vmem:[%s5262_s25 + $0x130] sm:$0xff] }
 0x20d   : > { %v1895_v22 = vadd.f32 %v5639_v38, %v1863_v9 }
 0x20e   : > { %v1137_v14 = vpop.f32.mrf.mxu3 }
 0x20f   : > { %v1138_v16 = vadd.f32 %v5443_v40, %v1137_v14  ;;  %v1927_v28 = vmax.f32 %v1895_v22, 0.0 }
 0x211   : > { %v1175_v15 = vpack.c.bf16 %v1138_v16, %v1138_v16  ;;  %v1437_v24 = vpop.f32.mrf.mxu0  ;;  %v1550_v20 = vpop.f32.mrf.mxu1 }
 0x212   : > { %v1806_v18 = vpop.f32.mrf.mxu2  ;;  %v1551_v34 = vadd.f32 %v1550_v20, %v1437_v24 }
 0x213   : > { %1208 = vst.msk [vmem:[%s5449_s27 + $0x70] sm:$0xf] %vm1179_vm4, %v1175_v15  ;;  %v1864_v23 = vadd.f32 %v1806_v18, %v1548_v17 }
 0x214   : > { %4636 = vmatmul.msk.bf16.vlgmr.msra.gmra.mxu0 %vm361_vm2, %v5726_v19  ;;  %4664 = vmatmul.msk.bf16.vlgmr.msra.gmra.mxu1 %vm361_vm2, %v5076_v21 }
 0x215   : > { %v1896_v27 = vadd.f32 %v5639_v38, %v1864_v23 }
 0x216   : > { %v1139_v25 = vpop.f32.mrf.mxu3 }
 0x217   : > { %v1928_v29 = vmax.f32 %v1896_v27, 0.0  ;;  %v1140_v56 = vadd.f32 %v5443_v40, %v1139_v25  ;;  %4750 = vmatmul.msk.bf16.vlgmr.msra.gmra.mxu2 %vm361_vm2, %v5096_v26 }
 0x219   : > { %v1952_v31 = vpack.c.bf16 %v1928_v29, %v1927_v28  ;;  %v1176_v30 = vpack.c.bf16 %v1140_v56, %v1140_v56  ;;  %v1439_v35 = vpop.f32.mrf.mxu0  ;;  %v1552_v36 = vpop.f32.mrf.mxu1  ;;  %v5785_v28 = vld [vmem:[%s5262_s25 + $0x128] sm:$0xff] }
 0x21a   : > { %v1809_v32 = vpop.f32.mrf.mxu2  ;;  %v1553_v33 = vadd.f32 %v1552_v36, %v1439_v35 }
 0x21b   : > { %1209 = vst.msk [vmem:[%s5449_s27 + $0x74] sm:$0xf] %vm1179_vm4, %v1176_v30  ;;  %4557 = vmatmul.msk.bf16.gmra.mxu3 %vm1009_vm3, %v1952_v31  ;;  %v1865_v39 = vadd.f32 %v1809_v32, %v1551_v34  ;;  %v5099_v32 = vld [vmem:[%s5262_s25 + $0x138] sm:$0xff] }
 0x21d   : > { %v1897_v50 = vadd.f32 %v5639_v38, %v1865_v39 }
 0x21e   : > { %v1142_v37 = vpop.f32.mrf.mxu3 }
 0x21f   : > { %v1143_v41 = vadd.f32 %v5443_v40, %v1142_v37  ;;  %v1929_v55 = vmax.f32 %v1897_v50, 0.0 }
 0x221   : > { %v1177_v42 = vpack.c.bf16 %v1143_v41, %v1143_v41  ;;  %v1442_v45 = vpop.f32.mrf.mxu0  ;;  %v1555_v52 = vpop.f32.mrf.mxu1 }
 0x222   : > { %v1811_v43 = vpop.f32.mrf.mxu2  ;;  %v1556_v44 = vadd.f32 %v1555_v52, %v1442_v45 }
 0x223   : > { %1210 = vst.msk [vmem:[%s5449_s27 + $0x78] sm:$0xf] %vm1179_vm4, %v1177_v42  ;;  %v1866_v51 = vadd.f32 %v1811_v43, %v1553_v33 }
 0x224   : > { %4637 = vmatmul.msk.bf16.gmra.mxu0 %vm361_vm2, %v5744_v47  ;;  %4665 = vmatmul.msk.bf16.gmra.mxu1 %vm361_vm2, %v5077_v48 }
 0x225   : > { %v1898_v49 = vadd.f32 %v5639_v38, %v1866_v51 }
 0x226   : > { %v1144_v54 = vpop.f32.mrf.mxu3 }
 0x227   : > { %v1930_v58 = vmax.f32 %v1898_v49, 0.0  ;;  %v1145_v59 = vadd.f32 %v5443_v40, %v1144_v54  ;;  %4751 = vmatmul.msk.bf16.gmra.mxu2 %vm361_vm2, %v5097_v53  ;;  %v5803_v54 = vld [vmem:[%s5262_s25 + $0x130] sm:$0xff] }
 0x229   : > { %v1953_v57 = vpack.c.bf16 %v1930_v58, %v1929_v55  ;;  %v1178_v61 = vpack.c.bf16 %v1145_v59, %v1145_v59  ;;  %v1444_v63 = vpop.f32.mrf.mxu0  ;;  %v1557_v0 = vpop.f32.mrf.mxu1 }
 0x22a   : > { %v1814_v62 = vpop.f32.mrf.mxu2  ;;  %v1558_v4 = vadd.f32 %v1557_v0, %v1444_v63 }
 0x22b   : > { %1211 = vst.msk [vmem:[%s5449_s27 + $0x7c] sm:$0xf] %vm1179_vm4, %v1178_v61  ;;  %4558 = vmatmul.msk.bf16.gmra.mxu3 %vm1009_vm3, %v1953_v57  ;;  %v1867_v1 = vadd.f32 %v1814_v62, %v1556_v44  ;;  %v5100_v61 = vld [vmem:[%s5262_s25 + $0x140] sm:$0xff] }
 0x22d   : > { %v1899_v3 = vadd.f32 %v5639_v38, %v1867_v1 }
 0x22e   : > { %v2018_v60 = vpop.f32.mrf.mxu3 }
 0x22f   : > { %v2019_v2 = vadd.f32 %v5443_v40, %v2018_v60  ;;  %v1931_v14 = vmax.f32 %v1899_v3, 0.0 }
 0x231   : > { %v2098_v5 = vpack.c.bf16 %v2019_v2, %v2019_v2  ;;  %v1447_v10 = vpop.f32.mrf.mxu0  ;;  %v1560_v11 = vpop.f32.mrf.mxu1 }
 0x232   : > { %v1816_v6 = vpop.f32.mrf.mxu2  ;;  %v1561_v21 = vadd.f32 %v1560_v11, %v1447_v10 }
 0x233   : > { %2130 = vst.msk [vmem:[%s5449_s27 + $0x80] sm:$0xf] %vm1179_vm4, %v2098_v5  ;;  %v1868_v7 = vadd.f32 %v1816_v6, %v1558_v4 }
 0x234   : > { %4638 = vmatmul.msk.bf16.gmra.mxu0 %vm361_vm2, %v5762_v8  ;;  %4666 = vmatmul.msk.bf16.gmra.mxu1 %vm361_vm2, %v5726_v19 }
 0x235   : > { %v1900_v13 = vadd.f32 %v5639_v38, %v1868_v7 }
 0x236   : > { %v2020_v46 = vpop.f32.mrf.mxu3 }
 0x237   : > { %v1932_v9 = vmax.f32 %v1900_v13, 0.0  ;;  %v2021_v16 = vadd.f32 %v5443_v40, %v2020_v46  ;;  %4752 = vmatmul.msk.bf16.gmra.mxu2 %vm361_vm2, %v5098_v12  ;;  %v5781_v40 = vld [vmem:[%s6455_s4] ss:$0 sm:$0xff]  ;;  %v5821_v46 = vld [vmem:[%s5262_s25 + $0x138] sm:$0xff] }
 0x239   : > { %v1954_v17 = vpack.c.bf16 %v1932_v9, %v1931_v14  ;;  %v2099_v15 = vpack.c.bf16 %v2021_v16, %v2021_v16  ;;  %v1449_v22 = vpop.f32.mrf.mxu0  ;;  %v1562_v23 = vpop.f32.mrf.mxu1 }
 0x23a   : > { %v1819_v18 = vpop.f32.mrf.mxu2  ;;  %v1563_v26 = vadd.f32 %v1562_v23, %v1449_v22 }
 0x23b   : > { %2131 = vst.msk [vmem:[%s5449_s27 + $0x84] sm:$0xf] %vm1179_vm4, %v2099_v15  ;;  %4559 = vmatmul.msk.bf16.gmra.mxu3 %vm1009_vm3, %v1954_v17  ;;  %v1869_v24 = vadd.f32 %v1819_v18, %v1561_v21  ;;  %v5101_v15 = vld [vmem:[%s5262_s25 + $0x148] sm:$0xff] }
 0x23d   : > { %v1901_v29 = vadd.f32 %v5639_v38, %v1869_v24 }
 0x23e   : > { %v2023_v19 = vpop.f32.mrf.mxu3 }
 0x23f   : > { %v2024_v20 = vadd.f32 %v5781_v40, %v2023_v19  ;;  %v1933_v36 = vmax.f32 %v1901_v29, 0.0 }
 0x241   : > { %v2100_v27 = vpack.c.bf16 %v2024_v20, %v2024_v20  ;;  %v1452_v31 = vpop.f32.mrf.mxu0  ;;  %v1565_v30 = vpop.f32.mrf.mxu1 }
 0x242   : > { %v1821_v25 = vpop.f32.mrf.mxu2  ;;  %v1566_v43 = vadd.f32 %v1565_v30, %v1452_v31 }
 0x243   : > { %2132 = vst.msk [vmem:[%s5449_s27 + $0x88] sm:$0xf] %vm1179_vm4, %v2100_v27  ;;  %v1870_v56 = vadd.f32 %v1821_v25, %v1563_v26 }
 0x244   : > { %4639 = vmatmul.msk.bf16.gmra.mxu0 %vm361_vm2, %v5785_v28  ;;  %4667 = vmatmul.msk.bf16.gmra.mxu1 %vm361_vm2, %v5744_v47 }
 0x245   : > { %v1902_v34 = vadd.f32 %v5639_v38, %v1870_v56 }
 0x246   : > { %v2025_v35 = vpop.f32.mrf.mxu3 }
 0x247   : > { %v1934_v37 = vmax.f32 %v1902_v34, 0.0  ;;  %v2026_v39 = vadd.f32 %v5781_v40, %v2025_v35  ;;  %4753 = vmatmul.msk.bf16.gmra.mxu2 %vm361_vm2, %v5099_v32  ;;  %v5839_v35 = vld [vmem:[%s5262_s25 + $0x140] sm:$0xff] }
 0x249   : > { %v1955_v41 = vpack.c.bf16 %v1934_v37, %v1933_v36  ;;  %v2101_v33 = vpack.c.bf16 %v2026_v39, %v2026_v39  ;;  %v1454_v48 = vpop.f32.mrf.mxu0  ;;  %v1567_v50 = vpop.f32.mrf.mxu1 }
 0x24a   : > { %v1824_v42 = vpop.f32.mrf.mxu2  ;;  %v1568_v52 = vadd.f32 %v1567_v50, %v1454_v48 }
 0x24b   : > { %2133 = vst.msk [vmem:[%s5449_s27 + $0x8c] sm:$0xf] %vm1179_vm4, %v2101_v33  ;;  %4560 = vmatmul.msk.bf16.gmra.mxu3 %vm1009_vm3, %v1955_v41  ;;  %v1871_v51 = vadd.f32 %v1824_v42, %v1566_v43  ;;  %v5102_v33 = vld [vmem:[%s5262_s25 + $0x150] sm:$0xff] }
 0x24d   : > { %v1903_v55 = vadd.f32 %v5639_v38, %v1871_v51 }
 0x24e   : > { %v2028_v47 = vpop.f32.mrf.mxu3 }
 0x24f   : > { %v2029_v45 = vadd.f32 %v5781_v40, %v2028_v47  ;;  %v1935_v63 = vmax.f32 %v1903_v55, 0.0 }
 0x251   : > { %v2102_v53 = vpack.c.bf16 %v2029_v45, %v2029_v45  ;;  %v1457_v59 = vpop.f32.mrf.mxu0  ;;  %v1570_v57 = vpop.f32.mrf.mxu1 }
 0x252   : > { %v1826_v49 = vpop.f32.mrf.mxu2  ;;  %v1571_v5 = vadd.f32 %v1570_v57, %v1457_v59 }
 0x253   : > { %2134 = vst.msk [vmem:[%s5449_s27 + $0x90] sm:$0xf] %vm1179_vm4, %v2102_v53  ;;  %v1872_v58 = vadd.f32 %v1826_v49, %v1568_v52 }
 0x254   : > { %4640 = vmatmul.msk.bf16.gmra.mxu0 %vm361_vm2, %v5803_v54  ;;  %4668 = vmatmul.msk.bf16.gmra.mxu1 %vm361_vm2, %v5762_v8 }
 0x255   : > { %v1904_v62 = vadd.f32 %v5639_v38, %v1872_v58 }
 0x256   : > { %v2030_v44 = vpop.f32.mrf.mxu3 }
 0x257   : > { %v1936_v0 = vmax.f32 %v1904_v62, 0.0  ;;  %v2031_v60 = vadd.f32 %v5781_v40, %v2030_v44  ;;  %4754 = vmatmul.msk.bf16.gmra.mxu2 %vm361_vm2, %v5100_v61  ;;  %v5857_v44 = vld [vmem:[%s5262_s25 + $0x148] sm:$0xff] }
 0x259   : > { %v1956_v1 = vpack.c.bf16 %v1936_v0, %v1935_v63  ;;  %v2103_v2 = vpack.c.bf16 %v2031_v60, %v2031_v60  ;;  %v1459_v6 = vpop.f32.mrf.mxu0  ;;  %v1572_v3 = vpop.f32.mrf.mxu1 }
 0x25a   : > { %v1829_v4 = vpop.f32.mrf.mxu2  ;;  %v1573_v11 = vadd.f32 %v1572_v3, %v1459_v6 }
 0x25b   : > { %2135 = vst.msk [vmem:[%s5449_s27 + $0x94] sm:$0xf] %vm1179_vm4, %v2103_v2  ;;  %4561 = vmatmul.msk.bf16.gmra.mxu3 %vm1009_vm3, %v1956_v1  ;;  %v1873_v7 = vadd.f32 %v1829_v4, %v1571_v5  ;;  %v5103_v2 = vld [vmem:[%s5262_s25 + $0x158] sm:$0xff] }
 0x25d   : > { %v1905_v14 = vadd.f32 %v5639_v38, %v1873_v7 }
 0x25e   : > { %v2033_v8 = vpop.f32.mrf.mxu3 }
 0x25f   : > { %v2034_v10 = vadd.f32 %v5781_v40, %v2033_v8  ;;  %v1937_v22 = vmax.f32 %v1905_v14, 0.0 }
 0x261   : > { %v2104_v12 = vpack.c.bf16 %v2034_v10, %v2034_v10  ;;  %v1462_v16 = vpop.f32.mrf.mxu0  ;;  %v1575_v17 = vpop.f32.mrf.mxu1 }
 0x262   : > { %v1831_v13 = vpop.f32.mrf.mxu2  ;;  %v1576_v27 = vadd.f32 %v1575_v17, %v1462_v16 }
 0x263   : > { %2136 = vst.msk [vmem:[%s5449_s27 + $0x98] sm:$0xf] %vm1179_vm4, %v2104_v12  ;;  %v1874_v9 = vadd.f32 %v1831_v13, %v1573_v11 }
 0x264   : > { %4641 = vmatmul.msk.bf16.gmra.mxu0 %vm361_vm2, %v5821_v46  ;;  %4669 = vmatmul.msk.bf16.gmra.mxu1 %vm361_vm2, %v5785_v28 }
 0x265   : > { %v1906_v18 = vadd.f32 %v5639_v38, %v1874_v9 }
 0x266   : > { %v2035_v21 = vpop.f32.mrf.mxu3 }
 0x267   : > { %v1938_v23 = vmax.f32 %v1906_v18, 0.0  ;;  %v2036_v19 = vadd.f32 %v5781_v40, %v2035_v21  ;;  %4755 = vmatmul.msk.bf16.gmra.mxu2 %vm361_vm2, %v5101_v15  ;;  %v5875_v21 = vld [vmem:[%s5262_s25 + $0x150] sm:$0xff] }
 0x269   : > { %v1957_v24 = vpack.c.bf16 %v1938_v23, %v1937_v22  ;;  %v2105_v20 = vpack.c.bf16 %v2036_v19, %v2036_v19  ;;  %v1464_v25 = vpop.f32.mrf.mxu0  ;;  %v1577_v29 = vpop.f32.mrf.mxu1 }
 0x26a   : > { %v1834_v26 = vpop.f32.mrf.mxu2  ;;  %v1578_v30 = vadd.f32 %v1577_v29, %v1464_v25 }
 0x26b   : > { %2137 = vst.msk [vmem:[%s5449_s27 + $0x9c] sm:$0xf] %vm1179_vm4, %v2105_v20  ;;  %4562 = vmatmul.msk.bf16.gmra.mxu3 %vm1009_vm3, %v1957_v24  ;;  %v1875_v56 = vadd.f32 %v1834_v26, %v1576_v27  ;;  %v5104_v20 = vld [vmem:[%s5262_s25 + $0x160] sm:$0xff] }
 0x26d   : > { %v1907_v36 = vadd.f32 %v5639_v38, %v1875_v56 }
 0x26e   : > { %v2038_v28 = vpop.f32.mrf.mxu3 }
 0x26f   : > { %v2039_v31 = vadd.f32 %v5781_v40, %v2038_v28  ;;  %v1939_v48 = vmax.f32 %v1907_v36, 0.0 }
 0x271   : > { %v2106_v32 = vpack.c.bf16 %v2039_v31, %v2039_v31  ;;  %v1467_v39 = vpop.f32.mrf.mxu0  ;;  %v1580_v41 = vpop.f32.mrf.mxu1 }
 0x272   : > { %v1836_v34 = vpop.f32.mrf.mxu2  ;;  %v1581_v53 = vadd.f32 %v1580_v41, %v1467_v39 }
 0x273   : > { %2138 = vst.msk [vmem:[%s5449_s27 + $0xa0] sm:$0xf] %vm1179_vm4, %v2106_v32  ;;  %v1876_v37 = vadd.f32 %v1836_v34, %v1578_v30 }
 0x274   : > { %4642 = vmatmul.msk.bf16.gmra.mxu0 %vm361_vm2, %v5839_v35  ;;  %4670 = vmatmul.msk.bf16.gmra.mxu1 %vm361_vm2, %v5803_v54 }
 0x275   : > { %v1908_v42 = vadd.f32 %v5639_v38, %v1876_v37 }
 0x276   : > { %v2040_v43 = vpop.f32.mrf.mxu3 }
 0x277   : > { %v1940_v50 = vmax.f32 %v1908_v42, 0.0  ;;  %v2041_v47 = vadd.f32 %v5781_v40, %v2040_v43  ;;  %4756 = vmatmul.msk.bf16.gmra.mxu2 %vm361_vm2, %v5102_v33  ;;  %v5893_v43 = vld [vmem:[%s5262_s25 + $0x158] sm:$0xff] }
 0x279   : > { %v1958_v51 = vpack.c.bf16 %v1940_v50, %v1939_v48  ;;  %v2107_v45 = vpack.c.bf16 %v2041_v47, %v2041_v47  ;;  %v1469_v49 = vpop.f32.mrf.mxu0  ;;  %v1582_v55 = vpop.f32.mrf.mxu1 }
 0x27a   : > { %v1839_v52 = vpop.f32.mrf.mxu2  ;;  %v1583_v57 = vadd.f32 %v1582_v55, %v1469_v49 }
 0x27b   : > { %2139 = vst.msk [vmem:[%s5449_s27 + $0xa4] sm:$0xf] %vm1179_vm4, %v2107_v45  ;;  %4563 = vmatmul.msk.bf16.gmra.mxu3 %vm1009_vm3, %v1958_v51  ;;  %v1877_v58 = vadd.f32 %v1839_v52, %v1581_v53  ;;  %v5105_v45 = vld [vmem:[%s5262_s25 + $0x168] sm:$0xff] }
 0x27d   : > { %v1909_v63 = vadd.f32 %v5639_v38, %v1877_v58 }
 0x27e   : > { %v2043_v54 = vpop.f32.mrf.mxu3 }
 0x27f   : > { %v2044_v59 = vadd.f32 %v5781_v40, %v2043_v54  ;;  %v1941_v6 = vmax.f32 %v1909_v63, 0.0 }
 0x281   : > { %v2108_v61 = vpack.c.bf16 %v2044_v59, %v2044_v59  ;;  %v1472_v60 = vpop.f32.mrf.mxu0  ;;  %v1585_v1 = vpop.f32.mrf.mxu1 }
 0x282   : > { %v1841_v62 = vpop.f32.mrf.mxu2  ;;  %v1586_v12 = vadd.f32 %v1585_v1, %v1472_v60 }
 0x283   : > { %2140 = vst.msk [vmem:[%s5449_s27 + $0xa8] sm:$0xf] %vm1179_vm4, %v2108_v61  ;;  %v1878_v0 = vadd.f32 %v1841_v62, %v1583_v57 }
 0x284   : > { %4643 = vmatmul.msk.bf16.gmra.mxu0 %vm361_vm2, %v5857_v44  ;;  %4671 = vmatmul.msk.bf16.gmra.mxu1 %vm361_vm2, %v5821_v46 }
 0x285   : > { %v1910_v4 = vadd.f32 %v5639_v38, %v1878_v0 }
 0x286   : > { %v2045_v5 = vpop.f32.mrf.mxu3 }
 0x287   : > { %v1942_v3 = vmax.f32 %v1910_v4, 0.0  ;;  %v2046_v8 = vadd.f32 %v5781_v40, %v2045_v5  ;;  %4757 = vmatmul.msk.bf16.gmra.mxu2 %vm361_vm2, %v5103_v2  ;;  %v5911_v5 = vld [vmem:[%s5262_s25 + $0x160] sm:$0xff] }
 0x289   : > { %v1959_v7 = vpack.c.bf16 %v1942_v3, %v1941_v6  ;;  %v2109_v10 = vpack.c.bf16 %v2046_v8, %v2046_v8  ;;  %v1474_v13 = vpop.f32.mrf.mxu0  ;;  %v1587_v14 = vpop.f32.mrf.mxu1 }
 0x28a   : > { %v1844_v11 = vpop.f32.mrf.mxu2  ;;  %v1588_v17 = vadd.f32 %v1587_v14, %v1474_v13 }
 0x28b   : > { %2141 = vst.msk [vmem:[%s5449_s27 + $0xac] sm:$0xf] %vm1179_vm4, %v2109_v10  ;;  %4564 = vmatmul.msk.bf16.gmra.mxu3 %vm1009_vm3, %v1959_v7  ;;  %v1879_v9 = vadd.f32 %v1844_v11, %v1586_v12  ;;  %v5106_v10 = vld [vmem:[%s5262_s25 + $0x170] sm:$0xff] }
 0x28d   : > { %v1911_v22 = vadd.f32 %v5639_v38, %v1879_v9 }
 0x28e   : > { %v2048_v46 = vpop.f32.mrf.mxu3 }
 0x28f   : > { %v2049_v16 = vadd.f32 %v5781_v40, %v2048_v46  ;;  %v1943_v25 = vmax.f32 %v1911_v22, 0.0 }
 0x291   : > { %v2110_v15 = vpack.c.bf16 %v2049_v16, %v2049_v16  ;;  %v2347_v19 = vpop.f32.mrf.mxu0  ;;  %v2460_v24 = vpop.f32.mrf.mxu1 }
 0x292   : > { %v1846_v18 = vpop.f32.mrf.mxu2  ;;  %v2461_v32 = vadd.f32 %v2460_v24, %v2347_v19 }
 0x293   : > { %2142 = vst.msk [vmem:[%s5449_s27 + $0xb0] sm:$0xf] %vm1179_vm4, %v2110_v15  ;;  %v1880_v23 = vadd.f32 %v1846_v18, %v1588_v17 }
 0x294   : > { %4644 = vmatmul.msk.bf16.gmra.mxu0 %vm361_vm2, %v5875_v21  ;;  %4672 = vmatmul.msk.bf16.gmra.mxu1 %vm361_vm2, %v5839_v35 }
 0x295   : > { %v1912_v26 = vadd.f32 %v5639_v38, %v1880_v23 }
 0x296   : > { %v2050_v27 = vpop.f32.mrf.mxu3 }
 0x297   : > { %v1944_v29 = vmax.f32 %v1912_v26, 0.0  ;;  %v2051_v28 = vadd.f32 %v5781_v40, %v2050_v27  ;;  %4758 = vmatmul.msk.bf16.gmra.mxu2 %vm361_vm2, %v5104_v20  ;;  %v5929_v27 = vld [vmem:[%s5262_s25 + $0x168] sm:$0xff] }
 0x299   : > { %v1960_v56 = vpack.c.bf16 %v1944_v29, %v1943_v25  ;;  %v2111_v31 = vpack.c.bf16 %v2051_v28, %v2051_v28  ;;  %v2349_v34 = vpop.f32.mrf.mxu0  ;;  %v2462_v36 = vpop.f32.mrf.mxu1 }
 0x29a   : > { %v2719_v30 = vpop.f32.mrf.mxu2  ;;  %v2463_v41 = vadd.f32 %v2462_v36, %v2349_v34 }
 0x29b   : > { %2143 = vst.msk [vmem:[%s5449_s27 + $0xb4] sm:$0xf] %vm1179_vm4, %v2111_v31  ;;  %4565 = vmatmul.msk.bf16.gmra.mxu3 %vm1009_vm3, %v1960_v56  ;;  %v2799_v37 = vadd.f32 %v2719_v30, %v2461_v32  ;;  %v5107_v31 = vld [vmem:[%s5262_s25 + $0x178] sm:$0xff] }
 0x29d   : > { %v2831_v48 = vadd.f32 %v5639_v38, %v2799_v37 }
 0x29e   : > { %v2053_v35 = vpop.f32.mrf.mxu3 }
 0x29f   : > { %v2054_v39 = vadd.f32 %v5781_v40, %v2053_v35  ;;  %v2863_v49 = vmax.f32 %v2831_v48, 0.0 }
 0x2a1   : > { %v2112_v33 = vpack.c.bf16 %v2054_v39, %v2054_v39  ;;  %v2352_v47 = vpop.f32.mrf.mxu0  ;;  %v2465_v51 = vpop.f32.mrf.mxu1 }
 0x2a2   : > { %v2721_v42 = vpop.f32.mrf.mxu2  ;;  %v2466_v61 = vadd.f32 %v2465_v51, %v2352_v47 }
 0x2a3   : > { %2144 = vst.msk [vmem:[%s5449_s27 + $0xb8] sm:$0xf] %vm1179_vm4, %v2112_v33  ;;  %v2800_v50 = vadd.f32 %v2721_v42, %v2463_v41 }
 0x2a4   : > { %4645 = vmatmul.msk.bf16.gmra.mxu0 %vm361_vm2, %v5893_v43  ;;  %4673 = vmatmul.msk.bf16.gmra.mxu1 %vm361_vm2, %v5857_v44 }
 0x2a5   : > { %v2832_v52 = vadd.f32 %v5639_v38, %v2800_v50 }
 0x2a6   : > { %v2055_v53 = vpop.f32.mrf.mxu3 }
 0x2a7   : > { %v2864_v55 = vmax.f32 %v2832_v52, 0.0  ;;  %v2056_v54 = vadd.f32 %v5781_v40, %v2055_v53  ;;  %4759 = vmatmul.msk.bf16.gmra.mxu2 %vm361_vm2, %v5105_v45  ;;  %v5947_v53 = vld [vmem:[%s5262_s25 + $0x170] sm:$0xff] }
 0x2a9   : > { %v2895_v58 = vpack.c.bf16 %v2864_v55, %v2863_v49  ;;  %v2113_v59 = vpack.c.bf16 %v2056_v54, %v2056_v54  ;;  %v2354_v62 = vpop.f32.mrf.mxu0  ;;  %v2467_v63 = vpop.f32.mrf.mxu1 }
 0x2aa   : > { %v2724_v57 = vpop.f32.mrf.mxu2  ;;  %v2468_v1 = vadd.f32 %v2467_v63, %v2354_v62 }
 0x2ab   : > { %2145 = vst.msk [vmem:[%s5449_s27 + $0xbc] sm:$0xf] %vm1179_vm4, %v2113_v59  ;;  %4766 = vmatmul.msk.bf16.vlgmr.msra.gmra.mxu3 %vm1009_vm3, %v2895_v58  ;;  %v2801_v0 = vadd.f32 %v2724_v57, %v2466_v61  ;;  %v5108_v59 = vld [vmem:[%s5262_s25 + $0x180] sm:$0xff] }
 0x2ad   : > { %v2833_v6 = vadd.f32 %v5639_v38, %v2801_v0 }
 0x2ae   : > { %v2058_v44 = vpop.f32.mrf.mxu3 }
 0x2af   : > { %v2059_v60 = vadd.f32 %v5781_v40, %v2058_v44  ;;  %v2865_v13 = vmax.f32 %v2833_v6, 0.0 }
 0x2b1   : > { %v2114_v2 = vpack.c.bf16 %v2059_v60, %v2059_v60  ;;  %v2357_v8 = vpop.f32.mrf.mxu0  ;;  %v2470_v7 = vpop.f32.mrf.mxu1 }
 0x2b2   : > { %v2726_v4 = vpop.f32.mrf.mxu2  ;;  %v2471_v15 = vadd.f32 %v2470_v7, %v2357_v8 }
 0x2b3   : > { %2146 = vst.msk [vmem:[%s5449_s27 + $0xc0] sm:$0xf] %vm1179_vm4, %v2114_v2  ;;  %v2802_v3 = vadd.f32 %v2726_v4, %v2468_v1 }
 0x2b4   : > { %4646 = vmatmul.msk.bf16.gmra.mxu0 %vm361_vm2, %v5911_v5  ;;  %4674 = vmatmul.msk.bf16.gmra.mxu1 %vm361_vm2, %v5875_v21 }
 0x2b5   : > { %v2834_v11 = vadd.f32 %v5639_v38, %v2802_v3 }
 0x2b6   : > { %v2060_v12 = vpop.f32.mrf.mxu3 }
 0x2b7   : > { %v2866_v14 = vmax.f32 %v2834_v11, 0.0  ;;  %v2061_v46 = vadd.f32 %v5781_v40, %v2060_v12  ;;  %4760 = vmatmul.msk.bf16.gmra.mxu2 %vm361_vm2, %v5106_v10  ;;  %v5965_v12 = vld [vmem:[%s5262_s25 + $0x178] sm:$0xff] }
 0x2b9   : > { %v2896_v9 = vpack.c.bf16 %v2866_v14, %v2865_v13  ;;  %v2115_v16 = vpack.c.bf16 %v2061_v46, %v2061_v46  ;;  %v2359_v18 = vpop.f32.mrf.mxu0  ;;  %v2472_v22 = vpop.f32.mrf.mxu1 }
 0x2ba   : > { %v2729_v17 = vpop.f32.mrf.mxu2  ;;  %v2473_v24 = vadd.f32 %v2472_v22, %v2359_v18 }
 0x2bb   : > { %2147 = vst.msk [vmem:[%s5449_s27 + $0xc4] sm:$0xf] %vm1179_vm4, %v2115_v16  ;;  %4767 = vmatmul.msk.bf16.gmra.mxu3 %vm1009_vm3, %v2896_v9  ;;  %v2803_v23 = vadd.f32 %v2729_v17, %v2471_v15  ;;  %v5109_v16 = vld [vmem:[%s5262_s25 + $0x188] sm:$0xff]  ;;  %v5974_v17 = vld [vmem:[%s6453_s2] ss:$0 sm:$0xff] }
 0x2bd   : > { %v2835_v25 = vadd.f32 %v5639_v38, %v2803_v23 }
 0x2be   : > { %v2063_v21 = vpop.f32.mrf.mxu3 }
 0x2bf   : > { %v2064_v19 = vadd.f32 %v5781_v40, %v2063_v21  ;;  %v2867_v34 = vmax.f32 %v2835_v25, 0.0 }
 0x2c1   : > { %v2116_v20 = vpack.c.bf16 %v2064_v19, %v2064_v19  ;;  %v2362_v28 = vpop.f32.mrf.mxu0  ;;  %v2475_v56 = vpop.f32.mrf.mxu1 }
 0x2c2   : > { %v2731_v26 = vpop.f32.mrf.mxu2  ;;  %v2476_v33 = vadd.f32 %v2475_v56, %v2362_v28 }
 0x2c3   : > { %2148 = vst.msk [vmem:[%s5449_s27 + $0xc8] sm:$0xf] %vm1179_vm4, %v2116_v20  ;;  %v2804_v29 = vadd.f32 %v2731_v26, %v2473_v24 }
 0x2c4   : > { %4647 = vmatmul.msk.bf16.gmra.mxu0 %vm361_vm2, %v5929_v27  ;;  %4675 = vmatmul.msk.bf16.gmra.mxu1 %vm361_vm2, %v5893_v43 }
 0x2c5   : > { %v2836_v30 = vadd.f32 %v5639_v38, %v2804_v29 }
 0x2c6   : > { %v2065_v32 = vpop.f32.mrf.mxu3 }
 0x2c7   : > { %v2868_v36 = vmax.f32 %v2836_v30, 0.0  ;;  %v2066_v35 = vadd.f32 %v5781_v40, %v2065_v32  ;;  %4761 = vmatmul.msk.bf16.gmra.mxu2 %vm361_vm2, %v5107_v31  ;;  %v5093_v32 = vld [vmem:[%s5262_s25 + $0x180] sm:$0xff] }
 0x2c9   : > { %v2897_v37 = vpack.c.bf16 %v2868_v36, %v2867_v34  ;;  %v2117_v39 = vpack.c.bf16 %v2066_v35, %v2066_v35  ;;  %v2364_v42 = vpop.f32.mrf.mxu0  ;;  %v2477_v48 = vpop.f32.mrf.mxu1 }
 0x2ca   : > { %v2734_v41 = vpop.f32.mrf.mxu2  ;;  %v2478_v51 = vadd.f32 %v2477_v48, %v2364_v42 }
 0x2cb   : > { %2149 = vst.msk [vmem:[%s5449_s27 + $0xcc] sm:$0xf] %vm1179_vm4, %v2117_v39  ;;  %4768 = vmatmul.msk.bf16.gmra.mxu3 %vm1009_vm3, %v2897_v37  ;;  %v2805_v50 = vadd.f32 %v2734_v41, %v2476_v33  ;;  %v5110_v39 = vld [vmem:[%s5262_s25 + $0x190] sm:$0xff] }
 0x2cd   : > { %v2837_v49 = vadd.f32 %v5639_v38, %v2805_v50 }
 0x2ce   : > { %v2068_v43 = vpop.f32.mrf.mxu3 }
 0x2cf   : > { %v2069_v47 = vadd.f32 %v5781_v40, %v2068_v43  ;;  %v2869_v62 = vmax.f32 %v2837_v49, 0.0 }
 0x2d1   : > { %v2118_v45 = vpack.c.bf16 %v2069_v47, %v2069_v47  ;;  %v2367_v54 = vpop.f32.mrf.mxu0  ;;  %v2480_v58 = vpop.f32.mrf.mxu1 }
 0x2d2   : > { %v2736_v52 = vpop.f32.mrf.mxu2  ;;  %v2481_v2 = vadd.f32 %v2480_v58, %v2367_v54 }
 0x2d3   : > { %2150 = vst.msk [vmem:[%s5449_s27 + $0xd0] sm:$0xf] %vm1179_vm4, %v2118_v45  ;;  %v2806_v55 = vadd.f32 %v2736_v52, %v2478_v51 }
 0x2d4   : > { %4648 = vmatmul.msk.bf16.gmra.mxu0 %vm361_vm2, %v5947_v53  ;;  %4676 = vmatmul.msk.bf16.gmra.mxu1 %vm361_vm2, %v5911_v5 }
 0x2d5   : > { %v2838_v57 = vadd.f32 %v5639_v38, %v2806_v55 }
 0x2d6   : > { %v2070_v61 = vpop.f32.mrf.mxu3 }
 0x2d7   : > { %v2870_v63 = vmax.f32 %v2838_v57, 0.0  ;;  %v2071_v44 = vadd.f32 %v5781_v40, %v2070_v61  ;;  %4762 = vmatmul.msk.bf16.gmra.mxu2 %vm361_vm2, %v5108_v59  ;;  %v5094_v61 = vld [vmem:[%s5262_s25 + $0x188] sm:$0xff] }
 0x2d9   : > { %v2898_v0 = vpack.c.bf16 %v2870_v63, %v2869_v62  ;;  %v2119_v60 = vpack.c.bf16 %v2071_v44, %v2071_v44  ;;  %v2369_v4 = vpop.f32.mrf.mxu0  ;;  %v2482_v6 = vpop.f32.mrf.mxu1 }
 0x2da   : > { %v2739_v1 = vpop.f32.mrf.mxu2  ;;  %v2483_v7 = vadd.f32 %v2482_v6, %v2369_v4 }
 0x2db   : > { %2151 = vst.msk [vmem:[%s5449_s27 + $0xd4] sm:$0xf] %vm1179_vm4, %v2119_v60  ;;  %4769 = vmatmul.msk.bf16.gmra.mxu3 %vm1009_vm3, %v2898_v0  ;;  %v2807_v3 = vadd.f32 %v2739_v1, %v2481_v2  ;;  %v5111_v60 = vld [vmem:[%s5262_s25 + $0x198] sm:$0xff] }
 0x2dd   : > { %v2839_v13 = vadd.f32 %v5639_v38, %v2807_v3 }
 0x2de   : > { %v2073_v5 = vpop.f32.mrf.mxu3 }
 0x2df   : > { %v2074_v8 = vadd.f32 %v5781_v40, %v2073_v5  ;;  %v2871_v38 = vmax.f32 %v2839_v13, 0.0 }
 0x2e1   : > { %v2120_v10 = vpack.c.bf16 %v2074_v8, %v2074_v8  ;;  %v2372_v46 = vpop.f32.mrf.mxu0  ;;  %v2485_v9 = vpop.f32.mrf.mxu1 }
 0x2e2   : > { %v2741_v11 = vpop.f32.mrf.mxu2  ;;  %v2486_v20 = vadd.f32 %v2485_v9, %v2372_v46 }
 0x2e3   : > { %2152 = vst.msk [vmem:[%s5449_s27 + $0xd8] sm:$0xf] %vm1179_vm4, %v2120_v10  ;;  %v2808_v14 = vadd.f32 %v2741_v11, %v2483_v7 }
 0x2e4   : > { %4649 = vmatmul.msk.bf16.gmra.mxu0 %vm361_vm2, %v5965_v12  ;;  %4677 = vmatmul.msk.bf16.gmra.mxu1 %vm361_vm2, %v5929_v27 }
 0x2e5   : > { %v2840_v15 = vadd.f32 %v5974_v17, %v2808_v14 }
 0x2e6   : > { %v2075_v18 = vpop.f32.mrf.mxu3 }
 0x2e7   : > { %v2872_v22 = vmax.f32 %v2840_v15, 0.0  ;;  %v2076_v21 = vadd.f32 %v5781_v40, %v2075_v18  ;;  %4763 = vmatmul.msk.bf16.gmra.mxu2 %vm361_vm2, %v5109_v16  ;;  %v6018_v18 = vld [vmem:[%s5262_s25 + $0x190] sm:$0xff] }
 0x2e9   : > { %v2899_v23 = vpack.c.bf16 %v2872_v22, %v2871_v38  ;;  %v2121_v19 = vpack.c.bf16 %v2076_v21, %v2076_v21  ;;  %v2374_v26 = vpop.f32.mrf.mxu0  ;;  %v2487_v25 = vpop.f32.mrf.mxu1  ;;  %v5113_v38 = vld [vmem:[%s5262_s25 + $0x180] sm:$0xff] }
 0x2ea   : > { %v2744_v24 = vpop.f32.mrf.mxu2  ;;  %v2488_v56 = vadd.f32 %v2487_v25, %v2374_v26 }
 0x2eb   : > { %2153 = vst.msk [vmem:[%s5449_s27 + $0xdc] sm:$0xf] %vm1179_vm4, %v2121_v19  ;;  %4770 = vmatmul.msk.bf16.gmra.mxu3 %vm1009_vm3, %v2899_v23  ;;  %v2809_v29 = vadd.f32 %v2744_v24, %v2486_v20  ;;  %v5133_v24 = vld [vmem:[%s5262_s25 + $0x1a0] sm:$0xff] }
 0x2ed   : > { %v2841_v34 = vadd.f32 %v5974_v17, %v2809_v29 }
 0x2ee   : > { %v2078_v27 = vpop.f32.mrf.mxu3 }
 0x2ef   : > { %v2079_v28 = vadd.f32 %v5781_v40, %v2078_v27  ;;  %v2873_v42 = vmax.f32 %v2841_v34, 0.0 }
 0x2f1   : > { %v2122_v31 = vpack.c.bf16 %v2079_v28, %v2079_v28  ;;  %v2377_v35 = vpop.f32.mrf.mxu0  ;;  %v2490_v37 = vpop.f32.mrf.mxu1 }
 0x2f2   : > { %v2746_v30 = vpop.f32.mrf.mxu2  ;;  %v2491_v45 = vadd.f32 %v2490_v37, %v2377_v35 }
 0x2f3   : > { %2154 = vst.msk [vmem:[%s5449_s27 + $0xe0] sm:$0xf] %vm1179_vm4, %v2122_v31  ;;  %v2810_v36 = vadd.f32 %v2746_v30, %v2488_v56 }
 0x2f4   : > { %4650 = vmatmul.msk.bf16.gmra.mxu0 %vm361_vm2, %v5093_v32  ;;  %4678 = vmatmul.msk.bf16.gmra.mxu1 %vm361_vm2, %v5947_v53 }
 0x2f5   : > { %v2842_v41 = vadd.f32 %v5974_v17, %v2810_v36 }
 0x2f6   : > { %v2080_v33 = vpop.f32.mrf.mxu3 }
 0x2f7   : > { %v2874_v48 = vmax.f32 %v2842_v41, 0.0  ;;  %v2081_v43 = vadd.f32 %v5781_v40, %v2080_v33  ;;  %4764 = vmatmul.msk.bf16.gmra.mxu2 %vm361_vm2, %v5110_v39 }
 0x2f9   : > { %v2900_v50 = vpack.c.bf16 %v2874_v48, %v2873_v42  ;;  %v2123_v47 = vpack.c.bf16 %v2081_v43, %v2081_v43  ;;  %v2379_v52 = vpop.f32.mrf.mxu0  ;;  %v2492_v49 = vpop.f32.mrf.mxu1  ;;  %v6036_v42 = vld [vmem:[%s5262_s25 + $0x198] sm:$0xff]  ;;  %v5114_v48 = vld [vmem:[%s5262_s25 + $0x188] sm:$0xff] }
 0x2fa   : > { %v2749_v51 = vpop.f32.mrf.mxu2  ;;  %v2493_v58 = vadd.f32 %v2492_v49, %v2379_v52 }
 0x2fb   : > { %2155 = vst.msk [vmem:[%s5449_s27 + $0xe4] sm:$0xf] %vm1179_vm4, %v2123_v47  ;;  %4771 = vmatmul.msk.bf16.gmra.mxu3 %vm1009_vm3, %v2900_v50  ;;  %v2811_v55 = vadd.f32 %v2749_v51, %v2491_v45  ;;  %v5134_v45 = vld [vmem:[%s5262_s25 + $0x1a8] sm:$0xff] }
 0x2fd   : > { %v2843_v62 = vadd.f32 %v5974_v17, %v2811_v55 }
 0x2fe   : > { %v2083_v53 = vpop.f32.mrf.mxu3 }
 0x2ff   : > { %v2084_v54 = vadd.f32 %v5781_v40, %v2083_v53  ;;  %v2875_v4 = vmax.f32 %v2843_v62, 0.0 }
 0x301   : > { %v2124_v59 = vpack.c.bf16 %v2084_v54, %v2084_v54  ;;  %v2382_v44 = vpop.f32.mrf.mxu0  ;;  %v2495_v0 = vpop.f32.mrf.mxu1 }
 0x302   : > { %v2751_v57 = vpop.f32.mrf.mxu2  ;;  %v2496_v10 = vadd.f32 %v2495_v0, %v2382_v44 }
 0x303   : > { %2156 = vst.msk [vmem:[%s5449_s27 + $0xe8] sm:$0xf] %vm1179_vm4, %v2124_v59  ;;  %v2812_v63 = vadd.f32 %v2751_v57, %v2493_v58 }
 0x304   : > { %4651 = vmatmul.msk.bf16.gmra.mxu0 %vm361_vm2, %v5094_v61  ;;  %4679 = vmatmul.msk.bf16.gmra.mxu1 %vm361_vm2, %v5965_v12 }
 0x305   : > { %v2844_v1 = vadd.f32 %v5974_v17, %v2812_v63 }
 0x306   : > { %v2085_v2 = vpop.f32.mrf.mxu3 }
 0x307   : > { %v2876_v6 = vmax.f32 %v2844_v1, 0.0  ;;  %v2086_v5 = vadd.f32 %v5781_v40, %v2085_v2  ;;  %4765 = vmatmul.msk.bf16.gmra.mxu2 %vm361_vm2, %v5111_v60 }
 0x309   : > { %v2901_v3 = vpack.c.bf16 %v2876_v6, %v2875_v4  ;;  %v2125_v8 = vpack.c.bf16 %v2086_v5, %v2086_v5  ;;  %v2384_v11 = vpop.f32.mrf.mxu0  ;;  %v2497_v12 = vpop.f32.mrf.mxu1  ;;  %v6054_v6 = vld [vmem:[%s5262_s25 + $0x1a0] sm:$0xff] }
 0x30a   : > { %v2754_v7 = vpop.f32.mrf.mxu2  ;;  %v2498_v9 = vadd.f32 %v2497_v12, %v2384_v11 }
 0x30b   : > { %2157 = vst.msk [vmem:[%s5449_s27 + $0xec] sm:$0xf] %vm1179_vm4, %v2125_v8  ;;  %4772 = vmatmul.msk.bf16.gmra.mxu3 %vm1009_vm3, %v2901_v3  ;;  %v2813_v14 = vadd.f32 %v2754_v7, %v2496_v10  ;;  %v5135_v10 = vld [vmem:[%s5262_s25 + $0x1b0] sm:$0xff] }
 0x30d   : > { %v2845_v22 = vadd.f32 %v5974_v17, %v2813_v14 }
 0x30e   : > { %v2088_v13 = vpop.f32.mrf.mxu3 }
 0x30f   : > { %v2089_v46 = vadd.f32 %v5781_v40, %v2088_v13  ;;  %v2877_v25 = vmax.f32 %v2845_v22, 0.0 }
 0x311   : > { %v2126_v16 = vpack.c.bf16 %v2089_v46, %v2089_v46  ;;  %v2387_v23 = vpop.f32.mrf.mxu0  ;;  %v2500_v19 = vpop.f32.mrf.mxu1 }
 0x312   : > { %v2756_v15 = vpop.f32.mrf.mxu2  ;;  %v2501_v30 = vadd.f32 %v2500_v19, %v2387_v23 }
 0x313   : > { %2158 = vst.msk [vmem:[%s5449_s27 + $0xf0] sm:$0xf] %vm1179_vm4, %v2126_v16  ;;  %v2814_v21 = vadd.f32 %v2756_v15, %v2498_v9 }
 0x314   : > { %4852 = vmatmul.msk.bf16.vlgmr.msrb.gmra.mxu0 %vm361_vm2, %v6018_v18  ;;  %4880 = vmatmul.msk.bf16.vlgmr.msrb.gmra.mxu1 %vm361_vm2, %v5113_v38 }
 0x315   : > { %v2846_v20 = vadd.f32 %v5974_v17, %v2814_v21 }
 0x316   : > { %v2090_v26 = vpop.f32.mrf.mxu3 }
 0x317   : > { %v2878_v27 = vmax.f32 %v2846_v20, 0.0  ;;  %v2091_v29 = vadd.f32 %v5781_v40, %v2090_v26  ;;  %4966 = vmatmul.msk.bf16.vlgmr.msrb.gmra.mxu2 %vm361_vm2, %v5133_v24 }
 0x319   : > { %v2902_v28 = vpack.c.bf16 %v2878_v27, %v2877_v25  ;;  %v2127_v56 = vpack.c.bf16 %v2091_v29, %v2091_v29  ;;  %v2389_v32 = vpop.f32.mrf.mxu0  ;;  %v2502_v34 = vpop.f32.mrf.mxu1  ;;  %v6072_v25 = vld [vmem:[%s5262_s25 + $0x1a8] sm:$0xff] }
 0x31a   : > { %v2759_v31 = vpop.f32.mrf.mxu2  ;;  %v2503_v39 = vadd.f32 %v2502_v34, %v2389_v32 }
 0x31b   : > { %2159 = vst.msk [vmem:[%s5449_s27 + $0xf4] sm:$0xf] %vm1179_vm4, %v2127_v56  ;;  %4773 = vmatmul.msk.bf16.gmra.mxu3 %vm1009_vm3, %v2902_v28  ;;  %v2815_v35 = vadd.f32 %v2759_v31, %v2501_v30  ;;  %v5136_v31 = vld [vmem:[%s5262_s25 + $0x1b8] sm:$0xff] }
 0x31d   : > { %v2847_v43 = vadd.f32 %v5974_v17, %v2815_v35 }
 0x31e   : > { %v2093_v36 = vpop.f32.mrf.mxu3 }
 0x31f   : > { %v2094_v37 = vadd.f32 %v5781_v40, %v2093_v36  ;;  %v2879_v53 = vmax.f32 %v2847_v43, 0.0 }
 0x321   : > { %v2128_v41 = vpack.c.bf16 %v2094_v37, %v2094_v37  ;;  %v2392_v47 = vpop.f32.mrf.mxu0  ;;  %v2505_v51 = vpop.f32.mrf.mxu1 }
 0x322   : > { %v2761_v33 = vpop.f32.mrf.mxu2  ;;  %v2506_v61 = vadd.f32 %v2505_v51, %v2392_v47 }
 0x323   : > { %2160 = vst.msk [vmem:[%s5449_s27 + $0xf8] sm:$0xf] %vm1179_vm4, %v2128_v41  ;;  %v2816_v50 = vadd.f32 %v2761_v33, %v2503_v39 }
 0x324   : > { %4853 = vmatmul.msk.bf16.gmra.mxu0 %vm361_vm2, %v6036_v42  ;;  %4881 = vmatmul.msk.bf16.gmra.mxu1 %vm361_vm2, %v5114_v48 }
 0x325   : > { %v2848_v52 = vadd.f32 %v5974_v17, %v2816_v50 }
 0x326   : > { %v2095_v49 = vpop.f32.mrf.mxu3 }
 0x327   : > { %v2880_v55 = vmax.f32 %v2848_v52, 0.0  ;;  %v2096_v54 = vadd.f32 %v5781_v40, %v2095_v49  ;;  %4967 = vmatmul.msk.bf16.gmra.mxu2 %vm361_vm2, %v5134_v45  ;;  %v6090_v49 = vld [vmem:[%s5262_s25 + $0x1b0] sm:$0xff] }
 0x329   : > { %v2903_v58 = vpack.c.bf16 %v2880_v55, %v2879_v53  ;;  %v2129_v59 = vpack.c.bf16 %v2096_v54, %v2096_v54  ;;  %v2394_v62 = vpop.f32.mrf.mxu0  ;;  %v2507_v63 = vpop.f32.mrf.mxu1 }
 0x32a   : > { %v2764_v57 = vpop.f32.mrf.mxu2  ;;  %v2508_v1 = vadd.f32 %v2507_v63, %v2394_v62  ;;  %v6104_v63 = vld [vmem:[%s6455_s4] ss:$0 sm:$0xff] }
 0x32b   : > { %2161 = vst.msk [vmem:[%s5449_s27 + $0xfc] sm:$0xf] %vm1179_vm4, %v2129_v59  ;;  %4774 = vmatmul.msk.bf16.gmra.mxu3 %vm1009_vm3, %v2903_v58  ;;  %v2817_v0 = vadd.f32 %v2764_v57, %v2506_v61  ;;  %v5137_v59 = vld [vmem:[%s5262_s25 + $0x1c0] sm:$0xff] }
 0x32d   : > { %v2849_v5 = vadd.f32 %v5974_v17, %v2817_v0 }
 0x32e   : > { %v2968_v44 = vpop.f32.mrf.mxu3 }
 0x32f   : > { %v2969_v60 = vadd.f32 %v5781_v40, %v2968_v44  ;;  %v2881_v13 = vmax.f32 %v2849_v5, 0.0 }
 0x331   : > { %v3048_v2 = vpack.c.bf16 %v2969_v60, %v2969_v60  ;;  %v2397_v8 = vpop.f32.mrf.mxu0  ;;  %v2510_v7 = vpop.f32.mrf.mxu1 }
 0x332   : > { %v2766_v4 = vpop.f32.mrf.mxu2  ;;  %v2511_v38 = vadd.f32 %v2510_v7, %v2397_v8 }
 0x333   : > { %3080 = vst.msk [vmem:[%s5449_s27 + $0x100] sm:$0xf] %vm1179_vm4, %v3048_v2  ;;  %v2818_v3 = vadd.f32 %v2766_v4, %v2508_v1 }
 0x334   : > { %4854 = vmatmul.msk.bf16.gmra.mxu0 %vm361_vm2, %v6054_v6  ;;  %4882 = vmatmul.msk.bf16.gmra.mxu1 %vm361_vm2, %v6018_v18 }
 0x335   : > { %v2850_v11 = vadd.f32 %v5974_v17, %v2818_v3 }
 0x336   : > { %v2970_v12 = vpop.f32.mrf.mxu3 }
 0x337   : > { %v2882_v14 = vmax.f32 %v2850_v11, 0.0  ;;  %v2971_v46 = vadd.f32 %v5781_v40, %v2970_v12  ;;  %4968 = vmatmul.msk.bf16.gmra.mxu2 %vm361_vm2, %v5135_v10  ;;  %v6113_v12 = vld [vmem:[%s5262_s25 + $0x1b8] sm:$0xff] }
 0x339   : > { %v2904_v9 = vpack.c.bf16 %v2882_v14, %v2881_v13  ;;  %v3049_v16 = vpack.c.bf16 %v2971_v46, %v2971_v46  ;;  %v2399_v22 = vpop.f32.mrf.mxu0  ;;  %v2512_v21 = vpop.f32.mrf.mxu1 }
 0x33a   : > { %v2769_v15 = vpop.f32.mrf.mxu2  ;;  %v2513_v24 = vadd.f32 %v2512_v21, %v2399_v22 }
 0x33b   : > { %3081 = vst.msk [vmem:[%s5449_s27 + $0x104] sm:$0xf] %vm1179_vm4, %v3049_v16  ;;  %4775 = vmatmul.msk.bf16.gmra.mxu3 %vm1009_vm3, %v2904_v9  ;;  %v2819_v23 = vadd.f32 %v2769_v15, %v2511_v38  ;;  %v5138_v16 = vld [vmem:[%s5262_s25 + $0x1c8] sm:$0xff] }
 0x33d   : > { %v2851_v27 = vadd.f32 %v5974_v17, %v2819_v23 }
 0x33e   : > { %v2973_v18 = vpop.f32.mrf.mxu3 }
 0x33f   : > { %v2974_v19 = vadd.f32 %v5781_v40, %v2973_v18  ;;  %v2883_v34 = vmax.f32 %v2851_v27, 0.0 }
 0x341   : > { %v3050_v20 = vpack.c.bf16 %v2974_v19, %v2974_v19  ;;  %v2402_v28 = vpop.f32.mrf.mxu0  ;;  %v2515_v56 = vpop.f32.mrf.mxu1 }
 0x342   : > { %v2771_v26 = vpop.f32.mrf.mxu2  ;;  %v2516_v33 = vadd.f32 %v2515_v56, %v2402_v28 }
 0x343   : > { %3082 = vst.msk [vmem:[%s5449_s27 + $0x108] sm:$0xf] %vm1179_vm4, %v3050_v20  ;;  %v2820_v29 = vadd.f32 %v2771_v26, %v2513_v24 }
 0x344   : > { %4855 = vmatmul.msk.bf16.gmra.mxu0 %vm361_vm2, %v6072_v25  ;;  %4883 = vmatmul.msk.bf16.gmra.mxu1 %vm361_vm2, %v6036_v42 }
 0x345   : > { %v2852_v30 = vadd.f32 %v5974_v17, %v2820_v29 }
 0x346   : > { %v2975_v32 = vpop.f32.mrf.mxu3 }
 0x347   : > { %v2884_v36 = vmax.f32 %v2852_v30, 0.0  ;;  %v2976_v35 = vadd.f32 %v5781_v40, %v2975_v32  ;;  %4969 = vmatmul.msk.bf16.gmra.mxu2 %vm361_vm2, %v5136_v31  ;;  %v6131_v32 = vld [vmem:[%s5262_s25 + $0x1c0] sm:$0xff] }
 0x349   : > { %v2905_v37 = vpack.c.bf16 %v2884_v36, %v2883_v34  ;;  %v3051_v39 = vpack.c.bf16 %v2976_v35, %v2976_v35  ;;  %v2404_v48 = vpop.f32.mrf.mxu0  ;;  %v2517_v43 = vpop.f32.mrf.mxu1 }
 0x34a   : > { %v2774_v41 = vpop.f32.mrf.mxu2  ;;  %v2518_v51 = vadd.f32 %v2517_v43, %v2404_v48 }
 0x34b   : > { %3083 = vst.msk [vmem:[%s5449_s27 + $0x10c] sm:$0xf] %vm1179_vm4, %v3051_v39  ;;  %4776 = vmatmul.msk.bf16.gmra.mxu3 %vm1009_vm3, %v2905_v37  ;;  %v2821_v50 = vadd.f32 %v2774_v41, %v2516_v33  ;;  %v5139_v39 = vld [vmem:[%s5262_s25 + $0x1d0] sm:$0xff] }
 0x34d   : > { %v2853_v53 = vadd.f32 %v5974_v17, %v2821_v50 }
 0x34e   : > { %v2978_v42 = vpop.f32.mrf.mxu3 }
 0x34f   : > { %v2979_v47 = vadd.f32 %v5781_v40, %v2978_v42  ;;  %v2885_v40 = vmax.f32 %v2853_v53, 0.0 }
 0x351   : > { %v3052_v45 = vpack.c.bf16 %v2979_v47, %v2979_v47  ;;  %v2407_v54 = vpop.f32.mrf.mxu0  ;;  %v2520_v58 = vpop.f32.mrf.mxu1 }
 0x352   : > { %v2776_v52 = vpop.f32.mrf.mxu2  ;;  %v2521_v2 = vadd.f32 %v2520_v58, %v2407_v54 }
 0x353   : > { %3084 = vst.msk [vmem:[%s5449_s27 + $0x110] sm:$0xf] %vm1179_vm4, %v3052_v45  ;;  %v2822_v55 = vadd.f32 %v2776_v52, %v2518_v51 }
 0x354   : > { %4856 = vmatmul.msk.bf16.gmra.mxu0 %vm361_vm2, %v6090_v49  ;;  %4884 = vmatmul.msk.bf16.gmra.mxu1 %vm361_vm2, %v6054_v6 }
 0x355   : > { %v2854_v57 = vadd.f32 %v5974_v17, %v2822_v55 }
 0x356   : > { %v2980_v61 = vpop.f32.mrf.mxu3 }
 0x357   : > { %v2886_v62 = vmax.f32 %v2854_v57, 0.0  ;;  %v2981_v44 = vadd.f32 %v6104_v63, %v2980_v61  ;;  %4970 = vmatmul.msk.bf16.gmra.mxu2 %vm361_vm2, %v5137_v59  ;;  %v6149_v61 = vld [vmem:[%s5262_s25 + $0x1c8] sm:$0xff] }
 0x359   : > { %v2906_v0 = vpack.c.bf16 %v2886_v62, %v2885_v40  ;;  %v3053_v60 = vpack.c.bf16 %v2981_v44, %v2981_v44  ;;  %v2409_v4 = vpop.f32.mrf.mxu0  ;;  %v2522_v6 = vpop.f32.mrf.mxu1 }
 0x35a   : > { %v2779_v1 = vpop.f32.mrf.mxu2  ;;  %v2523_v7 = vadd.f32 %v2522_v6, %v2409_v4 }
 0x35b   : > { %3085 = vst.msk [vmem:[%s5449_s27 + $0x114] sm:$0xf] %vm1179_vm4, %v3053_v60  ;;  %4777 = vmatmul.msk.bf16.gmra.mxu3 %vm1009_vm3, %v2906_v0  ;;  %v2823_v3 = vadd.f32 %v2779_v1, %v2521_v2  ;;  %v5140_v60 = vld [vmem:[%s5262_s25 + $0x1d8] sm:$0xff] }
 0x35d   : > { %v2855_v13 = vadd.f32 %v5974_v17, %v2823_v3 }
 0x35e   : > { %v2983_v5 = vpop.f32.mrf.mxu3 }
 0x35f   : > { %v2984_v8 = vadd.f32 %v6104_v63, %v2983_v5  ;;  %v2887_v22 = vmax.f32 %v2855_v13, 0.0 }
 0x361   : > { %v3054_v10 = vpack.c.bf16 %v2984_v8, %v2984_v8  ;;  %v2412_v46 = vpop.f32.mrf.mxu0  ;;  %v2525_v9 = vpop.f32.mrf.mxu1 }
 0x362   : > { %v2781_v11 = vpop.f32.mrf.mxu2  ;;  %v2526_v20 = vadd.f32 %v2525_v9, %v2412_v46 }
 0x363   : > { %3086 = vst.msk [vmem:[%s5449_s27 + $0x118] sm:$0xf] %vm1179_vm4, %v3054_v10  ;;  %v2824_v14 = vadd.f32 %v2781_v11, %v2523_v7 }
 0x364   : > { %4857 = vmatmul.msk.bf16.gmra.mxu0 %vm361_vm2, %v6113_v12  ;;  %4885 = vmatmul.msk.bf16.gmra.mxu1 %vm361_vm2, %v6072_v25 }
 0x365   : > { %v2856_v15 = vadd.f32 %v5974_v17, %v2824_v14 }
 0x366   : > { %v2985_v38 = vpop.f32.mrf.mxu3 }
 0x367   : > { %v2888_v21 = vmax.f32 %v2856_v15, 0.0  ;;  %v2986_v18 = vadd.f32 %v6104_v63, %v2985_v38  ;;  %4971 = vmatmul.msk.bf16.gmra.mxu2 %vm361_vm2, %v5138_v16  ;;  %v6167_v38 = vld [vmem:[%s5262_s25 + $0x1d0] sm:$0xff] }
 0x369   : > { %v2907_v23 = vpack.c.bf16 %v2888_v21, %v2887_v22  ;;  %v3055_v19 = vpack.c.bf16 %v2986_v18, %v2986_v18  ;;  %v2414_v26 = vpop.f32.mrf.mxu0  ;;  %v2527_v27 = vpop.f32.mrf.mxu1 }
 0x36a   : > { %v2784_v24 = vpop.f32.mrf.mxu2  ;;  %v2528_v56 = vadd.f32 %v2527_v27, %v2414_v26 }
 0x36b   : > { %3087 = vst.msk [vmem:[%s5449_s27 + $0x11c] sm:$0xf] %vm1179_vm4, %v3055_v19  ;;  %4778 = vmatmul.msk.bf16.gmra.mxu3 %vm1009_vm3, %v2907_v23  ;;  %v2825_v29 = vadd.f32 %v2784_v24, %v2526_v20  ;;  %v5141_v19 = vld [vmem:[%s5262_s25 + $0x1e0] sm:$0xff] }
 0x36d   : > { %v2857_v34 = vadd.f32 %v5974_v17, %v2825_v29 }
 0x36e   : > { %v2988_v25 = vpop.f32.mrf.mxu3 }
 0x36f   : > { %v2989_v28 = vadd.f32 %v6104_v63, %v2988_v25  ;;  %v2889_v48 = vmax.f32 %v2857_v34, 0.0 }
 0x371   : > { %v3056_v31 = vpack.c.bf16 %v2989_v28, %v2989_v28  ;;  %v2417_v35 = vpop.f32.mrf.mxu0  ;;  %v2530_v37 = vpop.f32.mrf.mxu1 }
 0x372   : > { %v2786_v30 = vpop.f32.mrf.mxu2  ;;  %v2531_v45 = vadd.f32 %v2530_v37, %v2417_v35 }
 0x373   : > { %3088 = vst.msk [vmem:[%s5449_s27 + $0x120] sm:$0xf] %vm1179_vm4, %v3056_v31  ;;  %v2826_v36 = vadd.f32 %v2786_v30, %v2528_v56 }
 0x374   : > { %4858 = vmatmul.msk.bf16.gmra.mxu0 %vm361_vm2, %v6131_v32  ;;  %4886 = vmatmul.msk.bf16.gmra.mxu1 %vm361_vm2, %v6090_v49 }
 0x375   : > { %v2858_v41 = vadd.f32 %v5974_v17, %v2826_v36 }
 0x376   : > { %v2990_v33 = vpop.f32.mrf.mxu3 }
 0x377   : > { %v2890_v43 = vmax.f32 %v2858_v41, 0.0  ;;  %v2991_v42 = vadd.f32 %v6104_v63, %v2990_v33  ;;  %4972 = vmatmul.msk.bf16.gmra.mxu2 %vm361_vm2, %v5139_v39  ;;  %v6185_v33 = vld [vmem:[%s5262_s25 + $0x1d8] sm:$0xff] }
 0x379   : > { %v2908_v50 = vpack.c.bf16 %v2890_v43, %v2889_v48  ;;  %v3057_v47 = vpack.c.bf16 %v2991_v42, %v2991_v42  ;;  %v2419_v52 = vpop.f32.mrf.mxu0  ;;  %v2532_v53 = vpop.f32.mrf.mxu1 }
 0x37a   : > { %v2789_v51 = vpop.f32.mrf.mxu2  ;;  %v2533_v58 = vadd.f32 %v2532_v53, %v2419_v52 }
 0x37b   : > { %3089 = vst.msk [vmem:[%s5449_s27 + $0x124] sm:$0xf] %vm1179_vm4, %v3057_v47  ;;  %4779 = vmatmul.msk.bf16.gmra.mxu3 %vm1009_vm3, %v2908_v50  ;;  %v2827_v55 = vadd.f32 %v2789_v51, %v2531_v45  ;;  %v5142_v47 = vld [vmem:[%s5262_s25 + $0x1e8] sm:$0xff] }
 0x37d   : > { %v2859_v40 = vadd.f32 %v5974_v17, %v2827_v55 }
 0x37e   : > { %v2993_v49 = vpop.f32.mrf.mxu3 }
 0x37f   : > { %v2994_v54 = vadd.f32 %v6104_v63, %v2993_v49  ;;  %v2891_v4 = vmax.f32 %v2859_v40, 0.0 }
 0x381   : > { %v3058_v59 = vpack.c.bf16 %v2994_v54, %v2994_v54  ;;  %v2422_v44 = vpop.f32.mrf.mxu0  ;;  %v2535_v0 = vpop.f32.mrf.mxu1 }
 0x382   : > { %v2791_v57 = vpop.f32.mrf.mxu2  ;;  %v2536_v10 = vadd.f32 %v2535_v0, %v2422_v44 }
 0x383   : > { %3090 = vst.msk [vmem:[%s5449_s27 + $0x128] sm:$0xf] %vm1179_vm4, %v3058_v59  ;;  %v2828_v62 = vadd.f32 %v2791_v57, %v2533_v58 }
 0x384   : > { %4859 = vmatmul.msk.bf16.gmra.mxu0 %vm361_vm2, %v6149_v61  ;;  %4887 = vmatmul.msk.bf16.gmra.mxu1 %vm361_vm2, %v6113_v12 }
 0x385   : > { %v2860_v1 = vadd.f32 %v5974_v17, %v2828_v62 }
 0x386   : > { %v2995_v2 = vpop.f32.mrf.mxu3 }
 0x387   : > { %v2892_v6 = vmax.f32 %v2860_v1, 0.0  ;;  %v2996_v5 = vadd.f32 %v6104_v63, %v2995_v2  ;;  %4973 = vmatmul.msk.bf16.gmra.mxu2 %vm361_vm2, %v5140_v60  ;;  %v6203_v2 = vld [vmem:[%s5262_s25 + $0x1e0] sm:$0xff] }
 0x389   : > { %v2909_v3 = vpack.c.bf16 %v2892_v6, %v2891_v4  ;;  %v3059_v8 = vpack.c.bf16 %v2996_v5, %v2996_v5  ;;  %v2424_v11 = vpop.f32.mrf.mxu0  ;;  %v2537_v13 = vpop.f32.mrf.mxu1 }
 0x38a   : > { %v2794_v7 = vpop.f32.mrf.mxu2  ;;  %v2538_v9 = vadd.f32 %v2537_v13, %v2424_v11 }
 0x38b   : > { %3091 = vst.msk [vmem:[%s5449_s27 + $0x12c] sm:$0xf] %vm1179_vm4, %v3059_v8  ;;  %4780 = vmatmul.msk.bf16.gmra.mxu3 %vm1009_vm3, %v2909_v3  ;;  %v2829_v14 = vadd.f32 %v2794_v7, %v2536_v10  ;;  %v5143_v8 = vld [vmem:[%s5262_s25 + $0x1f0] sm:$0xff] }
 0x38d   : > { %v2861_v22 = vadd.f32 %v5974_v17, %v2829_v14 }
 0x38e   : > { %v2998_v12 = vpop.f32.mrf.mxu3 }
 0x38f   : > { %v2999_v46 = vadd.f32 %v6104_v63, %v2998_v12  ;;  %v2893_v26 = vmax.f32 %v2861_v22, 0.0 }
 0x391   : > { %v3060_v16 = vpack.c.bf16 %v2999_v46, %v2999_v46  ;;  %v3297_v18 = vpop.f32.mrf.mxu0  ;;  %v3410_v23 = vpop.f32.mrf.mxu1 }
 0x392   : > { %v2796_v15 = vpop.f32.mrf.mxu2  ;;  %v3411_v31 = vadd.f32 %v3410_v23, %v3297_v18 }
 0x393   : > { %3092 = vst.msk [vmem:[%s5449_s27 + $0x130] sm:$0xf] %vm1179_vm4, %v3060_v16  ;;  %v2830_v21 = vadd.f32 %v2796_v15, %v2538_v9 }
 0x394   : > { %4860 = vmatmul.msk.bf16.gmra.mxu0 %vm361_vm2, %v6167_v38  ;;  %4888 = vmatmul.msk.bf16.gmra.mxu1 %vm361_vm2, %v6131_v32 }
 0x395   : > { %v2862_v24 = vadd.f32 %v5974_v17, %v2830_v21 }
 0x396   : > { %v3000_v20 = vpop.f32.mrf.mxu3 }
 0x397   : > { %v2894_v27 = vmax.f32 %v2862_v24, 0.0  ;;  %v3001_v25 = vadd.f32 %v6104_v63, %v3000_v20  ;;  %4974 = vmatmul.msk.bf16.gmra.mxu2 %vm361_vm2, %v5141_v19  ;;  %v6221_v20 = vld [vmem:[%s5262_s25 + $0x1e8] sm:$0xff] }
 0x399   : > { %v2910_v29 = vpack.c.bf16 %v2894_v27, %v2893_v26  ;;  %v3061_v28 = vpack.c.bf16 %v3001_v25, %v3001_v25  ;;  %v3299_v30 = vpop.f32.mrf.mxu0  ;;  %v3412_v34 = vpop.f32.mrf.mxu1 }
 0x39a   : > { %v3669_v56 = vpop.f32.mrf.mxu2  ;;  %v3413_v37 = vadd.f32 %v3412_v34, %v3299_v30 }
 0x39b   : > { %3093 = vst.msk [vmem:[%s5449_s27 + $0x134] sm:$0xf] %vm1179_vm4, %v3061_v28  ;;  %4781 = vmatmul.msk.bf16.gmra.mxu3 %vm1009_vm3, %v2910_v29  ;;  %v3749_v36 = vadd.f32 %v3669_v56, %v3411_v31  ;;  %v5144_v28 = vld [vmem:[%s5262_s25 + $0x1f8] sm:$0xff] }
 0x39d   : > { %v3781_v48 = vadd.f32 %v5974_v17, %v3749_v36 }
 0x39e   : > { %v3003_v32 = vpop.f32.mrf.mxu3 }
 0x39f   : > { %v3004_v35 = vadd.f32 %v6104_v63, %v3003_v32  ;;  %v3813_v52 = vmax.f32 %v3781_v48, 0.0 }
 0x3a1   : > { %v3062_v39 = vpack.c.bf16 %v3004_v35, %v3004_v35  ;;  %v3302_v42 = vpop.f32.mrf.mxu0  ;;  %v3415_v50 = vpop.f32.mrf.mxu1 }
 0x3a2   : > { %v3671_v41 = vpop.f32.mrf.mxu2  ;;  %v3416_v59 = vadd.f32 %v3415_v50, %v3302_v42 }
 0x3a3   : > { %3094 = vst.msk [vmem:[%s5449_s27 + $0x138] sm:$0xf] %vm1179_vm4, %v3062_v39  ;;  %v3750_v43 = vadd.f32 %v3671_v41, %v3413_v37 }
 0x3a4   : > { %4861 = vmatmul.msk.bf16.gmra.mxu0 %vm361_vm2, %v6185_v33  ;;  %4889 = vmatmul.msk.bf16.gmra.mxu1 %vm361_vm2, %v6149_v61 }
 0x3a5   : > { %v3782_v51 = vadd.f32 %v5974_v17, %v3750_v43 }
 0x3a6   : > { %v3005_v45 = vpop.f32.mrf.mxu3 }
 0x3a7   : > { %v3814_v53 = vmax.f32 %v3782_v51, 0.0  ;;  %v3006_v49 = vadd.f32 %v6104_v63, %v3005_v45  ;;  %4975 = vmatmul.msk.bf16.gmra.mxu2 %vm361_vm2, %v5142_v47  ;;  %v6239_v45 = vld [vmem:[%s5262_s25 + $0x1f0] sm:$0xff] }
 0x3a9   : > { %v3845_v55 = vpack.c.bf16 %v3814_v53, %v3813_v52  ;;  %v3063_v54 = vpack.c.bf16 %v3006_v49, %v3006_v49  ;;  %v3304_v57 = vpop.f32.mrf.mxu0  ;;  %v3417_v40 = vpop.f32.mrf.mxu1 }
 0x3aa   : > { %v3674_v58 = vpop.f32.mrf.mxu2  ;;  %v3418_v0 = vadd.f32 %v3417_v40, %v3304_v57 }
 0x3ab   : > { %3095 = vst.msk [vmem:[%s5449_s27 + $0x13c] sm:$0xf] %vm1179_vm4, %v3063_v54  ;;  %4982 = vmatmul.msk.bf16.vlgmr.msrb.gmra.mxu3 %vm1009_vm3, %v3845_v55  ;;  %v3751_v62 = vadd.f32 %v3674_v58, %v3416_v59  ;;  %v5145_v54 = vld [vmem:[%s5262_s25 + $0x200] sm:$0xff] }
 0x3ad   : > { %v3783_v4 = vadd.f32 %v5974_v17, %v3751_v62 }
 0x3ae   : > { %v3008_v61 = vpop.f32.mrf.mxu3 }
 0x3af   : > { %v3009_v44 = vadd.f32 %v6104_v63, %v3008_v61  ;;  %v3815_v11 = vmax.f32 %v3783_v4, 0.0 }
 0x3b1   : > { %v3064_v60 = vpack.c.bf16 %v3009_v44, %v3009_v44  ;;  %v3307_v5 = vpop.f32.mrf.mxu0  ;;  %v3420_v3 = vpop.f32.mrf.mxu1 }
 0x3b2   : > { %v3676_v1 = vpop.f32.mrf.mxu2  ;;  %v3421_v16 = vadd.f32 %v3420_v3, %v3307_v5 }
 0x3b3   : > { %3096 = vst.msk [vmem:[%s5449_s27 + $0x140] sm:$0xf] %vm1179_vm4, %v3064_v60  ;;  %v3752_v6 = vadd.f32 %v3676_v1, %v3418_v0 }
 0x3b4   : > { %4862 = vmatmul.msk.bf16.gmra.mxu0 %vm361_vm2, %v6203_v2  ;;  %4890 = vmatmul.msk.bf16.gmra.mxu1 %vm361_vm2, %v6167_v38 }
 0x3b5   : > { %v3784_v7 = vadd.f32 %v5974_v17, %v3752_v6 }
 0x3b6   : > { %v3010_v10 = vpop.f32.mrf.mxu3 }
 0x3b7   : > { %v3816_v13 = vmax.f32 %v3784_v7, 0.0  ;;  %v3011_v12 = vadd.f32 %v6104_v63, %v3010_v10  ;;  %4976 = vmatmul.msk.bf16.gmra.mxu2 %vm361_vm2, %v5143_v8  ;;  %v6257_v10 = vld [vmem:[%s5262_s25 + $0x1f8] sm:$0xff] }
 0x3b9   : > { %v3846_v14 = vpack.c.bf16 %v3816_v13, %v3815_v11  ;;  %v3065_v46 = vpack.c.bf16 %v3011_v12, %v3011_v12  ;;  %v3309_v15 = vpop.f32.mrf.mxu0  ;;  %v3422_v22 = vpop.f32.mrf.mxu1 }
 0x3ba   : > { %v3679_v9 = vpop.f32.mrf.mxu2  ;;  %v3423_v23 = vadd.f32 %v3422_v22, %v3309_v15 }
 0x3bb   : > { %3097 = vst.msk [vmem:[%s5449_s27 + $0x144] sm:$0xf] %vm1179_vm4, %v3065_v46  ;;  %4983 = vmatmul.msk.bf16.gmra.mxu3 %vm1009_vm3, %v3846_v14  ;;  %v3753_v21 = vadd.f32 %v3679_v9, %v3421_v16  ;;  %v5146_v46 = vld [vmem:[%s5262_s25 + $0x208] sm:$0xff] }
 0x3bd   : > { %v3785_v26 = vadd.f32 %v5974_v17, %v3753_v21 }
 0x3be   : > { %v3013_v38 = vpop.f32.mrf.mxu3 }
 0x3bf   : > { %v3014_v18 = vadd.f32 %v6104_v63, %v3013_v38  ;;  %v3817_v30 = vmax.f32 %v3785_v26, 0.0 }
 0x3c1   : > { %v3066_v19 = vpack.c.bf16 %v3014_v18, %v3014_v18  ;;  %v3312_v25 = vpop.f32.mrf.mxu0  ;;  %v3425_v29 = vpop.f32.mrf.mxu1 }
 0x3c2   : > { %v3681_v24 = vpop.f32.mrf.mxu2  ;;  %v3426_v39 = vadd.f32 %v3425_v29, %v3312_v25 }
 0x3c3   : > { %3098 = vst.msk [vmem:[%s5449_s27 + $0x148] sm:$0xf] %vm1179_vm4, %v3066_v19  ;;  %v3754_v27 = vadd.f32 %v3681_v24, %v3423_v23 }
 0x3c4   : > { %4863 = vmatmul.msk.bf16.gmra.mxu0 %vm361_vm2, %v6221_v20  ;;  %4891 = vmatmul.msk.bf16.gmra.mxu1 %vm361_vm2, %v6185_v33 }
 0x3c5   : > { %v3786_v56 = vadd.f32 %v5974_v17, %v3754_v27 }
 0x3c6   : > { %v3015_v31 = vpop.f32.mrf.mxu3 }
 0x3c7   : > { %v3818_v34 = vmax.f32 %v3786_v56, 0.0  ;;  %v3016_v32 = vadd.f32 %v6104_v63, %v3015_v31  ;;  %4977 = vmatmul.msk.bf16.gmra.mxu2 %vm361_vm2, %v5144_v28  ;;  %v5130_v31 = vld [vmem:[%s5262_s25 + $0x200] sm:$0xff] }
 0x3c9   : > { %v3847_v36 = vpack.c.bf16 %v3818_v34, %v3817_v30  ;;  %v3067_v35 = vpack.c.bf16 %v3016_v32, %v3016_v32  ;;  %v3314_v41 = vpop.f32.mrf.mxu0  ;;  %v3427_v48 = vpop.f32.mrf.mxu1 }
 0x3ca   : > { %v3684_v37 = vpop.f32.mrf.mxu2  ;;  %v3428_v50 = vadd.f32 %v3427_v48, %v3314_v41 }
 0x3cb   : > { %3099 = vst.msk [vmem:[%s5449_s27 + $0x14c] sm:$0xf] %vm1179_vm4, %v3067_v35  ;;  %4984 = vmatmul.msk.bf16.gmra.mxu3 %vm1009_vm3, %v3847_v36  ;;  %v3755_v43 = vadd.f32 %v3684_v37, %v3426_v39  ;;  %v5147_v35 = vld [vmem:[%s5262_s25 + $0x210] sm:$0xff] }
 0x3cd   : > { %v3787_v52 = vadd.f32 %v5974_v17, %v3755_v43 }
 0x3ce   : > { %v3018_v33 = vpop.f32.mrf.mxu3 }
 0x3cf   : > { %v3019_v42 = vadd.f32 %v6104_v63, %v3018_v33  ;;  %v3819_v57 = vmax.f32 %v3787_v52, 0.0 }
 0x3d1   : > { %v3068_v47 = vpack.c.bf16 %v3019_v42, %v3019_v42  ;;  %v3317_v49 = vpop.f32.mrf.mxu0  ;;  %v3430_v55 = vpop.f32.mrf.mxu1 }
 0x3d2   : > { %v3686_v51 = vpop.f32.mrf.mxu2  ;;  %v3431_v60 = vadd.f32 %v3430_v55, %v3317_v49 }
 0x3d3   : > { %3100 = vst.msk [vmem:[%s5449_s27 + $0x150] sm:$0xf] %vm1179_vm4, %v3068_v47  ;;  %v3756_v53 = vadd.f32 %v3686_v51, %v3428_v50 }
 0x3d4   : > { %4864 = vmatmul.msk.bf16.gmra.mxu0 %vm361_vm2, %v6239_v45  ;;  %4892 = vmatmul.msk.bf16.gmra.mxu1 %vm361_vm2, %v6203_v2 }
 0x3d5   : > { %v3788_v58 = vadd.f32 %v5974_v17, %v3756_v53 }
 0x3d6   : > { %v3020_v59 = vpop.f32.mrf.mxu3 }
 0x3d7   : > { %v3820_v40 = vmax.f32 %v3788_v58, 0.0  ;;  %v3021_v61 = vadd.f32 %v6104_v63, %v3020_v59  ;;  %4978 = vmatmul.msk.bf16.gmra.mxu2 %vm361_vm2, %v5145_v54  ;;  %v5131_v58 = vld [vmem:[%s5262_s25 + $0x208] sm:$0xff]  ;;  %v6293_v59 = vld [vmem:[%s6453_s2] ss:$0 sm:$0xff] }
 0x3d9   : > { %v3848_v62 = vpack.c.bf16 %v3820_v40, %v3819_v57  ;;  %v3069_v44 = vpack.c.bf16 %v3021_v61, %v3021_v61  ;;  %v3319_v1 = vpop.f32.mrf.mxu0  ;;  %v3432_v4 = vpop.f32.mrf.mxu1 }
 0x3da   : > { %v3689_v0 = vpop.f32.mrf.mxu2  ;;  %v3433_v3 = vadd.f32 %v3432_v4, %v3319_v1 }
 0x3db   : > { %3101 = vst.msk [vmem:[%s5449_s27 + $0x154] sm:$0xf] %vm1179_vm4, %v3069_v44  ;;  %4985 = vmatmul.msk.bf16.gmra.mxu3 %vm1009_vm3, %v3848_v62  ;;  %v3757_v6 = vadd.f32 %v3689_v0, %v3431_v60  ;;  %v5148_v44 = vld [vmem:[%s5262_s25 + $0x218] sm:$0xff] }
 0x3dd   : > { %v3789_v11 = vadd.f32 %v5974_v17, %v3757_v6 }
 0x3de   : > { %v3023_v2 = vpop.f32.mrf.mxu3 }
 0x3df   : > { %v3024_v5 = vadd.f32 %v6104_v63, %v3023_v2  ;;  %v3821_v15 = vmax.f32 %v3789_v11, 0.0 }
 0x3e1   : > { %v3070_v8 = vpack.c.bf16 %v3024_v5, %v3024_v5  ;;  %v3322_v12 = vpop.f32.mrf.mxu0  ;;  %v3435_v14 = vpop.f32.mrf.mxu1 }
 0x3e2   : > { %v3691_v7 = vpop.f32.mrf.mxu2  ;;  %v3436_v19 = vadd.f32 %v3435_v14, %v3322_v12 }
 0x3e3   : > { %3102 = vst.msk [vmem:[%s5449_s27 + $0x158] sm:$0xf] %vm1179_vm4, %v3070_v8  ;;  %v3758_v13 = vadd.f32 %v3691_v7, %v3433_v3 }
 0x3e4   : > { %4865 = vmatmul.msk.bf16.gmra.mxu0 %vm361_vm2, %v6257_v10  ;;  %4893 = vmatmul.msk.bf16.gmra.mxu1 %vm361_vm2, %v6221_v20 }
 0x3e5   : > { %v3790_v9 = vadd.f32 %v5974_v17, %v3758_v13 }
 0x3e6   : > { %v3025_v16 = vpop.f32.mrf.mxu3 }
 0x3e7   : > { %v3822_v22 = vmax.f32 %v3790_v9, 0.0  ;;  %v3026_v38 = vadd.f32 %v6104_v63, %v3025_v16  ;;  %4979 = vmatmul.msk.bf16.gmra.mxu2 %vm361_vm2, %v5146_v46 }
 0x3e9   : > { %v3849_v21 = vpack.c.bf16 %v3822_v22, %v3821_v15  ;;  %v3071_v18 = vpack.c.bf16 %v3026_v38, %v3026_v38  ;;  %v3324_v24 = vpop.f32.mrf.mxu0  ;;  %v3437_v26 = vpop.f32.mrf.mxu1 }
 0x3ea   : > { %v3694_v23 = vpop.f32.mrf.mxu2  ;;  %v3438_v29 = vadd.f32 %v3437_v26, %v3324_v24 }
 0x3eb   : > { %3103 = vst.msk [vmem:[%s5449_s27 + $0x15c] sm:$0xf] %vm1179_vm4, %v3071_v18  ;;  %4986 = vmatmul.msk.bf16.gmra.mxu3 %vm1009_vm3, %v3849_v21  ;;  %v3759_v27 = vadd.f32 %v3694_v23, %v3436_v19 }
 0x3ed   : > { %v3791_v30 = vadd.f32 %v5974_v17, %v3759_v27 }
 0x3ee   : > { %v3028_v20 = vpop.f32.mrf.mxu3 }
 0x3ef   : > { %v3029_v25 = vadd.f32 %v6104_v63, %v3028_v20  ;;  %v3823_v41 = vmax.f32 %v3791_v30, 0.0 }
 0x3f1   : > { %v3072_v28 = vpack.c.bf16 %v3029_v25, %v3029_v25  ;;  %v3327_v32 = vpop.f32.mrf.mxu0  ;;  %v3440_v36 = vpop.f32.mrf.mxu1 }
 0x3f2   : > { %v3696_v56 = vpop.f32.mrf.mxu2  ;;  %v3441_v47 = vadd.f32 %v3440_v36, %v3327_v32 }
 0x3f3   : > { %3104 = vst.msk [vmem:[%s5449_s27 + $0x160] sm:$0xf] %vm1179_vm4, %v3072_v28  ;;  %v3760_v34 = vadd.f32 %v3696_v56, %v3438_v29 }
 0x3f4   : > { %4866 = vmatmul.msk.bf16.gmra.mxu0 %vm361_vm2, %v5130_v31  ;;  %4894 = vmatmul.msk.bf16.gmra.mxu1 %vm361_vm2, %v6239_v45 }
 0x3f5   : > { %v3792_v37 = vadd.f32 %v5974_v17, %v3760_v34 }
 0x3f6   : > { %v3030_v39 = vpop.f32.mrf.mxu3 }
 0x3f7   : > { %v3824_v48 = vmax.f32 %v3792_v37, 0.0  ;;  %v3031_v33 = vadd.f32 %v6104_v63, %v3030_v39  ;;  %4980 = vmatmul.msk.bf16.gmra.mxu2 %vm361_vm2, %v5147_v35 }
 0x3f9   : > { %v3850_v43 = vpack.c.bf16 %v3824_v48, %v3823_v41  ;;  %v3073_v42 = vpack.c.bf16 %v3031_v33, %v3031_v33  ;;  %v3329_v17 = vpop.f32.mrf.mxu0  ;;  %v3442_v51 = vpop.f32.mrf.mxu1 }
 0x3fa   : > { %v3699_v50 = vpop.f32.mrf.mxu2  ;;  %v3443_v49 = vadd.f32 %v3442_v51, %v3329_v17 }
 0x3fb   : > { %3105 = vst.msk [vmem:[%s5449_s27 + $0x164] sm:$0xf] %vm1179_vm4, %v3073_v42  ;;  %4987 = vmatmul.msk.bf16.gmra.mxu3 %vm1009_vm3, %v3850_v43  ;;  %v3761_v52 = vadd.f32 %v3699_v50, %v3441_v47 }
 0x3fd   : > { %v3793_v57 = vadd.f32 %v6293_v59, %v3761_v52 }
 0x3fe   : > { %v3033_v45 = vpop.f32.mrf.mxu3 }
 0x3ff   : > { %v3034_v53 = vadd.f32 %v6104_v63, %v3033_v45  ;;  %v3825_v1 = vmax.f32 %v3793_v57, 0.0 }
 0x401   : > { %v3074_v55 = vpack.c.bf16 %v3034_v53, %v3034_v53  ;;  %v3332_v61 = vpop.f32.mrf.mxu0  ;;  %v3445_v62 = vpop.f32.mrf.mxu1 }
 0x402   : > { %v3701_v54 = vpop.f32.mrf.mxu2  ;;  %v3446_v8 = vadd.f32 %v3445_v62, %v3332_v61 }
 0x403   : > { %3106 = vst.msk [vmem:[%s5449_s27 + $0x168] sm:$0xf] %vm1179_vm4, %v3074_v55  ;;  %v3762_v40 = vadd.f32 %v3701_v54, %v3443_v49 }
 0x404   : > { %4867 = vmatmul.msk.bf16.gmra.mxu0 %vm361_vm2, %v5131_v58  ;;  %4895 = vmatmul.msk.bf16.gmra.mxu1 %vm361_vm2, %v6257_v10 }
 0x405   : > { %v3794_v0 = vadd.f32 %v6293_v59, %v3762_v40 }
 0x406   : > { %v3035_v60 = vpop.f32.mrf.mxu3 }
 0x407   : > { %v3826_v4 = vmax.f32 %v3794_v0, 0.0  ;;  %v3036_v2 = vadd.f32 %v6104_v63, %v3035_v60  ;;  %4981 = vmatmul.msk.bf16.gmra.mxu2 %vm361_vm2, %v5148_v44 }
 0x409   : > { %v3851_v6 = vpack.c.bf16 %v3826_v4, %v3825_v1  ;;  %v3075_v5 = vpack.c.bf16 %v3036_v2, %v3036_v2  ;;  %v3334_v7 = vpop.f32.mrf.mxu0  ;;  %v3447_v11 = vpop.f32.mrf.mxu1 }
 0x40a   : > { %v3704_v3 = vpop.f32.mrf.mxu2  ;;  %v3448_v14 = vadd.f32 %v3447_v11, %v3334_v7 }
 0x40b   : > { %3107 = vst.msk [vmem:[%s5449_s27 + $0x16c] sm:$0xf] %vm1179_vm4, %v3075_v5  ;;  %4988 = vmatmul.msk.bf16.gmra.mxu3 %vm1009_vm3, %v3851_v6  ;;  %v3763_v12 = vadd.f32 %v3704_v3, %v3446_v8 }
 0x40d   : > { %v3795_v16 = vadd.f32 %v6293_v59, %v3763_v12 }
 0x40e   : > { %v3038_v13 = vpop.f32.mrf.mxu3 }
 0x40f   : > { %v3039_v10 = vadd.f32 %v6104_v63, %v3038_v13  ;;  %v3827_v23 = vmax.f32 %v3795_v16, 0.0 }
 0x411   : > { %v3076_v46 = vpack.c.bf16 %v3039_v10, %v3039_v10  ;;  %v3337_v22 = vpop.f32.mrf.mxu0  ;;  %v3450_v38 = vpop.f32.mrf.mxu1 }
 0x412   : > { %v3706_v9 = vpop.f32.mrf.mxu2  ;;  %v3451_v25 = vadd.f32 %v3450_v38, %v3337_v22 }
 0x413   : > { %3108 = vst.msk [vmem:[%s5449_s27 + $0x170] sm:$0xf] %vm1179_vm4, %v3076_v46  ;;  %v3764_v15 = vadd.f32 %v3706_v9, %v3448_v14 }
 0x415   : > { %v3796_v21 = vadd.f32 %v6293_v59, %v3764_v15 }
 0x416   : > { %v3040_v18 = vpop.f32.mrf.mxu3 }
 0x417   : > { %v3828_v19 = vmax.f32 %v3796_v21, 0.0  ;;  %v3041_v24 = vadd.f32 %v6104_v63, %v3040_v18 }
 0x419   : > { %v3852_v26 = vpack.c.bf16 %v3828_v19, %v3827_v23  ;;  %v3077_v20 = vpack.c.bf16 %v3041_v24, %v3041_v24  ;;  %v3339_v29 = vpop.f32.mrf.mxu0  ;;  %v3452_v28 = vpop.f32.mrf.mxu1 }
 0x41a   : > { %v3709_v27 = vpop.f32.mrf.mxu2  ;;  %v3453_v34 = vadd.f32 %v3452_v28, %v3339_v29 }
 0x41b   : > { %3109 = vst.msk [vmem:[%s5449_s27 + $0x174] sm:$0xf] %vm1179_vm4, %v3077_v20  ;;  %4989 = vmatmul.msk.bf16.gmra.mxu3 %vm1009_vm3, %v3852_v26  ;;  %v3765_v31 = vadd.f32 %v3709_v27, %v3451_v25 }
 0x41d   : > { %v3797_v35 = vadd.f32 %v6293_v59, %v3765_v31 }
 0x41e   : > { %v3043_v56 = vpop.f32.mrf.mxu3 }
 0x41f   : > { %v3044_v30 = vadd.f32 %v6104_v63, %v3043_v56  ;;  %v3829_v43 = vmax.f32 %v3797_v35, 0.0 }
 0x421   : > { %v3078_v32 = vpack.c.bf16 %v3044_v30, %v3044_v30  ;;  %v3342_v39 = vpop.f32.mrf.mxu0  ;;  %v3455_v41 = vpop.f32.mrf.mxu1 }
 0x422   : > { %v3711_v36 = vpop.f32.mrf.mxu2  ;;  %v3456_v45 = vadd.f32 %v3455_v41, %v3342_v39 }
 0x423   : > { %3110 = vst.msk [vmem:[%s5449_s27 + $0x178] sm:$0xf] %vm1179_vm4, %v3078_v32  ;;  %v3766_v37 = vadd.f32 %v3711_v36, %v3453_v34 }
 0x425   : > { %v3798_v48 = vadd.f32 %v6293_v59, %v3766_v37 }
 0x426   : > { %v3045_v33 = vpop.f32.mrf.mxu3 }
 0x427   : > { %v3830_v42 = vmax.f32 %v3798_v48, 0.0  ;;  %v3046_v50 = vadd.f32 %v6104_v63, %v3045_v33 }
 0x429   : > { %v3853_v47 = vpack.c.bf16 %v3830_v42, %v3829_v43  ;;  %v3079_v17 = vpack.c.bf16 %v3046_v50, %v3046_v50  ;;  %v3344_v52 = vpop.f32.mrf.mxu0  ;;  %v3457_v53 = vpop.f32.mrf.mxu1 }
 0x42a   : > { %v3714_v51 = vpop.f32.mrf.mxu2  ;;  %v3458_v58 = vadd.f32 %v3457_v53, %v3344_v52 }
 0x42b   : > { %3111 = vst.msk [vmem:[%s5449_s27 + $0x17c] sm:$0xf] %vm1179_vm4, %v3079_v17  ;;  %4990 = vmatmul.msk.bf16.gmra.mxu3 %vm1009_vm3, %v3853_v47  ;;  %v3767_v55 = vadd.f32 %v3714_v51, %v3456_v45 }
 0x42d   : > { %v3799_v61 = vadd.f32 %v6293_v59, %v3767_v55 }
 0x42e   : > { %v3918_v49 = vpop.f32.mrf.mxu3 }
 0x42f   : > { %v3919_v54 = vadd.f32 %v6104_v63, %v3918_v49  ;;  %v3831_v4 = vmax.f32 %v3799_v61, 0.0 }
 0x431   : > { %v3998_v57 = vpack.c.bf16 %v3919_v54, %v3919_v54  ;;  %v3347_v44 = vpop.f32.mrf.mxu0  ;;  %v3460_v0 = vpop.f32.mrf.mxu1 }
 0x432   : > { %v3716_v40 = vpop.f32.mrf.mxu2  ;;  %v3461_v7 = vadd.f32 %v3460_v0, %v3347_v44 }
 0x433   : > { %4030 = vst.msk [vmem:[%s5449_s27 + $0x180] sm:$0xf] %vm1179_vm4, %v3998_v57  ;;  %v3768_v62 = vadd.f32 %v3716_v40, %v3458_v58 }
 0x435   : > { %v3800_v60 = vadd.f32 %v6293_v59, %v3768_v62 }
 0x436   : > { %v3920_v1 = vpop.f32.mrf.mxu3 }
 0x437   : > { %v3832_v2 = vmax.f32 %v3800_v60, 0.0  ;;  %v3921_v6 = vadd.f32 %v6104_v63, %v3920_v1 }
 0x439   : > { %v3854_v5 = vpack.c.bf16 %v3832_v2, %v3831_v4  ;;  %v3999_v3 = vpack.c.bf16 %v3921_v6, %v3921_v6  ;;  %v3349_v11 = vpop.f32.mrf.mxu0  ;;  %v3462_v13 = vpop.f32.mrf.mxu1 }
 0x43a   : > { %v3719_v8 = vpop.f32.mrf.mxu2  ;;  %v3463_v46 = vadd.f32 %v3462_v13, %v3349_v11 }
 0x43b   : > { %4031 = vst.msk [vmem:[%s5449_s27 + $0x184] sm:$0xf] %vm1179_vm4, %v3999_v3  ;;  %4991 = vmatmul.msk.bf16.gmra.mxu3 %vm1009_vm3, %v3854_v5  ;;  %v3769_v10 = vadd.f32 %v3719_v8, %v3461_v7 }
 0x43d   : > { %v3801_v15 = vadd.f32 %v6293_v59, %v3769_v10 }
 0x43e   : > { %v3923_v12 = vpop.f32.mrf.mxu3 }
 0x43f   : > { %v3924_v14 = vadd.f32 %v6104_v63, %v3923_v12  ;;  %v3833_v19 = vmax.f32 %v3801_v15, 0.0 }
 0x441   : > { %v4000_v9 = vpack.c.bf16 %v3924_v14, %v3924_v14  ;;  %v3352_v38 = vpop.f32.mrf.mxu0  ;;  %v3465_v21 = vpop.f32.mrf.mxu1 }
 0x442   : > { %v3721_v16 = vpop.f32.mrf.mxu2  ;;  %v3466_v29 = vadd.f32 %v3465_v21, %v3352_v38 }
 0x443   : > { %4032 = vst.msk [vmem:[%s5449_s27 + $0x188] sm:$0xf] %vm1179_vm4, %v4000_v9  ;;  %v3770_v22 = vadd.f32 %v3721_v16, %v3463_v46 }
 0x445   : > { %v3802_v18 = vadd.f32 %v6293_v59, %v3770_v22 }
 0x446   : > { %v3925_v23 = vpop.f32.mrf.mxu3 }
 0x447   : > { %v3834_v24 = vmax.f32 %v3802_v18, 0.0  ;;  %v3926_v26 = vadd.f32 %v6104_v63, %v3925_v23 }
 0x449   : > { %v3855_v20 = vpack.c.bf16 %v3834_v24, %v3833_v19  ;;  %v4001_v27 = vpack.c.bf16 %v3926_v26, %v3926_v26  ;;  %v3354_v28 = vpop.f32.mrf.mxu0  ;;  %v3467_v56 = vpop.f32.mrf.mxu1 }
 0x44a   : > { %v3724_v25 = vpop.f32.mrf.mxu2  ;;  %v3468_v32 = vadd.f32 %v3467_v56, %v3354_v28 }
 0x44b   : > { %4033 = vst.msk [vmem:[%s5449_s27 + $0x18c] sm:$0xf] %vm1179_vm4, %v4001_v27  ;;  %4992 = vmatmul.msk.bf16.gmra.mxu3 %vm1009_vm3, %v3855_v20  ;;  %v3771_v30 = vadd.f32 %v3724_v25, %v3466_v29 }
 0x44d   : > { %v3803_v37 = vadd.f32 %v6293_v59, %v3771_v30 }
 0x44e   : > { %v3928_v31 = vpop.f32.mrf.mxu3 }
 0x44f   : > { %v3929_v34 = vadd.f32 %v6104_v63, %v3928_v31  ;;  %v3835_v42 = vmax.f32 %v3803_v37, 0.0 }
 0x451   : > { %v4002_v36 = vpack.c.bf16 %v3929_v34, %v3929_v34  ;;  %v3357_v41 = vpop.f32.mrf.mxu0  ;;  %v3470_v48 = vpop.f32.mrf.mxu1 }
 0x452   : > { %v3726_v35 = vpop.f32.mrf.mxu2  ;;  %v3471_v52 = vadd.f32 %v3470_v48, %v3357_v41 }
 0x453   : > { %4034 = vst.msk [vmem:[%s5449_s27 + $0x190] sm:$0xf] %vm1179_vm4, %v4002_v36  ;;  %v3772_v39 = vadd.f32 %v3726_v35, %v3468_v32 }
 0x455   : > { %v3804_v33 = vadd.f32 %v6293_v59, %v3772_v39 }
 0x456   : > { %v3930_v43 = vpop.f32.mrf.mxu3 }
 0x457   : > { %v3836_v50 = vmax.f32 %v3804_v33, 0.0  ;;  %v3931_v47 = vadd.f32 %v6104_v63, %v3930_v43 }
 0x459   : > { %v3856_v17 = vpack.c.bf16 %v3836_v50, %v3835_v42  ;;  %v4003_v51 = vpack.c.bf16 %v3931_v47, %v3931_v47  ;;  %v3359_v53 = vpop.f32.mrf.mxu0  ;;  %v3472_v49 = vpop.f32.mrf.mxu1 }
 0x45a   : > { %v3729_v45 = vpop.f32.mrf.mxu2  ;;  %v3473_v57 = vadd.f32 %v3472_v49, %v3359_v53 }
 0x45b   : > { %4035 = vst.msk [vmem:[%s5449_s27 + $0x194] sm:$0xf] %vm1179_vm4, %v4003_v51  ;;  %4993 = vmatmul.msk.bf16.gmra.mxu3 %vm1009_vm3, %v3856_v17  ;;  %v3773_v54 = vadd.f32 %v3729_v45, %v3471_v52 }
 0x45d   : > { %v3805_v62 = vadd.f32 %v6293_v59, %v3773_v54 }
 0x45e   : > { %v3933_v55 = vpop.f32.mrf.mxu3 }
 0x45f   : > { %v3934_v58 = vadd.f32 %v6104_v63, %v3933_v55  ;;  %v3837_v2 = vmax.f32 %v3805_v62, 0.0 }
 0x461   : > { %v4004_v40 = vpack.c.bf16 %v3934_v58, %v3934_v58  ;;  %v3362_v0 = vpop.f32.mrf.mxu0  ;;  %v3475_v60 = vpop.f32.mrf.mxu1 }
 0x462   : > { %v3731_v61 = vpop.f32.mrf.mxu2  ;;  %v3476_v11 = vadd.f32 %v3475_v60, %v3362_v0 }
 0x463   : > { %4036 = vst.msk [vmem:[%s5449_s27 + $0x198] sm:$0xf] %vm1179_vm4, %v4004_v40  ;;  %v3774_v44 = vadd.f32 %v3731_v61, %v3473_v57 }
 0x465   : > { %v3806_v1 = vadd.f32 %v6293_v59, %v3774_v44 }
 0x466   : > { %v3935_v4 = vpop.f32.mrf.mxu3 }
 0x467   : > { %v3838_v6 = vmax.f32 %v3806_v1, 0.0  ;;  %v3936_v5 = vadd.f32 %v6104_v63, %v3935_v4 }
 0x469   : > { %v3857_v3 = vpack.c.bf16 %v3838_v6, %v3837_v2  ;;  %v4005_v8 = vpack.c.bf16 %v3936_v5, %v3936_v5  ;;  %v3364_v13 = vpop.f32.mrf.mxu0  ;;  %v3477_v12 = vpop.f32.mrf.mxu1 }
 0x46a   : > { %v3734_v7 = vpop.f32.mrf.mxu2  ;;  %v3478_v9 = vadd.f32 %v3477_v12, %v3364_v13 }
 0x46b   : > { %4037 = vst.msk [vmem:[%s5449_s27 + $0x19c] sm:$0xf] %vm1179_vm4, %v4005_v8  ;;  %4994 = vmatmul.msk.bf16.gmra.mxu3 %vm1009_vm3, %v3857_v3  ;;  %v3775_v14 = vadd.f32 %v3734_v7, %v3476_v11 }
 0x46d   : > { %v3807_v22 = vadd.f32 %v6293_v59, %v3775_v14 }
 0x46e   : > { %v3938_v10 = vpop.f32.mrf.mxu3 }
 0x46f   : > { %v3939_v46 = vadd.f32 %v6104_v63, %v3938_v10  ;;  %v3839_v24 = vmax.f32 %v3807_v22, 0.0 }
 0x471   : > { %v4006_v16 = vpack.c.bf16 %v3939_v46, %v3939_v46  ;;  %v3367_v21 = vpop.f32.mrf.mxu0  ;;  %v3480_v18 = vpop.f32.mrf.mxu1 }
 0x472   : > { %v3736_v15 = vpop.f32.mrf.mxu2  ;;  %v3481_v28 = vadd.f32 %v3480_v18, %v3367_v21 }
 0x473   : > { %4038 = vst.msk [vmem:[%s5449_s27 + $0x1a0] sm:$0xf] %vm1179_vm4, %v4006_v16  ;;  %v3776_v38 = vadd.f32 %v3736_v15, %v3478_v9 }
 0x475   : > { %v3808_v23 = vadd.f32 %v6293_v59, %v3776_v38 }
 0x476   : > { %v3940_v19 = vpop.f32.mrf.mxu3 }
 0x477   : > { %v3840_v26 = vmax.f32 %v3808_v23, 0.0  ;;  %v3941_v20 = vadd.f32 %v6104_v63, %v3940_v19 }
 0x479   : > { %v3858_v27 = vpack.c.bf16 %v3840_v26, %v3839_v24  ;;  %v4007_v25 = vpack.c.bf16 %v3941_v20, %v3941_v20  ;;  %v3369_v56 = vpop.f32.mrf.mxu0  ;;  %v3482_v31 = vpop.f32.mrf.mxu1 }
 0x47a   : > { %v3739_v29 = vpop.f32.mrf.mxu2  ;;  %v3483_v36 = vadd.f32 %v3482_v31, %v3369_v56 }
 0x47b   : > { %4039 = vst.msk [vmem:[%s5449_s27 + $0x1a4] sm:$0xf] %vm1179_vm4, %v4007_v25  ;;  %4995 = vmatmul.msk.bf16.gmra.mxu3 %vm1009_vm3, %v3858_v27  ;;  %v3777_v34 = vadd.f32 %v3739_v29, %v3481_v28 }
 0x47d   : > { %v3809_v39 = vadd.f32 %v6293_v59, %v3777_v34 }
 0x47e   : > { %v3943_v30 = vpop.f32.mrf.mxu3 }
 0x47f   : > { %v3944_v32 = vadd.f32 %v6104_v63, %v3943_v30  ;;  %v3841_v50 = vmax.f32 %v3809_v39, 0.0  ;;  %v6379_v63 = vld [vmem:[%s6455_s4] ss:$0 sm:$0xff] }
 0x481   : > { %v4008_v35 = vpack.c.bf16 %v3944_v32, %v3944_v32  ;;  %v3372_v48 = vpop.f32.mrf.mxu0  ;;  %v3485_v33 = vpop.f32.mrf.mxu1 }
 0x482   : > { %v3741_v37 = vpop.f32.mrf.mxu2  ;;  %v3486_v53 = vadd.f32 %v3485_v33, %v3372_v48 }
 0x483   : > { %4040 = vst.msk [vmem:[%s5449_s27 + $0x1a8] sm:$0xf] %vm1179_vm4, %v4008_v35  ;;  %v3778_v41 = vadd.f32 %v3741_v37, %v3483_v36 }
 0x485   : > { %v3810_v43 = vadd.f32 %v6293_v59, %v3778_v41 }
 0x486   : > { %v3945_v42 = vpop.f32.mrf.mxu3 }
 0x487   : > { %v3842_v47 = vmax.f32 %v3810_v43, 0.0  ;;  %v3946_v17 = vadd.f32 %v6379_v63, %v3945_v42 }
 0x489   : > { %v3859_v51 = vpack.c.bf16 %v3842_v47, %v3841_v50  ;;  %v4009_v45 = vpack.c.bf16 %v3946_v17, %v3946_v17  ;;  %v3374_v49 = vpop.f32.mrf.mxu0  ;;  %v3487_v55 = vpop.f32.mrf.mxu1 }
 0x48a   : > { %v3744_v52 = vpop.f32.mrf.mxu2  ;;  %v3488_v40 = vadd.f32 %v3487_v55, %v3374_v49 }
 0x48b   : > { %4041 = vst.msk [vmem:[%s5449_s27 + $0x1ac] sm:$0xf] %vm1179_vm4, %v4009_v45  ;;  %4996 = vmatmul.msk.bf16.gmra.mxu3 %vm1009_vm3, %v3859_v51  ;;  %v3779_v58 = vadd.f32 %v3744_v52, %v3486_v53 }
 0x48d   : > { %v3811_v44 = vadd.f32 %v6293_v59, %v3779_v58 }
 0x48e   : > { %v3948_v54 = vpop.f32.mrf.mxu3 }
 0x48f   : > { %v3949_v57 = vadd.f32 %v6379_v63, %v3948_v54  ;;  %v3843_v4 = vmax.f32 %v3811_v44, 0.0 }
 0x491   : > { %v4010_v61 = vpack.c.bf16 %v3949_v57, %v3949_v57 }
 0x492   : > { %v3746_v62 = vpop.f32.mrf.mxu2 }
 0x493   : > { %4042 = vst.msk [vmem:[%s5449_s27 + $0x1b0] sm:$0xf] %vm1179_vm4, %v4010_v61  ;;  %v3780_v0 = vadd.f32 %v3746_v62, %v3488_v40 }
 0x495   : > { %v3812_v60 = vadd.f32 %v6293_v59, %v3780_v0 }
 0x496   : > { %v3950_v1 = vpop.f32.mrf.mxu3 }
 0x497   : > { %v3844_v2 = vmax.f32 %v3812_v60, 0.0  ;;  %v3951_v6 = vadd.f32 %v6379_v63, %v3950_v1 }
 0x499   : > { %v3860_v5 = vpack.c.bf16 %v3844_v2, %v3843_v4  ;;  %v4011_v3 = vpack.c.bf16 %v3951_v6, %v3951_v6 }
 0x49b   : > { %4043 = vst.msk [vmem:[%s5449_s27 + $0x1b4] sm:$0xf] %vm1179_vm4, %v4011_v3  ;;  %4997 = vmatmul.msk.bf16.gmra.mxu3 %vm1009_vm3, %v3860_v5 }
 0x49e   : > { %v3953_v8 = vpop.f32.mrf.mxu3 }
 0x49f   : > { %v3954_v7 = vadd.f32 %v6379_v63, %v3953_v8 }
 0x4a1   : > { %v4012_v11 = vpack.c.bf16 %v3954_v7, %v3954_v7 }
 0x4a3   : > { %4044 = vst.msk [vmem:[%s5449_s27 + $0x1b8] sm:$0xf] %vm1179_vm4, %v4012_v11 }
 0x4a6   : > { %v3955_v59 = vpop.f32.mrf.mxu3 }
 0x4a7   : > { %v3956_v13 = vadd.f32 %v6379_v63, %v3955_v59 }
 0x4a9   : > { %v4013_v12 = vpack.c.bf16 %v3956_v13, %v3956_v13 }
 0x4ab   : > { %4045 = vst.msk [vmem:[%s5449_s27 + $0x1bc] sm:$0xf] %vm1179_vm4, %v4013_v12 }
 0x4ae   : > { %v3958_v10 = vpop.f32.mrf.mxu3 }
 0x4af   : > { %v3959_v14 = vadd.f32 %v6379_v63, %v3958_v10 }
 0x4b1   : > { %v4014_v46 = vpack.c.bf16 %v3959_v14, %v3959_v14 }
 0x4b3   : > { %4046 = vst.msk [vmem:[%s5449_s27 + $0x1c0] sm:$0xf] %vm1179_vm4, %v4014_v46 }
 0x4b6   : > { %v3960_v9 = vpop.f32.mrf.mxu3 }
 0x4b7   : > { %v3961_v16 = vadd.f32 %v6379_v63, %v3960_v9 }
 0x4b9   : > { %v4015_v15 = vpack.c.bf16 %v3961_v16, %v3961_v16 }
 0x4bb   : > { %4047 = vst.msk [vmem:[%s5449_s27 + $0x1c4] sm:$0xf] %vm1179_vm4, %v4015_v15 }
 0x4be   : > { %v3963_v22 = vpop.f32.mrf.mxu3 }
 0x4bf   : > { %v3964_v38 = vadd.f32 %v6379_v63, %v3963_v22 }
 0x4c1   : > { %v4016_v21 = vpack.c.bf16 %v3964_v38, %v3964_v38 }
 0x4c3   : > { %4048 = vst.msk [vmem:[%s5449_s27 + $0x1c8] sm:$0xf] %vm1179_vm4, %v4016_v21 }
 0x4c6   : > { %v3965_v18 = vpop.f32.mrf.mxu3 }
 0x4c7   : > { %v3966_v23 = vadd.f32 %v6379_v63, %v3965_v18 }
 0x4c9   : > { %v4017_v19 = vpack.c.bf16 %v3966_v23, %v3966_v23 }
 0x4cb   : > { %4049 = vst.msk [vmem:[%s5449_s27 + $0x1cc] sm:$0xf] %vm1179_vm4, %v4017_v19 }
 0x4ce   : > { %v3968_v24 = vpop.f32.mrf.mxu3 }
 0x4cf   : > { %v3969_v26 = vadd.f32 %v6379_v63, %v3968_v24 }
 0x4d1   : > { %v4018_v20 = vpack.c.bf16 %v3969_v26, %v3969_v26 }
 0x4d3   : > { %4050 = vst.msk [vmem:[%s5449_s27 + $0x1d0] sm:$0xf] %vm1179_vm4, %v4018_v20 }
 0x4d6   : > { %v3970_v27 = vpop.f32.mrf.mxu3 }
 0x4d7   : > { %v3971_v25 = vadd.f32 %v6379_v63, %v3970_v27 }
 0x4d9   : > { %v4019_v29 = vpack.c.bf16 %v3971_v25, %v3971_v25 }
 0x4db   : > { %4051 = vst.msk [vmem:[%s5449_s27 + $0x1d4] sm:$0xf] %vm1179_vm4, %v4019_v29 }
 0x4de   : > { %v3973_v28 = vpop.f32.mrf.mxu3 }
 0x4df   : > { %v3974_v56 = vadd.f32 %v6379_v63, %v3973_v28 }
 0x4e1   : > { %v4020_v31 = vpack.c.bf16 %v3974_v56, %v3974_v56 }
 0x4e3   : > { %4052 = vst.msk [vmem:[%s5449_s27 + $0x1d8] sm:$0xf] %vm1179_vm4, %v4020_v31 }
 0x4e6   : > { %v3975_v30 = vpop.f32.mrf.mxu3 }
 0x4e7   : > { %v3976_v34 = vadd.f32 %v6379_v63, %v3975_v30 }
 0x4e9   : > { %v4021_v32 = vpack.c.bf16 %v3976_v34, %v3976_v34 }
 0x4eb   : > { %4053 = vst.msk [vmem:[%s5449_s27 + $0x1dc] sm:$0xf] %vm1179_vm4, %v4021_v32 }
 0x4ee   : > { %v3978_v36 = vpop.f32.mrf.mxu3 }
 0x4ef   : > { %v3979_v35 = vadd.f32 %v6379_v63, %v3978_v36 }
 0x4f1   : > { %v4022_v37 = vpack.c.bf16 %v3979_v35, %v3979_v35 }
 0x4f3   : > { %4054 = vst.msk [vmem:[%s5449_s27 + $0x1e0] sm:$0xf] %vm1179_vm4, %v4022_v37 }
 0x4f6   : > { %v3980_v39 = vpop.f32.mrf.mxu3 }
 0x4f7   : > { %v3981_v41 = vadd.f32 %v6379_v63, %v3980_v39 }
 0x4f9   : > { %v4023_v48 = vpack.c.bf16 %v3981_v41, %v3981_v41 }
 0x4fb   : > { %4055 = vst.msk [vmem:[%s5449_s27 + $0x1e4] sm:$0xf] %vm1179_vm4, %v4023_v48 }
 0x4fe   : > { %v3983_v33 = vpop.f32.mrf.mxu3 }
 0x4ff   : > { %v3984_v43 = vadd.f32 %v6379_v63, %v3983_v33 }
 0x501   : > { %v4024_v42 = vpack.c.bf16 %v3984_v43, %v3984_v43 }
 0x503   : > { %4056 = vst.msk [vmem:[%s5449_s27 + $0x1e8] sm:$0xf] %vm1179_vm4, %v4024_v42 }
 0x506   : > { %v3985_v50 = vpop.f32.mrf.mxu3 }
 0x507   : > { %v3986_v47 = vadd.f32 %v6379_v63, %v3985_v50 }
 0x509   : > { %v4025_v17 = vpack.c.bf16 %v3986_v47, %v3986_v47 }
 0x50b   : > { %4057 = vst.msk [vmem:[%s5449_s27 + $0x1ec] sm:$0xf] %vm1179_vm4, %v4025_v17 }
 0x50e   : > { %v3988_v51 = vpop.f32.mrf.mxu3 }
 0x50f   : > { %v3989_v45 = vadd.f32 %v6379_v63, %v3988_v51 }
 0x511   : > { %v4026_v52 = vpack.c.bf16 %v3989_v45, %v3989_v45 }
 0x513   : > { %4058 = vst.msk [vmem:[%s5449_s27 + $0x1f0] sm:$0xf] %vm1179_vm4, %v4026_v52 }
 0x516   : > { %v3990_v53 = vpop.f32.mrf.mxu3 }
 0x517   : > { %v3991_v49 = vadd.f32 %v6379_v63, %v3990_v53 }
 0x519   : > { %v4027_v55 = vpack.c.bf16 %v3991_v49, %v3991_v49 }
 0x51b   : > { %4059 = vst.msk [vmem:[%s5449_s27 + $0x1f4] sm:$0xf] %vm1179_vm4, %v4027_v55 }
 0x51e   : > { %v3993_v54 = vpop.f32.mrf.mxu3 }
 0x51f   : > { %v3994_v58 = vadd.f32 %v6379_v63, %v3993_v54 }
 0x521   : > { %v4028_v57 = vpack.c.bf16 %v3994_v58, %v3994_v58 }
 0x523   : > { %4060 = vst.msk [vmem:[%s5449_s27 + $0x1f8] sm:$0xf] %vm1179_vm4, %v4028_v57 }
 0x526   : > { %v3995_v40 = vpop.f32.mrf.mxu3 }
 0x527   : > { %v3996_v61 = vadd.f32 %v6379_v63, %v3995_v40 }
 0x529   : > { %v4029_v62 = vpack.c.bf16 %v3996_v61, %v3996_v61 }
 0x52b   : > { %4061 = vst.msk [vmem:[%s5449_s27 + $0x1fc] sm:$0xf] %vm1179_vm4, %v4029_v62 }
 0x52c PF: > { %s15_s18 = sadd.s32 1, %s5173_s18  }
 0x52d   : > { %p12_p5 = scmp.ge.s32.totalorder %s15_s18, 4  }
 0x52f   :  { %14 = sbr.rel (!%p12_p5) target bundleno = 1 (0x1), region = 72 }

// kernel: custom-call
= control target key start
LH: loop header
LB: loop body
LE: loop exit
PB: predicated region body
PF: predicated region fallthrough
CT: control target
= control target key end

     0   :  { %5 = vsyncpa [#allocation9], 0  ;;  %v1006_v0 = vmov 2147483648   ;;  %v1007_v1 = vmov 2147483647   ;;  %s1129_s0 = inlined_call_operand.vmem [shape: f32[2,1024], index: 0, kind: input, shape index: {}]   ;;  %s1130_s1 = inlined_call_operand.hbm [shape: f32[2,4], index: 1, kind: output, shape index: {0}]   ;;  %s1131_s2 = inlined_call_operand.vmem [shape: s32[2,4], index: 2, kind: output, shape index: {1}]  }
   0x1   :  { %7 = vst [vmem:[#allocation12] sm:$0xff] %v1006_v0 }
   0x2   :  { %8 = vst [vmem:[#allocation14] sm:$0xff] %v1007_v1 }
   0x3   :  { %v34_v2 = vlaneseq  ;;  %v25_v3 = vld [vmem:[%s1129_s0] sm:$0xff]  ;;  %v1008_v5 = vmov 2147483648   ;;  %v27_v6 = vld [vmem:[%s1129_s0 + $0x8] sm:$0xff]  ;;  %v1009_v7 = vmov 2147483647   ;;  %s1042_s0 = smov 0  }
   0x4   :  { %75 = vst [vmem:[#allocation13] sm:$0xff] %v1008_v5  ;;  %v45_v10 = vsub.s32 2147483647, %v25_v3  ;;  %vm44_vm0 = vcmp.lt.s32.totalorder %v25_v3, 0  ;;  %v54_v12 = vsub.s32 2147483647, %v27_v6 }
   0x5   :  { %v1035_v4 = vshrl.u32 %v34_v2, 7  ;;  %76 = vst [vmem:[#allocation15] sm:$0xff] %v1009_v7  ;;  %v35_v8 = vand.u32 127, %v34_v2  ;;  %vm53_vm1 = vcmp.lt.s32.totalorder %v27_v6, 0 }
   0x6   :  { %v46_v14 = vsel %vm44_vm0, %v45_v10, %v25_v3  ;;  %v55_v15 = vsel %vm53_vm1, %v54_v12, %v27_v6 }
   0x7   :  { %v38_v9 = vshrl.u32 %v1035_v4, 1 }
   0x9   :  { %v40_v11 = vmul.u32 128, %v38_v9 }
   0xb   :  { %v41_v13 = vadd.s32 %v40_v11, %v35_v8 }
   0xd   :  { %vm48_vm2 = vcmp.lt.s32.totalorder %v41_v13, 1024  ;;  %v56_v16 = vadd.s32 512, %v41_v13  ;;  %70 = vst [vmem:[#allocation17] sm:$0xff] %v41_v13 }
   0xe   :  { %v49_v17 = vsel %vm48_vm2, %v46_v14, 2147483648 }
   0xf   :  { %50 = vst [vmem:[#allocation16] sm:$0xff] %v49_v17  ;;  %vm57_vm3 = vcmp.lt.s32.totalorder %v56_v16, 1024 }
  0x10   :  { %v58_v18 = vsel %vm57_vm3, %v55_v15, 2147483648  ;;  %73 = vst [vmem:[#allocation17 + $0x8] sm:$0xff] %v56_v16 }
  0x11   :  { %59 = vst [vmem:[#allocation16 + $0x8] sm:$0xff] %v58_v18 }
  0x12 LB: > { %s410_s13 = scalar_lea.vmem [#allocation13], %s1004_s0  ;;  %s412_s14 = scalar_lea.vmem [#allocation15], %s1004_s0  ;;  %s1004_s0 = sphi %s1042_s0, %s83_s0  }
  0x13   : > { %s83_s0 = sadd.s32 1, %s1004_s0  }
  0x14   : > { %v85_v20 = vld [vmem:[#allocation17] sm:$0xff]  ;;  %p80_p2 = scmp.ge.s32.totalorder %s83_s0, 4  }
  0x15   :  { %s1015_s0 = smov (%p80_p2), [#allocation8]  }
  0x16   : > { %v84_v19 = vld [vmem:[#allocation16] sm:$0xff] }
  0x17   : > { %v90_v22 = vld [vmem:[#allocation17 + $0x8] sm:$0xff] }
  0x18   : > { %v88_v21 = vld [vmem:[#allocation16 + $0x8] sm:$0xff]  ;;  %vm94_vm6 = vcmp.lt.s32.totalorder %v90_v22, %v85_v20 }
  0x19   : > { %vm92_vm4 = vcmp.gt.s32.totalorder %v88_v21, %v84_v19  ;;  %vm93_vm5 = vcmp.eq.s32.totalorder %v88_v21, %v84_v19 }
  0x1a   : > { %vm95_vm7 = vmand %vm93_vm5, %vm94_vm6 }
  0x1b   : > { %vm96_vm8 = vmor %vm92_vm4, %vm95_vm7 }
  0x1c   : > { %v97_v23 = vsel %vm96_vm8, %v88_v21, %v84_v19  ;;  %v98_v24 = vsel %vm96_vm8, %v90_v22, %v85_v20 }
  0x1d   : > { %v100_v25 = vrot.slane %v97_v23, 2  ;;  %v101_v26 = vrot.slane %v98_v24, 2 }
  0x1f   : > { %vm103_vm9 = vcmp.gt.s32.totalorder %v100_v25, %v97_v23  ;;  %vm104_vm10 = vcmp.eq.s32.totalorder %v100_v25, %v97_v23  ;;  %vm105_vm11 = vcmp.lt.s32.totalorder %v101_v26, %v98_v24 }
  0x20   : > { %vm106_vm12 = vmand %vm104_vm10, %vm105_vm11 }
  0x21   : > { %vm107_vm13 = vmor %vm103_vm9, %vm106_vm12 }
  0x22   : > { %v108_v27 = vsel %vm107_vm13, %v100_v25, %v97_v23  ;;  %v109_v28 = vsel %vm107_vm13, %v101_v26, %v98_v24 }
  0x23   : > { %v111_v29 = vrot.slane %v108_v27, 2  ;;  %v112_v30 = vrot.slane %v109_v28, 2 }
  0x25   : > { %vm114_vm14 = vcmp.gt.s32.totalorder %v111_v29, %v108_v27  ;;  %vm115_vm15 = vcmp.eq.s32.totalorder %v111_v29, %v108_v27  ;;  %vm116_vm0 = vcmp.lt.s32.totalorder %v112_v30, %v109_v28 }
  0x26   : > { %vm117_vm1 = vmand %vm115_vm15, %vm116_vm0 }
  0x27   : > { %vm118_vm2 = vmor %vm114_vm14, %vm117_vm1 }
  0x28   : > { %v119_v31 = vsel %vm118_vm2, %v111_v29, %v108_v27  ;;  %v120_v32 = vsel %vm118_vm2, %v112_v30, %v109_v28 }
  0x29   : > { %v122_v33 = vrot.slane %v119_v31, 2  ;;  %v123_v34 = vrot.slane %v120_v32, 2 }
  0x2b   : > { %vm125_vm3 = vcmp.gt.s32.totalorder %v122_v33, %v119_v31  ;;  %vm126_vm4 = vcmp.eq.s32.totalorder %v122_v33, %v119_v31  ;;  %vm127_vm5 = vcmp.lt.s32.totalorder %v123_v34, %v120_v32 }
  0x2c   : > { %vm128_vm6 = vmand %vm126_vm4, %vm127_vm5 }
  0x2d   : > { %vm129_vm7 = vmor %vm125_vm3, %vm128_vm6 }
  0x2e   : > { %v131_v35 = vsel %vm129_vm7, %v123_v34, %v120_v32  ;;  %v130_v36 = vsel %vm129_vm7, %v122_v33, %v119_v31 }
  0x2f   : > { %165 = vxpose.xlu1.b32.start [1/16] %v131_v35, 128  ;;  %133 = vxpose.xlu0.b32.start [1/16] %v130_v36, 128 }
  0x37   : > { %166 = vxpose.xlu1.b32.cont [2/16] %v131_v35, 128  ;;  %134 = vxpose.xlu0.b32.cont [2/16] %v130_v36, 128 }
  0x3f   : > { %167 = vxpose.xlu1.b32.cont [3/16] %v131_v35, 128  ;;  %135 = vxpose.xlu0.b32.cont [3/16] %v130_v36, 128 }
  0x47   : > { %168 = vxpose.xlu1.b32.cont [4/16] %v131_v35, 128  ;;  %136 = vxpose.xlu0.b32.cont [4/16] %v130_v36, 128 }
  0x4f   : > { %169 = vxpose.xlu1.b32.cont [5/16] %v131_v35, 128  ;;  %137 = vxpose.xlu0.b32.cont [5/16] %v130_v36, 128 }
  0x57   : > { %170 = vxpose.xlu1.b32.cont [6/16] %v131_v35, 128  ;;  %138 = vxpose.xlu0.b32.cont [6/16] %v130_v36, 128 }
  0x5f   : > { %171 = vxpose.xlu1.b32.cont [7/16] %v131_v35, 128  ;;  %139 = vxpose.xlu0.b32.cont [7/16] %v130_v36, 128 }
  0x67   : > { %172 = vxpose.xlu1.b32.cont [8/16] %v131_v35, 128  ;;  %140 = vxpose.xlu0.b32.cont [8/16] %v130_v36, 128 }
  0x6f   : > { %173 = vxpose.xlu1.b32.cont [9/16] %v131_v35, 128  ;;  %141 = vxpose.xlu0.b32.cont [9/16] %v130_v36, 128 }
  0x77   : > { %174 = vxpose.xlu1.b32.cont [10/16] %v131_v35, 128  ;;  %142 = vxpose.xlu0.b32.cont [10/16] %v130_v36, 128 }
  0x7f   : > { %175 = vxpose.xlu1.b32.cont [11/16] %v131_v35, 128  ;;  %143 = vxpose.xlu0.b32.cont [11/16] %v130_v36, 128 }
  0x87   : > { %176 = vxpose.xlu1.b32.cont [12/16] %v131_v35, 128  ;;  %144 = vxpose.xlu0.b32.cont [12/16] %v130_v36, 128 }
  0x8f   : > { %177 = vxpose.xlu1.b32.cont [13/16] %v131_v35, 128  ;;  %145 = vxpose.xlu0.b32.cont [13/16] %v130_v36, 128 }
  0x97   : > { %178 = vxpose.xlu1.b32.cont [14/16] %v131_v35, 128  ;;  %146 = vxpose.xlu0.b32.cont [14/16] %v130_v36, 128 }
  0x9f   : > { %179 = vxpose.xlu1.b32.cont [15/16] %v131_v35, 128  ;;  %147 = vxpose.xlu0.b32.cont [15/16] %v130_v36, 128 }
  0xa7   : > { %180 = vxpose.xlu1.b32.end [16/16] %v131_v35, 128  ;;  %148 = vxpose.xlu0.b32.end [16/16] %v130_v36, 128 }
  0xd3   : > { %v181_v37 = vpop.trf.xlu1  ;;  %v149_v38 = vpop.trf.xlu0 }
  0xdb   : > { %v182_v39 = vpop.trf.xlu1  ;;  %v150_v40 = vpop.trf.xlu0 }
  0xdc   : > { %vm201_vm8 = vcmp.lt.s32.totalorder %v182_v39, %v181_v37  ;;  %vm199_vm9 = vcmp.gt.s32.totalorder %v150_v40, %v149_v38  ;;  %vm200_vm10 = vcmp.eq.s32.totalorder %v150_v40, %v149_v38 }
  0xdd   : > { %vm202_vm11 = vmand %vm200_vm10, %vm201_vm8 }
  0xde   : > { %vm203_vm12 = vmor %vm199_vm9, %vm202_vm11 }
  0xdf   : > { %v204_v41 = vsel %vm203_vm12, %v150_v40, %v149_v38  ;;  %v205_v42 = vsel %vm203_vm12, %v182_v39, %v181_v37 }
  0xe3   : > { %v183_v43 = vpop.trf.xlu1  ;;  %v151_v44 = vpop.trf.xlu0 }
  0xe4   : > { %vm210_vm13 = vcmp.lt.s32.totalorder %v183_v43, %v205_v42  ;;  %vm208_vm14 = vcmp.gt.s32.totalorder %v151_v44, %v204_v41  ;;  %vm209_vm15 = vcmp.eq.s32.totalorder %v151_v44, %v204_v41 }
  0xe5   : > { %vm211_vm0 = vmand %vm209_vm15, %vm210_vm13 }
  0xe6   : > { %vm212_vm1 = vmor %vm208_vm14, %vm211_vm0 }
  0xe7   : > { %v213_v45 = vsel %vm212_vm1, %v151_v44, %v204_v41  ;;  %v214_v46 = vsel %vm212_vm1, %v183_v43, %v205_v42 }
  0xeb   : > { %v184_v47 = vpop.trf.xlu1  ;;  %v152_v48 = vpop.trf.xlu0 }
  0xec   : > { %vm219_vm2 = vcmp.lt.s32.totalorder %v184_v47, %v214_v46  ;;  %vm217_vm3 = vcmp.gt.s32.totalorder %v152_v48, %v213_v45  ;;  %vm218_vm4 = vcmp.eq.s32.totalorder %v152_v48, %v213_v45 }
  0xed   : > { %vm220_vm5 = vmand %vm218_vm4, %vm219_vm2 }
  0xee   : > { %vm221_vm6 = vmor %vm217_vm3, %vm220_vm5 }
  0xef   : > { %v222_v49 = vsel %vm221_vm6, %v152_v48, %v213_v45  ;;  %v223_v50 = vsel %vm221_vm6, %v184_v47, %v214_v46 }
  0xf3   : > { %v185_v51 = vpop.trf.xlu1  ;;  %v153_v52 = vpop.trf.xlu0 }
  0xf4   : > { %vm228_vm7 = vcmp.lt.s32.totalorder %v185_v51, %v223_v50  ;;  %vm226_vm8 = vcmp.gt.s32.totalorder %v153_v52, %v222_v49  ;;  %vm227_vm9 = vcmp.eq.s32.totalorder %v153_v52, %v222_v49 }
  0xf5   : > { %vm229_vm10 = vmand %vm227_vm9, %vm228_vm7 }
  0xf6   : > { %vm230_vm11 = vmor %vm226_vm8, %vm229_vm10 }
  0xf7   : > { %v231_v53 = vsel %vm230_vm11, %v153_v52, %v222_v49  ;;  %v232_v54 = vsel %vm230_vm11, %v185_v51, %v223_v50 }
  0xfb   : > { %v186_v55 = vpop.trf.xlu1  ;;  %v154_v56 = vpop.trf.xlu0 }
  0xfc   : > { %vm237_vm12 = vcmp.lt.s32.totalorder %v186_v55, %v232_v54  ;;  %vm235_vm13 = vcmp.gt.s32.totalorder %v154_v56, %v231_v53  ;;  %vm236_vm14 = vcmp.eq.s32.totalorder %v154_v56, %v231_v53 }
  0xfd   : > { %vm238_vm15 = vmand %vm236_vm14, %vm237_vm12 }
  0xfe   : > { %vm239_vm0 = vmor %vm235_vm13, %vm238_vm15 }
  0xff   : > { %v240_v57 = vsel %vm239_vm0, %v154_v56, %v231_v53  ;;  %v241_v58 = vsel %vm239_vm0, %v186_v55, %v232_v54 }
 0x103   : > { %v187_v59 = vpop.trf.xlu1  ;;  %v155_v60 = vpop.trf.xlu0 }
 0x104   : > { %vm246_vm1 = vcmp.lt.s32.totalorder %v187_v59, %v241_v58  ;;  %vm244_vm2 = vcmp.gt.s32.totalorder %v155_v60, %v240_v57  ;;  %vm245_vm3 = vcmp.eq.s32.totalorder %v155_v60, %v240_v57 }
 0x105   : > { %vm247_vm4 = vmand %vm245_vm3, %vm246_vm1 }
 0x106   : > { %vm248_vm5 = vmor %vm244_vm2, %vm247_vm4 }
 0x107   : > { %v249_v61 = vsel %vm248_vm5, %v155_v60, %v240_v57  ;;  %v250_v62 = vsel %vm248_vm5, %v187_v59, %v241_v58 }
 0x10b   : > { %v188_v63 = vpop.trf.xlu1  ;;  %v156_v0 = vpop.trf.xlu0 }
 0x10c   : > { %vm255_vm6 = vcmp.lt.s32.totalorder %v188_v63, %v250_v62  ;;  %vm253_vm7 = vcmp.gt.s32.totalorder %v156_v0, %v249_v61  ;;  %vm254_vm8 = vcmp.eq.s32.totalorder %v156_v0, %v249_v61 }
 0x10d   : > { %vm256_vm9 = vmand %vm254_vm8, %vm255_vm6 }
 0x10e   : > { %vm257_vm10 = vmor %vm253_vm7, %vm256_vm9 }
 0x10f   : > { %v258_v1 = vsel %vm257_vm10, %v156_v0, %v249_v61  ;;  %v259_v3 = vsel %vm257_vm10, %v188_v63, %v250_v62 }
 0x113   : > { %v189_v5 = vpop.trf.xlu1  ;;  %v157_v6 = vpop.trf.xlu0 }
 0x114   : > { %vm264_vm11 = vcmp.lt.s32.totalorder %v189_v5, %v259_v3  ;;  %vm262_vm12 = vcmp.gt.s32.totalorder %v157_v6, %v258_v1  ;;  %vm263_vm13 = vcmp.eq.s32.totalorder %v157_v6, %v258_v1 }
 0x115   : > { %vm265_vm14 = vmand %vm263_vm13, %vm264_vm11 }
 0x116   : > { %vm266_vm15 = vmor %vm262_vm12, %vm265_vm14 }
 0x117   : > { %v267_v7 = vsel %vm266_vm15, %v157_v6, %v258_v1  ;;  %v268_v8 = vsel %vm266_vm15, %v189_v5, %v259_v3  ;;  %v1010_v6 = vmov 2147483648  }
 0x11b   : > { %v190_v9 = vpop.trf.xlu1  ;;  %v158_v10 = vpop.trf.xlu0 }
 0x11c   : > { %vm273_vm0 = vcmp.lt.s32.totalorder %v190_v9, %v268_v8  ;;  %vm271_vm1 = vcmp.gt.s32.totalorder %v158_v10, %v267_v7  ;;  %vm272_vm2 = vcmp.eq.s32.totalorder %v158_v10, %v267_v7 }
 0x11d   : > { %vm274_vm3 = vmand %vm272_vm2, %vm273_vm0 }
 0x11e   : > { %vm275_vm4 = vmor %vm271_vm1, %vm274_vm3 }
 0x11f   : > { %v276_v11 = vsel %vm275_vm4, %v158_v10, %v267_v7  ;;  %v277_v12 = vsel %vm275_vm4, %v190_v9, %v268_v8  ;;  %v1011_v7 = vmov 2147483647  }
 0x123   : > { %v191_v13 = vpop.trf.xlu1  ;;  %v159_v14 = vpop.trf.xlu0 }
 0x124   : > { %vm282_vm5 = vcmp.lt.s32.totalorder %v191_v13, %v277_v12  ;;  %vm280_vm6 = vcmp.gt.s32.totalorder %v159_v14, %v276_v11  ;;  %vm281_vm7 = vcmp.eq.s32.totalorder %v159_v14, %v276_v11 }
 0x125   : > { %vm283_vm8 = vmand %vm281_vm7, %vm282_vm5 }
 0x126   : > { %vm284_vm9 = vmor %vm280_vm6, %vm283_vm8 }
 0x127   : > { %v285_v15 = vsel %vm284_vm9, %v159_v14, %v276_v11  ;;  %v286_v16 = vsel %vm284_vm9, %v191_v13, %v277_v12  ;;  %v508_v12 = vld [vmem:[#allocation12] sm:$0xff] (%p80_p2)  ;;  %v509_v13 = vld [vmem:[#allocation14] sm:$0xff] (%p80_p2)  ;;  %v1012_v14 = vmov (%p80_p2), 839939668  }
 0x12b   : > { %v192_v17 = vpop.trf.xlu1  ;;  %v160_v18 = vpop.trf.xlu0 }
 0x12c   : > { %vm291_vm10 = vcmp.lt.s32.totalorder %v192_v17, %v286_v16  ;;  %vm289_vm11 = vcmp.gt.s32.totalorder %v160_v18, %v285_v15  ;;  %vm290_vm12 = vcmp.eq.s32.totalorder %v160_v18, %v285_v15 }
 0x12d   : > { %vm292_vm13 = vmand %vm290_vm12, %vm291_vm10 }
 0x12e   : > { %vm293_vm14 = vmor %vm289_vm11, %vm292_vm13 }
 0x12f   : > { %v294_v19 = vsel %vm293_vm14, %v160_v18, %v285_v15  ;;  %v295_v20 = vsel %vm293_vm14, %v192_v17, %v286_v16  ;;  %v533_v15 = vunpack.c.l.s4 (%p80_p2), %v1012_v14  ;;  %v548_v17 = vand.u32 (%p80_p2), 4, %v1035_v4 }
 0x130   :  { %v1013_v18 = vmov (%p80_p2), 1417023538  }
 0x131   :  { %v1054_v16 = vunpack.c.0.s8 (%p80_p2), %v533_v15 }
 0x133   : > { %v193_v21 = vpop.trf.xlu1  ;;  %v161_v22 = vpop.trf.xlu0 }
 0x134   : > { %vm300_vm15 = vcmp.lt.s32.totalorder %v193_v21, %v295_v20  ;;  %vm298_vm0 = vcmp.gt.s32.totalorder %v161_v22, %v294_v19  ;;  %vm299_vm1 = vcmp.eq.s32.totalorder %v161_v22, %v294_v19 }
 0x135   : > { %vm301_vm2 = vmand %vm299_vm1, %vm300_vm15 }
 0x136   : > { %vm302_vm3 = vmor %vm298_vm0, %vm301_vm2 }
 0x137   : > { %v303_v23 = vsel %vm302_vm3, %v161_v22, %v294_v19  ;;  %v304_v24 = vsel %vm302_vm3, %v193_v21, %v295_v20  ;;  %v555_v19 = vunpack.c.l.s4 (%p80_p2), %v1013_v18 }
 0x13b   : > { %v194_v25 = vpop.trf.xlu1  ;;  %v162_v26 = vpop.trf.xlu0 }
 0x13c   : > { %vm309_vm4 = vcmp.lt.s32.totalorder %v194_v25, %v304_v24  ;;  %vm307_vm5 = vcmp.gt.s32.totalorder %v162_v26, %v303_v23  ;;  %vm308_vm6 = vcmp.eq.s32.totalorder %v162_v26, %v303_v23 }
 0x13d   : > { %vm310_vm7 = vmand %vm308_vm6, %vm309_vm4 }
 0x13e   : > { %vm311_vm8 = vmor %vm307_vm5, %vm310_vm7 }
 0x13f   : > { %v312_v27 = vsel %vm311_vm8, %v162_v26, %v303_v23  ;;  %v313_v28 = vsel %vm311_vm8, %v194_v25, %v304_v24 }
 0x143   : > { %v195_v29 = vpop.trf.xlu1  ;;  %v163_v30 = vpop.trf.xlu0 }
 0x144   : > { %vm318_vm9 = vcmp.lt.s32.totalorder %v195_v29, %v313_v28  ;;  %vm316_vm10 = vcmp.gt.s32.totalorder %v163_v30, %v312_v27  ;;  %vm317_vm11 = vcmp.eq.s32.totalorder %v163_v30, %v312_v27 }
 0x145   : > { %vm319_vm12 = vmand %vm317_vm11, %vm318_vm9 }
 0x146   : > { %vm320_vm13 = vmor %vm316_vm10, %vm319_vm12 }
 0x147   : > { %v321_v31 = vsel %vm320_vm13, %v163_v30, %v312_v27  ;;  %v322_v32 = vsel %vm320_vm13, %v195_v29, %v313_v28  ;;  %v1065_v28 = vunpack.c.0.s8 (%p80_p2), %v555_v19  ;;  %v570_v29 = vand.u32 (%p80_p2), 2, %v1035_v4 }
 0x14b   : > { %v196_v33 = vpop.trf.xlu1  ;;  %v164_v34 = vpop.trf.xlu0 }
 0x14c   : > { %vm327_vm14 = vcmp.lt.s32.totalorder %v196_v33, %v322_v32  ;;  %vm325_vm15 = vcmp.gt.s32.totalorder %v164_v34, %v321_v31  ;;  %vm326_vm0 = vcmp.eq.s32.totalorder %v164_v34, %v321_v31 }
 0x14d   : > { %vm328_vm1 = vmand %vm326_vm0, %vm327_vm14 }
 0x14e   : > { %vm329_vm2 = vmor %vm325_vm15, %vm328_vm1 }
 0x14f   : > { %v330_v35 = vsel %vm329_vm2, %v164_v34, %v321_v31  ;;  %v331_v36 = vsel %vm329_vm2, %v196_v33, %v322_v32  ;;  %v1014_v32 = vmov (%p80_p2), 1732584193  }
 0x150   : > { %v333_v37 = vrot.slane %v330_v35, 1  ;;  %v334_v38 = vrot.slane %v331_v36, 1  ;;  %v577_v33 = vunpack.c.l.s4 (%p80_p2), %v1014_v32 }
 0x152   : > { %vm336_vm3 = vcmp.gt.s32.totalorder %v333_v37, %v330_v35  ;;  %vm337_vm4 = vcmp.eq.s32.totalorder %v333_v37, %v330_v35  ;;  %vm338_vm5 = vcmp.lt.s32.totalorder %v334_v38, %v331_v36 }
 0x153   : > { %vm339_vm6 = vmand %vm337_vm4, %vm338_vm5 }
 0x154   : > { %vm340_vm7 = vmor %vm336_vm3, %vm339_vm6 }
 0x155   : > { %v341_v39 = vsel %vm340_vm7, %v333_v37, %v330_v35  ;;  %v342_v40 = vsel %vm340_vm7, %v334_v38, %v331_v36  ;;  %v1078_v38 = vunpack.c.0.s8 (%p80_p2), %v577_v33 }
 0x156   : > { %v344_v41 = vrot.slane %v341_v39, 1  ;;  %v345_v42 = vrot.slane %v342_v40, 1 }
 0x158   : > { %vm347_vm8 = vcmp.gt.s32.totalorder %v344_v41, %v341_v39  ;;  %vm348_vm9 = vcmp.eq.s32.totalorder %v344_v41, %v341_v39  ;;  %vm349_vm10 = vcmp.lt.s32.totalorder %v345_v42, %v342_v40 }
 0x159   : > { %vm350_vm11 = vmand %vm348_vm9, %vm349_vm10 }
 0x15a   : > { %vm351_vm12 = vmor %vm347_vm8, %vm350_vm11 }
 0x15b   : > { %v352_v43 = vsel %vm351_vm12, %v344_v41, %v341_v39  ;;  %v353_v44 = vsel %vm351_vm12, %v345_v42, %v342_v40  ;;  %v592_v42 = vand.u32 (%p80_p2), 1, %v1035_v4 }
 0x15c   : > { %v355_v45 = vrot.slane %v352_v43, 1  ;;  %v356_v46 = vrot.slane %v353_v44, 1 }
 0x15e   : > { %vm360_vm13 = vcmp.lt.s32.totalorder %v356_v46, %v353_v44  ;;  %vm358_vm14 = vcmp.gt.s32.totalorder %v355_v45, %v352_v43  ;;  %vm359_vm15 = vcmp.eq.s32.totalorder %v355_v45, %v352_v43 }
 0x15f   : > { %vm361_vm0 = vmand %vm359_vm15, %vm360_vm13 }
 0x160   : > { %vm362_vm1 = vmor %vm358_vm14, %vm361_vm0 }
 0x161   : > { %v363_v47 = vsel %vm362_vm1, %v355_v45, %v352_v43  ;;  %v364_v48 = vsel %vm362_vm1, %v356_v46, %v353_v44 }
 0x162   : > { %v366_v49 = vrot.slane %v363_v47, 1  ;;  %v367_v50 = vrot.slane %v364_v48, 1 }
 0x164   : > { %vm369_vm2 = vcmp.gt.s32.totalorder %v366_v49, %v363_v47  ;;  %vm370_vm3 = vcmp.eq.s32.totalorder %v366_v49, %v363_v47  ;;  %vm371_vm4 = vcmp.lt.s32.totalorder %v367_v50, %v364_v48 }
 0x165   : > { %vm372_vm5 = vmand %vm370_vm3, %vm371_vm4 }
 0x166   : > { %vm373_vm6 = vmor %vm369_vm2, %vm372_vm5 }
 0x167   : > { %v374_v51 = vsel %vm373_vm6, %v366_v49, %v363_v47  ;;  %v375_v52 = vsel %vm373_vm6, %v367_v50, %v364_v48 }
 0x168   : > { %v377_v53 = vrot.slane %v374_v51, 1  ;;  %v378_v54 = vrot.slane %v375_v52, 1 }
 0x16a   : > { %vm380_vm7 = vcmp.gt.s32.totalorder %v377_v53, %v374_v51  ;;  %vm381_vm8 = vcmp.eq.s32.totalorder %v377_v53, %v374_v51  ;;  %vm382_vm9 = vcmp.lt.s32.totalorder %v378_v54, %v375_v52 }
 0x16b   : > { %vm383_vm10 = vmand %vm381_vm8, %vm382_vm9 }
 0x16c   : > { %vm384_vm11 = vmor %vm380_vm7, %vm383_vm10 }
 0x16d   : > { %v385_v55 = vsel %vm384_vm11, %v377_v53, %v374_v51  ;;  %v386_v56 = vsel %vm384_vm11, %v378_v54, %v375_v52 }
 0x16e   : > { %v388_v57 = vrot.slane %v385_v55, 1  ;;  %v389_v58 = vrot.slane %v386_v56, 1 }
 0x170   : > { %vm391_vm12 = vcmp.gt.s32.totalorder %v388_v57, %v385_v55  ;;  %vm392_vm13 = vcmp.eq.s32.totalorder %v388_v57, %v385_v55  ;;  %vm393_vm14 = vcmp.lt.s32.totalorder %v389_v58, %v386_v56 }
 0x171   : > { %vm394_vm15 = vmand %vm392_vm13, %vm393_vm14 }
 0x172   : > { %vm395_vm0 = vmor %vm391_vm12, %vm394_vm15 }
 0x173   : > { %v396_v59 = vsel %vm395_vm0, %v388_v57, %v385_v55  ;;  %v397_v60 = vsel %vm395_vm0, %v389_v58, %v386_v56  ;;  %vm1061_vm0 = vcmp.ne.s32.totalorder (%p80_p2), %v548_v17, 0 }
 0x174   : > { %v399_v61 = vrot.slane %v396_v59, 1  ;;  %v400_v62 = vrot.slane %v397_v60, 1 }
 0x176   : > { %vm402_vm1 = vcmp.gt.s32.totalorder %v399_v61, %v396_v59  ;;  %vm403_vm2 = vcmp.eq.s32.totalorder %v399_v61, %v396_v59  ;;  %vm404_vm3 = vcmp.lt.s32.totalorder %v400_v62, %v397_v60 }
 0x177   : > { %vm405_vm4 = vmand %vm403_vm2, %vm404_vm3 }
 0x178   : > { %vm406_vm5 = vmor %vm402_vm1, %vm405_vm4 }
 0x179   : > { %v408_v63 = vsel %vm406_vm5, %v400_v62, %v397_v60  ;;  %v407_v0 = vsel %vm406_vm5, %v399_v61, %v396_v59 }
 0x17a   : > { %415 = vxpose.xlu2.b32.start.end [1/1] (short) (narrow) %v408_v63, 8  ;;  %411 = vst [vmem:[%s410_s13] sm:$0x1] %v407_v0  ;;  %s876_s13 = sshll.u32 (%p80_p2), %s1015_s0, 4  ;;  %s877_s13 = int_to_ptr.vmem [resolvable:$true] %s876_s13 }
 0x17b   : > { %413 = vst [vmem:[%s412_s14] sm:$0x1] %v408_v63 }
 0x181   :  { %v496_v10 = vld [vmem:[#allocation13 + $0x7] ss:$-1 sm:$0xff] (%p80_p2) }
 0x182   :  { %v502_v11 = vld [vmem:[#allocation15 + $0x7] ss:$-1 sm:$0xff] (%p80_p2)  ;;  %vm514_vm8 = vcmp.gt.s32.totalorder (%p80_p2), %v508_v12, %v496_v10  ;;  %vm515_vm9 = vcmp.eq.s32.totalorder (%p80_p2), %v508_v12, %v496_v10 }
 0x183   :  { %vm516_vm10 = vcmp.lt.s32.totalorder (%p80_p2), %v509_v13, %v502_v11 }
 0x184   :  { %vm517_vm11 = vmand (%p80_p2), %vm515_vm9, %vm516_vm10  ;;  %vm1072_vm9 = vcmp.ne.s32.totalorder (%p80_p2), %v570_v29, 0 }
 0x185   :  { %vm518_vm12 = vmor (%p80_p2), %vm514_vm8, %vm517_vm11 }
 0x186   :  { %v519_v20 = vsel (%p80_p2), %vm518_vm12, %v508_v12, %v496_v10  ;;  %v521_v21 = vsel (%p80_p2), %vm518_vm12, %v496_v10, %v508_v12  ;;  %v523_v22 = vsel (%p80_p2), %vm518_vm12, %v509_v13, %v502_v11 }
 0x187   :  { %v535_v23 = vperm.slane (%p80_p2), %v519_v20, %v1054_v16  ;;  %v539_v24 = vperm.slane (%p80_p2), %v523_v22, %v1054_v16  ;;  %v680_v25 = vperm.slane (%p80_p2), %v521_v21, %v1054_v16 }
 0x189   :  { %vm541_vm13 = vcmp.gt.s32.totalorder (%p80_p2), %v519_v20, %v535_v23  ;;  %vm542_vm14 = vcmp.eq.s32.totalorder (%p80_p2), %v519_v20, %v535_v23  ;;  %vm543_vm15 = vcmp.lt.s32.totalorder (%p80_p2), %v523_v22, %v539_v24  ;;  %vm687_vm2 = vcmp.eq.s32.totalorder (%p80_p2), %v521_v21, %v680_v25 }
 0x18a   :  { %vm544_vm1 = vmand (%p80_p2), %vm542_vm14, %vm543_vm15  ;;  %vm686_vm5 = vcmp.gt.s32.totalorder (%p80_p2), %v521_v21, %v680_v25 }
 0x18b   :  { %vm545_vm4 = vmor (%p80_p2), %vm541_vm13, %vm544_vm1 }
 0x213   : > { %v431_v1 = vpop.trf.xlu2 }
 0x214   : > { %v470_v3 = vrot.slane %v431_v1, 1  ;;  %949 = vpush %v431_v1 }
 0x216   : > { %951 = vpush %v470_v3 }
 0x245   : > { %s950_s15 = spop %949 }
 0x246   : > { %s448_s16 = sshrl.u32 %s950_s15, 9  ;;  %s450_s17 = ssub.s32 0, %s950_s15 }
 0x247   : > { %p449_p0 = scmp.lt.s32.totalorder %s950_s15, 0  ;;  %s941_s18 = smin.u32 %s950_s15, %s450_s17 }
 0x248   : > { %s452_s19 = sand.u32 511, %s941_s18   ;;  %s943_s20 = sshll.u32 %s448_s16, 3 }
 0x249   : > { %s453_s21 = ssub.s32 0, %s452_s19  ;;  %s952_s22 = spop %951 }
 0x24a   : > { %s1139_s21 = smov (!%p449_p0, %s453_s21), %s452_s19  ;;  %s474_s26 = ssub.s32 0, %s952_s22 }
 0x24b   : > { %s455_s23 = sshrl.u32 %s1139_s21, 7  ;;  %s457_s24 = sand.u32 127, %s1139_s21  }
 0x24c   : > { %s942_s25 = sshll.u32 %s455_s23, 8  ;;  %s945_s28 = smin.u32 %s952_s22, %s474_s26 }
 0x24d   : > { %s458_s27 = sadd.s32 %s942_s25, %s457_s24  ;;  %p473_p1 = scmp.lt.s32.totalorder %s952_s22, 0 }
 0x24e   : > { %v460_v5 = vstv %s458_s27  ;;  %s476_s29 = sand.u32 511, %s945_s28   ;;  %s464_s3 = scalar_lea.vmem [#allocation16], %s943_s20 }
 0x24f   : > { %vm462_vm6 = vcmp.eq.s32.totalorder %v34_v2, %v460_v5  ;;  %s477_s30 = ssub.s32 0, %s476_s29  ;;  %s467_s4 = scalar_lea.vmem [#allocation17], %s943_s20 }
 0x250   : > { %465 = vst.msk [vmem:[%s464_s3] sm:$0xff] %vm462_vm6, %v1010_v6  ;;  %s1141_s30 = smov (!%p473_p1, %s477_s30), %s476_s29  ;;  %s472_s5 = sshrl.u32 %s952_s22, 9 }
 0x251   : > { %468 = vst.msk [vmem:[%s467_s4] sm:$0xff] %vm462_vm6, %v1011_v7  ;;  %s479_s6 = sshrl.u32 %s1141_s30, 7  ;;  %s481_s7 = sand.u32 127, %s1141_s30   ;;  %vm550_vm6 = vmxor (%p80_p2), %vm545_vm4, %vm1061_vm0 }
 0x252   : > { %s946_s8 = sshll.u32 %s479_s6, 8  ;;  %s947_s10 = sshll.u32 %s472_s5, 3  ;;  %v551_v30 = vsel (%p80_p2), %vm550_vm6, %v519_v20, %v535_v23  ;;  %v552_v31 = vsel (%p80_p2), %vm550_vm6, %v523_v22, %v539_v24 }
 0x253   : > { %s482_s9 = sadd.s32 %s946_s8, %s481_s7  ;;  %s488_s11 = scalar_lea.vmem [#allocation16], %s947_s10  ;;  %v557_v34 = vperm.slane (%p80_p2), %v551_v30, %v1065_v28  ;;  %v561_v35 = vperm.slane (%p80_p2), %v552_v31, %v1065_v28 }
 0x254   : > { %v484_v8 = vstv %s482_s9  ;;  %s491_s12 = scalar_lea.vmem [#allocation17], %s947_s10  ;;  %s878_s16 = sshll.u32 (%p80_p2), %s1130_s1, 4  ;;  %s879_s16 = int_to_ptr.hbm [resolvable:$true] %s878_s16 }
 0x255   : > { %v485_v9 = vadd.s32 128, %v484_v8  ;;  %82 = sbr.rel (!%p80_p2) target bundleno = 18 (0x12), region = 98  ;;  %vm563_vm11 = vcmp.gt.s32.totalorder (%p80_p2), %v551_v30, %v557_v34  ;;  %vm565_vm13 = vcmp.lt.s32.totalorder (%p80_p2), %v552_v31, %v561_v35 }
 0x257   : > { %vm486_vm7 = vcmp.eq.s32.totalorder %v34_v2, %v485_v9  ;;  %v525_v2 = vsel (%p80_p2), %vm518_vm12, %v502_v11, %v509_v13  ;;  %vm564_vm12 = vcmp.eq.s32.totalorder (%p80_p2), %v551_v30, %v557_v34 }
 0x258   : > { %489 = vst.msk [vmem:[%s488_s11] sm:$0xff] %vm486_vm7, %v1010_v6  ;;  %v684_v26 = vperm.slane (%p80_p2), %v525_v2, %v1054_v16  ;;  %vm566_vm14 = vmand (%p80_p2), %vm564_vm12, %vm565_vm13 }
 0x259   : > { %492 = vst.msk [vmem:[%s491_s12] sm:$0xff] %vm486_vm7, %v1011_v7  ;;  %vm567_vm15 = vmor (%p80_p2), %vm563_vm11, %vm566_vm14  ;;  %vm1087_vm11 = vcmp.ne.s32.totalorder (%p80_p2), %v592_v42, 0 }
 0x25a   :  { %vm688_vm3 = vcmp.lt.s32.totalorder %v525_v2, %v684_v26  ;;  %vm572_vm1 = vmxor %vm567_vm15, %vm1072_vm9 }
 0x25b   :  { %vm689_vm7 = vmand %vm687_vm2, %vm688_vm3  ;;  %v573_v43 = vsel %vm572_vm1, %v551_v30, %v557_v34  ;;  %v574_v44 = vsel %vm572_vm1, %v552_v31, %v561_v35 }
 0x25c   :  { %vm690_vm8 = vmor %vm686_vm5, %vm689_vm7  ;;  %v579_v45 = vperm.slane %v573_v43, %v1078_v38  ;;  %v583_v46 = vperm.slane %v574_v44, %v1078_v38 }
 0x25d   :  { %vm695_vm10 = vmxor %vm690_vm8, %vm1061_vm0 }
 0x25e   :  { %v696_v37 = vsel %vm695_vm10, %v521_v21, %v680_v25  ;;  %v697_v39 = vsel %vm695_vm10, %v525_v2, %v684_v26  ;;  %vm585_vm7 = vcmp.gt.s32.totalorder %v573_v43, %v579_v45  ;;  %vm586_vm8 = vcmp.eq.s32.totalorder %v573_v43, %v579_v45 }
 0x25f   :  { %v702_v40 = vperm.slane %v696_v37, %v1065_v28  ;;  %v706_v41 = vperm.slane %v697_v39, %v1065_v28  ;;  %vm587_vm10 = vcmp.lt.s32.totalorder %v574_v44, %v583_v46 }
 0x260   :  { %vm588_vm13 = vmand %vm586_vm8, %vm587_vm10 }
 0x261   :  { %vm708_vm2 = vcmp.gt.s32.totalorder %v696_v37, %v702_v40  ;;  %vm709_vm3 = vcmp.eq.s32.totalorder %v696_v37, %v702_v40  ;;  %vm710_vm4 = vcmp.lt.s32.totalorder %v697_v39, %v706_v41  ;;  %vm589_vm14 = vmor %vm585_vm7, %vm588_vm13 }
 0x262   :  { %vm711_vm5 = vmand %vm709_vm3, %vm710_vm4 }
 0x263   :  { %vm712_vm6 = vmor %vm708_vm2, %vm711_vm5 }
 0x264   :  { %vm717_vm12 = vmxor %vm712_vm6, %vm1072_vm9 }
 0x265   :  { %v718_v4 = vsel %vm717_vm12, %v696_v37, %v702_v40  ;;  %v719_v48 = vsel %vm717_vm12, %v697_v39, %v706_v41  ;;  %vm594_vm15 = vmxor %vm589_vm14, %vm1087_vm11 }
 0x266   :  { %v724_v49 = vperm.slane %v718_v4, %v1078_v38  ;;  %v728_v50 = vperm.slane %v719_v48, %v1078_v38  ;;  %v595_v51 = vsel %vm594_vm15, %v573_v43, %v579_v45  ;;  %v596_v52 = vsel %vm594_vm15, %v574_v44, %v583_v46 }
 0x267   :  { %v607_v53 = vperm.slane %v595_v51, %v1054_v16  ;;  %v611_v54 = vperm.slane %v596_v52, %v1054_v16 }
 0x268   :  { %vm730_vm1 = vcmp.gt.s32.totalorder %v718_v4, %v724_v49  ;;  %vm731_vm2 = vcmp.eq.s32.totalorder %v718_v4, %v724_v49  ;;  %vm732_vm3 = vcmp.lt.s32.totalorder %v719_v48, %v728_v50 }
 0x269   :  { %vm733_vm4 = vmand %vm731_vm2, %vm732_vm3  ;;  %vm613_vm5 = vcmp.gt.s32.totalorder %v595_v51, %v607_v53  ;;  %vm614_vm6 = vcmp.eq.s32.totalorder %v595_v51, %v607_v53  ;;  %vm615_vm7 = vcmp.lt.s32.totalorder %v596_v52, %v611_v54 }
 0x26a   :  { %vm734_vm8 = vmor %vm730_vm1, %vm733_vm4 }
 0x26b   :  { %vm616_vm10 = vmand %vm614_vm6, %vm615_vm7 }
 0x26c   :  { %vm617_vm12 = vmor %vm613_vm5, %vm616_vm10 }
 0x26d   :  { %vm622_vm13 = vmxor %vm617_vm12, %vm1061_vm0 }
 0x26e   :  { %v623_v55 = vsel %vm622_vm13, %v595_v51, %v607_v53  ;;  %v624_v56 = vsel %vm622_vm13, %v596_v52, %v611_v54  ;;  %vm739_vm14 = vmxor %vm734_vm8, %vm1087_vm11 }
 0x26f   :  { %v629_v57 = vperm.slane %v623_v55, %v1065_v28  ;;  %v633_v58 = vperm.slane %v624_v56, %v1065_v28  ;;  %v740_v59 = vsel %vm739_vm14, %v718_v4, %v724_v49  ;;  %v741_v60 = vsel %vm739_vm14, %v719_v48, %v728_v50 }
 0x270   :  { %v752_v61 = vperm.slane %v740_v59, %v1054_v16  ;;  %v756_v62 = vperm.slane %v741_v60, %v1054_v16 }
 0x271   :  { %vm635_vm15 = vcmp.gt.s32.totalorder %v623_v55, %v629_v57  ;;  %vm636_vm1 = vcmp.eq.s32.totalorder %v623_v55, %v629_v57  ;;  %vm637_vm2 = vcmp.lt.s32.totalorder %v624_v56, %v633_v58 }
 0x272   :  { %vm638_vm3 = vmand %vm636_vm1, %vm637_vm2  ;;  %vm759_vm4 = vcmp.eq.s32.totalorder %v740_v59, %v752_v61  ;;  %vm760_vm5 = vcmp.lt.s32.totalorder %v741_v60, %v756_v62  ;;  %vm758_vm7 = vcmp.gt.s32.totalorder %v740_v59, %v752_v61 }
 0x273   :  { %vm639_vm6 = vmor %vm635_vm15, %vm638_vm3 }
 0x274   :  { %vm644_vm8 = vmxor %vm639_vm6, %vm1072_vm9 }
 0x275   :  { %v645_v63 = vsel %vm644_vm8, %v623_v55, %v629_v57  ;;  %v646_v0 = vsel %vm644_vm8, %v624_v56, %v633_v58  ;;  %vm761_vm10 = vmand %vm759_vm4, %vm760_vm5 }
 0x276   :  { %v651_v1 = vperm.slane %v645_v63, %v1078_v38  ;;  %v655_v3 = vperm.slane %v646_v0, %v1078_v38  ;;  %vm762_vm12 = vmor %vm758_vm7, %vm761_vm10 }
 0x277   :  { %vm767_vm13 = vmxor %vm762_vm12, %vm1061_vm0 }
 0x278   :  { %vm657_vm14 = vcmp.gt.s32.totalorder %v645_v63, %v651_v1  ;;  %vm658_vm1 = vcmp.eq.s32.totalorder %v645_v63, %v651_v1  ;;  %vm659_vm2 = vcmp.lt.s32.totalorder %v646_v0, %v655_v3  ;;  %v768_v5 = vsel %vm767_vm13, %v740_v59, %v752_v61 }
 0x279   :  { %vm660_vm15 = vmand %vm658_vm1, %vm659_vm2  ;;  %v769_v6 = vsel %vm767_vm13, %v741_v60, %v756_v62  ;;  %v774_v7 = vperm.slane %v768_v5, %v1065_v28 }
 0x27a   :  { %vm661_vm3 = vmor %vm657_vm14, %vm660_vm15  ;;  %v778_v8 = vperm.slane %v769_v6, %v1065_v28 }
 0x27b   :  { %vm666_vm4 = vmxor %vm661_vm3, %vm1087_vm11  ;;  %vm780_vm5 = vcmp.gt.s32.totalorder %v768_v5, %v774_v7  ;;  %vm781_vm6 = vcmp.eq.s32.totalorder %v768_v5, %v774_v7 }
 0x27c   :  { %v667_v9 = vsel %vm666_vm4, %v645_v63, %v651_v1  ;;  %v668_v10 = vsel %vm666_vm4, %v646_v0, %v655_v3  ;;  %vm782_vm7 = vcmp.lt.s32.totalorder %v769_v6, %v778_v8 }
 0x27d   :  { %670 = vst [vmem:[#allocation12] sm:$0xff] %v667_v9  ;;  %vm783_vm0 = vmand %vm781_vm6, %vm782_vm7 }
 0x27e   :  { %671 = vst [vmem:[#allocation14] sm:$0xff] %v668_v10  ;;  %vm784_vm8 = vmor %vm780_vm5, %vm783_vm0 }
 0x27f   :  { %vm789_vm10 = vmxor %vm784_vm8, %vm1072_vm9 }
 0x280   :  { %v790_v11 = vsel %vm789_vm10, %v768_v5, %v774_v7  ;;  %v791_v12 = vsel %vm789_vm10, %v769_v6, %v778_v8 }
 0x281   :  { %v796_v13 = vperm.slane %v790_v11, %v1078_v38  ;;  %v800_v14 = vperm.slane %v791_v12, %v1078_v38 }
 0x283   :  { %vm802_vm12 = vcmp.gt.s32.totalorder %v790_v11, %v796_v13  ;;  %vm803_vm13 = vcmp.eq.s32.totalorder %v790_v11, %v796_v13  ;;  %vm804_vm14 = vcmp.lt.s32.totalorder %v791_v12, %v800_v14 }
 0x284   :  { %vm805_vm1 = vmand %vm803_vm13, %vm804_vm14  ;;  %v818_v18 = vld [vmem:[#allocation12] sm:$0xff] }
 0x285   :  { %vm806_vm2 = vmor %vm802_vm12, %vm805_vm1  ;;  %v842_v17 = vld [vmem:[#allocation14] sm:$0xff]  ;;  %vm819_vm9 = vcmp.lt.s32.totalorder %v818_v18, 0  ;;  %v820_v19 = vsub.s32 2147483647, %v818_v18 }
 0x286   :  { %vm811_vm15 = vmxor %vm806_vm2, %vm1087_vm11  ;;  %843 = vxpose.xlu0.b32.start.end [1/1] (short) (narrow) %v842_v17, 8 }
 0x287   :  { %v812_v15 = vsel %vm811_vm15, %v790_v11, %v796_v13  ;;  %v813_v16 = vsel %vm811_vm15, %v791_v12, %v800_v14  ;;  %v821_v20 = vsel %vm819_vm9, %v820_v19, %v818_v18 }
 0x288   :  { %815 = vst [vmem:[#allocation13] sm:$0xff] %v812_v15 }
 0x289   :  { %816 = vst [vmem:[#allocation15] sm:$0xff] %v813_v16 }
 0x28a   :  { %822 = vst [vmem:[#allocation12] sm:$0xff] %v821_v20 }
 0x28e   :  { %824 = vxpose.xlu0.b32.start.end [1/1] (short) (narrow) %v821_v20, 8 }
 0x32a   :  { %v844_v21 = vpop.trf.xlu0 }
 0x32b   :  { %860 = vst [vmem:[#allocation10] sm:$0xff] %v844_v21 }
 0x332   :  { %v869_v22 = vld [vmem:[#allocation10] sm:$0x3]  ;;  %v825_v2 = vpop.trf.xlu0 }
 0x333   :  { %872 = vst [vmem:[#allocation11] sm:$0x3] %v869_v22 }
 0x334   :  { %841 = vst [vmem:[#allocation7] sm:$0xff] %v825_v2 }
 0x33a   :  { %v898_v23 = vld [vmem:[#allocation11] sm:$0x3] }
 0x33b   :  { %899 = vst [vmem:[%s1131_s2] sm:$0x3] %v898_v23  ;;  %v863_v24 = vld [vmem:[#allocation7] sm:$0x3] }
 0x33c   :  { %866 = vst [vmem:[#allocation8] sm:$0x3] %v863_v24 }
 0x33d   :  { %881 = dma.vmem_to_hbm [thread:$0]  %s877_s13, 32, %s879_s16, [#allocation9]  }
 0x33e   :  { %1000 = dma.done.wait [#allocation9], 32  }
 0x33f   :  { %1001 = vsyncadd [#allocation9], 4294967264 }
 0x340   :  { %917 = vsyncpa [#allocation9], 1 }

// kernel: faster_rcnn_forward.4
= control target key start
LH: loop header
LB: loop body
LE: loop exit
PB: predicated region body
PF: predicated region fallthrough
CT: control target
= control target key end

     0   :  { %s9783_s18 = smov 0   ;;  %s12779_s0 = inlined_call_operand.vmem [shape: bf16[2176,192], index: 0, kind: input, shape index: {}]   ;;  %s12780_s1 = inlined_call_operand.vmem [shape: bf16[3,192,64], index: 1, kind: input, shape index: {}]   ;;  %s12781_s2 = inlined_call_operand.vmem [shape: f32[1,64], index: 2, kind: input, shape index: {}]   ;;  %s12782_s3 = inlined_call_operand.vmem [shape: bf16[64,128], index: 3, kind: input, shape index: {}]   ;;  %s12783_s4 = inlined_call_operand.vmem [shape: f32[1,128], index: 4, kind: input, shape index: {}]   ;;  %s12784_s5 = inlined_call_operand.vmem [shape: bf16[2048,128], index: 5, kind: output, shape index: {}]  }
   0x1 LB: > { %s6775_s19 = sadd.s32 4294967295, %s9751_s18   ;;  %p6779_p0 = scmp.ge.s32.totalorder %s9751_s18, 1  ;;  %s9751_s18 = sphi %s9783_s18, %s15_s18  }
   0x2   : > { %p189_p1 = scmp.lt.s32.totalorder %s9751_s18, 3 }
   0x4   : > { %p190_p2 = pnand %p6779_p0, %p189_p1 }
   0x6   : > { %193 = sbr.rel (%p190_p2) target bundleno = 2245 (0x8c5), region = 40 }
   0xb   : > { %v8974_v0 = vld [vmem:[%s12780_s1 + $0x98] sm:$0xff]  ;;  %s218_s26 = smul.u32 136, %s6775_s19  ;;  %v8973_v4 = vld [vmem:[%s12780_s1 + $0x90] sm:$0xff]  ;;  %v8972_v8 = vld [vmem:[%s12780_s1 + $0x88] sm:$0xff]  ;;  %vm543_vm0 = vcmask 523264   ;;  %s6782_s30 = sshll.u32 %s6775_s19, 7 }
   0xc   : > { %v8978_v1 = vld [vmem:[%s12780_s1 + $0xb8] sm:$0xff]  ;;  %592 = vmatpush.bf16.msra.mxu0 %v8974_v0  ;;  %v8977_v5 = vld [vmem:[%s12780_s1 + $0xb0] sm:$0xff]  ;;  %v8976_v9 = vld [vmem:[%s12780_s1 + $0xa8] sm:$0xff]  ;;  %p226_p4 = scmp.lt.s32.totalorder %s6782_s30, 255 }
   0xd   : > { %v8958_v2 = vld [vmem:[%s12780_s1 + $0x38] sm:$0xff]  ;;  %685 = vmatpush.bf16.msra.mxu1 %v8978_v1  ;;  %p219_p3 = scmp.lt.s32.totalorder %s218_s26, 271  ;;  %v8957_v6 = vld [vmem:[%s12780_s1 + $0x30] sm:$0xff]  ;;  %v8956_v10 = vld [vmem:[%s12780_s1 + $0x28] sm:$0xff] }
   0xe   : > { %v8962_v3 = vld [vmem:[%s12780_s1 + $0x58] sm:$0xff]  ;;  %866 = vmatpush.bf16.msra.mxu2 %v8958_v2  ;;  %v8961_v7 = vld [vmem:[%s12780_s1 + $0x50] sm:$0xff]  ;;  %v8960_v11 = vld [vmem:[%s12780_s1 + $0x48] sm:$0xff]  ;;  %s12841_s30 = smov (!%p226_p4, %s6782_s30), 255 }
   0xf   : > { %959 = vmatpush.bf16.msra.mxu3 %v8962_v3  ;;  %s12839_s26 = smov (!%p219_p3, %s218_s26), 271  ;;  %v8971_v12 = vld [vmem:[%s12780_s1 + $0x80] sm:$0xff]  ;;  %v9018_v20 = vld [vmem:[%s12780_s1 + $0xf8] sm:$0xff]  ;;  %v8969_v26 = vld [vmem:[%s12780_s1 + $0x70] sm:$0xff]  ;;  %s6783_s7 = sshll.u32 %s12841_s30, 2 }
  0x10   : > { %593 = vmatpush.bf16.msra.mxu0 %v8973_v4  ;;  %s8914_s16 = sshll.u32 %s12839_s26, 3  ;;  %v8975_v13 = vld [vmem:[%s12780_s1 + $0xa0] sm:$0xff]  ;;  %v9022_v21 = vld [vmem:[%s12780_s1 + $0x118] sm:$0xff]  ;;  %v9017_v27 = vld [vmem:[%s12780_s1 + $0xf0] sm:$0xff]  ;;  %s10423_s12 = scalar_lea.vmem %s12784_s5, %s6783_s7 }
  0x11   : > { %686 = vmatpush.bf16.msra.mxu1 %v8977_v5  ;;  %s9832_s25 = scalar_lea.vmem %s12779_s0, %s8914_s16  ;;  %v8955_v14 = vld [vmem:[%s12780_s1 + $0x20] sm:$0xff]  ;;  %v8970_v24 = vld [vmem:[%s12780_s1 + $0x78] sm:$0xff]  ;;  %v8953_v28 = vld [vmem:[%s12780_s1 + $0x10] sm:$0xff] }
  0x12   : > { %867 = vmatpush.bf16.msra.mxu2 %v8957_v6  ;;  %v8923_v15 = vld [vmem:[%s9832_s25 + $0x24] sm:$0xf]  ;;  %v6812_v16 = vld [vmem:[%s9832_s25 + $0x28] sm:$0xf0]  ;;  %v8954_v25 = vld [vmem:[%s12780_s1 + $0x18] sm:$0xff] }
  0x13   : > { %960 = vmatpush.bf16.msra.mxu3 %v8961_v7  ;;  %v8959_v17 = vld [vmem:[%s12780_s1 + $0x40] sm:$0xff]  ;;  %v7004_v19 = vld [vmem:[%s9832_s25 + $0x8] sm:$0xf0]  ;;  %v6815_v22 = vor.u32 %v8923_v15, %v6812_v16  ;;  %v8924_v34 = vld [vmem:[%s9832_s25 + $0x24] sm:$0xf0] }
  0x14   : > { %594 = vmatpush.bf16.msra.mxu0 %v8972_v8  ;;  %v8919_v18 = vld [vmem:[%s9832_s25 + $0x4] sm:$0xf]  ;;  %v8968_v29 = vld [vmem:[%s12780_s1 + $0x68] sm:$0xff]  ;;  %v6810_v33 = vld [vmem:[%s9832_s25 + $0x20] sm:$0xf] }
  0x15   : > { %687 = vmatpush.bf16.msra.mxu1 %v8976_v9  ;;  %v7007_v23 = vor.u32 %v8919_v18, %v7004_v19  ;;  %v8952_v30 = vld [vmem:[%s12780_s1 + $0x8] sm:$0xff]  ;;  %v8967_v31 = vld [vmem:[%s12780_s1 + $0x60] sm:$0xff]  ;;  %v8925_v35 = vld [vmem:[%s9832_s25 + $0x34] sm:$0xf]  ;;  %v6811_v41 = vor.u32 %v8924_v34, %v6810_v33 }
  0x16   : > { %868 = vmatpush.bf16.msra.mxu2 %v8956_v10  ;;  %v8951_v32 = vld [vmem:[%s12780_s1] sm:$0xff]  ;;  %v6820_v36 = vld [vmem:[%s9832_s25 + $0x38] sm:$0xf0]  ;;  %v8920_v38 = vld [vmem:[%s9832_s25 + $0x4] sm:$0xf0] }
  0x17   : > { %961 = vmatpush.bf16.msra.mxu3 %v8960_v11  ;;  %v7002_v37 = vld [vmem:[%s9832_s25] sm:$0xf]  ;;  %v8921_v39 = vld [vmem:[%s9832_s25 + $0x14] sm:$0xf]  ;;  %v7012_v40 = vld [vmem:[%s9832_s25 + $0x18] sm:$0xf0]  ;;  %v6823_v42 = vor.u32 %v8925_v35, %v6820_v36 }
  0x18   : > { %595 = vmatpush.bf16.msra.mxu0 %v8971_v12  ;;  %v7003_v43 = vor.u32 %v8920_v38, %v7002_v37  ;;  %v7015_v44 = vor.u32 %v8921_v39, %v7012_v40  ;;  %v6818_v45 = vld [vmem:[%s9832_s25 + $0x30] sm:$0xf]  ;;  %v8926_v46 = vld [vmem:[%s9832_s25 + $0x34] sm:$0xf0]  ;;  %v8927_v47 = vld [vmem:[%s9832_s25 + $0x44] sm:$0xf] }
  0x19   : > { %688 = vmatpush.bf16.msra.mxu1 %v8975_v13  ;;  %v6828_v48 = vld [vmem:[%s9832_s25 + $0x48] sm:$0xf0]  ;;  %v7010_v49 = vld [vmem:[%s9832_s25 + $0x10] sm:$0xf]  ;;  %v8922_v50 = vld [vmem:[%s9832_s25 + $0x14] sm:$0xf0]  ;;  %v6819_v51 = vor.u32 %v8926_v46, %v6818_v45 }
  0x1a   : > { %869 = vmatpush.bf16.msra.mxu2 %v8955_v14  ;;  %v6831_v52 = vor.u32 %v8927_v47, %v6828_v48  ;;  %v7011_v53 = vor.u32 %v8922_v50, %v7010_v49  ;;  %v9016_v54 = vld [vmem:[%s12780_s1 + $0xe8] sm:$0xff]  ;;  %v9021_v55 = vld [vmem:[%s12780_s1 + $0x110] sm:$0xff]  ;;  %v6826_v56 = vld [vmem:[%s9832_s25 + $0x40] sm:$0xf] }
  0x1b   : > { %962 = vmatpush.bf16.msra.mxu3 %v8959_v17  ;;  %v8928_v57 = vld [vmem:[%s9832_s25 + $0x44] sm:$0xf0]  ;;  %v8929_v58 = vld [vmem:[%s9832_s25 + $0x54] sm:$0xf]  ;;  %v6836_v59 = vld [vmem:[%s9832_s25 + $0x58] sm:$0xf0] }
  0x1c   : > { %6984 = vmatmul.msk.bf16.vlgmr.msra.gmra.mxu1 %vm543_vm0, %v6815_v22  ;;  %596 = vmatpush.bf16.msra.mxu0 %v8970_v24  ;;  %v6827_v60 = vor.u32 %v8928_v57, %v6826_v56  ;;  %v6839_v61 = vor.u32 %v8929_v58, %v6836_v59  ;;  %v6834_v62 = vld [vmem:[%s9832_s25 + $0x50] sm:$0xf]  ;;  %v8930_v63 = vld [vmem:[%s9832_s25 + $0x54] sm:$0xf0]  ;;  %v8931_v0 = vld [vmem:[%s9832_s25 + $0x64] sm:$0xf] }
  0x1d   : > { %1365 = vmatpush.bf16.msrb.mxu1 %v9018_v20  ;;  %v6844_v1 = vld [vmem:[%s9832_s25 + $0x68] sm:$0xf0]  ;;  %v6835_v2 = vor.u32 %v8930_v63, %v6834_v62  ;;  %v9015_v4 = vld [vmem:[%s12780_s1 + $0xe0] sm:$0xff]  ;;  %v8932_v6 = vld [vmem:[%s9832_s25 + $0x64] sm:$0xf0] }
  0x1e   : > { %7064 = vmatmul.msk.bf16.vlgmr.msra.gmra.mxu3 %vm543_vm0, %v7007_v23  ;;  %870 = vmatpush.bf16.msra.mxu2 %v8954_v25  ;;  %v6847_v3 = vor.u32 %v8931_v0, %v6844_v1  ;;  %v6842_v5 = vld [vmem:[%s9832_s25 + $0x60] sm:$0xf]  ;;  %v8933_v7 = vld [vmem:[%s9832_s25 + $0x74] sm:$0xf]  ;;  %v6852_v8 = vld [vmem:[%s9832_s25 + $0x78] sm:$0xf0] }
  0x1f   : > { %1458 = vmatpush.bf16.msrb.mxu3 %v9022_v21  ;;  %v6843_v9 = vor.u32 %v8932_v6, %v6842_v5  ;;  %v6855_v10 = vor.u32 %v8933_v7, %v6852_v8  ;;  %v6850_v11 = vld [vmem:[%s9832_s25 + $0x70] sm:$0xf]  ;;  %v8934_v12 = vld [vmem:[%s9832_s25 + $0x74] sm:$0xf0]  ;;  %v8935_v13 = vld [vmem:[%s9832_s25 + $0x84] sm:$0xf] }
  0x20   : > { %597 = vmatpush.bf16.msra.mxu0 %v8969_v26  ;;  %v6860_v14 = vld [vmem:[%s9832_s25 + $0x88] sm:$0xf0]  ;;  %v6851_v15 = vor.u32 %v8934_v12, %v6850_v11  ;;  %v9014_v17 = vld [vmem:[%s12780_s1 + $0xd8] sm:$0xff]  ;;  %v6858_v19 = vld [vmem:[%s9832_s25 + $0x80] sm:$0xf] }
  0x21   : > { %1366 = vmatpush.bf16.msrb.mxu1 %v9017_v27  ;;  %v6863_v16 = vor.u32 %v8935_v13, %v6860_v14  ;;  %v9020_v18 = vld [vmem:[%s12780_s1 + $0x108] sm:$0xff]  ;;  %v8937_v21 = vld [vmem:[%s9832_s25 + $0x94] sm:$0xf]  ;;  %v8918_v25 = vld [vmem:[%s12782_s3 + $0x18] sm:$0xff] }
  0x22   : > { %871 = vmatpush.bf16.msra.mxu2 %v8953_v28  ;;  %v8936_v20 = vld [vmem:[%s9832_s25 + $0x84] sm:$0xf0]  ;;  %v6866_v26 = vld [vmem:[%s9832_s25 + $0x90] sm:$0xf]  ;;  %v8938_v27 = vld [vmem:[%s9832_s25 + $0x94] sm:$0xf0] }
  0x23   : > { %1459 = vmatpush.bf16.msrb.mxu3 %v9021_v55  ;;  %v6859_v23 = vor.u32 %v8936_v20, %v6858_v19  ;;  %v8939_v28 = vld [vmem:[%s9832_s25 + $0xa4] sm:$0xf]  ;;  %v9013_v33 = vld [vmem:[%s12780_s1 + $0xd0] sm:$0xff]  ;;  %v6874_v36 = vld [vmem:[%s9832_s25 + $0xa0] sm:$0xf] }
  0x24   : > { %598 = vmatpush.bf16.msra.mxu0 %v8968_v29  ;;  %v6876_v29 = vld [vmem:[%s9832_s25 + $0xa8] sm:$0xf0]  ;;  %v8940_v37 = vld [vmem:[%s9832_s25 + $0xa4] sm:$0xf0]  ;;  %v8941_v38 = vld [vmem:[%s9832_s25 + $0xb4] sm:$0xf] }
  0x25   : > { %1367 = vmatpush.bf16.msrb.mxu1 %v9016_v54  ;;  %v6884_v39 = vld [vmem:[%s9832_s25 + $0xb8] sm:$0xf0]  ;;  %v8942_v54 = vld [vmem:[%s9832_s25 + $0xb4] sm:$0xf0]  ;;  %v8943_v55 = vld [vmem:[%s9832_s25 + $0xc4] sm:$0xf] }
  0x26   : > { %872 = vmatpush.bf16.msra.mxu2 %v8952_v30  ;;  %v6867_v30 = vor.u32 %v8938_v27, %v6866_v26  ;;  %v6892_v56 = vld [vmem:[%s9832_s25 + $0xc8] sm:$0xf0]  ;;  %v6890_v11 = vld [vmem:[%s9832_s25 + $0xc0] sm:$0xf]  ;;  %v8944_v12 = vld [vmem:[%s9832_s25 + $0xc4] sm:$0xf0] }
  0x27   : > { %1460 = vmatpush.bf16.msrb.mxu3 %v9020_v18  ;;  %v8945_v13 = vld [vmem:[%s9832_s25 + $0xd4] sm:$0xf]  ;;  %v6900_v14 = vld [vmem:[%s9832_s25 + $0xd8] sm:$0xf0] }
  0x28   : > { %599 = vmatpush.bf16.msra.mxu0 %v8967_v31  ;;  %v6879_v31 = vor.u32 %v8939_v28, %v6876_v29  ;;  %v6903_v18 = vor.u32 %v8945_v13, %v6900_v14  ;;  %v8950_v13 = vld [vmem:[%s9832_s25 + $0xf4] sm:$0xf0]  ;;  %v8963_v14 = vld [vmem:[%s9832_s25 + $0x104] sm:$0xf] }
  0x29   : > { %1368 = vmatpush.bf16.msrb.mxu1 %v9015_v4 }
  0x2a   : > { %873 = vmatpush.bf16.msra.mxu2 %v8951_v32 }
  0x2b   : > { %600 = vmatmul.bf16.vlgmr.msra.gmra.mxu0 %v6811_v41 }
  0x2c   : > { %6985 = vmatmul.msk.bf16.gmra.mxu1 %vm543_vm0, %v6823_v42  ;;  %1737 = vmatpush.bf16.msrb.mxu0 %v8918_v25 }
  0x2d   : > { %874 = vmatmul.bf16.vlgmr.msra.gmra.mxu2 %v7003_v43  ;;  %1369 = vmatpush.bf16.msrb.mxu1 %v9014_v17  ;;  %v6891_v17 = vor.u32 %v8944_v12, %v6890_v11  ;;  %v9078_v11 = vld [vmem:[%s12780_s1 + $0x98] sm:$0xff]  ;;  %v6914_v12 = vld [vmem:[%s9832_s25 + $0xf0] sm:$0xf] }
  0x2e   : > { %7065 = vmatmul.msk.bf16.gmra.mxu3 %vm543_vm0, %v7015_v44  ;;  %2234 = vmatpush.bf16.msrb.mxu2 %v9078_v11 }
  0x31   : > { %1370 = vmatpush.bf16.msrb.mxu1 %v9013_v33  ;;  %v8946_v33 = vld [vmem:[%s9832_s25 + $0xd4] sm:$0xf0] }
  0x3b   : > { %605 = vmatmul.bf16.gmra.mxu0 %v6819_v51 }
  0x3c   : > { %6986 = vmatmul.msk.bf16.gmra.mxu1 %vm543_vm0, %v6831_v52 }
  0x3d   : > { %879 = vmatmul.bf16.gmra.mxu2 %v7011_v53  ;;  %v6882_v53 = vld [vmem:[%s9832_s25 + $0xb0] sm:$0xf] }
  0x3e   : > { %7066 = vmatmul.msk.bf16.gmra.mxu3 %vm543_vm0, %v6815_v22  ;;  %v6868_v22 = vld [vmem:[%s9832_s25 + $0x98] sm:$0xf0]  ;;  %v9972_v59 = vor.u32 %v8942_v54, %v6882_v53  ;;  %v6906_v54 = vld [vmem:[%s9832_s25 + $0xe0] sm:$0xf] }
  0x3f   : > { %v6871_v24 = vor.u32 %v8937_v21, %v6868_v22 }
  0x4b   : > { %610 = vmatmul.bf16.gmra.mxu0 %v6827_v60 }
  0x4c   : > { %6987 = vmatmul.msk.bf16.gmra.mxu1 %vm543_vm0, %v6839_v61 }
  0x4d   : > { %884 = vmatmul.bf16.gmra.mxu2 %v6811_v41  ;;  %v6875_v41 = vor.u32 %v8940_v37, %v6874_v36 }
  0x4e   : > { %7067 = vmatmul.msk.bf16.gmra.mxu3 %vm543_vm0, %v6823_v42  ;;  %v6887_v42 = vor.u32 %v8941_v38, %v6884_v39 }
  0x5b   : > { %615 = vmatmul.bf16.gmra.mxu0 %v6835_v2 }
  0x5c   : > { %6988 = vmatmul.msk.bf16.gmra.mxu1 %vm543_vm0, %v6847_v3 }
  0x5d   : > { %889 = vmatmul.bf16.gmra.mxu2 %v6819_v51 }
  0x5e   : > { %7068 = vmatmul.msk.bf16.gmra.mxu3 %vm543_vm0, %v6831_v52 }
  0x6b   : > { %620 = vmatmul.bf16.gmra.mxu0 %v6843_v9 }
  0x6c   : > { %6989 = vmatmul.msk.bf16.gmra.mxu1 %vm543_vm0, %v6855_v10 }
  0x6d   : > { %894 = vmatmul.bf16.gmra.mxu2 %v6827_v60  ;;  %v9974_v60 = vor.u32 %v8943_v55, %v6892_v56  ;;  %v8948_v55 = vld [vmem:[%s9832_s25 + $0xe4] sm:$0xf0]  ;;  %v8949_v56 = vld [vmem:[%s9832_s25 + $0xf4] sm:$0xf] }
  0x6e   : > { %7069 = vmatmul.msk.bf16.gmra.mxu3 %vm543_vm0, %v6839_v61 }
  0x7b   : > { %625 = vmatmul.bf16.gmra.mxu0 %v6851_v15 }
  0x7c   : > { %6990 = vmatmul.msk.bf16.gmra.mxu1 %vm543_vm0, %v6863_v16 }
  0x7d   : > { %899 = vmatmul.bf16.gmra.mxu2 %v6835_v2  ;;  %v9012_v2 = vld [vmem:[%s12780_s1 + $0xc8] sm:$0xff] }
  0x7e   : > { %7070 = vmatmul.msk.bf16.gmra.mxu3 %vm543_vm0, %v6847_v3  ;;  %v9019_v3 = vld [vmem:[%s12780_s1 + $0x100] sm:$0xff]  ;;  %1371 = vmatpush.bf16.msrb.mxu1 %v9012_v2 }
  0x7f   : > { %1461 = vmatpush.bf16.msrb.mxu3 %v9019_v3 }
  0x8b   : > { %630 = vmatmul.bf16.gmra.mxu0 %v6859_v23 }
  0x8c   : > { %6991 = vmatmul.msk.bf16.gmra.mxu1 %vm543_vm0, %v6871_v24 }
  0x8d   : > { %904 = vmatmul.bf16.gmra.mxu2 %v6843_v9 }
  0x8e   : > { %7071 = vmatmul.msk.bf16.gmra.mxu3 %vm543_vm0, %v6855_v10 }
  0x99   : > { %v690_v32 = vpop.f32.mrf.mxu1 }
  0x9b   : > { %635 = vmatmul.bf16.gmra.mxu0 %v6867_v30 }
  0x9c   : > { %6992 = vmatmul.msk.bf16.gmra.mxu1 %vm543_vm0, %v6879_v31 }
  0x9d   : > { %909 = vmatmul.bf16.gmra.mxu2 %v6851_v15 }
  0x9e   : > { %7072 = vmatmul.msk.bf16.gmra.mxu3 %vm543_vm0, %v6863_v16 }
  0xa1   : > { %v964_v34 = vpop.f32.mrf.mxu3  ;;  %v692_v35 = vpop.f32.mrf.mxu1 }
  0xa8   : > { %v601_v43 = vpop.f32.mrf.mxu0 }
  0xa9   : > { %v966_v40 = vpop.f32.mrf.mxu3  ;;  %v695_v44 = vpop.f32.mrf.mxu1  ;;  %v691_v45 = vadd.f32 %v690_v32, %v601_v43  ;;  %v6898_v32 = vld [vmem:[%s9832_s25 + $0xd0] sm:$0xf] }
  0xaa   : > { %v6899_v38 = vor.u32 %v8946_v33, %v6898_v32 }
  0xab   : > { %640 = vmatmul.bf16.gmra.mxu0 %v6875_v41 }
  0xac   : > { %6993 = vmatmul.msk.bf16.gmra.mxu1 %vm543_vm0, %v6887_v42 }
  0xad   : > { %914 = vmatmul.bf16.gmra.mxu2 %v6859_v23 }
  0xae   : > { %7073 = vmatmul.msk.bf16.gmra.mxu3 %vm543_vm0, %v6871_v24 }
  0xb0   : > { %v875_v46 = vpop.f32.mrf.mxu2  ;;  %v603_v49 = vpop.f32.mrf.mxu0 }
  0xb1   : > { %v969_v47 = vpop.f32.mrf.mxu3  ;;  %v876_v48 = vadd.f32 %v875_v46, %v691_v45  ;;  %v697_v50 = vpop.f32.mrf.mxu1  ;;  %v693_v51 = vadd.f32 %v692_v35, %v603_v49  ;;  %v6908_v35 = vld [vmem:[%s9832_s25 + $0xe8] sm:$0xf0]  ;;  %v9011_v45 = vld [vmem:[%s12780_s1 + $0xc0] sm:$0xff] }
  0xb2   : > { %1372 = vmatpush.bf16.msrb.mxu1 %v9011_v45 }
  0xb3   : > { %v9966_v52 = vadd.f32 %v964_v34, %v876_v48  ;;  %v8947_v34 = vld [vmem:[%s9832_s25 + $0xe4] sm:$0xf] }
  0xb4   : > { %v6911_v39 = vor.u32 %v8947_v34, %v6908_v35  ;;  %v6922_v35 = vld [vmem:[%s9832_s25 + $0x100] sm:$0xf] }
  0xb8   : > { %v877_v57 = vpop.f32.mrf.mxu2  ;;  %v606_v62 = vpop.f32.mrf.mxu0 }
  0xb9   : > { %v971_v58 = vpop.f32.mrf.mxu3  ;;  %v878_v61 = vadd.f32 %v877_v57, %v693_v51  ;;  %v700_v63 = vpop.f32.mrf.mxu1  ;;  %v696_v0 = vadd.f32 %v695_v44, %v606_v62  ;;  %v6916_v57 = vld [vmem:[%s9832_s25 + $0xf8] sm:$0xf0] }
  0xbb   : > { %v9976_v1 = vadd.f32 %v966_v40, %v878_v61  ;;  %645 = vmatmul.bf16.gmra.mxu0 %v9972_v59  ;;  %v6919_v61 = vor.u32 %v8949_v56, %v6916_v57 }
  0xbc   : > { %6994 = vmatmul.msk.bf16.gmra.mxu1 %vm543_vm0, %v9974_v60 }
  0xbd   : > { %919 = vmatmul.bf16.gmra.mxu2 %v6867_v30 }
  0xbe   : > { %7074 = vmatmul.msk.bf16.gmra.mxu3 %vm543_vm0, %v6879_v31  ;;  %v8917_v31 = vld [vmem:[%s12782_s3 + $0x10] sm:$0xff] }
  0xbf   : > { %1738 = vmatpush.bf16.msrb.mxu0 %v8917_v31 }
  0xc0   : > { %v880_v4 = vpop.f32.mrf.mxu2  ;;  %v608_v7 = vpop.f32.mrf.mxu0 }
  0xc1   : > { %v974_v5 = vpop.f32.mrf.mxu3  ;;  %v881_v6 = vadd.f32 %v880_v4, %v696_v0  ;;  %v702_v8 = vpop.f32.mrf.mxu1  ;;  %v698_v9 = vadd.f32 %v697_v50, %v608_v7 }
  0xc3   : > { %v9988_v10 = vadd.f32 %v969_v47, %v881_v6 }
  0xc8   : > { %v882_v15 = vpop.f32.mrf.mxu2  ;;  %v611_v20 = vpop.f32.mrf.mxu0 }
  0xc9   : > { %v976_v16 = vpop.f32.mrf.mxu3  ;;  %v883_v19 = vadd.f32 %v882_v15, %v698_v9  ;;  %v705_v21 = vpop.f32.mrf.mxu1  ;;  %v701_v22 = vadd.f32 %v700_v63, %v611_v20  ;;  %v6924_v15 = vld [vmem:[%s9832_s25 + $0x108] sm:$0xf0] }
  0xca   : > { %v6927_v20 = vor.u32 %v8963_v14, %v6924_v15 }
  0xcb   : > { %v9994_v23 = vadd.f32 %v971_v58, %v883_v19  ;;  %650 = vmatmul.bf16.gmra.mxu0 %v6891_v17 }
  0xcc   : > { %6995 = vmatmul.msk.bf16.gmra.mxu1 %vm543_vm0, %v6903_v18 }
  0xcd   : > { %924 = vmatmul.bf16.gmra.mxu2 %v6875_v41 }
  0xce   : > { %7075 = vmatmul.msk.bf16.gmra.mxu3 %vm543_vm0, %v6887_v42 }
  0xd0   : > { %v885_v24 = vpop.f32.mrf.mxu2  ;;  %v613_v27 = vpop.f32.mrf.mxu0 }
  0xd1   : > { %v979_v25 = vpop.f32.mrf.mxu3  ;;  %v886_v26 = vadd.f32 %v885_v24, %v701_v22  ;;  %v707_v28 = vpop.f32.mrf.mxu1  ;;  %v703_v29 = vadd.f32 %v702_v8, %v613_v27  ;;  %v9082_v27 = vld [vmem:[%s12780_s1 + $0xb8] sm:$0xff] }
  0xd2   : > { %2327 = vmatpush.bf16.msra.mxu1 %v9082_v27  ;;  %v8982_v27 = vld [vmem:[%s9832_s25 + $0x54] sm:$0xf0] }
  0xd3   : > { %v9998_v30 = vadd.f32 %v974_v5, %v886_v26 }
  0xd8   : > { %v887_v36 = vpop.f32.mrf.mxu2  ;;  %v616_v41 = vpop.f32.mrf.mxu0 }
  0xd9   : > { %v981_v37 = vpop.f32.mrf.mxu3  ;;  %v888_v40 = vadd.f32 %v887_v36, %v703_v29  ;;  %v710_v42 = vpop.f32.mrf.mxu1  ;;  %v706_v43 = vadd.f32 %v705_v21, %v616_v41  ;;  %v8964_v36 = vld [vmem:[%s9832_s25 + $0x104] sm:$0xf0] }
  0xdb   : > { %v10007_v44 = vadd.f32 %v976_v16, %v888_v40  ;;  %655 = vmatmul.bf16.gmra.mxu0 %v6899_v38  ;;  %v6932_v40 = vld [vmem:[%s9832_s25 + $0x118] sm:$0xf0] }
  0xdc   : > { %6996 = vmatmul.msk.bf16.gmra.mxu1 %vm543_vm0, %v6911_v39 }
  0xdd   : > { %929 = vmatmul.bf16.gmra.mxu2 %v9972_v59 }
  0xde   : > { %7076 = vmatmul.msk.bf16.gmra.mxu3 %vm543_vm0, %v9974_v60  ;;  %v6907_v60 = vor.u32 %v8948_v55, %v6906_v54 }
  0xe0   : > { %v890_v46 = vpop.f32.mrf.mxu2  ;;  %v618_v49 = vpop.f32.mrf.mxu0 }
  0xe1   : > { %v984_v47 = vpop.f32.mrf.mxu3  ;;  %v891_v48 = vadd.f32 %v890_v46, %v706_v43  ;;  %v712_v50 = vpop.f32.mrf.mxu1  ;;  %v708_v51 = vadd.f32 %v707_v28, %v618_v49 }
  0xe3   : > { %v10016_v53 = vadd.f32 %v979_v25, %v891_v48 }
  0xe8   : > { %v892_v58 = vpop.f32.mrf.mxu2  ;;  %v621_v63 = vpop.f32.mrf.mxu0 }
  0xe9   : > { %v986_v59 = vpop.f32.mrf.mxu3  ;;  %v893_v62 = vadd.f32 %v892_v58, %v708_v51  ;;  %v715_v0 = vpop.f32.mrf.mxu1  ;;  %v711_v2 = vadd.f32 %v710_v42, %v621_v63  ;;  %v10060_v58 = vld [vmem:[%s12782_s3 + $0x8] sm:$0xff] }
  0xea   : > { %v8980_v63 = vld [vmem:[%s9832_s25 + $0x44] sm:$0xf0]  ;;  %1739 = vmatpush.bf16.msrb.mxu0 %v10060_v58 }
  0xeb   : > { %v10022_v3 = vadd.f32 %v981_v37, %v893_v62  ;;  %660 = vmatmul.bf16.gmra.mxu0 %v6907_v60  ;;  %v8965_v37 = vld [vmem:[%s9832_s25 + $0x114] sm:$0xf]  ;;  %v8966_v62 = vld [vmem:[%s9832_s25 + $0x114] sm:$0xf0] }
  0xec   : > { %6997 = vmatmul.msk.bf16.gmra.mxu1 %vm543_vm0, %v6919_v61  ;;  %v6935_v43 = vor.u32 %v8965_v37, %v6932_v40 }
  0xed   : > { %934 = vmatmul.bf16.gmra.mxu2 %v6891_v17 }
  0xee   : > { %7077 = vmatmul.msk.bf16.gmra.mxu3 %vm543_vm0, %v6903_v18  ;;  %v10035_v18 = vor.u32 %v8950_v13, %v6914_v12 }
  0xf0   : > { %v895_v4 = vpop.f32.mrf.mxu2  ;;  %v623_v7 = vpop.f32.mrf.mxu0 }
  0xf1   : > { %v989_v5 = vpop.f32.mrf.mxu3  ;;  %v896_v6 = vadd.f32 %v895_v4, %v711_v2  ;;  %v717_v8 = vpop.f32.mrf.mxu1  ;;  %v713_v16 = vadd.f32 %v712_v50, %v623_v7  ;;  %v7108_v2 = vld [vmem:[%s9832_s25 + $0x48] sm:$0xf0] }
  0xf3   : > { %v10026_v9 = vadd.f32 %v984_v47, %v896_v6 }
  0xf8   : > { %v897_v17 = vpop.f32.mrf.mxu2  ;;  %v626_v22 = vpop.f32.mrf.mxu0 }
  0xf9   : > { %v991_v19 = vpop.f32.mrf.mxu3  ;;  %v898_v21 = vadd.f32 %v897_v17, %v713_v16  ;;  %v720_v24 = vpop.f32.mrf.mxu1  ;;  %v716_v25 = vadd.f32 %v715_v0, %v626_v22  ;;  %v8979_v0 = vld [vmem:[%s9832_s25 + $0x44] sm:$0xf] }
  0xfa   : > { %v7111_v14 = vor.u32 %v8979_v0, %v7108_v2 }
  0xfb   : > { %v10037_v26 = vadd.f32 %v986_v59, %v898_v21  ;;  %665 = vmatmul.bf16.gmra.mxu0 %v10035_v18  ;;  %v9077_v59 = vld [vmem:[%s12780_s1 + $0x90] sm:$0xff] }
  0xfc   : > { %6998 = vmatmul.msk.bf16.gmra.mxu1 %vm543_vm0, %v6927_v20  ;;  %2235 = vmatpush.bf16.msrb.mxu2 %v9077_v59 }
  0xfd   : > { %939 = vmatmul.bf16.gmra.mxu2 %v6899_v38 }
  0xfe   : > { %7078 = vmatmul.msk.bf16.gmra.mxu3 %vm543_vm0, %v6911_v39  ;;  %v6923_v39 = vor.u32 %v8964_v36, %v6922_v35 }
 0x100   : > { %v900_v28 = vpop.f32.mrf.mxu2  ;;  %v628_v32 = vpop.f32.mrf.mxu0 }
 0x101   : > { %v994_v29 = vpop.f32.mrf.mxu3  ;;  %v901_v31 = vadd.f32 %v900_v28, %v716_v25  ;;  %v722_v33 = vpop.f32.mrf.mxu1  ;;  %v718_v41 = vadd.f32 %v717_v8, %v628_v32  ;;  %v7114_v25 = vld [vmem:[%s9832_s25 + $0x50] sm:$0xf]  ;;  %v8981_v28 = vld [vmem:[%s9832_s25 + $0x54] sm:$0xf] }
 0x102   : > { %v7115_v35 = vor.u32 %v8982_v27, %v7114_v25 }
 0x103   : > { %v10045_v34 = vadd.f32 %v989_v5, %v901_v31 }
 0x108   : > { %v902_v38 = vpop.f32.mrf.mxu2  ;;  %v631_v46 = vpop.f32.mrf.mxu0 }
 0x109   : > { %v996_v42 = vpop.f32.mrf.mxu3  ;;  %v903_v45 = vadd.f32 %v902_v38, %v718_v41  ;;  %v725_v47 = vpop.f32.mrf.mxu1  ;;  %v721_v48 = vadd.f32 %v720_v24, %v631_v46 }
 0x10b   : > { %v10051_v49 = vadd.f32 %v991_v19, %v903_v45  ;;  %670 = vmatmul.bf16.gmra.mxu0 %v6923_v39 }
 0x10c   : > { %6999 = vmatmul.msk.bf16.gmra.mxu1 %vm543_vm0, %v6935_v43 }
 0x10d   : > { %944 = vmatmul.bf16.gmra.mxu2 %v6907_v60  ;;  %v6930_v60 = vld [vmem:[%s9832_s25 + $0x110] sm:$0xf] }
 0x10e   : > { %7079 = vmatmul.msk.bf16.gmra.mxu3 %vm543_vm0, %v6919_v61  ;;  %v7106_v61 = vld [vmem:[%s9832_s25 + $0x40] sm:$0xf]  ;;  %v6931_v7 = vor.u32 %v8966_v62, %v6930_v60 }
 0x10f   : > { %v7107_v8 = vor.u32 %v8980_v63, %v7106_v61 }
 0x110   : > { %v905_v50 = vpop.f32.mrf.mxu2  ;;  %v633_v55 = vpop.f32.mrf.mxu0 }
 0x111   : > { %v999_v51 = vpop.f32.mrf.mxu3  ;;  %v906_v54 = vadd.f32 %v905_v50, %v721_v48  ;;  %v727_v56 = vpop.f32.mrf.mxu1  ;;  %v723_v4 = vadd.f32 %v722_v33, %v633_v55  ;;  %v9076_v48 = vld [vmem:[%s12780_s1 + $0x88] sm:$0xff]  ;;  %v7122_v50 = vld [vmem:[%s9832_s25 + $0x60] sm:$0xf] }
 0x112   : > { %2236 = vmatpush.bf16.msrb.mxu2 %v9076_v48  ;;  %v7124_v55 = vld [vmem:[%s9832_s25 + $0x68] sm:$0xf0]  ;;  %v8987_v48 = vld [vmem:[%s9832_s25 + $0x84] sm:$0xf] }
 0x113   : > { %v10055_v57 = vadd.f32 %v994_v29, %v906_v54  ;;  %v7116_v29 = vld [vmem:[%s9832_s25 + $0x58] sm:$0xf0]  ;;  %v8983_v54 = vld [vmem:[%s9832_s25 + $0x64] sm:$0xf] }
 0x114   : > { %v7119_v40 = vor.u32 %v8981_v28, %v7116_v29  ;;  %v7127_v2 = vor.u32 %v8983_v54, %v7124_v55 }
 0x118   : > { %v907_v5 = vpop.f32.mrf.mxu2  ;;  %v636_v12 = vpop.f32.mrf.mxu0 }
 0x119   : > { %v1001_v6 = vpop.f32.mrf.mxu3  ;;  %v908_v11 = vadd.f32 %v907_v5, %v723_v4  ;;  %v730_v13 = vpop.f32.mrf.mxu1  ;;  %v726_v15 = vadd.f32 %v725_v47, %v636_v12 }
 0x11b   : > { %v10072_v16 = vadd.f32 %v996_v42, %v908_v11  ;;  %675 = vmatmul.bf16.gmra.mxu0 %v6931_v7 }
 0x11c   : > { %1373 = vmatmul.bf16.vlgmr.msrb.gmra.mxu1 %v7107_v8 }
 0x11d   : > { %949 = vmatmul.bf16.gmra.mxu2 %v10035_v18 }
 0x11e   : > { %7280 = vmatmul.msk.bf16.vlgmr.msrb.gmra.mxu3 %vm543_vm0, %v7111_v14 }
 0x120   : > { %v910_v17 = vpop.f32.mrf.mxu2  ;;  %v638_v21 = vpop.f32.mrf.mxu0 }
 0x121   : > { %v1004_v19 = vpop.f32.mrf.mxu3  ;;  %v911_v20 = vadd.f32 %v910_v17, %v726_v15  ;;  %v732_v22 = vpop.f32.mrf.mxu1  ;;  %v728_v31 = vadd.f32 %v727_v56, %v638_v21  ;;  %v7130_v15 = vld [vmem:[%s9832_s25 + $0x70] sm:$0xf]  ;;  %v8986_v17 = vld [vmem:[%s9832_s25 + $0x74] sm:$0xf0] }
 0x122   : > { %v7131_v27 = vor.u32 %v8986_v17, %v7130_v15  ;;  %v8989_v15 = vld [vmem:[%s9832_s25 + $0x94] sm:$0xf]  ;;  %v7148_v17 = vld [vmem:[%s9832_s25 + $0x98] sm:$0xf0] }
 0x123   : > { %v10076_v24 = vadd.f32 %v999_v51, %v911_v20  ;;  %v8984_v51 = vld [vmem:[%s9832_s25 + $0x64] sm:$0xf0]  ;;  %v7132_v20 = vld [vmem:[%s9832_s25 + $0x78] sm:$0xf0] }
 0x124   : > { %v7123_v62 = vor.u32 %v8984_v51, %v7122_v50  ;;  %v7140_v50 = vld [vmem:[%s9832_s25 + $0x88] sm:$0xf0] }
 0x128   : > { %v912_v32 = vpop.f32.mrf.mxu2  ;;  %v641_v18 = vpop.f32.mrf.mxu0 }
 0x129   : > { %v1006_v33 = vpop.f32.mrf.mxu3  ;;  %v913_v36 = vadd.f32 %v912_v32, %v728_v31  ;;  %v735_v37 = vpop.f32.mrf.mxu1  ;;  %v731_v41 = vadd.f32 %v730_v13, %v641_v18 }
 0x12b   : > { %v10082_v38 = vadd.f32 %v1001_v6, %v913_v36  ;;  %v9081_v6 = vld [vmem:[%s12780_s1 + $0xb0] sm:$0xff] }
 0x12c   : > { %1378 = vmatmul.bf16.gmra.mxu1 %v7115_v35 }
 0x12d   : > { %2328 = vmatpush.bf16.msra.mxu1 %v9081_v6 }
 0x12e   : > { %7281 = vmatmul.msk.bf16.gmra.mxu3 %vm543_vm0, %v7119_v40 }
 0x130   : > { %v915_v42 = vpop.f32.mrf.mxu2  ;;  %v643_v45 = vpop.f32.mrf.mxu0 }
 0x131   : > { %v1009_v39 = vpop.f32.mrf.mxu3  ;;  %v916_v43 = vadd.f32 %v915_v42, %v731_v41  ;;  %v737_v46 = vpop.f32.mrf.mxu1  ;;  %v733_v56 = vadd.f32 %v732_v22, %v643_v45  ;;  %v7138_v45 = vld [vmem:[%s9832_s25 + $0x80] sm:$0xf] }
 0x133   : > { %v10085_v47 = vadd.f32 %v1004_v19, %v916_v43  ;;  %v8985_v19 = vld [vmem:[%s9832_s25 + $0x74] sm:$0xf]  ;;  %v9075_v43 = vld [vmem:[%s12780_s1 + $0x80] sm:$0xff] }
 0x134   : > { %v7135_v32 = vor.u32 %v8985_v19, %v7132_v20  ;;  %2237 = vmatpush.bf16.msrb.mxu2 %v9075_v43  ;;  %v9074_v43 = vld [vmem:[%s12780_s1 + $0x78] sm:$0xff] }
 0x138   : > { %v917_v59 = vpop.f32.mrf.mxu2  ;;  %v646_v63 = vpop.f32.mrf.mxu0  ;;  %2238 = vmatpush.bf16.msrb.mxu2 %v9074_v43 }
 0x139   : > { %v1011_v60 = vpop.f32.mrf.mxu3  ;;  %v918_v61 = vadd.f32 %v917_v59, %v733_v56  ;;  %v740_v0 = vpop.f32.mrf.mxu1  ;;  %v736_v4 = vadd.f32 %v735_v37, %v646_v63 }
 0x13b   : > { %v10094_v5 = vadd.f32 %v1006_v33, %v918_v61  ;;  %v7143_v61 = vor.u32 %v8987_v48, %v7140_v50  ;;  %v8991_v48 = vld [vmem:[%s9832_s25 + $0xa4] sm:$0xf]  ;;  %v7156_v50 = vld [vmem:[%s9832_s25 + $0xa8] sm:$0xf0] }
 0x13c   : > { %1383 = vmatmul.bf16.gmra.mxu1 %v7123_v62 }
 0x13e   : > { %7282 = vmatmul.msk.bf16.gmra.mxu3 %vm543_vm0, %v7127_v2 }
 0x140   : > { %v920_v7 = vpop.f32.mrf.mxu2  ;;  %v648_v12 = vpop.f32.mrf.mxu0 }
 0x141   : > { %v1014_v8 = vpop.f32.mrf.mxu3  ;;  %v921_v11 = vadd.f32 %v920_v7, %v736_v4  ;;  %v742_v13 = vpop.f32.mrf.mxu1  ;;  %v738_v21 = vadd.f32 %v737_v46, %v648_v12  ;;  %v8988_v46 = vld [vmem:[%s9832_s25 + $0x84] sm:$0xf0]  ;;  %v7146_v12 = vld [vmem:[%s9832_s25 + $0x90] sm:$0xf] }
 0x142   : > { %v7139_v56 = vor.u32 %v8988_v46, %v7138_v45  ;;  %v7154_v45 = vld [vmem:[%s9832_s25 + $0xa0] sm:$0xf]  ;;  %v8992_v46 = vld [vmem:[%s9832_s25 + $0xa4] sm:$0xf0] }
 0x143   : > { %v10100_v14 = vadd.f32 %v1009_v39, %v921_v11  ;;  %v10114_v39 = vld [vmem:[%s12782_s3] sm:$0xff] }
 0x144   : > { %1740 = vmatpush.bf16.msrb.mxu0 %v10114_v39 }
 0x148   : > { %v922_v22 = vpop.f32.mrf.mxu2  ;;  %v651_v29 = vpop.f32.mrf.mxu0 }
 0x149   : > { %v1016_v25 = vpop.f32.mrf.mxu3  ;;  %v923_v28 = vadd.f32 %v922_v22, %v738_v21  ;;  %v745_v31 = vpop.f32.mrf.mxu1  ;;  %v741_v33 = vadd.f32 %v740_v0, %v651_v29  ;;  %v7151_v29 = vor.u32 %v8989_v15, %v7148_v17 }
 0x14b   : > { %v10106_v35 = vadd.f32 %v1011_v60, %v923_v28 }
 0x14c   : > { %1388 = vmatmul.bf16.gmra.mxu1 %v7131_v27 }
 0x14e   : > { %7283 = vmatmul.msk.bf16.gmra.mxu3 %vm543_vm0, %v7135_v32 }
 0x150   : > { %v925_v36 = vpop.f32.mrf.mxu2  ;;  %v653_v40 = vpop.f32.mrf.mxu0 }
 0x151   : > { %v1019_v18 = vpop.f32.mrf.mxu3  ;;  %v926_v37 = vadd.f32 %v925_v36, %v741_v33  ;;  %v747_v41 = vpop.f32.mrf.mxu1  ;;  %v743_v51 = vadd.f32 %v742_v13, %v653_v40  ;;  %v8990_v13 = vld [vmem:[%s9832_s25 + $0x94] sm:$0xf0] }
 0x152   : > { %v7147_v22 = vor.u32 %v8990_v13, %v7146_v12 }
 0x153   : > { %v10109_v42 = vadd.f32 %v1014_v8, %v926_v37 }
 0x158   : > { %v927_v54 = vpop.f32.mrf.mxu2  ;;  %v656_v60 = vpop.f32.mrf.mxu0 }
 0x159   : > { %v1021_v55 = vpop.f32.mrf.mxu3  ;;  %v928_v59 = vadd.f32 %v927_v54, %v743_v51  ;;  %v750_v62 = vpop.f32.mrf.mxu1  ;;  %v746_v63 = vadd.f32 %v745_v31, %v656_v60 }
 0x15b   : > { %v10124_v0 = vadd.f32 %v1016_v25, %v928_v59 }
 0x15c   : > { %1393 = vmatmul.bf16.gmra.mxu1 %v7139_v56  ;;  %v7155_v56 = vor.u32 %v8992_v46, %v7154_v45 }
 0x15e   : > { %7284 = vmatmul.msk.bf16.gmra.mxu3 %vm543_vm0, %v7143_v61  ;;  %v7159_v61 = vor.u32 %v8991_v48, %v7156_v50  ;;  %v7354_v48 = vld [vmem:[%s9832_s25 + $0x120] sm:$0xf] }
 0x160   : > { %v930_v2 = vpop.f32.mrf.mxu2  ;;  %v658_v7 = vpop.f32.mrf.mxu0 }
 0x161   : > { %v1024_v4 = vpop.f32.mrf.mxu3  ;;  %v931_v6 = vadd.f32 %v930_v2, %v746_v63  ;;  %v752_v8 = vpop.f32.mrf.mxu1  ;;  %v748_v19 = vadd.f32 %v747_v41, %v658_v7 }
 0x163   : > { %v10127_v11 = vadd.f32 %v1019_v18, %v931_v6 }
 0x168   : > { %v932_v20 = vpop.f32.mrf.mxu2  ;;  %v661_v27 = vpop.f32.mrf.mxu0 }
 0x169   : > { %v1026_v21 = vpop.f32.mrf.mxu3  ;;  %v933_v25 = vadd.f32 %v932_v20, %v748_v19  ;;  %v755_v28 = vpop.f32.mrf.mxu1  ;;  %v751_v31 = vadd.f32 %v750_v62, %v661_v27  ;;  %v9072_v19 = vld [vmem:[%s12780_s1 + $0x68] sm:$0xff]  ;;  %v7162_v20 = vld [vmem:[%s9832_s25 + $0xb0] sm:$0xf] }
 0x16b   : > { %v10133_v32 = vadd.f32 %v1021_v55, %v933_v25  ;;  %v7164_v25 = vld [vmem:[%s9832_s25 + $0xb8] sm:$0xf0] }
 0x16c   : > { %1398 = vmatmul.bf16.gmra.mxu1 %v7147_v22  ;;  %v8993_v22 = vld [vmem:[%s9832_s25 + $0xb4] sm:$0xf] }
 0x16d   : > { %v7167_v43 = vor.u32 %v8993_v22, %v7164_v25 }
 0x16e   : > { %7285 = vmatmul.msk.bf16.gmra.mxu3 %vm543_vm0, %v7151_v29 }
 0x170   : > { %v935_v33 = vpop.f32.mrf.mxu2  ;;  %v663_v37 = vpop.f32.mrf.mxu0 }
 0x171   : > { %v1029_v36 = vpop.f32.mrf.mxu3  ;;  %v936_v18 = vadd.f32 %v935_v33, %v751_v31  ;;  %v757_v40 = vpop.f32.mrf.mxu1  ;;  %v753_v51 = vadd.f32 %v752_v8, %v663_v37  ;;  %v9073_v8 = vld [vmem:[%s12780_s1 + $0x70] sm:$0xff]  ;;  %v9071_v33 = vld [vmem:[%s12780_s1 + $0x60] sm:$0xff] }
 0x172   : > { %2239 = vmatpush.bf16.msrb.mxu2 %v9073_v8 }
 0x173   : > { %v10136_v41 = vadd.f32 %v1024_v4, %v936_v18  ;;  %v9080_v4 = vld [vmem:[%s12780_s1 + $0xa8] sm:$0xff] }
 0x174   : > { %2329 = vmatpush.bf16.msra.mxu1 %v9080_v4  ;;  %v8995_v4 = vld [vmem:[%s9832_s25 + $0xc4] sm:$0xf] }
 0x176   : > { %2240 = vmatpush.bf16.msrb.mxu2 %v9072_v19 }
 0x178   : > { %v937_v54 = vpop.f32.mrf.mxu2  ;;  %v666_v60 = vpop.f32.mrf.mxu0 }
 0x179   : > { %v1031_v55 = vpop.f32.mrf.mxu3  ;;  %v938_v59 = vadd.f32 %v937_v54, %v753_v51  ;;  %v760_v62 = vpop.f32.mrf.mxu1  ;;  %v756_v63 = vadd.f32 %v755_v28, %v666_v60 }
 0x17a   : > { %2241 = vmatpush.bf16.msrb.mxu2 %v9071_v33 }
 0x17b   : > { %v10145_v2 = vadd.f32 %v1026_v21, %v938_v59  ;;  %v8994_v21 = vld [vmem:[%s9832_s25 + $0xb4] sm:$0xf0] }
 0x17c   : > { %1403 = vmatmul.bf16.gmra.mxu1 %v7155_v56  ;;  %v7163_v31 = vor.u32 %v8994_v21, %v7162_v20 }
 0x17e   : > { %7286 = vmatmul.msk.bf16.gmra.mxu3 %vm543_vm0, %v7159_v61  ;;  %v7170_v61 = vld [vmem:[%s9832_s25 + $0xc0] sm:$0xf] }
 0x180   : > { %v940_v6 = vpop.f32.mrf.mxu2  ;;  %v668_v13 = vpop.f32.mrf.mxu0 }
 0x181   : > { %v1034_v7 = vpop.f32.mrf.mxu3  ;;  %v941_v12 = vadd.f32 %v940_v6, %v756_v63  ;;  %v762_v15 = vpop.f32.mrf.mxu1  ;;  %v758_v27 = vadd.f32 %v757_v40, %v668_v13  ;;  %v9028_v40 = vld [vmem:[%s9832_s25 + $0x124] sm:$0xf0]  ;;  %v7172_v6 = vld [vmem:[%s9832_s25 + $0xc8] sm:$0xf0] }
 0x182   : > { %v10170_v50 = vor.u32 %v9028_v40, %v7354_v48  ;;  %v8996_v63 = vld [vmem:[%s9832_s25 + $0xc4] sm:$0xf0]  ;;  %v7178_v40 = vld [vmem:[%s9832_s25 + $0xd0] sm:$0xf] }
 0x183   : > { %v10154_v17 = vadd.f32 %v1029_v36, %v941_v12  ;;  %v9066_v12 = vld [vmem:[%s12780_s1 + $0x58] sm:$0xff]  ;;  %v7171_v20 = vor.u32 %v8996_v63, %v7170_v61  ;;  %v10204_v61 = vld [vmem:[%s12781_s2] ss:$0 sm:$0xff] }
 0x184   : > { %2242 = vmatmul.bf16.vlgmr.msrb.gmra.mxu2 %v10170_v50  ;;  %2601 = vmatpush.bf16.msra.mxu0 %v9066_v12 }
 0x188   : > { %v942_v28 = vpop.f32.mrf.mxu2  ;;  %v671_v18 = vpop.f32.mrf.mxu0 }
 0x189   : > { %v1036_v29 = vpop.f32.mrf.mxu3  ;;  %v943_v36 = vadd.f32 %v942_v28, %v758_v27  ;;  %v765_v37 = vpop.f32.mrf.mxu1  ;;  %v761_v45 = vadd.f32 %v760_v62, %v671_v18 }
 0x18b   : > { %v10166_v46 = vadd.f32 %v1031_v55, %v943_v36  ;;  %v9062_v55 = vld [vmem:[%s12780_s1 + $0x38] sm:$0xff] }
 0x18c   : > { %1408 = vmatmul.bf16.gmra.mxu1 %v7163_v31  ;;  %2508 = vmatpush.bf16.msra.mxu3 %v9062_v55  ;;  %v7362_v31 = vld [vmem:[%s9832_s25 + $0x130] sm:$0xf] }
 0x18e   : > { %7287 = vmatmul.msk.bf16.gmra.mxu3 %vm543_vm0, %v7167_v43 }
 0x190   : > { %v945_v51 = vpop.f32.mrf.mxu2  ;;  %v673_v59 = vpop.f32.mrf.mxu0 }
 0x191   : > { %v1039_v54 = vpop.f32.mrf.mxu3  ;;  %v946_v56 = vadd.f32 %v945_v51, %v761_v45  ;;  %v767_v60 = vpop.f32.mrf.mxu1  ;;  %v763_v8 = vadd.f32 %v762_v15, %v673_v59  ;;  %v9030_v15 = vld [vmem:[%s9832_s25 + $0x134] sm:$0xf0]  ;;  %v7180_v59 = vld [vmem:[%s9832_s25 + $0xd8] sm:$0xf0] }
 0x192   : > { %v10190_v33 = vor.u32 %v9030_v15, %v7362_v31  ;;  %v8998_v51 = vld [vmem:[%s9832_s25 + $0xd4] sm:$0xf0] }
 0x193   : > { %v10177_v62 = vadd.f32 %v1034_v7, %v946_v56  ;;  %v7175_v7 = vor.u32 %v8995_v4, %v7172_v6  ;;  %v8997_v56 = vld [vmem:[%s9832_s25 + $0xd4] sm:$0xf] }
 0x194   : > { %2247 = vmatmul.bf16.gmra.mxu2 %v10190_v33 }
 0x198   : > { %v947_v13 = vpop.f32.mrf.mxu2  ;;  %v676_v22 = vpop.f32.mrf.mxu0 }
 0x199   : > { %v1041_v19 = vpop.f32.mrf.mxu3  ;;  %v948_v21 = vadd.f32 %v947_v13, %v763_v8  ;;  %v1374_v25 = vpop.f32.mrf.mxu1  ;;  %v766_v27 = vadd.f32 %v765_v37, %v676_v22 }
 0x19b   : > { %v10186_v28 = vadd.f32 %v1036_v29, %v948_v21 }
 0x19c   : > { %1413 = vmatmul.bf16.gmra.mxu1 %v7171_v20  ;;  %v7183_v20 = vor.u32 %v8997_v56, %v7180_v59 }
 0x19e   : > { %7288 = vmatmul.msk.bf16.gmra.mxu3 %vm543_vm0, %v7175_v7  ;;  %v9032_v7 = vld [vmem:[%s9832_s25 + $0x144] sm:$0xf0] }
 0x1a0   : > { %v950_v36 = vpop.f32.mrf.mxu2  ;;  %v678_v29 = vpop.f32.mrf.mxu0 }
 0x1a1   : > { %v1463_v18 = vpop.f32.mrf.mxu3  ;;  %v951_v43 = vadd.f32 %v950_v36, %v766_v27  ;;  %v1376_v45 = vpop.f32.mrf.mxu1  ;;  %v768_v63 = vadd.f32 %v767_v60, %v678_v29  ;;  %v8999_v29 = vld [vmem:[%s9832_s25 + $0xe4] sm:$0xf] }
 0x1a2   : > { %v1464_v37 = vadd.f32 %v1463_v18, %v1374_v25 }
 0x1a3   : > { %v10194_v48 = vadd.f32 %v1039_v54, %v951_v43  ;;  %v7179_v54 = vor.u32 %v8998_v51, %v7178_v40  ;;  %v7188_v40 = vld [vmem:[%s9832_s25 + $0xe8] sm:$0xf0] }
 0x1a4   : > { %v1543_v55 = vadd.f32 %v1464_v37, %v9966_v52  ;;  %v7370_v52 = vld [vmem:[%s9832_s25 + $0x140] sm:$0xf]  ;;  %v9000_v37 = vld [vmem:[%s9832_s25 + $0xe4] sm:$0xf0] }
 0x1a5   : > { %v10212_v60 = vor.u32 %v9032_v7, %v7370_v52 }
 0x1a6   : > { %v1578_v21 = vadd.f32 %v10204_v61, %v1543_v55 }
 0x1a7   : > { %2252 = vmatmul.bf16.gmra.mxu2 %v10212_v60 }
 0x1a8   : > { %v952_v4 = vpop.f32.mrf.mxu2  ;;  %v1610_v31 = vmax.f32 %v1578_v21, 0.0 }
 0x1a9   : > { %v1465_v6 = vpop.f32.mrf.mxu3  ;;  %v953_v8 = vadd.f32 %v952_v4, %v768_v63  ;;  %v1379_v13 = vpop.f32.mrf.mxu1  ;;  %v7191_v4 = vor.u32 %v8999_v29, %v7188_v40 }
 0x1aa   : > { %v1466_v12 = vadd.f32 %v1465_v6, %v1376_v45  ;;  %v7186_v45 = vld [vmem:[%s9832_s25 + $0xe0] sm:$0xf] }
 0x1ab   : > { %v10207_v22 = vadd.f32 %v1041_v19, %v953_v8  ;;  %v7187_v59 = vor.u32 %v9000_v37, %v7186_v45  ;;  %v7378_v8 = vld [vmem:[%s9832_s25 + $0x150] sm:$0xf] }
 0x1ac   : > { %v1544_v25 = vadd.f32 %v1466_v12, %v9976_v1  ;;  %1418 = vmatmul.bf16.gmra.mxu1 %v7179_v54  ;;  %v9061_v1 = vld [vmem:[%s12780_s1 + $0x30] sm:$0xff]  ;;  %v9034_v12 = vld [vmem:[%s9832_s25 + $0x154] sm:$0xf0] }
 0x1ad   : > { %2509 = vmatpush.bf16.msra.mxu3 %v9061_v1  ;;  %v9001_v1 = vld [vmem:[%s9832_s25 + $0xf4] sm:$0xf] }
 0x1ae   : > { %v1579_v27 = vadd.f32 %v10204_v61, %v1544_v25  ;;  %7289 = vmatmul.msk.bf16.gmra.mxu3 %vm543_vm0, %v7183_v20 }
 0x1b0   : > { %v1611_v19 = vmax.f32 %v1579_v27, 0.0 }
 0x1b1   : > { %v1468_v15 = vpop.f32.mrf.mxu3  ;;  %v1381_v18 = vpop.f32.mrf.mxu1 }
 0x1b2   : > { %v1642_v36 = vpack.c.bf16 %v1611_v19, %v1610_v31  ;;  %v1469_v43 = vadd.f32 %v1468_v15, %v1379_v13  ;;  %v10230_v13 = vor.u32 %v9034_v12, %v7378_v8  ;;  %v7194_v31 = vld [vmem:[%s9832_s25 + $0xf0] sm:$0xf]  ;;  %v9002_v19 = vld [vmem:[%s9832_s25 + $0xf4] sm:$0xf0]  ;;  %v7196_v15 = vld [vmem:[%s9832_s25 + $0xf8] sm:$0xf0] }
 0x1b3   : > { %v7199_v29 = vor.u32 %v9001_v1, %v7196_v15 }
 0x1b4   : > { %7312 = vmatmul.msk.bf16.vlgmr.msrb.gmra.mxu0 %vm543_vm0, %v1642_v36  ;;  %v1545_v51 = vadd.f32 %v1469_v43, %v9988_v10  ;;  %v7195_v43 = vor.u32 %v9002_v19, %v7194_v31 }
 0x1b6   : > { %v1580_v6 = vadd.f32 %v10204_v61, %v1545_v51 }
 0x1b7   : > { %2257 = vmatmul.bf16.gmra.mxu2 %v10230_v13 }
 0x1b8   : > { %v1612_v20 = vmax.f32 %v1580_v6, 0.0 }
 0x1b9   : > { %v1470_v56 = vpop.f32.mrf.mxu3  ;;  %v1384_v63 = vpop.f32.mrf.mxu1 }
 0x1ba   : > { %v1471_v55 = vadd.f32 %v1470_v56, %v1381_v18  ;;  %v7386_v56 = vld [vmem:[%s9832_s25 + $0x160] sm:$0xf] }
 0x1bc   : > { %v1546_v54 = vadd.f32 %v1471_v55, %v9994_v23  ;;  %1423 = vmatmul.bf16.gmra.mxu1 %v7187_v59  ;;  %v9079_v23 = vld [vmem:[%s12780_s1 + $0xa0] sm:$0xff]  ;;  %v9036_v59 = vld [vmem:[%s9832_s25 + $0x164] sm:$0xf0] }
 0x1bd   : > { %2330 = vmatpush.bf16.msra.mxu1 %v9079_v23  ;;  %v10248_v55 = vor.u32 %v9036_v59, %v7386_v56  ;;  %v7204_v23 = vld [vmem:[%s9832_s25 + $0x108] sm:$0xf0]  ;;  %v7210_v59 = vld [vmem:[%s9832_s25 + $0x110] sm:$0xf] }
 0x1be   : > { %v1581_v10 = vadd.f32 %v10204_v61, %v1546_v54  ;;  %7290 = vmatmul.msk.bf16.gmra.mxu3 %vm543_vm0, %v7191_v4 }
 0x1c0   : > { %v1613_v21 = vmax.f32 %v1581_v10, 0.0  ;;  %v7202_v10 = vld [vmem:[%s9832_s25 + $0x100] sm:$0xf] }
 0x1c1   : > { %v1473_v25 = vpop.f32.mrf.mxu3  ;;  %v1386_v52 = vpop.f32.mrf.mxu1 }
 0x1c2   : > { %v1643_v7 = vpack.c.bf16 %v1613_v21, %v1612_v20  ;;  %v1474_v27 = vadd.f32 %v1473_v25, %v1384_v63  ;;  %v9004_v20 = vld [vmem:[%s9832_s25 + $0x104] sm:$0xf0]  ;;  %v9003_v21 = vld [vmem:[%s9832_s25 + $0x104] sm:$0xf] }
 0x1c3   : > { %v7207_v1 = vor.u32 %v9003_v21, %v7204_v23 }
 0x1c4   : > { %7313 = vmatmul.msk.bf16.gmra.mxu0 %vm543_vm0, %v1643_v7  ;;  %v1547_v36 = vadd.f32 %v1474_v27, %v9998_v30  ;;  %v7203_v27 = vor.u32 %v9004_v20, %v7202_v10 }
 0x1c6   : > { %v1582_v40 = vadd.f32 %v10204_v61, %v1547_v36 }
 0x1c7   : > { %2262 = vmatmul.bf16.gmra.mxu2 %v10248_v55 }
 0x1c8   : > { %v1614_v63 = vmax.f32 %v1582_v40, 0.0 }
 0x1c9   : > { %v1475_v18 = vpop.f32.mrf.mxu3  ;;  %v1389_v37 = vpop.f32.mrf.mxu1 }
 0x1ca   : > { %v1476_v45 = vadd.f32 %v1475_v18, %v1386_v52  ;;  %v9065_v52 = vld [vmem:[%s12780_s1 + $0x50] sm:$0xff] }
 0x1cb   : > { %2602 = vmatpush.bf16.msra.mxu0 %v9065_v52  ;;  %v7394_v18 = vld [vmem:[%s9832_s25 + $0x170] sm:$0xf]  ;;  %v9040_v52 = vld [vmem:[%s9832_s25 + $0x184] sm:$0xf0] }
 0x1cc   : > { %v1548_v51 = vadd.f32 %v1476_v45, %v10007_v44  ;;  %1428 = vmatmul.bf16.gmra.mxu1 %v7195_v43  ;;  %v9060_v44 = vld [vmem:[%s12780_s1 + $0x28] sm:$0xff]  ;;  %v9038_v43 = vld [vmem:[%s9832_s25 + $0x174] sm:$0xf0] }
 0x1cd   : > { %2510 = vmatpush.bf16.msra.mxu3 %v9060_v44 }
 0x1ce   : > { %v1583_v30 = vadd.f32 %v10204_v61, %v1548_v51  ;;  %7291 = vmatmul.msk.bf16.gmra.mxu3 %vm543_vm0, %v7199_v29 }
 0x1d0   : > { %v1615_v4 = vmax.f32 %v1583_v30, 0.0  ;;  %v9006_v30 = vld [vmem:[%s9832_s25 + $0x114] sm:$0xf0] }
 0x1d1   : > { %v1478_v6 = vpop.f32.mrf.mxu3  ;;  %v1391_v54 = vpop.f32.mrf.mxu1 }
 0x1d2   : > { %v1644_v8 = vpack.c.bf16 %v1615_v4, %v1614_v63  ;;  %v1479_v12 = vadd.f32 %v1478_v6, %v1389_v37  ;;  %v9005_v63 = vld [vmem:[%s9832_s25 + $0x114] sm:$0xf]  ;;  %v7212_v4 = vld [vmem:[%s9832_s25 + $0x118] sm:$0xf0] }
 0x1d3   : > { %v7215_v20 = vor.u32 %v9005_v63, %v7212_v4 }
 0x1d4   : > { %7314 = vmatmul.msk.bf16.gmra.mxu0 %vm543_vm0, %v1644_v8  ;;  %v1549_v25 = vadd.f32 %v1479_v12, %v10016_v53  ;;  %v10269_v53 = vor.u32 %v9038_v43, %v7394_v18  ;;  %v9059_v8 = vld [vmem:[%s12780_s1 + $0x20] sm:$0xff]  ;;  %v9056_v43 = vld [vmem:[%s12780_s1 + $0x8] sm:$0xff] }
 0x1d5   : > { %2511 = vmatpush.bf16.msra.mxu3 %v9059_v8 }
 0x1d6   : > { %v1584_v15 = vadd.f32 %v10204_v61, %v1549_v25  ;;  %v7402_v25 = vld [vmem:[%s9832_s25 + $0x180] sm:$0xf] }
 0x1d7   : > { %2267 = vmatmul.bf16.gmra.mxu2 %v10269_v53 }
 0x1d8   : > { %v1616_v37 = vmax.f32 %v1584_v15, 0.0 }
 0x1d9   : > { %v1480_v7 = vpop.f32.mrf.mxu3  ;;  %v1394_v19 = vpop.f32.mrf.mxu1 }
 0x1da   : > { %v1481_v31 = vadd.f32 %v1480_v7, %v1391_v54  ;;  %v7211_v54 = vor.u32 %v9006_v30, %v7210_v59  ;;  %v10287_v7 = vor.u32 %v9040_v52, %v7402_v25  ;;  %v9055_v30 = vld [vmem:[%s12780_s1] sm:$0xff]  ;;  %v9729_v25 = vld [vmem:[%s12782_s3 + $0x10] sm:$0xff] }
 0x1dc   : > { %v1550_v36 = vadd.f32 %v1481_v31, %v10022_v3  ;;  %1433 = vmatmul.bf16.gmra.mxu1 %v7203_v27 }
 0x1de   : > { %v1585_v45 = vadd.f32 %v10204_v61, %v1550_v36  ;;  %7292 = vmatmul.msk.bf16.gmra.mxu3 %vm543_vm0, %v7207_v1  ;;  %v9057_v1 = vld [vmem:[%s12780_s1 + $0x10] sm:$0xff] }
 0x1e0   : > { %v1617_v29 = vmax.f32 %v1585_v45, 0.0  ;;  %v7218_v45 = vld [vmem:[%s9832_s25 + $0x120] sm:$0xf] }
 0x1e1   : > { %v1483_v40 = vpop.f32.mrf.mxu3  ;;  %v1396_v51 = vpop.f32.mrf.mxu1 }
 0x1e2   : > { %v1645_v56 = vpack.c.bf16 %v1617_v29, %v1616_v37  ;;  %v1484_v3 = vadd.f32 %v1483_v40, %v1394_v19  ;;  %v9008_v37 = vld [vmem:[%s9832_s25 + $0x124] sm:$0xf0]  ;;  %v9007_v29 = vld [vmem:[%s9832_s25 + $0x124] sm:$0xf]  ;;  %v7220_v40 = vld [vmem:[%s9832_s25 + $0x128] sm:$0xf0] }
 0x1e3   : > { %v7219_v59 = vor.u32 %v9008_v37, %v7218_v45 }
 0x1e4   : > { %7315 = vmatmul.msk.bf16.gmra.mxu0 %vm543_vm0, %v1645_v56  ;;  %v1551_v44 = vadd.f32 %v1484_v3, %v10026_v9  ;;  %v9058_v9 = vld [vmem:[%s12780_s1 + $0x18] sm:$0xff] }
 0x1e5   : > { %2512 = vmatpush.bf16.msra.mxu3 %v9058_v9  ;;  %v9122_v56 = vld [vmem:[%s12780_s1 + $0xf8] sm:$0xff] }
 0x1e6   : > { %v1586_v21 = vadd.f32 %v10204_v61, %v1551_v44  ;;  %v7223_v44 = vor.u32 %v9007_v29, %v7220_v40  ;;  %3006 = vmatpush.bf16.msra.mxu2 %v9122_v56  ;;  %v7418_v40 = vld [vmem:[%s9832_s25 + $0x1a0] sm:$0xf] }
 0x1e7   : > { %2272 = vmatmul.bf16.gmra.mxu2 %v10287_v7 }
 0x1e9   : > { %v1485_v6 = vpop.f32.mrf.mxu3  ;;  %v1399_v10 = vpop.f32.mrf.mxu1  ;;  %2513 = vmatpush.bf16.msra.mxu3 %v9057_v1  ;;  %v9009_v1 = vld [vmem:[%s9832_s25 + $0x134] sm:$0xf] }
 0x1ea   : > { %v1486_v12 = vadd.f32 %v1485_v6, %v1396_v51  ;;  %v7410_v6 = vld [vmem:[%s9832_s25 + $0x190] sm:$0xf] }
 0x1ec   : > { %v1552_v23 = vadd.f32 %v1486_v12, %v10037_v26  ;;  %1438 = vmatmul.bf16.gmra.mxu1 %v7211_v54  ;;  %v1618_v26 = vmax.f32 %v1586_v21, 0.0  ;;  %v9042_v54 = vld [vmem:[%s9832_s25 + $0x194] sm:$0xf0] }
 0x1ed   : > { %2514 = vmatpush.bf16.msra.mxu3 %v9056_v43  ;;  %v10317_v12 = vor.u32 %v9042_v54, %v7410_v6  ;;  %v7356_v54 = vld [vmem:[%s9832_s25 + $0x128] sm:$0xf0] }
 0x1ee   : > { %v1587_v27 = vadd.f32 %v10204_v61, %v1552_v23  ;;  %7293 = vmatmul.msk.bf16.gmra.mxu3 %vm543_vm0, %v7215_v20  ;;  %v9126_v23 = vld [vmem:[%s12780_s1 + $0x118] sm:$0xff] }
 0x1ef   : > { %3099 = vmatpush.bf16.msrb.mxu1 %v9126_v23 }
 0x1f0   : > { %v1619_v31 = vmax.f32 %v1587_v27, 0.0 }
 0x1f1   : > { %v1488_v19 = vpop.f32.mrf.mxu3  ;;  %v1401_v15 = vpop.f32.mrf.mxu1  ;;  %2515 = vmatpush.bf16.msra.mxu3 %v9055_v30 }
 0x1f2   : > { %v1646_v36 = vpack.c.bf16 %v1619_v31, %v1618_v26  ;;  %v1489_v18 = vadd.f32 %v1488_v19, %v1399_v10  ;;  %v9728_v10 = vld [vmem:[%s12782_s3 + $0x18] sm:$0xff]  ;;  %v7226_v31 = vld [vmem:[%s9832_s25 + $0x130] sm:$0xf] }
 0x1f3   : > { %v9010_v19 = vld [vmem:[%s9832_s25 + $0x134] sm:$0xf0] }
 0x1f4   : > { %7316 = vmatmul.msk.bf16.gmra.mxu0 %vm543_vm0, %v1646_v36  ;;  %v1553_v51 = vadd.f32 %v1489_v18, %v10045_v34  ;;  %v7227_v43 = vor.u32 %v9010_v19, %v7226_v31 }
 0x1f5   : > { %3348 = vmatpush.bf16.msrb.mxu3 %v9728_v10 }
 0x1f6   : > { %v1588_v8 = vadd.f32 %v10204_v61, %v1553_v51  ;;  %v9044_v51 = vld [vmem:[%s9832_s25 + $0x1a4] sm:$0xf0] }
 0x1f7   : > { %2277 = vmatmul.bf16.gmra.mxu2 %v10317_v12 }
 0x1f8   : > { %v1620_v21 = vmax.f32 %v1588_v8, 0.0  ;;  %v7546_v8 = vld [vmem:[%s9832_s25 + $0x100] sm:$0xf] }
 0x1f9   : > { %v1490_v3 = vpop.f32.mrf.mxu3  ;;  %v1404_v4 = vpop.f32.mrf.mxu1  ;;  %3349 = vmatpush.bf16.msrb.mxu3 %v9729_v25 }
 0x1fa   : > { %v1491_v63 = vadd.f32 %v1490_v3, %v1401_v15  ;;  %v7228_v15 = vld [vmem:[%s9832_s25 + $0x138] sm:$0xf0]  ;;  %v10343_v3 = vor.u32 %v9044_v51, %v7418_v40  ;;  %v9029_v40 = vld [vmem:[%s9832_s25 + $0x134] sm:$0xf] }
 0x1fb   : > { %v7231_v29 = vor.u32 %v9009_v1, %v7228_v15  ;;  %v7364_v51 = vld [vmem:[%s9832_s25 + $0x138] sm:$0xf0] }
 0x1fc   : > { %v1554_v34 = vadd.f32 %v1491_v63, %v10051_v49  ;;  %1443 = vmatmul.bf16.gmra.mxu1 %v7219_v59 }
 0x1fd   : > { %3350 = vmatpush.bf16.msrb.mxu3 %v10060_v58 }
 0x1fe   : > { %v1589_v20 = vadd.f32 %v10204_v61, %v1554_v34  ;;  %7294 = vmatmul.msk.bf16.gmra.mxu3 %vm543_vm0, %v7223_v44  ;;  %v9024_v34 = vld [vmem:[%s9832_s25 + $0x104] sm:$0xf0] }
 0x200   : > { %v1621_v49 = vmax.f32 %v1589_v20, 0.0  ;;  %v9064_v20 = vld [vmem:[%s12780_s1 + $0x48] sm:$0xff] }
 0x201   : > { %v1493_v52 = vpop.f32.mrf.mxu3  ;;  %v1406_v9 = vpop.f32.mrf.mxu1  ;;  %3351 = vmatpush.bf16.msrb.mxu3 %v10114_v39  ;;  %2603 = vmatpush.bf16.msra.mxu0 %v9064_v20 }
 0x202   : > { %v1647_v27 = vpack.c.bf16 %v1621_v49, %v1620_v21  ;;  %v1494_v26 = vadd.f32 %v1493_v52, %v1404_v4  ;;  %v9121_v21 = vld [vmem:[%s12780_s1 + $0xf0] sm:$0xff] }
 0x203   : > { %3007 = vmatpush.bf16.msra.mxu2 %v9121_v21 }
 0x204   : > { %7317 = vmatmul.msk.bf16.gmra.mxu0 %vm543_vm0, %v1647_v27  ;;  %v1555_v36 = vadd.f32 %v1494_v26, %v10055_v57  ;;  %v7426_v26 = vld [vmem:[%s9832_s25 + $0x1b0] sm:$0xf] }
 0x206   : > { %v1590_v56 = vadd.f32 %v10204_v61, %v1555_v36 }
 0x207   : > { %2282 = vmatmul.bf16.gmra.mxu2 %v10343_v3  ;;  %v10348_v44 = vpop.f32.mrf.mxu2 }
 0x208   : > { %v1622_v39 = vmax.f32 %v1590_v56, 0.0  ;;  %v7554_v56 = vld [vmem:[%s9832_s25 + $0x110] sm:$0xf] }
 0x209   : > { %v1495_v18 = vpop.f32.mrf.mxu3  ;;  %v1409_v37 = vpop.f32.mrf.mxu1 }
 0x20a   : > { %v1496_v45 = vadd.f32 %v1495_v18, %v1406_v9  ;;  %v7547_v9 = vor.u32 %v9024_v34, %v7546_v8 }
 0x20c   : > { %v1556_v58 = vadd.f32 %v1496_v45, %v10072_v16  ;;  %1448 = vmatmul.bf16.gmra.mxu1 %v7227_v43  ;;  %v9027_v16 = vld [vmem:[%s9832_s25 + $0x124] sm:$0xf] }
 0x20d   : > { %v10362_v23 = vor.u32 %v9027_v16, %v7356_v54  ;;  %v7434_v16 = vld [vmem:[%s9832_s25 + $0x1c0] sm:$0xf]  ;;  %v9048_v54 = vld [vmem:[%s9832_s25 + $0x1c4] sm:$0xf0] }
 0x20e   : > { %v1591_v57 = vadd.f32 %v10204_v61, %v1556_v58  ;;  %7295 = vmatmul.msk.bf16.gmra.mxu3 %vm543_vm0, %v7231_v29  ;;  %v9026_v58 = vld [vmem:[%s9832_s25 + $0x114] sm:$0xf0] }
 0x20f   : > { %v10364_v27 = vpop.f32.mrf.mxu2 }
 0x210   : > { %v1623_v59 = vmax.f32 %v1591_v57, 0.0 }
 0x211   : > { %v1498_v30 = vpop.f32.mrf.mxu3  ;;  %v1411_v63 = vpop.f32.mrf.mxu1 }
 0x212   : > { %v1648_v4 = vpack.c.bf16 %v1623_v59, %v1622_v39  ;;  %v1499_v6 = vadd.f32 %v1498_v30, %v1409_v37  ;;  %v10384_v59 = vor.u32 %v9029_v40, %v7364_v51 }
 0x214   : > { %7318 = vmatmul.msk.bf16.gmra.mxu0 %vm543_vm0, %v1648_v4  ;;  %v1557_v10 = vadd.f32 %v1499_v6, %v10076_v24  ;;  %v9046_v24 = vld [vmem:[%s9832_s25 + $0x1b4] sm:$0xf0]  ;;  %v7555_v4 = vor.u32 %v9026_v58, %v7554_v56 }
 0x215   : > { %v10370_v1 = vor.u32 %v9046_v24, %v7426_v26  ;;  %v10406_v24 = vld [vmem:[%s12783_s4] ss:$0 sm:$0xff]  ;;  %v9050_v58 = vld [vmem:[%s9832_s25 + $0x1d4] sm:$0xf0] }
 0x216   : > { %v1592_v31 = vadd.f32 %v10204_v61, %v1557_v10  ;;  %v10392_v10 = vor.u32 %v9048_v54, %v7434_v16 }
 0x217   : > { %2287 = vmatmul.bf16.gmra.mxu2 %v10370_v1 }
 0x218   : > { %v1624_v36 = vmax.f32 %v1592_v31, 0.0  ;;  %v9031_v31 = vld [vmem:[%s9832_s25 + $0x144] sm:$0xf] }
 0x219   : > { %v1500_v49 = vpop.f32.mrf.mxu3  ;;  %v1414_v52 = vpop.f32.mrf.mxu1 }
 0x21a   : > { %v1501_v25 = vadd.f32 %v1500_v49, %v1411_v63 }
 0x21c   : > { %v1558_v19 = vadd.f32 %v1501_v25, %v10082_v38  ;;  %7528 = vmatmul.msk.bf16.vlgmr.msra.gmra.mxu1 %vm543_vm0, %v10362_v23  ;;  %v10376_v38 = vpop.f32.mrf.mxu2 }
 0x21e   : > { %v1593_v15 = vadd.f32 %v10204_v61, %v1558_v19  ;;  %2516 = vmatmul.bf16.vlgmr.msra.gmra.mxu3 %v7547_v9  ;;  %v7372_v19 = vld [vmem:[%s9832_s25 + $0x148] sm:$0xf0] }
 0x220   : > { %v1625_v18 = vmax.f32 %v1593_v15, 0.0 }
 0x221   : > { %v1503_v43 = vpop.f32.mrf.mxu3  ;;  %v1416_v45 = vpop.f32.mrf.mxu1 }
 0x222   : > { %v1649_v37 = vpack.c.bf16 %v1625_v18, %v1624_v36  ;;  %v1504_v29 = vadd.f32 %v1503_v43, %v1414_v52  ;;  %v9120_v36 = vld [vmem:[%s12780_s1 + $0xe8] sm:$0xff] }
 0x223   : > { %3008 = vmatpush.bf16.msra.mxu2 %v9120_v36 }
 0x224   : > { %7319 = vmatmul.msk.bf16.gmra.mxu0 %vm543_vm0, %v1649_v37  ;;  %v1559_v57 = vadd.f32 %v1504_v29, %v10085_v47  ;;  %v10386_v6 = vpop.f32.mrf.mxu2 }
 0x226   : > { %v1594_v8 = vadd.f32 %v10204_v61, %v1559_v57 }
 0x227   : > { %2292 = vmatmul.bf16.gmra.mxu2 %v10392_v10 }
 0x228   : > { %v1626_v20 = vmax.f32 %v1594_v8, 0.0 }
 0x229   : > { %v1505_v39 = vpop.f32.mrf.mxu3  ;;  %v1419_v63 = vpop.f32.mrf.mxu1 }
 0x22a   : > { %v1506_v30 = vadd.f32 %v1505_v39, %v1416_v45  ;;  %v10414_v45 = vor.u32 %v9031_v31, %v7372_v19 }
 0x22c   : > { %v1560_v34 = vadd.f32 %v1506_v30, %v10094_v5  ;;  %7529 = vmatmul.msk.bf16.gmra.mxu1 %vm543_vm0, %v10384_v59  ;;  %v10400_v9 = vpop.f32.mrf.mxu2 }
 0x22e   : > { %v1595_v47 = vadd.f32 %v10204_v61, %v1560_v34  ;;  %2521 = vmatmul.bf16.gmra.mxu3 %v7555_v4 }
 0x230   : > { %v1627_v21 = vmax.f32 %v1595_v47, 0.0 }
 0x231   : > { %v1508_v49 = vpop.f32.mrf.mxu3  ;;  %v1742_v25 = vpop.f32.mrf.mxu0 }
 0x232   : > { %v1421_v5 = vpop.f32.mrf.mxu1  ;;  %v1650_v52 = vpack.c.bf16 %v1627_v21, %v1626_v20  ;;  %v1509_v26 = vadd.f32 %v1508_v49, %v1419_v63  ;;  %v1743_v37 = vadd.f32 %v10406_v24, %v1742_v25  ;;  %v7380_v25 = vld [vmem:[%s9832_s25 + $0x158] sm:$0xf0] }
 0x234   : > { %7320 = vmatmul.msk.bf16.gmra.mxu0 %vm543_vm0, %v1650_v52  ;;  %v1561_v15 = vadd.f32 %v1509_v26, %v10100_v14  ;;  %v10418_v56 = vpop.f32.mrf.mxu2  ;;  %v7442_v14 = vld [vmem:[%s9832_s25 + $0x1d0] sm:$0xf] }
 0x235   : > { %v10429_v63 = vor.u32 %v9050_v58, %v7442_v14 }
 0x236   : > { %v1596_v57 = vadd.f32 %v10204_v61, %v1561_v15 }
 0x237   : > { %2297 = vmatmul.bf16.gmra.mxu2 %v10429_v63 }
 0x238   : > { %v1628_v16 = vmax.f32 %v1596_v57, 0.0 }
 0x239   : > { %v1510_v18 = vpop.f32.mrf.mxu3  ;;  %v1744_v43 = vpop.f32.mrf.mxu0 }
 0x23a   : > { %v1511_v29 = vadd.f32 %v1510_v18, %v1421_v5  ;;  %v1745_v40 = vadd.f32 %v10406_v24, %v1744_v43  ;;  %v1424_v51 = vpop.f32.mrf.mxu1 }
 0x23c   : > { %v1562_v39 = vadd.f32 %v1511_v29, %v10106_v35  ;;  %v9338_v30 = vpack.c.bf16 %v1745_v40, %v1743_v37  ;;  %7530 = vmatmul.msk.bf16.gmra.mxu1 %vm543_vm0, %v10414_v45  ;;  %v9125_v35 = vld [vmem:[%s12780_s1 + $0x110] sm:$0xff]  ;;  %v10440_v21 = vpop.f32.mrf.mxu2  ;;  %v7450_v37 = vld [vmem:[%s9832_s25 + $0x1e0] sm:$0xf]  ;;  %v9052_v29 = vld [vmem:[%s9832_s25 + $0x1e4] sm:$0xf0] }
 0x23d   : > { %3100 = vmatpush.bf16.msrb.mxu1 %v9125_v35  ;;  %v10456_v14 = vor.u32 %v9052_v29, %v7450_v37 }
 0x23e   : > { %v1597_v4 = vadd.f32 %v10204_v61, %v1562_v39  ;;  %9339 = vst [vmem:[%s10423_s12] sm:$0xff] %v9338_v30   ;;  %2526 = vmatmul.bf16.gmra.mxu3 %v10170_v50  ;;  %v9033_v50 = vld [vmem:[%s9832_s25 + $0x154] sm:$0xf] }
 0x23f   : > { %v10446_v31 = vor.u32 %v9033_v50, %v7380_v25 }
 0x240   : > { %v1629_v54 = vmax.f32 %v1597_v4, 0.0 }
 0x241   : > { %v1513_v8 = vpop.f32.mrf.mxu3  ;;  %v1747_v34 = vpop.f32.mrf.mxu0 }
 0x242   : > { %v1426_v47 = vpop.f32.mrf.mxu1  ;;  %v1651_v20 = vpack.c.bf16 %v1629_v54, %v1628_v16  ;;  %v1514_v49 = vadd.f32 %v1513_v8, %v1424_v51  ;;  %v1748_v19 = vadd.f32 %v10406_v24, %v1747_v34  ;;  %v9035_v8 = vld [vmem:[%s9832_s25 + $0x164] sm:$0xf]  ;;  %v7388_v34 = vld [vmem:[%s9832_s25 + $0x168] sm:$0xf0] }
 0x243   : > { %v10476_v25 = vor.u32 %v9035_v8, %v7388_v34 }
 0x244   : > { %7321 = vmatmul.msk.bf16.gmra.mxu0 %vm543_vm0, %v1651_v20  ;;  %v1563_v5 = vadd.f32 %v1514_v49, %v10109_v42  ;;  %v10450_v43 = vpop.f32.mrf.mxu2  ;;  %v9119_v20 = vld [vmem:[%s12780_s1 + $0xe0] sm:$0xff] }
 0x245   : > { %3009 = vmatpush.bf16.msra.mxu2 %v9119_v20 }
 0x246   : > { %v1598_v40 = vadd.f32 %v10204_v61, %v1563_v5 }
 0x247   : > { %2302 = vmatmul.bf16.gmra.mxu2 %v10456_v14 }
 0x248   : > { %v1630_v57 = vmax.f32 %v1598_v40, 0.0 }
 0x249   : > { %v1515_v52 = vpop.f32.mrf.mxu3  ;;  %v1749_v26 = vpop.f32.mrf.mxu0 }
 0x24a   : > { %v1516_v15 = vadd.f32 %v1515_v52, %v1426_v47  ;;  %v1750_v36 = vadd.f32 %v10406_v24, %v1749_v26  ;;  %v1429_v18 = vpop.f32.mrf.mxu1 }
 0x24c   : > { %v1564_v51 = vadd.f32 %v1516_v15, %v10124_v0  ;;  %v9343_v42 = vpack.c.bf16 %v1750_v36, %v1748_v19  ;;  %7531 = vmatmul.msk.bf16.gmra.mxu1 %vm543_vm0, %v10446_v31  ;;  %v10464_v54 = vpop.f32.mrf.mxu2  ;;  %v7458_v15 = vld [vmem:[%s9832_s25 + $0x1f0] sm:$0xf]  ;;  %v9054_v36 = vld [vmem:[%s9832_s25 + $0x1f4] sm:$0xf0] }
 0x24d   : > { %v10486_v40 = vor.u32 %v9054_v36, %v7458_v15 }
 0x24e   : > { %v1599_v58 = vadd.f32 %v10204_v61, %v1564_v51  ;;  %9655 = vst [vmem:[%s10423_s12 + $0x8] sm:$0xff] %v9343_v42   ;;  %2531 = vmatmul.bf16.gmra.mxu3 %v10190_v33  ;;  %v9063_v33 = vld [vmem:[%s12780_s1 + $0x40] sm:$0xff] }
 0x24f   : > { %2604 = vmatpush.bf16.msra.mxu0 %v9063_v33 }
 0x250   : > { %v1631_v39 = vmax.f32 %v1599_v58, 0.0 }
 0x251   : > { %v1518_v30 = vpop.f32.mrf.mxu3  ;;  %v1752_v4 = vpop.f32.mrf.mxu0 }
 0x252   : > { %v1431_v0 = vpop.f32.mrf.mxu1  ;;  %v1652_v16 = vpack.c.bf16 %v1631_v39, %v1630_v57  ;;  %v1519_v35 = vadd.f32 %v1518_v30, %v1429_v18  ;;  %v1753_v5 = vadd.f32 %v10406_v24, %v1752_v4 }
 0x254   : > { %7322 = vmatmul.msk.bf16.gmra.mxu0 %vm543_vm0, %v1652_v16  ;;  %v1565_v47 = vadd.f32 %v1519_v35, %v10127_v11  ;;  %v10480_v11 = vpop.f32.mrf.mxu2  ;;  %v9037_v16 = vld [vmem:[%s9832_s25 + $0x174] sm:$0xf]  ;;  %v7396_v35 = vld [vmem:[%s9832_s25 + $0x178] sm:$0xf0] }
 0x256   : > { %v1600_v18 = vadd.f32 %v10204_v61, %v1565_v47  ;;  %v10500_v47 = vor.u32 %v9037_v16, %v7396_v35 }
 0x257   : > { %2307 = vmatmul.bf16.gmra.mxu2 %v10486_v40 }
 0x258   : > { %v1632_v42 = vmax.f32 %v1600_v18, 0.0 }
 0x259   : > { %v1520_v49 = vpop.f32.mrf.mxu3  ;;  %v1754_v50 = vpop.f32.mrf.mxu0 }
 0x25a   : > { %v1521_v52 = vadd.f32 %v1520_v49, %v1431_v0  ;;  %v1755_v26 = vadd.f32 %v10406_v24, %v1754_v50  ;;  %v1434_v19 = vpop.f32.mrf.mxu1 }
 0x25c   : > { %v1566_v37 = vadd.f32 %v1521_v52, %v10133_v32  ;;  %v9348_v29 = vpack.c.bf16 %v1755_v26, %v1753_v5  ;;  %7532 = vmatmul.msk.bf16.gmra.mxu1 %vm543_vm0, %v10476_v25  ;;  %v10494_v4 = vpop.f32.mrf.mxu2  ;;  %v7466_v52 = vld [vmem:[%s9832_s25 + $0x200] sm:$0xf]  ;;  %v9068_v26 = vld [vmem:[%s9832_s25 + $0x204] sm:$0xf0] }
 0x25d   : > { %v7467_v36 = vor.u32 %v9068_v26, %v7466_v52 }
 0x25e   : > { %v1601_v51 = vadd.f32 %v10204_v61, %v1566_v37  ;;  %9656 = vst [vmem:[%s10423_s12 + $0x10] sm:$0xff] %v9348_v29   ;;  %2536 = vmatmul.bf16.gmra.mxu3 %v10212_v60 }
 0x260   : > { %v1633_v58 = vmax.f32 %v1601_v51, 0.0 }
 0x261   : > { %v1523_v57 = vpop.f32.mrf.mxu3  ;;  %v1757_v39 = vpop.f32.mrf.mxu0 }
 0x262   : > { %v1436_v32 = vpop.f32.mrf.mxu1  ;;  %v1653_v30 = vpack.c.bf16 %v1633_v58, %v1632_v42  ;;  %v1524_v0 = vadd.f32 %v1523_v57, %v1434_v19  ;;  %v1758_v33 = vadd.f32 %v10406_v24, %v1757_v39 }
 0x264   : > { %7323 = vmatmul.msk.bf16.gmra.mxu0 %vm543_vm0, %v1653_v30  ;;  %v1567_v8 = vadd.f32 %v1524_v0, %v10136_v41  ;;  %v10504_v5 = vpop.f32.mrf.mxu2  ;;  %v7404_v30 = vld [vmem:[%s9832_s25 + $0x188] sm:$0xf0] }
 0x266   : > { %v1602_v19 = vadd.f32 %v10204_v61, %v1567_v8 }
 0x267   : > { %2312 = vmatmul.bf16.gmra.mxu2 %v7467_v36 }
 0x268   : > { %v1634_v37 = vmax.f32 %v1602_v19, 0.0 }
 0x269   : > { %v1525_v60 = vpop.f32.mrf.mxu3  ;;  %v1759_v34 = vpop.f32.mrf.mxu0 }
 0x26a   : > { %v1526_v20 = vadd.f32 %v1525_v60, %v1436_v32  ;;  %v1760_v49 = vadd.f32 %v10406_v24, %v1759_v34  ;;  %v1439_v50 = vpop.f32.mrf.mxu1  ;;  %v9039_v32 = vld [vmem:[%s9832_s25 + $0x184] sm:$0xf] }
 0x26b   : > { %v10524_v8 = vor.u32 %v9039_v32, %v7404_v30  ;;  %v9041_v32 = vld [vmem:[%s9832_s25 + $0x194] sm:$0xf]  ;;  %v7412_v30 = vld [vmem:[%s9832_s25 + $0x198] sm:$0xf0] }
 0x26c   : > { %v1568_v15 = vadd.f32 %v1526_v20, %v10145_v2  ;;  %v9353_v41 = vpack.c.bf16 %v1760_v49, %v1758_v33  ;;  %7533 = vmatmul.msk.bf16.gmra.mxu1 %vm543_vm0, %v10500_v47  ;;  %v10515_v2 = vpop.f32.mrf.mxu2 }
 0x26e   : > { %v1603_v18 = vadd.f32 %v10204_v61, %v1568_v15  ;;  %9657 = vst [vmem:[%s10423_s12 + $0x18] sm:$0xff] %v9353_v41   ;;  %2541 = vmatmul.bf16.gmra.mxu3 %v10230_v13  ;;  %v9118_v13 = vld [vmem:[%s12780_s1 + $0xd8] sm:$0xff] }
 0x26f   : > { %3010 = vmatpush.bf16.msra.mxu2 %v9118_v13 }
 0x270   : > { %v1635_v29 = vmax.f32 %v1603_v18, 0.0 }
 0x271   : > { %v1528_v51 = vpop.f32.mrf.mxu3  ;;  %v1762_v42 = vpop.f32.mrf.mxu0 }
 0x272   : > { %v1441_v58 = vpop.f32.mrf.mxu1  ;;  %v1654_v57 = vpack.c.bf16 %v1635_v29, %v1634_v37  ;;  %v1529_v39 = vadd.f32 %v1528_v51, %v1439_v50  ;;  %v1763_v60 = vadd.f32 %v10406_v24, %v1762_v42  ;;  %v7474_v50 = vld [vmem:[%s9832_s25 + $0x210] sm:$0xf]  ;;  %v9124_v37 = vld [vmem:[%s12780_s1 + $0x108] sm:$0xff] }
 0x273   : > { %v9117_v51 = vld [vmem:[%s12780_s1 + $0xd0] sm:$0xff]  ;;  %3101 = vmatpush.bf16.msrb.mxu1 %v9124_v37 }
 0x274   : > { %7324 = vmatmul.msk.bf16.gmra.mxu0 %vm543_vm0, %v1654_v57  ;;  %v1569_v0 = vadd.f32 %v1529_v39, %v10154_v17  ;;  %v10528_v49 = vpop.f32.mrf.mxu2  ;;  %v9070_v17 = vld [vmem:[%s9832_s25 + $0x214] sm:$0xf0]  ;;  %3011 = vmatpush.bf16.msra.mxu2 %v9117_v51  ;;  %v9116_v39 = vld [vmem:[%s12780_s1 + $0xc8] sm:$0xff] }
 0x275   : > { %v7475_v15 = vor.u32 %v9070_v17, %v7474_v50 }
 0x276   : > { %v1604_v52 = vadd.f32 %v10204_v61, %v1569_v0 }
 0x277   : > { %2317 = vmatmul.bf16.gmra.mxu2 %v7475_v15  ;;  %v9084_v15 = vld [vmem:[%s9832_s25 + $0x144] sm:$0xf0] }
 0x278   : > { %v1636_v36 = vmax.f32 %v1604_v52, 0.0  ;;  %3012 = vmatpush.bf16.msra.mxu2 %v9116_v39  ;;  %v7650_v52 = vld [vmem:[%s9832_s25 + $0x140] sm:$0xf]  ;;  %v9043_v39 = vld [vmem:[%s9832_s25 + $0x1a4] sm:$0xf] }
 0x279   : > { %v1530_v16 = vpop.f32.mrf.mxu3  ;;  %v1764_v35 = vpop.f32.mrf.mxu0 }
 0x27a   : > { %v1531_v34 = vadd.f32 %v1530_v16, %v1441_v58  ;;  %v1765_v33 = vadd.f32 %v10406_v24, %v1764_v35  ;;  %v1444_v20 = vpop.f32.mrf.mxu1  ;;  %v10554_v35 = vor.u32 %v9041_v32, %v7412_v30 }
 0x27c   : > { %v1570_v26 = vadd.f32 %v1531_v34, %v10166_v46  ;;  %v9358_v19 = vpack.c.bf16 %v1765_v33, %v1763_v60  ;;  %7534 = vmatmul.msk.bf16.gmra.mxu1 %vm543_vm0, %v10524_v8  ;;  %v10545_v57 = vpop.f32.mrf.mxu2  ;;  %v9115_v60 = vld [vmem:[%s12780_s1 + $0xc0] sm:$0xff] }
 0x27d   : > { %3013 = vmatpush.bf16.msra.mxu2 %v9115_v60 }
 0x27e   : > { %v1605_v41 = vadd.f32 %v10204_v61, %v1570_v26  ;;  %9658 = vst [vmem:[%s10423_s12 + $0x20] sm:$0xff] %v9358_v19   ;;  %2546 = vmatmul.bf16.gmra.mxu3 %v10248_v55 }
 0x280   : > { %v1637_v18 = vmax.f32 %v1605_v41, 0.0  ;;  %v7651_v41 = vor.u32 %v9084_v15, %v7650_v52 }
 0x281   : > { %v1533_v46 = vpop.f32.mrf.mxu3  ;;  %v1767_v29 = vpop.f32.mrf.mxu0 }
 0x282   : > { %v1446_v42 = vpop.f32.mrf.mxu1  ;;  %v1655_v58 = vpack.c.bf16 %v1637_v18, %v1636_v36  ;;  %v1534_v55 = vadd.f32 %v1533_v46, %v1444_v20  ;;  %v1768_v34 = vadd.f32 %v10406_v24, %v1767_v29 }
 0x284   : > { %7325 = vmatmul.msk.bf16.gmra.mxu0 %vm543_vm0, %v1655_v58  ;;  %v1571_v0 = vadd.f32 %v1534_v55, %v10177_v62  ;;  %v10561_v17 = vpop.f32.mrf.mxu2  ;;  %v9182_v55 = vld [vmem:[%s12780_s1 + $0x98] sm:$0xff] }
 0x285   : > { %3845 = vmatpush.bf16.msrb.mxu0 %v9182_v55 }
 0x286   : > { %v1606_v62 = vadd.f32 %v10204_v61, %v1571_v0 }
 0x287   : > { %3014 = vmatmul.bf16.vlgmr.msra.gmra.mxu2 %v7651_v41 }
 0x288   : > { %v1638_v18 = vmax.f32 %v1606_v62, 0.0 }
 0x289   : > { %v1535_v13 = vpop.f32.mrf.mxu3  ;;  %v1769_v16 = vpop.f32.mrf.mxu0 }
 0x28a   : > { %v1536_v33 = vadd.f32 %v1535_v13, %v1446_v42  ;;  %v1770_v20 = vadd.f32 %v10406_v24, %v1769_v16  ;;  %v1449_v50 = vpop.f32.mrf.mxu1 }
 0x28c   : > { %v1572_v26 = vadd.f32 %v1536_v33, %v10186_v28  ;;  %v9363_v19 = vpack.c.bf16 %v1770_v20, %v1768_v34  ;;  %7535 = vmatmul.msk.bf16.gmra.mxu1 %vm543_vm0, %v10554_v35  ;;  %v10572_v42 = vpop.f32.mrf.mxu2 }
 0x28e   : > { %v1607_v36 = vadd.f32 %v10204_v61, %v1572_v26  ;;  %9659 = vst [vmem:[%s10423_s12 + $0x28] sm:$0xff] %v9363_v19   ;;  %2551 = vmatmul.bf16.gmra.mxu3 %v10269_v53  ;;  %v7420_v53 = vld [vmem:[%s9832_s25 + $0x1a8] sm:$0xf0] }
 0x28f   : > { %v10581_v13 = vor.u32 %v9043_v39, %v7420_v53 }
 0x290   : > { %v1639_v37 = vmax.f32 %v1607_v36, 0.0 }
 0x291   : > { %v1538_v46 = vpop.f32.mrf.mxu3  ;;  %v1772_v29 = vpop.f32.mrf.mxu0 }
 0x292   : > { %v1451_v51 = vpop.f32.mrf.mxu1  ;;  %v1656_v28 = vpack.c.bf16 %v1639_v37, %v1638_v18  ;;  %v1539_v58 = vadd.f32 %v1538_v46, %v1449_v50  ;;  %v1773_v16 = vadd.f32 %v10406_v24, %v1772_v29  ;;  %v7658_v50 = vld [vmem:[%s9832_s25 + $0x150] sm:$0xf] }
 0x294   : > { %7326 = vmatmul.msk.bf16.gmra.mxu0 %vm543_vm0, %v1656_v28  ;;  %v1573_v32 = vadd.f32 %v1539_v58, %v10194_v48  ;;  %v10585_v20 = vpop.f32.mrf.mxu2  ;;  %v9086_v48 = vld [vmem:[%s9832_s25 + $0x154] sm:$0xf0] }
 0x295   : > { %v7659_v19 = vor.u32 %v9086_v48, %v7658_v50  ;;  %v7548_v50 = vld [vmem:[%s9832_s25 + $0x108] sm:$0xf0] }
 0x296   : > { %v1608_v52 = vadd.f32 %v10204_v61, %v1573_v32 }
 0x297   : > { %3019 = vmatmul.bf16.gmra.mxu2 %v7659_v19 }
 0x298   : > { %v1640_v41 = vmax.f32 %v1608_v52, 0.0 }
 0x299   : > { %v1540_v30 = vpop.f32.mrf.mxu3  ;;  %v1774_v0 = vpop.f32.mrf.mxu0 }
 0x29a   : > { %v1541_v60 = vadd.f32 %v1540_v30, %v1451_v51  ;;  %v1775_v34 = vadd.f32 %v10406_v24, %v1774_v0  ;;  %v2332_v33 = vpop.f32.mrf.mxu1 }
 0x29b   : > { %v2333_v18 = vadd.f32 %v2332_v33, %v10348_v44  ;;  %v9088_v33 = vld [vmem:[%s9832_s25 + $0x164] sm:$0xf0] }
 0x29c   : > { %v1574_v62 = vadd.f32 %v1541_v60, %v10207_v22  ;;  %v9368_v26 = vpack.c.bf16 %v1775_v34, %v1773_v16  ;;  %7536 = vmatmul.msk.bf16.gmra.mxu1 %vm543_vm0, %v10581_v13  ;;  %v10599_v28 = vpop.f32.mrf.mxu2  ;;  %v7666_v60 = vld [vmem:[%s9832_s25 + $0x160] sm:$0xf] }
 0x29d   : > { %v7667_v52 = vor.u32 %v9088_v33, %v7666_v60  ;;  %v7556_v60 = vld [vmem:[%s9832_s25 + $0x118] sm:$0xf0]  ;;  %v9123_v33 = vld [vmem:[%s12780_s1 + $0x100] sm:$0xff] }
 0x29e   : > { %v1609_v15 = vadd.f32 %v10204_v61, %v1574_v62  ;;  %9660 = vst [vmem:[%s10423_s12 + $0x30] sm:$0xff] %v9368_v26   ;;  %2556 = vmatmul.bf16.gmra.mxu3 %v10287_v7  ;;  %v9045_v61 = vld [vmem:[%s9832_s25 + $0x1b4] sm:$0xf]  ;;  %v7428_v7 = vld [vmem:[%s9832_s25 + $0x1b8] sm:$0xf0]  ;;  %3102 = vmatpush.bf16.msrb.mxu1 %v9123_v33 }
 0x29f   : > { %v10605_v39 = vor.u32 %v9045_v61, %v7428_v7 }
 0x2a0   : > { %v1641_v36 = vmax.f32 %v1609_v15, 0.0 }
 0x2a1   : > { %v1777_v37 = vpop.f32.mrf.mxu0  ;;  %v2517_v22 = vpop.f32.mrf.mxu3 }
 0x2a2   : > { %v10597_v46 = vadd.f32 %v2517_v22, %v2333_v18  ;;  %v2334_v29 = vpop.f32.mrf.mxu1  ;;  %v1657_v51 = vpack.c.bf16 %v1641_v36, %v1640_v41  ;;  %v1778_v53 = vadd.f32 %v10406_v24, %v1777_v37  ;;  %v9181_v18 = vld [vmem:[%s12780_s1 + $0x90] sm:$0xff]  ;;  %v7436_v37 = vld [vmem:[%s9832_s25 + $0x1c8] sm:$0xf0] }
 0x2a3   : > { %v2335_v58 = vadd.f32 %v2334_v29, %v10364_v27  ;;  %v9023_v27 = vld [vmem:[%s9832_s25 + $0x104] sm:$0xf]  ;;  %3846 = vmatpush.bf16.msrb.mxu0 %v9181_v18 }
 0x2a4   : > { %7327 = vmatmul.msk.bf16.gmra.mxu0 %vm543_vm0, %v1657_v51  ;;  %v10611_v16 = vpop.f32.mrf.mxu2  ;;  %v7551_v26 = vor.u32 %v9023_v27, %v7548_v50 }
 0x2a7   : > { %3024 = vmatmul.bf16.gmra.mxu2 %v7667_v52 }
 0x2a9   : > { %v1779_v44 = vpop.f32.mrf.mxu0  ;;  %v2519_v55 = vpop.f32.mrf.mxu3 }
 0x2aa   : > { %v1780_v32 = vadd.f32 %v10406_v24, %v1779_v44  ;;  %v10609_v30 = vadd.f32 %v2519_v55, %v2335_v58  ;;  %v2337_v0 = vpop.f32.mrf.mxu1 }
 0x2ab   : > { %v2338_v62 = vadd.f32 %v2337_v0, %v10376_v38  ;;  %v9090_v0 = vld [vmem:[%s9832_s25 + $0x174] sm:$0xf0] }
 0x2ac   : > { %v9373_v34 = vpack.c.bf16 %v1780_v32, %v1778_v53  ;;  %7537 = vmatmul.msk.bf16.gmra.mxu1 %vm543_vm0, %v10605_v39  ;;  %v10624_v36 = vpop.f32.mrf.mxu2  ;;  %v7674_v53 = vld [vmem:[%s9832_s25 + $0x170] sm:$0xf] }
 0x2ae   : > { %9661 = vst [vmem:[%s10423_s12 + $0x38] sm:$0xff] %v9373_v34   ;;  %2561 = vmatmul.bf16.gmra.mxu3 %v10317_v12  ;;  %v9047_v12 = vld [vmem:[%s9832_s25 + $0x1c4] sm:$0xf]  ;;  %v7675_v34 = vor.u32 %v9090_v0, %v7674_v53 }
 0x2af   : > { %v10633_v51 = vor.u32 %v9047_v12, %v7436_v37 }
 0x2b1   : > { %v1782_v48 = vpop.f32.mrf.mxu0  ;;  %v2522_v19 = vpop.f32.mrf.mxu3 }
 0x2b2   : > { %v10622_v15 = vadd.f32 %v2522_v19, %v2338_v62  ;;  %v2339_v41 = vpop.f32.mrf.mxu1  ;;  %v1783_v61 = vadd.f32 %v10406_v24, %v1782_v48 }
 0x2b3   : > { %v2340_v38 = vadd.f32 %v2339_v41, %v10386_v6  ;;  %v9025_v6 = vld [vmem:[%s9832_s25 + $0x114] sm:$0xf]  ;;  %v7444_v41 = vld [vmem:[%s9832_s25 + $0x1d8] sm:$0xf0] }
 0x2b4   : > { %7608 = vmatmul.msk.bf16.vlgmr.msra.gmra.mxu0 %vm543_vm0, %v7551_v26  ;;  %v10639_v55 = vpop.f32.mrf.mxu2  ;;  %v7559_v50 = vor.u32 %v9025_v6, %v7556_v60 }
 0x2b5   : > { %12790 = vst [vmem:[#allocation2_spill] sm:$0xff] %v10639_v55 }
 0x2b7   : > { %3029 = vmatmul.bf16.gmra.mxu2 %v7675_v34 }
 0x2b9   : > { %v1784_v22 = vpop.f32.mrf.mxu0  ;;  %v2524_v29 = vpop.f32.mrf.mxu3 }
 0x2ba   : > { %v1785_v7 = vadd.f32 %v10406_v24, %v1784_v22  ;;  %v10637_v58 = vadd.f32 %v2524_v29, %v2340_v38  ;;  %v2342_v44 = vpop.f32.mrf.mxu1 }
 0x2bb   : > { %v2343_v27 = vadd.f32 %v2342_v44, %v10400_v9  ;;  %v7682_v44 = vld [vmem:[%s9832_s25 + $0x180] sm:$0xf] }
 0x2bc   : > { %v9378_v32 = vpack.c.bf16 %v1785_v7, %v1783_v61  ;;  %7538 = vmatmul.msk.bf16.gmra.mxu1 %vm543_vm0, %v10633_v51  ;;  %v10655_v19 = vpop.f32.mrf.mxu2 }
 0x2be   : > { %9662 = vst [vmem:[%s10423_s12 + $0x40] sm:$0xff] %v9378_v32   ;;  %2566 = vmatmul.bf16.gmra.mxu3 %v10343_v3  ;;  %v9049_v3 = vld [vmem:[%s9832_s25 + $0x1d4] sm:$0xf]  ;;  %v9092_v32 = vld [vmem:[%s9832_s25 + $0x184] sm:$0xf0] }
 0x2bf   : > { %v10661_v37 = vor.u32 %v9049_v3, %v7444_v41 }
 0x2c1   : > { %v1787_v52 = vpop.f32.mrf.mxu0  ;;  %v2527_v62 = vpop.f32.mrf.mxu3 }
 0x2c2   : > { %v10653_v26 = vadd.f32 %v2527_v62, %v2343_v27  ;;  %v2344_v48 = vpop.f32.mrf.mxu1  ;;  %v1788_v38 = vadd.f32 %v10406_v24, %v1787_v52  ;;  %v7452_v52 = vld [vmem:[%s9832_s25 + $0x1e8] sm:$0xf0] }
 0x2c3   : > { %v2345_v18 = vadd.f32 %v2344_v48, %v10418_v56  ;;  %v7683_v56 = vor.u32 %v9092_v32, %v7682_v44 }
 0x2c4   : > { %7609 = vmatmul.msk.bf16.gmra.mxu0 %vm543_vm0, %v7559_v50  ;;  %v10667_v7 = vpop.f32.mrf.mxu2  ;;  %v9180_v50 = vld [vmem:[%s12780_s1 + $0x88] sm:$0xff] }
 0x2c5   : > { %12791 = vst [vmem:[#allocation3_spill] sm:$0xff] %v10667_v7  ;;  %3847 = vmatpush.bf16.msrb.mxu0 %v9180_v50 }
 0x2c7   : > { %3034 = vmatmul.bf16.gmra.mxu2 %v7683_v56 }
 0x2c9   : > { %v1789_v12 = vpop.f32.mrf.mxu0  ;;  %v2529_v9 = vpop.f32.mrf.mxu3 }
 0x2ca   : > { %v1790_v22 = vadd.f32 %v10406_v24, %v1789_v12  ;;  %v10665_v29 = vadd.f32 %v2529_v9, %v2345_v18  ;;  %v2347_v61 = vpop.f32.mrf.mxu1 }
 0x2cb   : > { %v2348_v0 = vadd.f32 %v2347_v61, %v10440_v21  ;;  %v9094_v61 = vld [vmem:[%s9832_s25 + $0x194] sm:$0xf0] }
 0x2cc   : > { %v9383_v53 = vpack.c.bf16 %v1790_v22, %v1788_v38  ;;  %7539 = vmatmul.msk.bf16.gmra.mxu1 %vm543_vm0, %v10661_v37  ;;  %v10678_v27 = vpop.f32.mrf.mxu2  ;;  %v7690_v38 = vld [vmem:[%s9832_s25 + $0x190] sm:$0xf] }
 0x2ce   : > { %9663 = vst [vmem:[%s10423_s12 + $0x48] sm:$0xff] %v9383_v53   ;;  %2571 = vmatmul.bf16.gmra.mxu3 %v10370_v1  ;;  %v9051_v1 = vld [vmem:[%s9832_s25 + $0x1e4] sm:$0xf] }
 0x2cf   : > { %v10688_v3 = vor.u32 %v9051_v1, %v7452_v52 }
 0x2d1   : > { %v1792_v6 = vpop.f32.mrf.mxu0  ;;  %v2532_v60 = vpop.f32.mrf.mxu3 }
 0x2d2   : > { %v10676_v34 = vadd.f32 %v2532_v60, %v2348_v0  ;;  %v2349_v33 = vpop.f32.mrf.mxu1  ;;  %v1793_v41 = vadd.f32 %v10406_v24, %v1792_v6  ;;  %v9053_v60 = vld [vmem:[%s9832_s25 + $0x1f4] sm:$0xf] }
 0x2d3   : > { %v2350_v21 = vadd.f32 %v2349_v33, %v10450_v43  ;;  %v7691_v43 = vor.u32 %v9094_v61, %v7690_v38  ;;  %v7460_v33 = vld [vmem:[%s9832_s25 + $0x1f8] sm:$0xf0] }
 0x2d4   : > { %7610 = vmatmul.msk.bf16.gmra.mxu0 %vm543_vm0, %v10362_v23  ;;  %v10694_v9 = vpop.f32.mrf.mxu2 }
 0x2d5   : > { %12792 = vst [vmem:[#allocation4_spill] sm:$0xff] %v10694_v9 }
 0x2d7   : > { %3039 = vmatmul.bf16.gmra.mxu2 %v7691_v43 }
 0x2d9   : > { %v1794_v62 = vpop.f32.mrf.mxu0  ;;  %v2534_v48 = vpop.f32.mrf.mxu3 }
 0x2da   : > { %v1795_v18 = vadd.f32 %v10406_v24, %v1794_v62  ;;  %v10692_v23 = vadd.f32 %v2534_v48, %v2350_v21  ;;  %v2352_v12 = vpop.f32.mrf.mxu1  ;;  %v7698_v48 = vld [vmem:[%s9832_s25 + $0x1a0] sm:$0xf] }
 0x2db   : > { %v2353_v44 = vadd.f32 %v2352_v12, %v10464_v54  ;;  %v10715_v54 = vor.u32 %v9053_v60, %v7460_v33 }
 0x2dc   : > { %v9388_v22 = vpack.c.bf16 %v1795_v18, %v1793_v41  ;;  %7540 = vmatmul.msk.bf16.gmra.mxu1 %vm543_vm0, %v10688_v3  ;;  %v10707_v6 = vpop.f32.mrf.mxu2  ;;  %v9096_v18 = vld [vmem:[%s9832_s25 + $0x1a4] sm:$0xf0] }
 0x2de   : > { %9664 = vst [vmem:[%s10423_s12 + $0x50] sm:$0xff] %v9388_v22   ;;  %2576 = vmatmul.bf16.gmra.mxu3 %v10392_v10 }
 0x2e1   : > { %v1797_v53 = vpop.f32.mrf.mxu0  ;;  %v2537_v32 = vpop.f32.mrf.mxu3 }
 0x2e2   : > { %v10703_v56 = vadd.f32 %v2537_v32, %v2353_v44  ;;  %v10705_v0 = vpop.f32.mrf.mxu1  ;;  %v1798_v1 = vadd.f32 %v10406_v24, %v1797_v53  ;;  %v9067_v53 = vld [vmem:[%s9832_s25 + $0x204] sm:$0xf] }
 0x2e4   : > { %7611 = vmatmul.msk.bf16.gmra.mxu0 %vm543_vm0, %v10384_v59  ;;  %v10719_v62 = vpop.f32.mrf.mxu2  ;;  %v7699_v59 = vor.u32 %v9096_v18, %v7698_v48  ;;  %v9098_v48 = vld [vmem:[%s9832_s25 + $0x1b4] sm:$0xf0] }
 0x2e5   : > { %12793 = vst [vmem:[#allocation5_spill] sm:$0xff] %v10719_v62 }
 0x2e7   : > { %3044 = vmatmul.bf16.gmra.mxu2 %v7699_v59  ;;  %v9186_v59 = vld [vmem:[%s12780_s1 + $0xb8] sm:$0xff] }
 0x2e8   : > { %3938 = vmatpush.bf16.msrb.mxu2 %v9186_v59 }
 0x2e9   : > { %v1799_v10 = vpop.f32.mrf.mxu0  ;;  %v10713_v50 = vpop.f32.mrf.mxu3 }
 0x2ea   : > { %v1800_v52 = vadd.f32 %v10406_v24, %v1799_v10  ;;  %v2357_v21 = vpop.f32.mrf.mxu1 }
 0x2eb   : > { %v2358_v12 = vadd.f32 %v2357_v21, %v10494_v4  ;;  %v7468_v4 = vld [vmem:[%s9832_s25 + $0x208] sm:$0xf0] }
 0x2ec   : > { %v9393_v41 = vpack.c.bf16 %v1800_v52, %v1798_v1  ;;  %7541 = vmatmul.msk.bf16.gmra.mxu1 %vm543_vm0, %v10715_v54  ;;  %v10732_v44 = vpop.f32.mrf.mxu2  ;;  %v7471_v33 = vor.u32 %v9067_v53, %v7468_v4 }
 0x2ee   : > { %9665 = vst [vmem:[%s10423_s12 + $0x58] sm:$0xff] %v9393_v41   ;;  %2581 = vmatmul.bf16.gmra.mxu3 %v10429_v63  ;;  %v9179_v63 = vld [vmem:[%s12780_s1 + $0x80] sm:$0xff] }
 0x2ef   : > { %3848 = vmatpush.bf16.msrb.mxu0 %v9179_v63 }
 0x2f1   : > { %v1802_v38 = vpop.f32.mrf.mxu0  ;;  %v2542_v22 = vpop.f32.mrf.mxu3 }
 0x2f2   : > { %v10728_v61 = vadd.f32 %v2542_v22, %v2358_v12  ;;  %v10730_v43 = vpop.f32.mrf.mxu1  ;;  %v1803_v10 = vadd.f32 %v10406_v24, %v1802_v38 }
 0x2f4   : > { %7612 = vmatmul.msk.bf16.gmra.mxu0 %vm543_vm0, %v10414_v45  ;;  %v10745_v21 = vpop.f32.mrf.mxu2  ;;  %v7706_v45 = vld [vmem:[%s9832_s25 + $0x1b0] sm:$0xf] }
 0x2f5   : > { %12794 = vst [vmem:[#allocation6_spill] sm:$0xff] %v10745_v21  ;;  %v7707_v18 = vor.u32 %v9098_v48, %v7706_v45 }
 0x2f7   : > { %3049 = vmatmul.bf16.gmra.mxu2 %v7707_v18  ;;  %v9100_v18 = vld [vmem:[%s9832_s25 + $0x1c4] sm:$0xf0] }
 0x2f9   : > { %v1804_v32 = vpop.f32.mrf.mxu0  ;;  %v10741_v60 = vpop.f32.mrf.mxu3 }
 0x2fa   : > { %v1805_v1 = vadd.f32 %v10406_v24, %v1804_v32  ;;  %v2362_v52 = vpop.f32.mrf.mxu1  ;;  %v7476_v32 = vld [vmem:[%s9832_s25 + $0x218] sm:$0xf0] }
 0x2fb   : > { %v2363_v12 = vadd.f32 %v2362_v52, %v10515_v2 }
 0x2fc   : > { %v9398_v41 = vpack.c.bf16 %v1805_v1, %v1803_v10  ;;  %7542 = vmatmul.msk.bf16.gmra.mxu1 %vm543_vm0, %v7471_v33  ;;  %v10760_v4 = vpop.f32.mrf.mxu2 }
 0x2fe   : > { %9666 = vst [vmem:[%s10423_s12 + $0x60] sm:$0xff] %v9398_v41   ;;  %2586 = vmatmul.bf16.gmra.mxu3 %v10456_v14  ;;  %v9069_v14 = vld [vmem:[%s9832_s25 + $0x214] sm:$0xf]  ;;  %v7714_v41 = vld [vmem:[%s9832_s25 + $0x1c0] sm:$0xf] }
 0x2ff   : > { %v7479_v2 = vor.u32 %v9069_v14, %v7476_v32 }
 0x301   : > { %v1807_v38 = vpop.f32.mrf.mxu0  ;;  %v2547_v22 = vpop.f32.mrf.mxu3 }
 0x302   : > { %v10756_v63 = vadd.f32 %v2547_v22, %v2363_v12  ;;  %v10758_v53 = vpop.f32.mrf.mxu1  ;;  %v1808_v1 = vadd.f32 %v10406_v24, %v1807_v38  ;;  %v7715_v12 = vor.u32 %v9100_v18, %v7714_v41 }
 0x304   : > { %7613 = vmatmul.msk.bf16.gmra.mxu0 %vm543_vm0, %v10446_v31  ;;  %v10770_v48 = vpop.f32.mrf.mxu2 }
 0x305   : > { %12795 = vst [vmem:[#allocation7_spill] sm:$0xff] %v10770_v48 }
 0x307   : > { %3054 = vmatmul.bf16.gmra.mxu2 %v7715_v12 }
 0x309   : > { %v1809_v33 = vpop.f32.mrf.mxu0  ;;  %v10766_v10 = vpop.f32.mrf.mxu3 }
 0x30a   : > { %v1810_v52 = vadd.f32 %v10406_v24, %v1809_v33  ;;  %v2367_v45 = vpop.f32.mrf.mxu1 }
 0x30b   : > { %v2368_v31 = vadd.f32 %v2367_v45, %v10545_v57  ;;  %v7652_v57 = vld [vmem:[%s9832_s25 + $0x148] sm:$0xf0] }
 0x30c   : > { %v9403_v59 = vpack.c.bf16 %v1810_v52, %v1808_v1  ;;  %7543 = vmatmul.msk.bf16.gmra.mxu1 %vm543_vm0, %v7479_v2  ;;  %v10782_v33 = vpop.f32.mrf.mxu2  ;;  %v9083_v2 = vld [vmem:[%s9832_s25 + $0x144] sm:$0xf] }
 0x30d   : > { %v7655_v45 = vor.u32 %v9083_v2, %v7652_v57 }
 0x30e   : > { %9667 = vst [vmem:[%s10423_s12 + $0x68] sm:$0xff] %v9403_v59   ;;  %2591 = vmatmul.bf16.gmra.mxu3 %v10486_v40  ;;  %v9178_v40 = vld [vmem:[%s12780_s1 + $0x78] sm:$0xff] }
 0x30f   : > { %3849 = vmatpush.bf16.msrb.mxu0 %v9178_v40 }
 0x311   : > { %v1812_v38 = vpop.f32.mrf.mxu0  ;;  %v2552_v22 = vpop.f32.mrf.mxu3 }
 0x312   : > { %v10778_v14 = vadd.f32 %v2552_v22, %v2368_v31  ;;  %v10780_v32 = vpop.f32.mrf.mxu1  ;;  %v1813_v41 = vadd.f32 %v10406_v24, %v1812_v38  ;;  %v9102_v31 = vld [vmem:[%s9832_s25 + $0x1d4] sm:$0xf0] }
 0x314   : > { %7614 = vmatmul.msk.bf16.gmra.mxu0 %vm543_vm0, %v10476_v25  ;;  %v10795_v12 = vpop.f32.mrf.mxu2  ;;  %v7722_v25 = vld [vmem:[%s9832_s25 + $0x1d0] sm:$0xf] }
 0x315   : > { %v7723_v48 = vor.u32 %v9102_v31, %v7722_v25 }
 0x317   : > { %3059 = vmatmul.bf16.gmra.mxu2 %v7723_v48 }
 0x319   : > { %v1814_v1 = vpop.f32.mrf.mxu0  ;;  %v10791_v52 = vpop.f32.mrf.mxu3 }
 0x31a   : > { %v1815_v18 = vadd.f32 %v10406_v24, %v1814_v1  ;;  %v2372_v59 = vpop.f32.mrf.mxu1 }
 0x31b   : > { %v2373_v40 = vadd.f32 %v2372_v59, %v10572_v42 }
 0x31c   : > { %v9408_v22 = vpack.c.bf16 %v1815_v18, %v1813_v41  ;;  %7824 = vmatmul.msk.bf16.vlgmr.msrb.gmra.mxu1 %vm543_vm0, %v7655_v45  ;;  %v10806_v21 = vpop.f32.mrf.mxu2  ;;  %v9085_v41 = vld [vmem:[%s9832_s25 + $0x154] sm:$0xf]  ;;  %v7660_v45 = vld [vmem:[%s9832_s25 + $0x158] sm:$0xf0] }
 0x31d   : > { %v7663_v42 = vor.u32 %v9085_v41, %v7660_v45 }
 0x31e   : > { %9668 = vst [vmem:[%s10423_s12 + $0x70] sm:$0xff] %v9408_v22  }
 0x321   : > { %v1817_v2 = vpop.f32.mrf.mxu0  ;;  %v2557_v38 = vpop.f32.mrf.mxu3 }
 0x322   : > { %v10802_v57 = vadd.f32 %v2557_v38, %v2373_v40  ;;  %v10804_v1 = vpop.f32.mrf.mxu1  ;;  %v1818_v59 = vadd.f32 %v10406_v24, %v1817_v2  ;;  %v7730_v40 = vld [vmem:[%s9832_s25 + $0x1e0] sm:$0xf]  ;;  %v9104_v38 = vld [vmem:[%s9832_s25 + $0x1e4] sm:$0xf0] }
 0x323   : > { %v7731_v9 = vor.u32 %v9104_v38, %v7730_v40  ;;  %v7738_v38 = vld [vmem:[%s9832_s25 + $0x1f0] sm:$0xf] }
 0x324   : > { %7615 = vmatmul.msk.bf16.gmra.mxu0 %vm543_vm0, %v10500_v47  ;;  %v10816_v22 = vpop.f32.mrf.mxu2 }
 0x327   : > { %3064 = vmatmul.bf16.gmra.mxu2 %v7731_v9  ;;  %v9087_v9 = vld [vmem:[%s9832_s25 + $0x164] sm:$0xf] }
 0x329   : > { %v1819_v18 = vpop.f32.mrf.mxu0  ;;  %v10812_v48 = vpop.f32.mrf.mxu3 }
 0x32a   : > { %v1820_v25 = vadd.f32 %v10406_v24, %v1819_v18  ;;  %v2377_v31 = vpop.f32.mrf.mxu1 }
 0x32b   : > { %v2378_v47 = vadd.f32 %v2377_v31, %v10599_v28  ;;  %v9177_v28 = vld [vmem:[%s12780_s1 + $0x70] sm:$0xff] }
 0x32c   : > { %v9413_v62 = vpack.c.bf16 %v1820_v25, %v1818_v59  ;;  %7825 = vmatmul.msk.bf16.gmra.mxu1 %vm543_vm0, %v7663_v42  ;;  %v10830_v7 = vpop.f32.mrf.mxu2  ;;  %3850 = vmatpush.bf16.msrb.mxu0 %v9177_v28 }
 0x32e   : > { %9669 = vst [vmem:[%s10423_s12 + $0x78] sm:$0xff] %v9413_v62   ;;  %v7668_v62 = vld [vmem:[%s9832_s25 + $0x168] sm:$0xf0] }
 0x32f   : > { %v7671_v25 = vor.u32 %v9087_v9, %v7668_v62 }
 0x331   : > { %v2562_v41 = vpop.f32.mrf.mxu3  ;;  %v2606_v45 = vpop.f32.mrf.mxu0 }
 0x332   : > { %v10823_v2 = vadd.f32 %v2562_v41, %v2378_v47  ;;  %v10826_v24 = vadd.f32 %v2606_v45, %v10597_v46  ;;  %v10828_v18 = vpop.f32.mrf.mxu1  ;;  %v9185_v41 = vld [vmem:[%s12780_s1 + $0xb0] sm:$0xff] }
 0x333   : > { %3939 = vmatpush.bf16.msrb.mxu2 %v9185_v41 }
 0x334   : > { %7616 = vmatmul.msk.bf16.gmra.mxu0 %vm543_vm0, %v10524_v8  ;;  %v10844_v40 = vpop.f32.mrf.mxu2  ;;  %v9106_v8 = vld [vmem:[%s9832_s25 + $0x1f4] sm:$0xf0] }
 0x335   : > { %v7739_v47 = vor.u32 %v9106_v8, %v7738_v38  ;;  %v9089_v38 = vld [vmem:[%s9832_s25 + $0x174] sm:$0xf]  ;;  %v7676_v8 = vld [vmem:[%s9832_s25 + $0x178] sm:$0xf0] }
 0x337   : > { %3069 = vmatmul.bf16.gmra.mxu2 %v7739_v47  ;;  %v7679_v47 = vor.u32 %v9089_v38, %v7676_v8 }
 0x339   : > { %v10839_v42 = vpop.f32.mrf.mxu3  ;;  %v2608_v59 = vpop.f32.mrf.mxu0 }
 0x33a   : > { %v10842_v46 = vadd.f32 %v2608_v59, %v10609_v30  ;;  %v2382_v31 = vpop.f32.mrf.mxu1 }
 0x33b   : > { %v2383_v45 = vadd.f32 %v2382_v31, %v10624_v36 }
 0x33c   : > { %7826 = vmatmul.msk.bf16.gmra.mxu1 %vm543_vm0, %v7671_v25  ;;  %v10860_v25 = vpop.f32.mrf.mxu2 }
 0x341   : > { %v2567_v30 = vpop.f32.mrf.mxu3  ;;  %v2611_v28 = vpop.f32.mrf.mxu0 }
 0x342   : > { %v10853_v9 = vadd.f32 %v2567_v30, %v2383_v45  ;;  %v10856_v62 = vadd.f32 %v2611_v28, %v10622_v15  ;;  %v10858_v59 = vpop.f32.mrf.mxu1  ;;  %v7746_v30 = vld [vmem:[%s9832_s25 + $0x200] sm:$0xf]  ;;  %v9108_v28 = vld [vmem:[%s9832_s25 + $0x204] sm:$0xf0] }
 0x343   : > { %12796 = vst [vmem:[#allocation8_spill] sm:$0xff] %v10858_v59  ;;  %v7747_v59 = vor.u32 %v9108_v28, %v7746_v30 }
 0x344   : > { %7617 = vmatmul.msk.bf16.gmra.mxu0 %vm543_vm0, %v10554_v35  ;;  %v10871_v15 = vpop.f32.mrf.mxu2 }
 0x347   : > { %3074 = vmatmul.bf16.gmra.mxu2 %v7747_v59  ;;  %v9091_v59 = vld [vmem:[%s9832_s25 + $0x184] sm:$0xf] }
 0x349   : > { %v10866_v36 = vpop.f32.mrf.mxu3  ;;  %v2613_v31 = vpop.f32.mrf.mxu0 }
 0x34a   : > { %12797 = vst [vmem:[#allocation9_spill] sm:$0xff] %v10866_v36  ;;  %v10869_v41 = vadd.f32 %v2613_v31, %v10637_v58  ;;  %v2387_v45 = vpop.f32.mrf.mxu1 }
 0x34b   : > { %v2388_v35 = vadd.f32 %v2387_v45, %v10655_v19  ;;  %v9176_v19 = vld [vmem:[%s12780_s1 + $0x68] sm:$0xff] }
 0x34c   : > { %7827 = vmatmul.msk.bf16.gmra.mxu1 %vm543_vm0, %v7679_v47  ;;  %v10884_v31 = vpop.f32.mrf.mxu2  ;;  %v7684_v47 = vld [vmem:[%s9832_s25 + $0x188] sm:$0xf0]  ;;  %3851 = vmatpush.bf16.msrb.mxu0 %v9176_v19 }
 0x34d   : > { %v7687_v30 = vor.u32 %v9091_v59, %v7684_v47 }
 0x351   : > { %v2572_v55 = vpop.f32.mrf.mxu3  ;;  %v2616_v36 = vpop.f32.mrf.mxu0 }
 0x352   : > { %v10877_v38 = vadd.f32 %v2572_v55, %v2388_v35  ;;  %v10880_v58 = vadd.f32 %v2616_v36, %v10653_v26  ;;  %v10882_v8 = vpop.f32.mrf.mxu1  ;;  %v9110_v35 = vld [vmem:[%s9832_s25 + $0x214] sm:$0xf0] }
 0x353   : > { %12798 = vst [vmem:[#allocation10_spill] sm:$0xff] %v10882_v8 }
 0x354   : > { %7618 = vmatmul.msk.bf16.gmra.mxu0 %vm543_vm0, %v10581_v13  ;;  %v10898_v28 = vpop.f32.mrf.mxu2  ;;  %v7754_v13 = vld [vmem:[%s9832_s25 + $0x210] sm:$0xf] }
 0x355   : > { %12800 = vst [vmem:[#allocation12_spill] sm:$0xff] %v10898_v28  ;;  %v7755_v8 = vor.u32 %v9110_v35, %v7754_v13 }
 0x357   : > { %3079 = vmatmul.bf16.gmra.mxu2 %v7755_v8  ;;  %v7692_v8 = vld [vmem:[%s9832_s25 + $0x198] sm:$0xf0] }
 0x359   : > { %v10893_v55 = vpop.f32.mrf.mxu3  ;;  %v2618_v45 = vpop.f32.mrf.mxu0 }
 0x35a   : > { %12799 = vst [vmem:[#allocation11_spill] sm:$0xff] %v10893_v55  ;;  %v10896_v26 = vadd.f32 %v2618_v45, %v10665_v29  ;;  %v2392_v36 = vpop.f32.mrf.mxu1 }
 0x35b   : > { %v2393_v19 = vadd.f32 %v2392_v36, %v10678_v27 }
 0x35c   : > { %7828 = vmatmul.msk.bf16.gmra.mxu1 %vm543_vm0, %v7687_v30  ;;  %v10911_v28 = vpop.f32.mrf.mxu2  ;;  %v9093_v30 = vld [vmem:[%s9832_s25 + $0x194] sm:$0xf] }
 0x35d   : > { %12803 = vst [vmem:[#allocation15_spill] sm:$0xff] %v10911_v28  ;;  %v7695_v36 = vor.u32 %v9093_v30, %v7692_v8 }
 0x361   : > { %v2577_v55 = vpop.f32.mrf.mxu3  ;;  %v2621_v59 = vpop.f32.mrf.mxu0 }
 0x362   : > { %v10904_v47 = vadd.f32 %v2577_v55, %v2393_v19  ;;  %v10907_v29 = vadd.f32 %v2621_v59, %v10676_v34  ;;  %v10909_v45 = vpop.f32.mrf.mxu1  ;;  %v7762_v34 = vld [vmem:[%s9832_s25 + $0x220] sm:$0xf]  ;;  %v9112_v59 = vld [vmem:[%s9832_s25 + $0x224] sm:$0xf0] }
 0x363   : > { %12802 = vst [vmem:[#allocation14_spill] sm:$0xff] %v10909_v45  ;;  %v7763_v45 = vor.u32 %v9112_v59, %v7762_v34 }
 0x364   : > { %12801 = vst [vmem:[#allocation13_spill] sm:$0xff] %v10904_v47  ;;  %7619 = vmatmul.msk.bf16.gmra.mxu0 %vm543_vm0, %v10605_v39  ;;  %v10922_v19 = vpop.f32.mrf.mxu2 }
 0x367   : > { %3084 = vmatmul.bf16.gmra.mxu2 %v7763_v45  ;;  %v9095_v45 = vld [vmem:[%s9832_s25 + $0x1a4] sm:$0xf] }
 0x369   : > { %v10917_v13 = vpop.f32.mrf.mxu3  ;;  %v2623_v27 = vpop.f32.mrf.mxu0 }
 0x36a   : > { %12804 = vst [vmem:[#allocation16_spill] sm:$0xff] %v10917_v13  ;;  %v10920_v35 = vadd.f32 %v2623_v27, %v10692_v23  ;;  %v2397_v55 = vpop.f32.mrf.mxu1  ;;  %v7700_v27 = vld [vmem:[%s9832_s25 + $0x1a8] sm:$0xf0] }
 0x36b   : > { %v2398_v39 = vadd.f32 %v2397_v55, %v10707_v6  ;;  %v9175_v6 = vld [vmem:[%s12780_s1 + $0x60] sm:$0xff]  ;;  %v7703_v55 = vor.u32 %v9095_v45, %v7700_v27 }
 0x36c   : > { %7829 = vmatmul.msk.bf16.gmra.mxu1 %vm543_vm0, %v7695_v36  ;;  %v10935_v8 = vpop.f32.mrf.mxu2  ;;  %3852 = vmatpush.bf16.msrb.mxu0 %v9175_v6  ;;  %v9184_v6 = vld [vmem:[%s12780_s1 + $0xa8] sm:$0xff] }
 0x36d   : > { %3940 = vmatpush.bf16.msrb.mxu2 %v9184_v6 }
 0x371   : > { %v2582_v47 = vpop.f32.mrf.mxu3  ;;  %v2626_v13 = vpop.f32.mrf.mxu0 }
 0x372   : > { %v10928_v28 = vadd.f32 %v2582_v47, %v2398_v39  ;;  %v10931_v23 = vadd.f32 %v2626_v13, %v10703_v56  ;;  %v10933_v30 = vpop.f32.mrf.mxu1  ;;  %v2355_v47 = vadd.f32 %v10705_v0, %v10480_v11  ;;  %v7770_v39 = vld [vmem:[%s9832_s25 + $0x230] sm:$0xf] }
 0x373   : > { %12806 = vst [vmem:[#allocation18_spill] sm:$0xff] %v10933_v30  ;;  %v9114_v30 = vld [vmem:[%s9832_s25 + $0x234] sm:$0xf0] }
 0x374   : > { %12805 = vst [vmem:[#allocation17_spill] sm:$0xff] %v10928_v28  ;;  %7620 = vmatmul.msk.bf16.gmra.mxu0 %vm543_vm0, %v10633_v51  ;;  %v2540_v56 = vadd.f32 %v10713_v50, %v2355_v47  ;;  %v10951_v51 = vpop.f32.mrf.mxu2  ;;  %v7771_v28 = vor.u32 %v9114_v30, %v7770_v39  ;;  %v9183_v39 = vld [vmem:[%s12780_s1 + $0xa0] sm:$0xff] }
 0x375   : > { %3941 = vmatpush.bf16.msrb.mxu2 %v9183_v39  ;;  %v9099_v39 = vld [vmem:[%s9832_s25 + $0x1c4] sm:$0xf] }
 0x377   : > { %3089 = vmatmul.bf16.gmra.mxu2 %v7771_v28  ;;  %v9097_v28 = vld [vmem:[%s9832_s25 + $0x1b4] sm:$0xf] }
 0x379   : > { %v10947_v13 = vpop.f32.mrf.mxu3  ;;  %v2628_v36 = vpop.f32.mrf.mxu0 }
 0x37a   : > { %v10949_v34 = vadd.f32 %v2628_v36, %v2540_v56  ;;  %v2402_v59 = vpop.f32.mrf.mxu1  ;;  %v7708_v56 = vld [vmem:[%s9832_s25 + $0x1b8] sm:$0xf0] }
 0x37b   : > { %v2403_v11 = vadd.f32 %v2402_v59, %v10732_v44  ;;  %v2360_v44 = vadd.f32 %v10730_v43, %v10504_v5  ;;  %v7711_v59 = vor.u32 %v9097_v28, %v7708_v56  ;;  %v7884_v5 = vld [vmem:[%s9832_s25 + $0x228] sm:$0xf0]  ;;  %v9170_v28 = vld [vmem:[%s12780_s1 + $0x58] sm:$0xff] }
 0x37c   : > { %7830 = vmatmul.msk.bf16.gmra.mxu1 %vm543_vm0, %v7703_v55  ;;  %v10967_v30 = vpop.f32.mrf.mxu2  ;;  %4212 = vmatpush.bf16.msra.mxu3 %v9170_v28 }
 0x37d   : > { %v2545_v36 = vadd.f32 %v10741_v60, %v2360_v44 }
 0x381   : > { %v2587_v0 = vpop.f32.mrf.mxu3  ;;  %v2631_v50 = vpop.f32.mrf.mxu0 }
 0x382   : > { %v10960_v47 = vadd.f32 %v2587_v0, %v2403_v11  ;;  %v10963_v45 = vadd.f32 %v2631_v50, %v10728_v61  ;;  %v10965_v27 = vpop.f32.mrf.mxu1 }
 0x384   : > { %7621 = vmatmul.msk.bf16.gmra.mxu0 %vm543_vm0, %v10661_v37  ;;  %v10983_v50 = vpop.f32.mrf.mxu2  ;;  %v9131_v37 = vld [vmem:[%s9832_s25 + $0x224] sm:$0xf] }
 0x385   : > { %v10988_v43 = vor.u32 %v9131_v37, %v7884_v5 }
 0x387   : > { %12807 = vst [vmem:[#allocation19_spill] sm:$0xff] %v10988_v43  ;;  %8056 = vmatmul.msk.bf16.vlgmr.msrb.gmra.mxu2 %vm543_vm0, %v10988_v43 }
 0x389   : > { %v10976_v55 = vpop.f32.mrf.mxu3  ;;  %v2633_v61 = vpop.f32.mrf.mxu0 }
 0x38a   : > { %v10981_v11 = vadd.f32 %v2633_v61, %v2545_v36  ;;  %v2407_v0 = vpop.f32.mrf.mxu1 }
 0x38b   : > { %v2408_v60 = vadd.f32 %v2407_v0, %v10760_v4  ;;  %v2365_v4 = vadd.f32 %v10758_v53, %v10528_v49  ;;  %v7716_v0 = vld [vmem:[%s9832_s25 + $0x1c8] sm:$0xf0]  ;;  %v9133_v49 = vld [vmem:[%s9832_s25 + $0x234] sm:$0xf]  ;;  %v7892_v53 = vld [vmem:[%s9832_s25 + $0x238] sm:$0xf0] }
 0x38c   : > { %7831 = vmatmul.msk.bf16.gmra.mxu1 %vm543_vm0, %v7711_v59  ;;  %v11003_v59 = vpop.f32.mrf.mxu2 }
 0x38d   : > { %v2550_v37 = vadd.f32 %v10766_v10, %v2365_v4  ;;  %v11026_v4 = vor.u32 %v9133_v49, %v7892_v53  ;;  %v7724_v49 = vld [vmem:[%s9832_s25 + $0x1d8] sm:$0xf0] }
 0x38f   : > { %12808 = vst [vmem:[#allocation20_spill] sm:$0xff] %v11026_v4 }
 0x391   : > { %v2592_v6 = vpop.f32.mrf.mxu3  ;;  %v2636_v44 = vpop.f32.mrf.mxu0 }
 0x392   : > { %v10996_v56 = vadd.f32 %v2592_v6, %v2408_v60  ;;  %v10999_v36 = vadd.f32 %v2636_v44, %v10756_v63  ;;  %v11001_v61 = vpop.f32.mrf.mxu1  ;;  %v7719_v63 = vor.u32 %v9099_v39, %v7716_v0  ;;  %v9166_v60 = vld [vmem:[%s12780_s1 + $0x38] sm:$0xff] }
 0x393   : > { %v9226_v6 = vld [vmem:[%s12780_s1 + $0xf8] sm:$0xff]  ;;  %4119 = vmatpush.bf16.msra.mxu1 %v9166_v60 }
 0x394   : > { %7622 = vmatmul.msk.bf16.gmra.mxu0 %vm543_vm0, %v10688_v3  ;;  %v11020_v28 = vpop.f32.mrf.mxu2 }
 0x395   : > { %4617 = vmatpush.bf16.msra.mxu0 %v9226_v6 }
 0x397   : > { %8057 = vmatmul.msk.bf16.gmra.mxu2 %vm543_vm0, %v11026_v4 }
 0x399   : > { %v2638_v5 = vpop.f32.mrf.mxu0 }
 0x39a   : > { %v11018_v44 = vadd.f32 %v2638_v5, %v2550_v37  ;;  %v3104_v3 = vpop.f32.mrf.mxu1 }
 0x39b   : > { %v3105_v10 = vadd.f32 %v3104_v3, %v10782_v33  ;;  %v11042_v33 = vld [vmem:[%s12781_s2] ss:$0 sm:$0xff]  ;;  %v9101_v3 = vld [vmem:[%s9832_s25 + $0x1d4] sm:$0xf] }
 0x39c   : > { %7832 = vmatmul.msk.bf16.gmra.mxu1 %vm543_vm0, %v7719_v63  ;;  %v11034_v60 = vpop.f32.mrf.mxu2  ;;  %v2370_v63 = vadd.f32 %v10780_v32, %v10561_v17  ;;  %v7900_v17 = vld [vmem:[%s9832_s25 + $0x248] sm:$0xf0] }
 0x39d   : > { %v3184_v39 = vadd.f32 %v3105_v10, %v10826_v24 }
 0x39f   : > { %v3216_v24 = vadd.f32 %v11042_v33, %v3184_v39 }
 0x3a1   : > { %v2641_v0 = vpop.f32.mrf.mxu0  ;;  %v3248_v53 = vmax.f32 %v3216_v24, 0.0  ;;  %v9132_v24 = vld [vmem:[%s9832_s25 + $0x224] sm:$0xf0] }
 0x3a2   : > { %v11032_v37 = vadd.f32 %v2641_v0, %v10778_v14  ;;  %v3106_v5 = vpop.f32.mrf.mxu1 }
 0x3a3   : > { %v3107_v6 = vadd.f32 %v3106_v5, %v10795_v12  ;;  %v7727_v5 = vor.u32 %v9101_v3, %v7724_v49 }
 0x3a4   : > { %7623 = vmatmul.msk.bf16.gmra.mxu0 %vm543_vm0, %v10715_v54  ;;  %v2555_v54 = vadd.f32 %v10791_v52, %v2370_v63  ;;  %v11054_v43 = vpop.f32.mrf.mxu2  ;;  %v7882_v52 = vld [vmem:[%s9832_s25 + $0x220] sm:$0xf] }
 0x3a5   : > { %v3185_v14 = vadd.f32 %v3107_v6, %v10842_v46  ;;  %v9135_v6 = vld [vmem:[%s9832_s25 + $0x244] sm:$0xf]  ;;  %v11067_v63 = vor.u32 %v9132_v24, %v7882_v52 }
 0x3a7   : > { %v3217_v12 = vadd.f32 %v11042_v33, %v3185_v14  ;;  %v11063_v14 = vor.u32 %v9135_v6, %v7900_v17 }
 0x3a9   : > { %v3249_v10 = vmax.f32 %v3217_v12, 0.0  ;;  %v2643_v0 = vpop.f32.mrf.mxu0  ;;  %8058 = vmatmul.msk.bf16.gmra.mxu2 %vm543_vm0, %v11063_v14 }
 0x3aa   : > { %v11052_v4 = vadd.f32 %v2643_v0, %v2555_v54  ;;  %v3109_v39 = vpop.f32.mrf.mxu1 }
 0x3ab   : > { %v3280_v46 = vpack.c.bf16 %v3249_v10, %v3248_v53  ;;  %v3110_v32 = vadd.f32 %v3109_v39, %v10806_v21  ;;  %v9103_v39 = vld [vmem:[%s9832_s25 + $0x1e4] sm:$0xf] }
 0x3ac   : > { %7833 = vmatmul.msk.bf16.gmra.mxu1 %vm543_vm0, %v7727_v5  ;;  %v11073_v54 = vpop.f32.mrf.mxu2  ;;  %v2375_v5 = vadd.f32 %v10804_v1, %v10585_v20  ;;  %v9225_v20 = vld [vmem:[%s12780_s1 + $0xf0] sm:$0xff] }
 0x3ad   : > { %7840 = vmatmul.msk.bf16.vlgmr.msrb.gmra.mxu3 %vm543_vm0, %v3280_v46  ;;  %v3186_v3 = vadd.f32 %v3110_v32, %v10856_v62  ;;  %v7732_v62 = vld [vmem:[%s9832_s25 + $0x1e8] sm:$0xf0]  ;;  %4618 = vmatpush.bf16.msra.mxu0 %v9225_v20 }
 0x3ae   : > { %v2560_v46 = vadd.f32 %v10812_v48, %v2375_v5  ;;  %v7735_v32 = vor.u32 %v9103_v39, %v7732_v62 }
 0x3af   : > { %v3218_v10 = vadd.f32 %v11042_v33, %v3186_v3  ;;  %v9137_v3 = vld [vmem:[%s9832_s25 + $0x254] sm:$0xf] }
 0x3b1   : > { %v2646_v49 = vpop.f32.mrf.mxu0  ;;  %v3250_v6 = vmax.f32 %v3218_v10, 0.0  ;;  %v9134_v10 = vld [vmem:[%s9832_s25 + $0x234] sm:$0xf0] }
 0x3b2   : > { %v11071_v21 = vadd.f32 %v2646_v49, %v10802_v57  ;;  %v3111_v12 = vpop.f32.mrf.mxu1  ;;  %v7908_v49 = vld [vmem:[%s9832_s25 + $0x258] sm:$0xf0] }
 0x3b3   : > { %v3112_v53 = vadd.f32 %v3111_v12, %v10816_v22 }
 0x3b4   : > { %3853 = vmatmul.bf16.vlgmr.msrb.gmra.mxu0 %v11067_v63  ;;  %v11093_v24 = vpop.f32.mrf.mxu2 }
 0x3b5   : > { %v3187_v0 = vadd.f32 %v3112_v53, %v10869_v41  ;;  %v9165_v41 = vld [vmem:[%s12780_s1 + $0x30] sm:$0xff] }
 0x3b6   : > { %4120 = vmatpush.bf16.msra.mxu1 %v9165_v41  ;;  %v7890_v53 = vld [vmem:[%s9832_s25 + $0x230] sm:$0xf]  ;;  %v7740_v41 = vld [vmem:[%s9832_s25 + $0x1f8] sm:$0xf0] }
 0x3b7   : > { %v3219_v57 = vadd.f32 %v11042_v33, %v3187_v0  ;;  %v11102_v0 = vor.u32 %v9137_v3, %v7908_v49  ;;  %v11106_v5 = vor.u32 %v9134_v10, %v7890_v53  ;;  %v9139_v10 = vld [vmem:[%s9832_s25 + $0x264] sm:$0xf] }
 0x3b9   : > { %v3251_v17 = vmax.f32 %v3219_v57, 0.0  ;;  %v2648_v22 = vpop.f32.mrf.mxu0  ;;  %8059 = vmatmul.msk.bf16.gmra.mxu2 %vm543_vm0, %v11102_v0 }
 0x3ba   : > { %v11091_v1 = vadd.f32 %v2648_v22, %v2560_v46  ;;  %v3114_v52 = vpop.f32.mrf.mxu1 }
 0x3bb   : > { %v3281_v48 = vpack.c.bf16 %v3251_v17, %v3250_v6  ;;  %v3115_v12 = vadd.f32 %v3114_v52, %v10830_v7 }
 0x3bc   : > { %7834 = vmatmul.msk.bf16.gmra.mxu1 %vm543_vm0, %v7735_v32  ;;  %v11112_v46 = vpop.f32.mrf.mxu2  ;;  %v9105_v32 = vld [vmem:[%s9832_s25 + $0x1f4] sm:$0xf] }
 0x3bd   : > { %7841 = vmatmul.msk.bf16.gmra.mxu3 %vm543_vm0, %v3281_v48  ;;  %v3188_v39 = vadd.f32 %v3115_v12, %v10880_v58  ;;  %v2380_v58 = vadd.f32 %v10828_v18, %v10611_v16  ;;  %v7743_v3 = vor.u32 %v9105_v32, %v7740_v41  ;;  %v7916_v16 = vld [vmem:[%s9832_s25 + $0x268] sm:$0xf0] }
 0x3bf   : > { %v3220_v17 = vadd.f32 %v11042_v33, %v3188_v39  ;;  %v2565_v20 = vadd.f32 %v10839_v42, %v2380_v58  ;;  %v7898_v39 = vld [vmem:[%s9832_s25 + $0x240] sm:$0xf]  ;;  %v9136_v42 = vld [vmem:[%s9832_s25 + $0x244] sm:$0xf0] }
 0x3c1   : > { %v2651_v62 = vpop.f32.mrf.mxu0 }
 0x3c2   : > { %v11110_v7 = vadd.f32 %v2651_v62, %v10823_v2  ;;  %v3116_v57 = vpop.f32.mrf.mxu1  ;;  %v11135_v62 = vor.u32 %v9139_v10, %v7916_v16 }
 0x3c3   : > { %v3117_v6 = vadd.f32 %v3116_v57, %v10844_v40  ;;  %v3252_v40 = vmax.f32 %v3220_v17, 0.0  ;;  %v11139_v57 = vor.u32 %v9136_v42, %v7898_v39  ;;  %v9224_v39 = vld [vmem:[%s12780_s1 + $0xe8] sm:$0xff] }
 0x3c4   : > { %3858 = vmatmul.bf16.gmra.mxu0 %v11106_v5  ;;  %v11126_v53 = vpop.f32.mrf.mxu2 }
 0x3c5   : > { %v3189_v22 = vadd.f32 %v3117_v6, %v10896_v26  ;;  %4619 = vmatpush.bf16.msra.mxu0 %v9224_v39 }
 0x3c7   : > { %v3221_v2 = vadd.f32 %v11042_v33, %v3189_v22 }
 0x3c9   : > { %v3253_v52 = vmax.f32 %v3221_v2, 0.0  ;;  %v2653_v48 = vpop.f32.mrf.mxu0  ;;  %8060 = vmatmul.msk.bf16.gmra.mxu2 %vm543_vm0, %v11135_v62 }
 0x3ca   : > { %v11124_v49 = vadd.f32 %v2653_v48, %v2565_v20  ;;  %v3119_v12 = vpop.f32.mrf.mxu1  ;;  %v12809_v20 = vld [vmem:[#allocation2_spill] sm:$0xff] }
 0x3cb   : > { %v3282_v26 = vpack.c.bf16 %v3253_v52, %v3252_v40  ;;  %v3120_v18 = vadd.f32 %v3119_v12, %v10860_v25  ;;  %v9169_v25 = vld [vmem:[%s12780_s1 + $0x50] sm:$0xff]  ;;  %v9107_v48 = vld [vmem:[%s9832_s25 + $0x204] sm:$0xf]  ;;  %v12811_v12 = vld [vmem:[#allocation9_spill] sm:$0xff] }
 0x3cc   : > { %7835 = vmatmul.msk.bf16.gmra.mxu1 %vm543_vm0, %v7743_v3  ;;  %v11148_v32 = vpop.f32.mrf.mxu2  ;;  %4213 = vmatpush.bf16.msra.mxu3 %v9169_v25  ;;  %v12810_v40 = vld [vmem:[#allocation8_spill] sm:$0xff]  ;;  %v7748_v3 = vld [vmem:[%s9832_s25 + $0x208] sm:$0xf0] }
 0x3cd   : > { %7842 = vmatmul.msk.bf16.gmra.mxu3 %vm543_vm0, %v3282_v26  ;;  %v3190_v6 = vadd.f32 %v3120_v18, %v10907_v29  ;;  %v2385_v52 = vadd.f32 %v12810_v40, %v12809_v20  ;;  %v7751_v18 = vor.u32 %v9107_v48, %v7748_v3  ;;  %v9138_v20 = vld [vmem:[%s9832_s25 + $0x254] sm:$0xf0] }
 0x3cf   : > { %v3222_v2 = vadd.f32 %v11042_v33, %v3190_v6  ;;  %v2570_v26 = vadd.f32 %v12811_v12, %v2385_v52 }
 0x3d1   : > { %v2656_v17 = vpop.f32.mrf.mxu0  ;;  %v3254_v10 = vmax.f32 %v3222_v2, 0.0 }
 0x3d2   : > { %v11146_v22 = vadd.f32 %v2656_v17, %v10853_v9  ;;  %v3121_v58 = vpop.f32.mrf.mxu1 }
 0x3d3   : > { %v3122_v41 = vadd.f32 %v3121_v58, %v10871_v15  ;;  %v9141_v58 = vld [vmem:[%s9832_s25 + $0x274] sm:$0xf] }
 0x3d4   : > { %3863 = vmatmul.bf16.gmra.mxu0 %v11139_v57  ;;  %v11168_v17 = vpop.f32.mrf.mxu2 }
 0x3d5   : > { %v3191_v29 = vadd.f32 %v3122_v41, %v10920_v35  ;;  %v9164_v35 = vld [vmem:[%s12780_s1 + $0x28] sm:$0xff]  ;;  %v7924_v41 = vld [vmem:[%s9832_s25 + $0x278] sm:$0xf0] }
 0x3d6   : > { %4121 = vmatpush.bf16.msra.mxu1 %v9164_v35  ;;  %v11177_v40 = vor.u32 %v9141_v58, %v7924_v41  ;;  %v12814_v35 = vld [vmem:[#allocation10_spill] sm:$0xff] }
 0x3d7   : > { %v3223_v9 = vadd.f32 %v11042_v33, %v3191_v29  ;;  %v7906_v29 = vld [vmem:[%s9832_s25 + $0x250] sm:$0xf] }
 0x3d8   : > { %v11181_v52 = vor.u32 %v9138_v20, %v7906_v29 }
 0x3d9   : > { %v3255_v15 = vmax.f32 %v3223_v9, 0.0  ;;  %v2658_v16 = vpop.f32.mrf.mxu0  ;;  %8061 = vmatmul.msk.bf16.gmra.mxu2 %vm543_vm0, %v11177_v40 }
 0x3da   : > { %v11166_v42 = vadd.f32 %v2658_v16, %v2570_v26  ;;  %v3124_v6 = vpop.f32.mrf.mxu1  ;;  %v12812_v26 = vld [vmem:[#allocation12_spill] sm:$0xff] }
 0x3db   : > { %v3283_v25 = vpack.c.bf16 %v3255_v15, %v3254_v10  ;;  %v3125_v2 = vadd.f32 %v3124_v6, %v10884_v31  ;;  %v7756_v6 = vld [vmem:[%s9832_s25 + $0x218] sm:$0xf0] }
 0x3dc   : > { %7836 = vmatmul.msk.bf16.gmra.mxu1 %vm543_vm0, %v7751_v18  ;;  %v11187_v12 = vpop.f32.mrf.mxu2  ;;  %v12813_v18 = vld [vmem:[#allocation3_spill] sm:$0xff] }
 0x3dd   : > { %7843 = vmatmul.msk.bf16.gmra.mxu3 %vm543_vm0, %v3283_v25  ;;  %v3192_v48 = vadd.f32 %v3125_v2, %v10931_v23  ;;  %v2390_v39 = vadd.f32 %v12814_v35, %v12813_v18  ;;  %v9109_v23 = vld [vmem:[%s9832_s25 + $0x214] sm:$0xf]  ;;  %v12815_v25 = vld [vmem:[#allocation11_spill] sm:$0xff] }
 0x3de   : > { %v7759_v20 = vor.u32 %v9109_v23, %v7756_v6  ;;  %v12816_v18 = vld [vmem:[#allocation15_spill] sm:$0xff]  ;;  %v9162_v6 = vld [vmem:[%s12780_s1 + $0x18] sm:$0xff] }
 0x3df   : > { %v3224_v15 = vadd.f32 %v11042_v33, %v3192_v48  ;;  %v2575_v58 = vadd.f32 %v12815_v25, %v2390_v39  ;;  %v9140_v39 = vld [vmem:[%s9832_s25 + $0x264] sm:$0xf0] }
 0x3e1   : > { %v2661_v3 = vpop.f32.mrf.mxu0  ;;  %v3256_v41 = vmax.f32 %v3224_v15, 0.0  ;;  %v7914_v15 = vld [vmem:[%s9832_s25 + $0x260] sm:$0xf] }
 0x3e2   : > { %v11185_v31 = vadd.f32 %v2661_v3, %v10877_v38  ;;  %v3126_v9 = vpop.f32.mrf.mxu1 }
 0x3e3   : > { %v3127_v10 = vadd.f32 %v3126_v9, %v12812_v26 }
 0x3e4   : > { %3868 = vmatmul.bf16.gmra.mxu0 %v11181_v52  ;;  %v11204_v9 = vpop.f32.mrf.mxu2 }
 0x3e5   : > { %v3193_v16 = vadd.f32 %v3127_v10, %v10949_v34  ;;  %v9163_v34 = vld [vmem:[%s12780_s1 + $0x20] sm:$0xff] }
 0x3e6   : > { %4122 = vmatpush.bf16.msra.mxu1 %v9163_v34  ;;  %v9143_v10 = vld [vmem:[%s9832_s25 + $0x284] sm:$0xf] }
 0x3e7   : > { %v3225_v38 = vadd.f32 %v11042_v33, %v3193_v16  ;;  %v7932_v16 = vld [vmem:[%s9832_s25 + $0x288] sm:$0xf0] }
 0x3e8   : > { %v11213_v23 = vor.u32 %v9143_v10, %v7932_v16  ;;  %v9160_v10 = vld [vmem:[%s12780_s1 + $0x8] sm:$0xff]  ;;  %v12819_v16 = vld [vmem:[#allocation4_spill] sm:$0xff] }
 0x3e9   : > { %v3257_v2 = vmax.f32 %v3225_v38, 0.0  ;;  %v2663_v29 = vpop.f32.mrf.mxu0  ;;  %v11220_v38 = vor.u32 %v9140_v39, %v7914_v15  ;;  %v9111_v15 = vld [vmem:[%s9832_s25 + $0x224] sm:$0xf]  ;;  %v7764_v39 = vld [vmem:[%s9832_s25 + $0x228] sm:$0xf0] }
 0x3ea   : > { %v11202_v48 = vadd.f32 %v2663_v29, %v2575_v58  ;;  %v3129_v3 = vpop.f32.mrf.mxu1  ;;  %12817 = vst [vmem:[#allocation2_spill] sm:$0xff] %v11213_v23  ;;  %8062 = vmatmul.msk.bf16.gmra.mxu2 %vm543_vm0, %v11213_v23  ;;  %4123 = vmatpush.bf16.msra.mxu1 %v9162_v6  ;;  %v7948_v23 = vld [vmem:[%s9832_s25 + $0x2a8] sm:$0xf0] }
 0x3eb   : > { %v3284_v26 = vpack.c.bf16 %v3257_v2, %v3256_v41  ;;  %v3130_v35 = vadd.f32 %v3129_v3, %v12816_v18  ;;  %v9161_v41 = vld [vmem:[%s12780_s1 + $0x10] sm:$0xff]  ;;  %v12818_v2 = vld [vmem:[#allocation13_spill] sm:$0xff]  ;;  %v12820_v18 = vld [vmem:[#allocation14_spill] sm:$0xff] }
 0x3ec   : > { %7837 = vmatmul.msk.bf16.gmra.mxu1 %vm543_vm0, %v7759_v20  ;;  %v11229_v34 = vpop.f32.mrf.mxu2 }
 0x3ed   : > { %7844 = vmatmul.msk.bf16.gmra.mxu3 %vm543_vm0, %v3284_v26  ;;  %v3194_v25 = vadd.f32 %v3130_v35, %v10963_v45  ;;  %v2395_v35 = vadd.f32 %v12820_v18, %v12819_v16 }
 0x3ee   : > { %4124 = vmatpush.bf16.msra.mxu1 %v9161_v41 }
 0x3ef   : > { %v3226_v26 = vadd.f32 %v11042_v33, %v3194_v25 }
 0x3f1   : > { %v2666_v58 = vpop.f32.mrf.mxu0  ;;  %v3258_v41 = vmax.f32 %v3226_v26, 0.0  ;;  %v9145_v26 = vld [vmem:[%s9832_s25 + $0x294] sm:$0xf] }
 0x3f2   : > { %v11227_v29 = vadd.f32 %v2666_v58, %v12818_v2  ;;  %v3131_v20 = vpop.f32.mrf.mxu1  ;;  %4125 = vmatpush.bf16.msra.mxu1 %v9160_v10 }
 0x3f3   : > { %v3132_v3 = vadd.f32 %v3131_v20, %v10922_v19  ;;  %v12821_v19 = vld [vmem:[#allocation16_spill] sm:$0xff]  ;;  %v9223_v20 = vld [vmem:[%s12780_s1 + $0xe0] sm:$0xff] }
 0x3f4   : > { %3873 = vmatmul.bf16.gmra.mxu0 %v11220_v38  ;;  %v2580_v58 = vadd.f32 %v12821_v19, %v2395_v35  ;;  %v11252_v10 = vpop.f32.mrf.mxu2  ;;  %v7940_v35 = vld [vmem:[%s9832_s25 + $0x298] sm:$0xf0]  ;;  %v7922_v19 = vld [vmem:[%s9832_s25 + $0x270] sm:$0xf] }
 0x3f5   : > { %v3195_v45 = vadd.f32 %v3132_v3, %v10981_v11  ;;  %v7767_v11 = vor.u32 %v9111_v15, %v7764_v39  ;;  %v9159_v3 = vld [vmem:[%s12780_s1] sm:$0xff]  ;;  %4620 = vmatpush.bf16.msra.mxu0 %v9223_v20  ;;  %v11256_v15 = vor.u32 %v9145_v26, %v7940_v35  ;;  %v9731_v39 = vld [vmem:[%s12782_s3 + $0x18] sm:$0xff] }
 0x3f6   : > { %4126 = vmatpush.bf16.msra.mxu1 %v9159_v3  ;;  %v12823_v20 = vld [vmem:[#allocation17_spill] sm:$0xff] }
 0x3f7   : > { %v3227_v6 = vadd.f32 %v11042_v33, %v3195_v45  ;;  %12822 = vst [vmem:[#allocation8_spill] sm:$0xff] %v11256_v15 }
 0x3f9   : > { %v3259_v25 = vmax.f32 %v3227_v6, 0.0  ;;  %v2668_v2 = vpop.f32.mrf.mxu0 }
 0x3fa   : > { %v11250_v16 = vadd.f32 %v2668_v2, %v2580_v58  ;;  %v3134_v45 = vpop.f32.mrf.mxu1  ;;  %4959 = vmatpush.bf16.msrb.mxu1 %v9731_v39  ;;  %v9142_v58 = vld [vmem:[%s9832_s25 + $0x274] sm:$0xf0]  ;;  %8063 = vmatmul.msk.bf16.gmra.mxu2 %vm543_vm0, %v11256_v15 }
 0x3fb   : > { %v3285_v18 = vpack.c.bf16 %v3259_v25, %v3258_v41  ;;  %v3135_v6 = vadd.f32 %v3134_v45, %v10935_v8  ;;  %v11268_v41 = vor.u32 %v9142_v58, %v7922_v19  ;;  %v9732_v25 = vld [vmem:[%s12782_s3 + $0x10] sm:$0xff]  ;;  %v12825_v19 = vld [vmem:[#allocation18_spill] sm:$0xff] }
 0x3fc   : > { %7838 = vmatmul.msk.bf16.gmra.mxu1 %vm543_vm0, %v7767_v11  ;;  %v9230_v11 = vld [vmem:[%s12780_s1 + $0x118] sm:$0xff] }
 0x3fd   : > { %7845 = vmatmul.msk.bf16.gmra.mxu3 %vm543_vm0, %v3285_v18  ;;  %v3196_v8 = vadd.f32 %v3135_v6, %v10999_v36  ;;  %v11280_v18 = vpop.f32.mrf.mxu2  ;;  %4710 = vmatpush.bf16.msra.mxu2 %v9230_v11  ;;  %v9733_v36 = vld [vmem:[%s12782_s3 + $0x8] sm:$0xff]  ;;  %v12824_v6 = vld [vmem:[#allocation5_spill] sm:$0xff] }
 0x3fe   : > { %4960 = vmatpush.bf16.msrb.mxu1 %v9732_v25  ;;  %v2400_v58 = vadd.f32 %v12825_v19, %v12824_v6  ;;  %v9113_v25 = vld [vmem:[%s9832_s25 + $0x234] sm:$0xf] }
 0x3ff   : > { %v3228_v35 = vadd.f32 %v11042_v33, %v3196_v8 }
 0x400   : > { %v2585_v11 = vadd.f32 %v10947_v13, %v2400_v58 }
 0x401   : > { %v2671_v2 = vpop.f32.mrf.mxu0  ;;  %v3260_v8 = vmax.f32 %v3228_v35, 0.0  ;;  %v7930_v35 = vld [vmem:[%s9832_s25 + $0x280] sm:$0xf] }
 0x402   : > { %v11278_v3 = vadd.f32 %v2671_v2, %v12823_v20  ;;  %v3136_v45 = vpop.f32.mrf.mxu1  ;;  %4961 = vmatpush.bf16.msrb.mxu1 %v9733_v36  ;;  %v7772_v2 = vld [vmem:[%s9832_s25 + $0x238] sm:$0xf0]  ;;  %v9734_v20 = vld [vmem:[%s12782_s3] sm:$0xff] }
 0x403   : > { %v3137_v26 = vadd.f32 %v3136_v45, %v10951_v51 }
 0x404   : > { %3878 = vmatmul.bf16.gmra.mxu0 %v11268_v41 }
 0x405   : > { %v3197_v39 = vadd.f32 %v3137_v26, %v11018_v44  ;;  %v7775_v26 = vor.u32 %v9113_v25, %v7772_v2  ;;  %v11300_v19 = vpop.f32.mrf.mxu2 }
 0x406   : > { %4962 = vmatpush.bf16.msrb.mxu1 %v9734_v20 }
 0x407   : > { %v3229_v51 = vadd.f32 %v11042_v33, %v3197_v39  ;;  %v9147_v39 = vld [vmem:[%s9832_s25 + $0x2a4] sm:$0xf] }
 0x408   : > { %v11304_v13 = vor.u32 %v9147_v39, %v7948_v23 }
 0x409   : > { %v3261_v44 = vmax.f32 %v3229_v51, 0.0  ;;  %v2673_v45 = vpop.f32.mrf.mxu0  ;;  %v9144_v51 = vld [vmem:[%s9832_s25 + $0x284] sm:$0xf0] }
 0x40a   : > { %v11298_v36 = vadd.f32 %v2673_v45, %v2585_v11  ;;  %v3139_v6 = vpop.f32.mrf.mxu1  ;;  %8064 = vmatmul.msk.bf16.gmra.mxu2 %vm543_vm0, %v11304_v13  ;;  %v11313_v25 = vor.u32 %v9144_v51, %v7930_v35  ;;  %v12826_v45 = vld [vmem:[#allocation6_spill] sm:$0xff] }
 0x40b   : > { %v3286_v15 = vpack.c.bf16 %v3261_v44, %v3260_v8  ;;  %v3140_v58 = vadd.f32 %v3139_v6, %v10967_v30  ;;  %v9168_v30 = vld [vmem:[%s12780_s1 + $0x48] sm:$0xff]  ;;  %v8074_v6 = vld [vmem:[%s9832_s25 + $0x200] sm:$0xf] }
 0x40c   : > { %7839 = vmatmul.msk.bf16.gmra.mxu1 %vm543_vm0, %v7775_v26  ;;  %4214 = vmatpush.bf16.msra.mxu3 %v9168_v30  ;;  %v2405_v26 = vadd.f32 %v10965_v27, %v12826_v45  ;;  %v7938_v45 = vld [vmem:[%s9832_s25 + $0x290] sm:$0xf] }
 0x40d   : > { %7846 = vmatmul.msk.bf16.gmra.mxu3 %vm543_vm0, %v3286_v15  ;;  %v3198_v2 = vadd.f32 %v3140_v58, %v11032_v37  ;;  %v11322_v20 = vpop.f32.mrf.mxu2 }
 0x40e   : > { %v2590_v58 = vadd.f32 %v10976_v55, %v2405_v26  ;;  %v9146_v26 = vld [vmem:[%s9832_s25 + $0x294] sm:$0xf0] }
 0x40f   : > { %v3230_v44 = vadd.f32 %v11042_v33, %v3198_v2 }
 0x411   : > { %v2676_v11 = vpop.f32.mrf.mxu0  ;;  %v3262_v35 = vmax.f32 %v3230_v44, 0.0 }
 0x412   : > { %v11320_v23 = vadd.f32 %v2676_v11, %v10960_v47  ;;  %v3141_v15 = vpop.f32.mrf.mxu1  ;;  %v9128_v47 = vld [vmem:[%s9832_s25 + $0x204] sm:$0xf0] }
 0x413   : > { %v3142_v8 = vadd.f32 %v3141_v15, %v10983_v50  ;;  %v8075_v11 = vor.u32 %v9128_v47, %v8074_v6  ;;  %v11351_v6 = vor.u32 %v9146_v26, %v7938_v45 }
 0x414   : > { %3883 = vmatmul.bf16.gmra.mxu0 %v11313_v25 }
 0x415   : > { %v3199_v37 = vadd.f32 %v3142_v8, %v11052_v4  ;;  %v9222_v4 = vld [vmem:[%s12780_s1 + $0xd8] sm:$0xff]  ;;  %v11339_v30 = vpop.f32.mrf.mxu2  ;;  %v9149_v8 = vld [vmem:[%s9832_s25 + $0x2b4] sm:$0xf] }
 0x416   : > { %4621 = vmatpush.bf16.msra.mxu0 %v9222_v4 }
 0x417   : > { %v3231_v39 = vadd.f32 %v11042_v33, %v3199_v37  ;;  %v7956_v37 = vld [vmem:[%s9832_s25 + $0x2b8] sm:$0xf0] }
 0x418   : > { %v11343_v55 = vor.u32 %v9149_v8, %v7956_v37 }
 0x419   : > { %v3263_v50 = vmax.f32 %v3231_v39, 0.0  ;;  %v2678_v51 = vpop.f32.mrf.mxu0 }
 0x41a   : > { %v11337_v2 = vadd.f32 %v2678_v51, %v2590_v58  ;;  %v3144_v27 = vpop.f32.mrf.mxu1  ;;  %12827 = vst [vmem:[#allocation9_spill] sm:$0xff] %v11343_v55  ;;  %8065 = vmatmul.msk.bf16.gmra.mxu2 %vm543_vm0, %v11343_v55  ;;  %v2594_v51 = vpop.f32.mrf.mxu3  ;;  %v7964_v55 = vld [vmem:[%s9832_s25 + $0x2c8] sm:$0xf0] }
 0x41b   : > { %v3287_v15 = vpack.c.bf16 %v3263_v50, %v3262_v35  ;;  %v3145_v44 = vadd.f32 %v3144_v27, %v11003_v59  ;;  %v12828_v27 = vld [vmem:[#allocation7_spill] sm:$0xff] }
 0x41c   : > { %4127 = vmatmul.bf16.vlgmr.msra.gmra.mxu1 %v8075_v11 }
 0x41d   : > { %7847 = vmatmul.msk.bf16.gmra.mxu3 %vm543_vm0, %v3287_v15  ;;  %v3200_v47 = vadd.f32 %v3145_v44, %v11071_v21  ;;  %v11357_v59 = vpop.f32.mrf.mxu2  ;;  %v2410_v21 = vadd.f32 %v11001_v61, %v12828_v27  ;;  %v8082_v15 = vld [vmem:[%s9832_s25 + $0x210] sm:$0xf] }
 0x41f   : > { %v3232_v11 = vadd.f32 %v11042_v33, %v3200_v47  ;;  %v2595_v37 = vadd.f32 %v2594_v51, %v2410_v21  ;;  %v7946_v51 = vld [vmem:[%s9832_s25 + $0x2a0] sm:$0xf] }
 0x421   : > { %v2681_v39 = vpop.f32.mrf.mxu0 }
 0x422   : > { %v11355_v58 = vadd.f32 %v2681_v39, %v10996_v56  ;;  %v3146_v35 = vpop.f32.mrf.mxu1  ;;  %v9130_v56 = vld [vmem:[%s9832_s25 + $0x214] sm:$0xf0] }
 0x423   : > { %v3147_v50 = vadd.f32 %v3146_v35, %v11020_v28  ;;  %v3264_v28 = vmax.f32 %v3232_v11, 0.0  ;;  %v8083_v26 = vor.u32 %v9130_v56, %v8082_v15  ;;  %v9148_v11 = vld [vmem:[%s9832_s25 + $0x2a4] sm:$0xf0] }
 0x424   : > { %3888 = vmatmul.bf16.gmra.mxu0 %v11351_v6  ;;  %v11382_v21 = vor.u32 %v9148_v11, %v7946_v51 }
 0x425   : > { %v3201_v4 = vadd.f32 %v3147_v50, %v11091_v1  ;;  %v11370_v35 = vpop.f32.mrf.mxu2  ;;  %v9151_v50 = vld [vmem:[%s9832_s25 + $0x2c4] sm:$0xf] }
 0x426   : > { %v11374_v61 = vor.u32 %v9151_v50, %v7964_v55 }
 0x427   : > { %v3233_v8 = vadd.f32 %v11042_v33, %v3201_v4 }
 0x429   : > { %v3265_v44 = vmax.f32 %v3233_v8, 0.0  ;;  %v2683_v45 = vpop.f32.mrf.mxu0 }
 0x42a   : > { %v11368_v39 = vadd.f32 %v2683_v45, %v2595_v37  ;;  %v3149_v47 = vpop.f32.mrf.mxu1  ;;  %8066 = vmatmul.msk.bf16.gmra.mxu2 %vm543_vm0, %v11374_v61 }
 0x42b   : > { %v3288_v1 = vpack.c.bf16 %v3265_v44, %v3264_v28  ;;  %v3150_v27 = vadd.f32 %v3149_v47, %v11034_v60 }
 0x42c   : > { %4132 = vmatmul.bf16.gmra.mxu1 %v8083_v26 }
 0x42d   : > { %7848 = vmatmul.msk.bf16.gmra.mxu3 %vm543_vm0, %v3288_v1  ;;  %v3202_v15 = vadd.f32 %v3150_v27, %v11110_v7  ;;  %v11388_v37 = vpop.f32.mrf.mxu2 }
 0x42f   : > { %v3234_v28 = vadd.f32 %v11042_v33, %v3202_v15 }
 0x430   : > { %v3353_v4 = vpop.f32.mrf.mxu3 }
 0x431   : > { %v3854_v56 = vpop.f32.mrf.mxu0  ;;  %v3266_v26 = vmax.f32 %v3234_v28, 0.0 }
 0x432   : > { %v11386_v8 = vadd.f32 %v11322_v20, %v3854_v56  ;;  %v3151_v55 = vpop.f32.mrf.mxu1  ;;  %v11398_v20 = vld [vmem:[%s12783_s4] ss:$0 sm:$0xff] }
 0x433   : > { %v3152_v60 = vadd.f32 %v3151_v55, %v11054_v43  ;;  %v3354_v43 = vadd.f32 %v11398_v20, %v3353_v4  ;;  %v9153_v4 = vld [vmem:[%s9832_s25 + $0x2d4] sm:$0xf]  ;;  %v7972_v55 = vld [vmem:[%s9832_s25 + $0x2d8] sm:$0xf0] }
 0x434   : > { %3893 = vmatmul.bf16.gmra.mxu0 %v11382_v21 }
 0x435   : > { %v3203_v44 = vadd.f32 %v3152_v60, %v11124_v49  ;;  %v9221_v49 = vld [vmem:[%s12780_s1 + $0xd0] sm:$0xff]  ;;  %v11408_v11 = vpop.f32.mrf.mxu2  ;;  %v11412_v60 = vor.u32 %v9153_v4, %v7972_v55 }
 0x436   : > { %4622 = vmatpush.bf16.msra.mxu0 %v9221_v49 }
 0x437   : > { %v3235_v45 = vadd.f32 %v11042_v33, %v3203_v44  ;;  %v7954_v44 = vld [vmem:[%s9832_s25 + $0x2b0] sm:$0xf] }
 0x438   : > { %v3355_v7 = vpop.f32.mrf.mxu3 }
 0x439   : > { %v3267_v47 = vmax.f32 %v3235_v45, 0.0  ;;  %v3356_v1 = vadd.f32 %v11398_v20, %v3355_v7  ;;  %v3856_v50 = vpop.f32.mrf.mxu0 }
 0x43a   : > { %v11406_v27 = vadd.f32 %v11339_v30, %v3856_v50  ;;  %v3154_v51 = vpop.f32.mrf.mxu1  ;;  %v9150_v30 = vld [vmem:[%s9832_s25 + $0x2b4] sm:$0xf0]  ;;  %8067 = vmatmul.msk.bf16.gmra.mxu2 %vm543_vm0, %v11412_v60 }
 0x43b   : > { %v9418_v15 = vpack.c.bf16 %v3356_v1, %v3354_v43  ;;  %v3289_v56 = vpack.c.bf16 %v3267_v47, %v3266_v26  ;;  %v3155_v28 = vadd.f32 %v3154_v51, %v11073_v54  ;;  %v11422_v7 = vor.u32 %v9150_v30, %v7954_v44  ;;  %v9229_v47 = vld [vmem:[%s12780_s1 + $0x110] sm:$0xff] }
 0x43c   : > { %4137 = vmatmul.bf16.gmra.mxu1 %v11067_v63  ;;  %4711 = vmatpush.bf16.msra.mxu2 %v9229_v47  ;;  %v7980_v47 = vld [vmem:[%s9832_s25 + $0x2e8] sm:$0xf0] }
 0x43d   : > { %9670 = vst [vmem:[%s10423_s12 + $0x80] sm:$0xff] %v9418_v15   ;;  %7849 = vmatmul.msk.bf16.gmra.mxu3 %vm543_vm0, %v3289_v56  ;;  %v3204_v26 = vadd.f32 %v3155_v28, %v11146_v22  ;;  %v11431_v63 = vpop.f32.mrf.mxu2 }
 0x43f   : > { %v3236_v22 = vadd.f32 %v11042_v33, %v3204_v26 }
 0x440   : > { %v3358_v45 = vpop.f32.mrf.mxu3 }
 0x441   : > { %v3859_v43 = vpop.f32.mrf.mxu0  ;;  %v3359_v56 = vadd.f32 %v11398_v20, %v3358_v45 }
 0x442   : > { %v11429_v54 = vadd.f32 %v11357_v59, %v3859_v43  ;;  %v3156_v1 = vpop.f32.mrf.mxu1  ;;  %v3268_v59 = vmax.f32 %v3236_v22, 0.0  ;;  %v9155_v43 = vld [vmem:[%s9832_s25 + $0x2e4] sm:$0xf]  ;;  %v9152_v22 = vld [vmem:[%s9832_s25 + $0x2c4] sm:$0xf0] }
 0x443   : > { %v3157_v50 = vadd.f32 %v3156_v1, %v11093_v24  ;;  %v11447_v1 = vor.u32 %v9155_v43, %v7980_v47  ;;  %v9220_v47 = vld [vmem:[%s12780_s1 + $0xc8] sm:$0xff] }
 0x444   : > { %3898 = vmatmul.bf16.gmra.mxu0 %v11422_v7 }
 0x445   : > { %v3205_v49 = vadd.f32 %v3157_v50, %v11166_v42  ;;  %v11443_v30 = vpop.f32.mrf.mxu2  ;;  %v7962_v50 = vld [vmem:[%s9832_s25 + $0x2c0] sm:$0xf]  ;;  %4623 = vmatpush.bf16.msra.mxu0 %v9220_v47 }
 0x447   : > { %v3237_v51 = vadd.f32 %v11042_v33, %v3205_v49  ;;  %v11457_v49 = vor.u32 %v9152_v22, %v7962_v50 }
 0x448   : > { %v3360_v15 = vpop.f32.mrf.mxu3 }
 0x449   : > { %v3269_v4 = vmax.f32 %v3237_v51, 0.0  ;;  %v3361_v24 = vadd.f32 %v11398_v20, %v3360_v15  ;;  %v3861_v55 = vpop.f32.mrf.mxu0 }
 0x44a   : > { %v11441_v28 = vadd.f32 %v11370_v35, %v3861_v55  ;;  %v3159_v44 = vpop.f32.mrf.mxu1  ;;  %8068 = vmatmul.msk.bf16.gmra.mxu2 %vm543_vm0, %v11447_v1 }
 0x44b   : > { %v9423_v42 = vpack.c.bf16 %v3361_v24, %v3359_v56  ;;  %v3290_v26 = vpack.c.bf16 %v3269_v4, %v3268_v59  ;;  %v3160_v45 = vadd.f32 %v3159_v44, %v11112_v46  ;;  %v9167_v59 = vld [vmem:[%s12780_s1 + $0x40] sm:$0xff] }
 0x44c   : > { %4142 = vmatmul.bf16.gmra.mxu1 %v11106_v5  ;;  %4215 = vmatpush.bf16.msra.mxu3 %v9167_v59 }
 0x44d   : > { %9671 = vst [vmem:[%s10423_s12 + $0x88] sm:$0xff] %v9423_v42   ;;  %7850 = vmatmul.msk.bf16.gmra.mxu3 %vm543_vm0, %v3290_v26  ;;  %v3206_v51 = vadd.f32 %v3160_v45, %v11185_v31  ;;  %v11466_v5 = vpop.f32.mrf.mxu2 }
 0x44f   : > { %v3238_v24 = vadd.f32 %v11042_v33, %v3206_v51 }
 0x450   : > { %v3363_v35 = vpop.f32.mrf.mxu3 }
 0x451   : > { %v3864_v15 = vpop.f32.mrf.mxu0  ;;  %v3364_v42 = vadd.f32 %v11398_v20, %v3363_v35  ;;  %v9157_v35 = vld [vmem:[%s9832_s25 + $0x2f4] sm:$0xf] }
 0x452   : > { %v11464_v46 = vadd.f32 %v11388_v37, %v3864_v15  ;;  %v3161_v56 = vpop.f32.mrf.mxu1  ;;  %v3270_v37 = vmax.f32 %v3238_v24, 0.0  ;;  %v7988_v15 = vld [vmem:[%s9832_s25 + $0x2f8] sm:$0xf0] }
 0x453   : > { %v3162_v4 = vadd.f32 %v3161_v56, %v11126_v53  ;;  %v11485_v59 = vor.u32 %v9157_v35, %v7988_v15 }
 0x454   : > { %3903 = vmatmul.bf16.gmra.mxu0 %v11457_v49 }
 0x455   : > { %v3207_v31 = vadd.f32 %v3162_v4, %v11202_v48  ;;  %v11481_v50 = vpop.f32.mrf.mxu2  ;;  %v7970_v4 = vld [vmem:[%s9832_s25 + $0x2d0] sm:$0xf] }
 0x457   : > { %v3239_v55 = vadd.f32 %v11042_v33, %v3207_v31 }
 0x458   : > { %v3365_v44 = vpop.f32.mrf.mxu3 }
 0x459   : > { %v3271_v26 = vmax.f32 %v3239_v55, 0.0  ;;  %v3366_v43 = vadd.f32 %v11398_v20, %v3365_v44  ;;  %v3866_v53 = vpop.f32.mrf.mxu0 }
 0x45a   : > { %v11479_v48 = vadd.f32 %v11408_v11, %v3866_v53  ;;  %v3164_v45 = vpop.f32.mrf.mxu1  ;;  %v9154_v11 = vld [vmem:[%s9832_s25 + $0x2d4] sm:$0xf0]  ;;  %8069 = vmatmul.msk.bf16.gmra.mxu2 %vm543_vm0, %v11485_v59 }
 0x45b   : > { %v9428_v22 = vpack.c.bf16 %v3366_v43, %v3364_v42  ;;  %v3291_v51 = vpack.c.bf16 %v3271_v26, %v3270_v37  ;;  %v3165_v56 = vadd.f32 %v3164_v45, %v11148_v32  ;;  %v11495_v31 = vor.u32 %v9154_v11, %v7970_v4  ;;  %v9171_v4 = vld [vmem:[%s9832_s25 + $0x304] sm:$0xf]  ;;  %v7996_v11 = vld [vmem:[%s9832_s25 + $0x308] sm:$0xf0] }
 0x45c   : > { %4147 = vmatmul.bf16.gmra.mxu1 %v11139_v57 }
 0x45d   : > { %9672 = vst [vmem:[%s10423_s12 + $0x90] sm:$0xff] %v9428_v22   ;;  %7851 = vmatmul.msk.bf16.gmra.mxu3 %vm543_vm0, %v3291_v51  ;;  %v3208_v55 = vadd.f32 %v3165_v56, %v11227_v29  ;;  %v11501_v32 = vpop.f32.mrf.mxu2 }
 0x45f   : > { %v3240_v57 = vadd.f32 %v11042_v33, %v3208_v55  ;;  %v7999_v55 = vor.u32 %v9171_v4, %v7996_v11 }
 0x460   : > { %v3368_v24 = vpop.f32.mrf.mxu3 }
 0x461   : > { %v3869_v44 = vpop.f32.mrf.mxu0  ;;  %v3272_v47 = vmax.f32 %v3240_v57, 0.0 }
 0x462   : > { %v11499_v37 = vadd.f32 %v11431_v63, %v3869_v44  ;;  %v3166_v42 = vpop.f32.mrf.mxu1  ;;  %v3369_v63 = vadd.f32 %v11398_v20, %v3368_v24  ;;  %v7978_v44 = vld [vmem:[%s9832_s25 + $0x2e0] sm:$0xf] }
 0x463   : > { %v3167_v26 = vadd.f32 %v3166_v42, %v11168_v17  ;;  %v9156_v42 = vld [vmem:[%s9832_s25 + $0x2e4] sm:$0xf0] }
 0x464   : > { %3908 = vmatmul.bf16.gmra.mxu0 %v11495_v31 }
 0x465   : > { %v3209_v43 = vadd.f32 %v3167_v26, %v11250_v16  ;;  %v11513_v15 = vpop.f32.mrf.mxu2  ;;  %v11524_v26 = vor.u32 %v9156_v42, %v7978_v44  ;;  %v8004_v44 = vld [vmem:[%s9832_s25 + $0x318] sm:$0xf0] }
 0x467   : > { %v3241_v29 = vadd.f32 %v11042_v33, %v3209_v43 }
 0x468   : > { %v3370_v53 = vpop.f32.mrf.mxu3 }
 0x469   : > { %v3273_v45 = vmax.f32 %v3241_v29, 0.0  ;;  %v3371_v17 = vadd.f32 %v11398_v20, %v3370_v53  ;;  %v3871_v22 = vpop.f32.mrf.mxu0 }
 0x46a   : > { %v11511_v51 = vadd.f32 %v11443_v30, %v3871_v22  ;;  %v3169_v35 = vpop.f32.mrf.mxu1  ;;  %8070 = vmatmul.msk.bf16.gmra.mxu2 %vm543_vm0, %v7999_v55 }
 0x46b   : > { %v9433_v16 = vpack.c.bf16 %v3371_v17, %v3369_v63  ;;  %v3292_v56 = vpack.c.bf16 %v3273_v45, %v3272_v47  ;;  %v3170_v24 = vadd.f32 %v3169_v35, %v11187_v12 }
 0x46c   : > { %4152 = vmatmul.bf16.gmra.mxu1 %v11181_v52 }
 0x46d   : > { %9673 = vst [vmem:[%s10423_s12 + $0x98] sm:$0xff] %v9433_v16   ;;  %7852 = vmatmul.msk.bf16.gmra.mxu3 %vm543_vm0, %v3292_v56  ;;  %v3210_v57 = vadd.f32 %v3170_v24, %v11278_v3  ;;  %v11530_v47 = vpop.f32.mrf.mxu2  ;;  %v9219_v16 = vld [vmem:[%s12780_s1 + $0xc0] sm:$0xff]  ;;  %v9173_v24 = vld [vmem:[%s9832_s25 + $0x314] sm:$0xf] }
 0x46e   : > { %4624 = vmatpush.bf16.msra.mxu0 %v9219_v16  ;;  %v8007_v42 = vor.u32 %v9173_v24, %v8004_v44  ;;  %v9187_v44 = vld [vmem:[%s9832_s25 + $0x244] sm:$0xf] }
 0x46f   : > { %v3242_v52 = vadd.f32 %v11042_v33, %v3210_v57  ;;  %v7986_v57 = vld [vmem:[%s9832_s25 + $0x2f0] sm:$0xf] }
 0x470   : > { %v3373_v30 = vpop.f32.mrf.mxu3 }
 0x471   : > { %v3874_v43 = vpop.f32.mrf.mxu0  ;;  %v3274_v17 = vmax.f32 %v3242_v52, 0.0 }
 0x472   : > { %v11528_v29 = vadd.f32 %v11466_v5, %v3874_v43  ;;  %v3171_v53 = vpop.f32.mrf.mxu1  ;;  %v3374_v5 = vadd.f32 %v11398_v20, %v3373_v30  ;;  %v9158_v43 = vld [vmem:[%s9832_s25 + $0x2f4] sm:$0xf0] }
 0x473   : > { %v3172_v12 = vadd.f32 %v3171_v53, %v11204_v9 }
 0x474   : > { %3913 = vmatmul.bf16.gmra.mxu0 %v11524_v26 }
 0x475   : > { %v3211_v63 = vadd.f32 %v3172_v12, %v11298_v36  ;;  %v11545_v4 = vpop.f32.mrf.mxu2  ;;  %v11559_v12 = vor.u32 %v9158_v43, %v7986_v57  ;;  %v7994_v57 = vld [vmem:[%s9832_s25 + $0x300] sm:$0xf]  ;;  %v9172_v43 = vld [vmem:[%s9832_s25 + $0x304] sm:$0xf0] }
 0x477   : > { %v3243_v45 = vadd.f32 %v11042_v33, %v3211_v63 }
 0x478   : > { %v3375_v3 = vpop.f32.mrf.mxu3 }
 0x479   : > { %v3275_v22 = vmax.f32 %v3243_v45, 0.0  ;;  %v3376_v35 = vadd.f32 %v11398_v20, %v3375_v3  ;;  %v3876_v9 = vpop.f32.mrf.mxu0 }
 0x47a   : > { %v11543_v36 = vadd.f32 %v11481_v50, %v3876_v9  ;;  %v3174_v56 = vpop.f32.mrf.mxu1  ;;  %v9228_v50 = vld [vmem:[%s12780_s1 + $0x108] sm:$0xff]  ;;  %8071 = vmatmul.msk.bf16.gmra.mxu2 %vm543_vm0, %v8007_v42 }
 0x47b   : > { %v9438_v11 = vpack.c.bf16 %v3376_v35, %v3374_v5  ;;  %v3293_v55 = vpack.c.bf16 %v3275_v22, %v3274_v17  ;;  %v3175_v30 = vadd.f32 %v3174_v56, %v11229_v34  ;;  %4712 = vmatpush.bf16.msra.mxu2 %v9228_v50  ;;  %v9227_v56 = vld [vmem:[%s12780_s1 + $0x100] sm:$0xff]  ;;  %v8180_v42 = vld [vmem:[%s9832_s25 + $0x248] sm:$0xf0] }
 0x47c   : > { %4157 = vmatmul.bf16.gmra.mxu1 %v11220_v38  ;;  %v8183_v50 = vor.u32 %v9187_v44, %v8180_v42  ;;  %v9189_v42 = vld [vmem:[%s9832_s25 + $0x254] sm:$0xf] }
 0x47d   : > { %9674 = vst [vmem:[%s10423_s12 + $0xa0] sm:$0xff] %v9438_v11   ;;  %7853 = vmatmul.msk.bf16.gmra.mxu3 %vm543_vm0, %v3293_v55  ;;  %v3212_v52 = vadd.f32 %v3175_v30, %v11320_v23  ;;  %v11565_v38 = vpop.f32.mrf.mxu2 }
 0x47f   : > { %v3244_v17 = vadd.f32 %v11042_v33, %v3212_v52  ;;  %4713 = vmatpush.bf16.msra.mxu2 %v9227_v56  ;;  %v7995_v52 = vor.u32 %v9172_v43, %v7994_v57  ;;  %v8002_v57 = vld [vmem:[%s9832_s25 + $0x310] sm:$0xf]  ;;  %v9174_v43 = vld [vmem:[%s9832_s25 + $0x314] sm:$0xf0] }
 0x480   : > { %v3378_v53 = vpop.f32.mrf.mxu3 }
 0x481   : > { %v3879_v63 = vpop.f32.mrf.mxu0  ;;  %v3276_v35 = vmax.f32 %v3244_v17, 0.0 }
 0x482   : > { %v11563_v34 = vadd.f32 %v11501_v32, %v3879_v63  ;;  %v3176_v45 = vpop.f32.mrf.mxu1  ;;  %v3379_v32 = vadd.f32 %v11398_v20, %v3378_v53 }
 0x483   : > { %v3177_v3 = vadd.f32 %v3176_v45, %v11252_v10 }
 0x484   : > { %3918 = vmatmul.bf16.gmra.mxu0 %v11559_v12 }
 0x485   : > { %v3213_v5 = vadd.f32 %v3177_v3, %v11337_v2 }
 0x487   : > { %v3245_v22 = vadd.f32 %v11042_v33, %v3213_v5  ;;  %v11580_v33 = vpop.f32.mrf.mxu2  ;;  %v9290_v5 = vld [vmem:[%s12780_s1 + $0xb8] sm:$0xff] }
 0x488   : > { %v3380_v23 = vpop.f32.mrf.mxu3  ;;  %5549 = vmatpush.bf16.msrb.mxu0 %v9290_v5 }
 0x489   : > { %v3277_v9 = vmax.f32 %v3245_v22, 0.0  ;;  %v3381_v16 = vadd.f32 %v11398_v20, %v3380_v23  ;;  %v3881_v10 = vpop.f32.mrf.mxu0  ;;  %v11607_v22 = vld [vmem:[%s12781_s2] ss:$0 sm:$0xff] }
 0x48a   : > { %v11578_v2 = vadd.f32 %v11513_v15, %v3881_v10  ;;  %v3179_v11 = vpop.f32.mrf.mxu1  ;;  %v9286_v15 = vld [vmem:[%s12780_s1 + $0x98] sm:$0xff]  ;;  %8352 = vmatmul.msk.bf16.vlgmr.msra.gmra.mxu2 %vm543_vm0, %v8183_v50 }
 0x48b   : > { %v9443_v55 = vpack.c.bf16 %v3381_v16, %v3379_v32  ;;  %v3294_v24 = vpack.c.bf16 %v3277_v9, %v3276_v35  ;;  %v3180_v30 = vadd.f32 %v3179_v11, %v11280_v18  ;;  %5456 = vmatpush.bf16.msrb.mxu3 %v9286_v15  ;;  %v8003_v15 = vor.u32 %v9174_v43, %v8002_v57 }
 0x48c   : > { %4162 = vmatmul.bf16.gmra.mxu1 %v11268_v41 }
 0x48d   : > { %9675 = vst [vmem:[%s10423_s12 + $0xa8] sm:$0xff] %v9443_v55   ;;  %7854 = vmatmul.msk.bf16.gmra.mxu3 %vm543_vm0, %v3294_v24  ;;  %v3214_v63 = vadd.f32 %v3180_v30, %v11355_v58  ;;  %v8188_v30 = vld [vmem:[%s9832_s25 + $0x258] sm:$0xf0] }
 0x48f   : > { %v11598_v41 = vpop.f32.mrf.mxu2  ;;  %v3246_v58 = vadd.f32 %v11607_v22, %v3214_v63 }
 0x490   : > { %v3383_v53 = vpop.f32.mrf.mxu3 }
 0x491   : > { %v3884_v45 = vpop.f32.mrf.mxu0  ;;  %v3278_v35 = vmax.f32 %v3246_v58, 0.0  ;;  %v3384_v32 = vadd.f32 %v11398_v20, %v3383_v53 }
 0x492   : > { %v11596_v18 = vadd.f32 %v11530_v47, %v3884_v45  ;;  %v3181_v3 = vpop.f32.mrf.mxu1 }
 0x493   : > { %v3182_v17 = vadd.f32 %v3181_v3, %v11300_v19  ;;  %v8076_v3 = vld [vmem:[%s9832_s25 + $0x208] sm:$0xf0] }
 0x494   : > { %3923 = vmatmul.bf16.gmra.mxu0 %v7995_v52 }
 0x495   : > { %v3215_v47 = vadd.f32 %v3182_v17, %v11368_v39 }
 0x497   : > { %v3247_v19 = vadd.f32 %v11607_v22, %v3215_v47  ;;  %v3985_v39 = vpop.f32.mrf.mxu2 }
 0x498   : > { %v3385_v23 = vpop.f32.mrf.mxu3 }
 0x499   : > { %v3279_v9 = vmax.f32 %v3247_v19, 0.0  ;;  %v3386_v16 = vadd.f32 %v11398_v20, %v3385_v23  ;;  %v3886_v10 = vpop.f32.mrf.mxu0 }
 0x49a   : > { %v11615_v56 = vadd.f32 %v11545_v4, %v3886_v10  ;;  %v4128_v11 = vpop.f32.mrf.mxu1  ;;  %v8191_v4 = vor.u32 %v9189_v42, %v8188_v30 }
 0x49b   : > { %v9448_v55 = vpack.c.bf16 %v3386_v16, %v3384_v32  ;;  %v11618_v24 = vadd.f32 %v4128_v11, %v11386_v8  ;;  %v3295_v44 = vpack.c.bf16 %v3279_v9, %v3278_v35  ;;  %v9191_v9 = vld [vmem:[%s9832_s25 + $0x264] sm:$0xf]  ;;  %v8196_v16 = vld [vmem:[%s9832_s25 + $0x268] sm:$0xf0]  ;;  %v8178_v11 = vld [vmem:[%s9832_s25 + $0x240] sm:$0xf] }
 0x49c   : > { %4167 = vmatmul.bf16.gmra.mxu1 %v11313_v25  ;;  %8353 = vmatmul.msk.bf16.gmra.mxu2 %vm543_vm0, %v8191_v4  ;;  %v9127_v25 = vld [vmem:[%s9832_s25 + $0x204] sm:$0xf]  ;;  %v8199_v10 = vor.u32 %v9191_v9, %v8196_v16  ;;  %v9129_v4 = vld [vmem:[%s9832_s25 + $0x214] sm:$0xf]  ;;  %v9190_v9 = vld [vmem:[%s9832_s25 + $0x254] sm:$0xf0] }
 0x49d   : > { %9676 = vst [vmem:[%s10423_s12 + $0xb0] sm:$0xff] %v9448_v55   ;;  %7855 = vmatmul.msk.bf16.gmra.mxu3 %vm543_vm0, %v3295_v44  ;;  %v8079_v47 = vor.u32 %v9127_v25, %v8076_v3  ;;  %v9188_v55 = vld [vmem:[%s9832_s25 + $0x244] sm:$0xf0] }
 0x49e   : > { %v8179_v44 = vor.u32 %v9188_v55, %v8178_v11 }
 0x49f   : > { %v3988_v63 = vpop.f32.mrf.mxu2 }
 0x4a0   : > { %v3388_v50 = vpop.f32.mrf.mxu3 }
 0x4a1   : > { %v3889_v53 = vpop.f32.mrf.mxu0  ;;  %v3389_v5 = vadd.f32 %v11398_v20, %v3388_v50  ;;  %v8084_v50 = vld [vmem:[%s9832_s25 + $0x218] sm:$0xf0] }
 0x4a2   : > { %v11629_v8 = vadd.f32 %v11565_v38, %v3889_v53  ;;  %v4130_v52 = vpop.f32.mrf.mxu1  ;;  %v8087_v25 = vor.u32 %v9129_v4, %v8084_v50 }
 0x4a3   : > { %v11632_v45 = vadd.f32 %v4130_v52, %v11406_v27 }
 0x4a4   : > { %3928 = vmatmul.bf16.gmra.mxu0 %v8003_v15 }
 0x4a7   : > { %v3990_v35 = vpop.f32.mrf.mxu2 }
 0x4a8   : > { %v3390_v17 = vpop.f32.mrf.mxu3 }
 0x4a9   : > { %v3391_v58 = vadd.f32 %v11398_v20, %v3390_v17  ;;  %v3891_v38 = vpop.f32.mrf.mxu0 }
 0x4aa   : > { %v11639_v19 = vadd.f32 %v11580_v33, %v3891_v38  ;;  %v4133_v23 = vpop.f32.mrf.mxu1  ;;  %v9285_v33 = vld [vmem:[%s12780_s1 + $0x90] sm:$0xff] }
 0x4ab   : > { %v9453_v27 = vpack.c.bf16 %v3391_v58, %v3389_v5  ;;  %v11642_v32 = vadd.f32 %v4133_v23, %v11429_v54  ;;  %5457 = vmatpush.bf16.msrb.mxu3 %v9285_v33  ;;  %v9193_v38 = vld [vmem:[%s9832_s25 + $0x274] sm:$0xf] }
 0x4ac   : > { %4172 = vmatmul.bf16.gmra.mxu1 %v11351_v6  ;;  %8354 = vmatmul.msk.bf16.gmra.mxu2 %vm543_vm0, %v8199_v10 }
 0x4ad   : > { %9677 = vst [vmem:[%s10423_s12 + $0xb8] sm:$0xff] %v9453_v27   ;;  %8136 = vmatmul.msk.bf16.vlgmr.msra.gmra.mxu3 %vm543_vm0, %v8079_v47  ;;  %v8204_v47 = vld [vmem:[%s9832_s25 + $0x278] sm:$0xf0]  ;;  %v8186_v27 = vld [vmem:[%s9832_s25 + $0x250] sm:$0xf] }
 0x4ae   : > { %v8207_v23 = vor.u32 %v9193_v38, %v8204_v47  ;;  %v8187_v16 = vor.u32 %v9190_v9, %v8186_v27  ;;  %v9289_v9 = vld [vmem:[%s12780_s1 + $0xb0] sm:$0xff] }
 0x4af   : > { %v3993_v6 = vpop.f32.mrf.mxu2  ;;  %5550 = vmatpush.bf16.msrb.mxu0 %v9289_v9 }
 0x4b0   : > { %v3393_v54 = vpop.f32.mrf.mxu3 }
 0x4b1   : > { %v3894_v42 = vpop.f32.mrf.mxu0  ;;  %v3394_v53 = vadd.f32 %v11398_v20, %v3393_v54 }
 0x4b2   : > { %v11656_v30 = vadd.f32 %v11598_v41, %v3894_v42  ;;  %v4135_v57 = vpop.f32.mrf.mxu1 }
 0x4b3   : > { %v11659_v43 = vadd.f32 %v4135_v57, %v11441_v28 }
 0x4b4   : > { %4625 = vmatmul.bf16.vlgmr.msra.gmra.mxu0 %v8179_v44 }
 0x4b7   : > { %v3995_v5 = vpop.f32.mrf.mxu2 }
 0x4b8   : > { %v3395_v15 = vpop.f32.mrf.mxu3 }
 0x4b9   : > { %v3396_v52 = vadd.f32 %v11398_v20, %v3395_v15  ;;  %v3896_v41 = vpop.f32.mrf.mxu0 }
 0x4ba   : > { %v11665_v3 = vadd.f32 %v3985_v39, %v3896_v41  ;;  %v4138_v17 = vpop.f32.mrf.mxu1  ;;  %v12829_v41 = vld [vmem:[#allocation19_spill] sm:$0xff] }
 0x4bb   : > { %v9458_v58 = vpack.c.bf16 %v3396_v52, %v3394_v53  ;;  %v11668_v28 = vadd.f32 %v4138_v17, %v11464_v46  ;;  %v9195_v53 = vld [vmem:[%s9832_s25 + $0x284] sm:$0xf]  ;;  %v9192_v17 = vld [vmem:[%s9832_s25 + $0x264] sm:$0xf0] }
 0x4bc   : > { %4177 = vmatmul.bf16.gmra.mxu1 %v11382_v21  ;;  %8355 = vmatmul.msk.bf16.gmra.mxu2 %vm543_vm0, %v8207_v23 }
 0x4bd   : > { %9678 = vst [vmem:[%s10423_s12 + $0xc0] sm:$0xff] %v9458_v58   ;;  %8137 = vmatmul.msk.bf16.gmra.mxu3 %vm543_vm0, %v8087_v25  ;;  %v8194_v25 = vld [vmem:[%s9832_s25 + $0x260] sm:$0xf] }
 0x4be   : > { %v8195_v58 = vor.u32 %v9192_v17, %v8194_v25 }
 0x4bf   : > { %v3998_v55 = vpop.f32.mrf.mxu2 }
 0x4c0   : > { %v3398_v39 = vpop.f32.mrf.mxu3 }
 0x4c1   : > { %v3899_v10 = vpop.f32.mrf.mxu0  ;;  %v3399_v54 = vadd.f32 %v11398_v20, %v3398_v39 }
 0x4c2   : > { %v11678_v11 = vadd.f32 %v3988_v63, %v3899_v10  ;;  %v4140_v46 = vpop.f32.mrf.mxu1 }
 0x4c3   : > { %v11681_v33 = vadd.f32 %v4140_v46, %v11479_v48  ;;  %v8212_v48 = vld [vmem:[%s9832_s25 + $0x288] sm:$0xf0] }
 0x4c4   : > { %4630 = vmatmul.bf16.gmra.mxu0 %v8187_v16  ;;  %v8215_v52 = vor.u32 %v9195_v53, %v8212_v48  ;;  %v12830_v53 = vld [vmem:[#allocation20_spill] sm:$0xff] }
 0x4c5   : > { %v8202_v48 = vld [vmem:[%s9832_s25 + $0x270] sm:$0xf] }
 0x4c7   : > { %v4000_v63 = vpop.f32.mrf.mxu2 }
 0x4c8   : > { %v3400_v21 = vpop.f32.mrf.mxu3 }
 0x4c9   : > { %v3401_v44 = vadd.f32 %v11398_v20, %v3400_v21  ;;  %v3901_v42 = vpop.f32.mrf.mxu0 }
 0x4ca   : > { %v11685_v57 = vadd.f32 %v3990_v35, %v3901_v42  ;;  %v4143_v4 = vpop.f32.mrf.mxu1  ;;  %v9284_v35 = vld [vmem:[%s12780_s1 + $0x88] sm:$0xff]  ;;  %v9197_v42 = vld [vmem:[%s9832_s25 + $0x294] sm:$0xf] }
 0x4cb   : > { %v9463_v50 = vpack.c.bf16 %v3401_v44, %v3399_v54  ;;  %v11688_v15 = vadd.f32 %v4143_v4, %v11499_v37  ;;  %5458 = vmatpush.bf16.msrb.mxu3 %v9284_v35  ;;  %v8220_v4 = vld [vmem:[%s9832_s25 + $0x298] sm:$0xf0] }
 0x4cc   : > { %4182 = vmatmul.bf16.gmra.mxu1 %v11422_v7  ;;  %8356 = vmatmul.msk.bf16.gmra.mxu2 %vm543_vm0, %v8215_v52  ;;  %v9194_v52 = vld [vmem:[%s9832_s25 + $0x274] sm:$0xf0] }
 0x4cd   : > { %9679 = vst [vmem:[%s10423_s12 + $0xc8] sm:$0xff] %v9463_v50   ;;  %8138 = vmatmul.msk.bf16.gmra.mxu3 %vm543_vm0, %v12829_v41  ;;  %v8223_v50 = vor.u32 %v9197_v42, %v8220_v4  ;;  %v8203_v41 = vor.u32 %v9194_v52, %v8202_v48  ;;  %v9196_v42 = vld [vmem:[%s9832_s25 + $0x284] sm:$0xf0] }
 0x4cf   : > { %v4003_v7 = vpop.f32.mrf.mxu2 }
 0x4d0   : > { %v3403_v37 = vpop.f32.mrf.mxu3 }
 0x4d1   : > { %v3904_v38 = vpop.f32.mrf.mxu0 }
 0x4d2   : > { %v11702_v47 = vadd.f32 %v3993_v6, %v3904_v38  ;;  %v4145_v23 = vpop.f32.mrf.mxu1  ;;  %v3404_v6 = vadd.f32 %v11398_v20, %v3403_v37 }
 0x4d3   : > { %v11705_v27 = vadd.f32 %v4145_v23, %v11511_v51 }
 0x4d4   : > { %4635 = vmatmul.bf16.gmra.mxu0 %v8195_v58 }
 0x4d7   : > { %v4005_v51 = vpop.f32.mrf.mxu2 }
 0x4d8   : > { %v3405_v39 = vpop.f32.mrf.mxu3 }
 0x4d9   : > { %v3406_v16 = vadd.f32 %v11398_v20, %v3405_v39  ;;  %v3906_v10 = vpop.f32.mrf.mxu0 }
 0x4da   : > { %v11712_v46 = vadd.f32 %v3995_v5, %v3906_v10  ;;  %v4148_v21 = vpop.f32.mrf.mxu1  ;;  %v8228_v10 = vld [vmem:[%s9832_s25 + $0x2a8] sm:$0xf0] }
 0x4db   : > { %v9468_v54 = vpack.c.bf16 %v3406_v16, %v3404_v6  ;;  %v11715_v44 = vadd.f32 %v4148_v21, %v11528_v29  ;;  %v9199_v16 = vld [vmem:[%s9832_s25 + $0x2a4] sm:$0xf] }
 0x4dc   : > { %4187 = vmatmul.bf16.gmra.mxu1 %v11457_v49  ;;  %8357 = vmatmul.msk.bf16.gmra.mxu2 %vm543_vm0, %v8223_v50  ;;  %v8231_v21 = vor.u32 %v9199_v16, %v8228_v10  ;;  %v8218_v16 = vld [vmem:[%s9832_s25 + $0x290] sm:$0xf]  ;;  %v9198_v10 = vld [vmem:[%s9832_s25 + $0x294] sm:$0xf0] }
 0x4dd   : > { %9680 = vst [vmem:[%s10423_s12 + $0xd0] sm:$0xff] %v9468_v54   ;;  %8139 = vmatmul.msk.bf16.gmra.mxu3 %vm543_vm0, %v12830_v53  ;;  %v8210_v54 = vld [vmem:[%s9832_s25 + $0x280] sm:$0xf] }
 0x4de   : > { %v8211_v4 = vor.u32 %v9196_v42, %v8210_v54 }
 0x4df   : > { %v4008_v35 = vpop.f32.mrf.mxu2 }
 0x4e0   : > { %v3408_v5 = vpop.f32.mrf.mxu3 }
 0x4e1   : > { %v3909_v25 = vpop.f32.mrf.mxu0  ;;  %v3409_v37 = vadd.f32 %v11398_v20, %v3408_v5 }
 0x4e2   : > { %v11726_v29 = vadd.f32 %v3998_v55, %v3909_v25  ;;  %v11728_v17 = vpop.f32.mrf.mxu1 }
 0x4e4   : > { %4640 = vmatmul.bf16.gmra.mxu0 %v8203_v41 }
 0x4e7   : > { %v4010_v39 = vpop.f32.mrf.mxu2 }
 0x4e8   : > { %v3410_v49 = vpop.f32.mrf.mxu3 }
 0x4e9   : > { %v3411_v58 = vadd.f32 %v11398_v20, %v3410_v49  ;;  %v3911_v38 = vpop.f32.mrf.mxu0 }
 0x4ea   : > { %v11732_v23 = vadd.f32 %v4000_v63, %v3911_v38  ;;  %v4153_v9 = vpop.f32.mrf.mxu1  ;;  %v9283_v63 = vld [vmem:[%s12780_s1 + $0x80] sm:$0xff]  ;;  %v9201_v38 = vld [vmem:[%s9832_s25 + $0x2b4] sm:$0xf] }
 0x4eb   : > { %v9473_v6 = vpack.c.bf16 %v3411_v58, %v3409_v37  ;;  %v11735_v55 = vadd.f32 %v4153_v9, %v11563_v34  ;;  %5459 = vmatpush.bf16.msrb.mxu3 %v9283_v63  ;;  %v8236_v9 = vld [vmem:[%s9832_s25 + $0x2b8] sm:$0xf0] }
 0x4ec   : > { %4192 = vmatmul.bf16.gmra.mxu1 %v11495_v31  ;;  %8358 = vmatmul.msk.bf16.gmra.mxu2 %vm543_vm0, %v8231_v21  ;;  %v8219_v21 = vor.u32 %v9198_v10, %v8218_v16 }
 0x4ed   : > { %9681 = vst [vmem:[%s10423_s12 + $0xd8] sm:$0xff] %v9473_v6   ;;  %8140 = vmatmul.msk.bf16.gmra.mxu3 %vm543_vm0, %v11063_v14  ;;  %v8239_v6 = vor.u32 %v9201_v38, %v8236_v9  ;;  %v8226_v38 = vld [vmem:[%s9832_s25 + $0x2a0] sm:$0xf]  ;;  %v9200_v9 = vld [vmem:[%s9832_s25 + $0x2a4] sm:$0xf0] }
 0x4ef   : > { %v4013_v14 = vpop.f32.mrf.mxu2 }
 0x4f0   : > { %v3413_v34 = vpop.f32.mrf.mxu3 }
 0x4f1   : > { %v3914_v50 = vpop.f32.mrf.mxu0  ;;  %v3414_v52 = vadd.f32 %v11398_v20, %v3413_v34 }
 0x4f2   : > { %v11749_v53 = vadd.f32 %v4003_v7, %v3914_v50  ;;  %v11751_v31 = vpop.f32.mrf.mxu1 }
 0x4f4   : > { %4645 = vmatmul.bf16.gmra.mxu0 %v8211_v4 }
 0x4f7   : > { %v4015_v37 = vpop.f32.mrf.mxu2 }
 0x4f8   : > { %v3415_v48 = vpop.f32.mrf.mxu3 }
 0x4f9   : > { %v3416_v5 = vadd.f32 %v11398_v20, %v3415_v48  ;;  %v3916_v41 = vpop.f32.mrf.mxu0 }
 0x4fa   : > { %v11755_v25 = vadd.f32 %v4005_v51, %v3916_v41  ;;  %v4158_v49 = vpop.f32.mrf.mxu1  ;;  %v9203_v41 = vld [vmem:[%s9832_s25 + $0x2c4] sm:$0xf] }
 0x4fb   : > { %v9478_v58 = vpack.c.bf16 %v3416_v5, %v3414_v52  ;;  %v11758_v7 = vadd.f32 %v4158_v49, %v11596_v18  ;;  %v8244_v49 = vld [vmem:[%s9832_s25 + $0x2c8] sm:$0xf0] }
 0x4fc   : > { %4197 = vmatmul.bf16.gmra.mxu1 %v11524_v26  ;;  %8359 = vmatmul.msk.bf16.gmra.mxu2 %vm543_vm0, %v8239_v6  ;;  %v8227_v6 = vor.u32 %v9200_v9, %v8226_v38  ;;  %v8234_v38 = vld [vmem:[%s9832_s25 + $0x2b0] sm:$0xf]  ;;  %v9202_v9 = vld [vmem:[%s9832_s25 + $0x2b4] sm:$0xf0] }
 0x4fd   : > { %9682 = vst [vmem:[%s10423_s12 + $0xe0] sm:$0xff] %v9478_v58   ;;  %8141 = vmatmul.msk.bf16.gmra.mxu3 %vm543_vm0, %v11102_v0  ;;  %v8247_v58 = vor.u32 %v9203_v41, %v8244_v49  ;;  %v9205_v41 = vld [vmem:[%s9832_s25 + $0x2d4] sm:$0xf]  ;;  %v8252_v49 = vld [vmem:[%s9832_s25 + $0x2d8] sm:$0xf0] }
 0x4ff   : > { %v4018_v63 = vpop.f32.mrf.mxu2 }
 0x500   : > { %v3418_v51 = vpop.f32.mrf.mxu3 }
 0x501   : > { %v3919_v54 = vpop.f32.mrf.mxu0  ;;  %v3419_v0 = vadd.f32 %v11398_v20, %v3418_v51 }
 0x502   : > { %v11769_v18 = vadd.f32 %v4008_v35, %v3919_v54  ;;  %v11771_v42 = vpop.f32.mrf.mxu1 }
 0x504   : > { %4650 = vmatmul.bf16.gmra.mxu0 %v8219_v21  ;;  %v9288_v21 = vld [vmem:[%s12780_s1 + $0xa8] sm:$0xff] }
 0x505   : > { %5551 = vmatpush.bf16.msrb.mxu0 %v9288_v21 }
 0x507   : > { %v4020_v52 = vpop.f32.mrf.mxu2 }
 0x508   : > { %v3420_v26 = vpop.f32.mrf.mxu3 }
 0x509   : > { %v3421_v34 = vadd.f32 %v11398_v20, %v3420_v26  ;;  %v3921_v4 = vpop.f32.mrf.mxu0 }
 0x50a   : > { %v11775_v50 = vadd.f32 %v4010_v39, %v3921_v4  ;;  %v4163_v48 = vpop.f32.mrf.mxu1  ;;  %v9282_v39 = vld [vmem:[%s12780_s1 + $0x78] sm:$0xff] }
 0x50b   : > { %v9483_v5 = vpack.c.bf16 %v3421_v34, %v3419_v0  ;;  %v11778_v35 = vadd.f32 %v4163_v48, %v11629_v8  ;;  %5460 = vmatpush.bf16.msrb.mxu3 %v9282_v39  ;;  %v8235_v39 = vor.u32 %v9202_v9, %v8234_v38  ;;  %v12832_v9 = vld [vmem:[#allocation2_spill] sm:$0xff] }
 0x50c   : > { %4202 = vmatmul.bf16.gmra.mxu1 %v11559_v12  ;;  %8360 = vmatmul.msk.bf16.gmra.mxu2 %vm543_vm0, %v8247_v58  ;;  %v8255_v58 = vor.u32 %v9205_v41, %v8252_v49  ;;  %v9207_v49 = vld [vmem:[%s9832_s25 + $0x2e4] sm:$0xf] }
 0x50d   : > { %9683 = vst [vmem:[%s10423_s12 + $0xe8] sm:$0xff] %v9483_v5   ;;  %8142 = vmatmul.msk.bf16.gmra.mxu3 %vm543_vm0, %v11135_v62 }
 0x50f   : > { %v4715_v51 = vpop.f32.mrf.mxu2 }
 0x510   : > { %v3423_v8 = vpop.f32.mrf.mxu3 }
 0x511   : > { %v3924_v16 = vpop.f32.mrf.mxu0  ;;  %v3424_v54 = vadd.f32 %v11398_v20, %v3423_v8 }
 0x512   : > { %v11792_v10 = vadd.f32 %v4013_v14, %v3924_v16  ;;  %v11794_v12 = vpop.f32.mrf.mxu1 }
 0x514   : > { %4655 = vmatmul.bf16.gmra.mxu0 %v8227_v6 }
 0x517   : > { %v4717_v4 = vpop.f32.mrf.mxu2 }
 0x518   : > { %v3425_v62 = vpop.f32.mrf.mxu3 }
 0x519   : > { %v3426_v26 = vadd.f32 %v11398_v20, %v3425_v62  ;;  %v3926_v0 = vpop.f32.mrf.mxu0 }
 0x51a   : > { %v11801_v14 = vadd.f32 %v4015_v37, %v3926_v0  ;;  %v4168_v34 = vpop.f32.mrf.mxu1 }
 0x51b   : > { %v9488_v48 = vpack.c.bf16 %v3426_v26, %v3424_v54  ;;  %v11804_v5 = vadd.f32 %v4168_v34, %v11656_v30 }
 0x51c   : > { %8361 = vmatmul.msk.bf16.gmra.mxu2 %vm543_vm0, %v8255_v58  ;;  %v8260_v58 = vld [vmem:[%s9832_s25 + $0x2e8] sm:$0xf0] }
 0x51d   : > { %9684 = vst [vmem:[%s10423_s12 + $0xf0] sm:$0xff] %v9488_v48   ;;  %8143 = vmatmul.msk.bf16.gmra.mxu3 %vm543_vm0, %v11177_v40  ;;  %v9270_v40 = vld [vmem:[%s12780_s1 + $0x38] sm:$0xff]  ;;  %v8263_v38 = vor.u32 %v9207_v49, %v8260_v58 }
 0x51e   : > { %5730 = vmatpush.bf16.msrb.mxu2 %v9270_v40 }
 0x51f   : > { %v4720_v16 = vpop.f32.mrf.mxu2 }
 0x520   : > { %v3428_v37 = vpop.f32.mrf.mxu3 }
 0x521   : > { %v3929_v8 = vpop.f32.mrf.mxu0  ;;  %v3429_v21 = vadd.f32 %v11398_v20, %v3428_v37  ;;  %v8242_v37 = vld [vmem:[%s9832_s25 + $0x2c0] sm:$0xf] }
 0x522   : > { %v11814_v6 = vadd.f32 %v4018_v63, %v3929_v8  ;;  %v11816_v30 = vpop.f32.mrf.mxu1  ;;  %v9281_v8 = vld [vmem:[%s12780_s1 + $0x70] sm:$0xff] }
 0x523   : > { %5461 = vmatpush.bf16.msrb.mxu3 %v9281_v8  ;;  %v8268_v8 = vld [vmem:[%s9832_s25 + $0x2f8] sm:$0xf0] }
 0x524   : > { %4660 = vmatmul.bf16.gmra.mxu0 %v8235_v39  ;;  %v9204_v39 = vld [vmem:[%s9832_s25 + $0x2c4] sm:$0xf0] }
 0x527   : > { %v4722_v34 = vpop.f32.mrf.mxu2 }
 0x528   : > { %v3430_v62 = vpop.f32.mrf.mxu3 }
 0x529   : > { %v3431_v54 = vadd.f32 %v11398_v20, %v3430_v62  ;;  %v3931_v26 = vpop.f32.mrf.mxu0 }
 0x52a   : > { %v11823_v63 = vadd.f32 %v4020_v52, %v3931_v26  ;;  %v4173_v0 = vpop.f32.mrf.mxu1  ;;  %v8243_v52 = vor.u32 %v9204_v39, %v8242_v37  ;;  %v9209_v39 = vld [vmem:[%s9832_s25 + $0x2f4] sm:$0xf] }
 0x52b   : > { %v9493_v48 = vpack.c.bf16 %v3431_v54, %v3429_v21  ;;  %v11826_v41 = vadd.f32 %v4173_v0, %v11678_v11 }
 0x52c   : > { %12831 = vst [vmem:[#allocation12_spill] sm:$0xff] %v11823_v63  ;;  %8362 = vmatmul.msk.bf16.gmra.mxu2 %vm543_vm0, %v8263_v38 }
 0x52d   : > { %9685 = vst [vmem:[%s10423_s12 + $0xf8] sm:$0xff] %v9493_v48   ;;  %8144 = vmatmul.msk.bf16.gmra.mxu3 %vm543_vm0, %v12832_v9 }
 0x52f   : > { %v11841_v40 = vpop.f32.mrf.mxu2 }
 0x530   : > { %v4217_v20 = vpop.f32.mrf.mxu3 }
 0x531   : > { %v4626_v11 = vpop.f32.mrf.mxu0  ;;  %v4218_v21 = vadd.f32 %v4217_v20, %v11618_v24  ;;  %v8271_v20 = vor.u32 %v9209_v39, %v8268_v8 }
 0x532   : > { %v11839_v62 = vpop.f32.mrf.mxu1  ;;  %v4716_v54 = vadd.f32 %v4715_v51, %v4626_v11  ;;  %v8250_v11 = vld [vmem:[%s9832_s25 + $0x2d0] sm:$0xf] }
 0x534   : > { %4665 = vmatmul.bf16.gmra.mxu0 %v8243_v52  ;;  %v4795_v26 = vadd.f32 %v4716_v54, %v4218_v21  ;;  %v12833_v52 = vld [vmem:[#allocation8_spill] sm:$0xff]  ;;  %v9206_v21 = vld [vmem:[%s9832_s25 + $0x2d4] sm:$0xf0] }
 0x536   : > { %v4827_v24 = vadd.f32 %v11607_v22, %v4795_v26 }
 0x537   : > { %v11845_v9 = vpop.f32.mrf.mxu2 }
 0x538   : > { %v4219_v0 = vpop.f32.mrf.mxu3 }
 0x539   : > { %v4220_v48 = vadd.f32 %v4219_v0, %v11632_v45  ;;  %v4628_v49 = vpop.f32.mrf.mxu0 }
 0x53a   : > { %v4718_v58 = vadd.f32 %v4717_v4, %v4628_v49  ;;  %v4178_v38 = vpop.f32.mrf.mxu1  ;;  %v4859_v4 = vmax.f32 %v4827_v24, 0.0  ;;  %v9269_v24 = vld [vmem:[%s12780_s1 + $0x30] sm:$0xff] }
 0x53b   : > { %v11848_v37 = vadd.f32 %v4178_v38, %v11702_v47  ;;  %v8251_v47 = vor.u32 %v9206_v21, %v8250_v11  ;;  %5731 = vmatpush.bf16.msrb.mxu2 %v9269_v24 }
 0x53c   : > { %v4796_v51 = vadd.f32 %v4718_v58, %v4220_v48  ;;  %8363 = vmatmul.msk.bf16.gmra.mxu2 %vm543_vm0, %v8271_v20 }
 0x53d   : > { %8145 = vmatmul.msk.bf16.gmra.mxu3 %vm543_vm0, %v12833_v52 }
 0x53e   : > { %v4828_v45 = vadd.f32 %v11607_v22, %v4796_v51 }
 0x53f   : > { %v11861_v26 = vpop.f32.mrf.mxu2 }
 0x540   : > { %v4860_v54 = vmax.f32 %v4828_v45, 0.0  ;;  %v4222_v0 = vpop.f32.mrf.mxu3  ;;  %v8276_v45 = vld [vmem:[%s9832_s25 + $0x308] sm:$0xf0] }
 0x541   : > { %v4631_v49 = vpop.f32.mrf.mxu0  ;;  %v4223_v48 = vadd.f32 %v4222_v0, %v11642_v32 }
 0x542   : > { %v4891_v38 = vpack.c.bf16 %v4860_v54, %v4859_v4  ;;  %v11859_v63 = vpop.f32.mrf.mxu1  ;;  %v4721_v58 = vadd.f32 %v4720_v16, %v4631_v49  ;;  %v9211_v16 = vld [vmem:[%s9832_s25 + $0x304] sm:$0xf] }
 0x543   : > { %v8279_v0 = vor.u32 %v9211_v16, %v8276_v45  ;;  %v9287_v16 = vld [vmem:[%s12780_s1 + $0xa0] sm:$0xff] }
 0x544   : > { %4670 = vmatmul.bf16.gmra.mxu0 %v8251_v47  ;;  %8368 = vmatmul.msk.bf16.vlgmr.msrb.gmra.mxu1 %vm543_vm0, %v4891_v38  ;;  %v4797_v39 = vadd.f32 %v4721_v58, %v4223_v48  ;;  %v8258_v47 = vld [vmem:[%s9832_s25 + $0x2e0] sm:$0xf]  ;;  %v9280_v58 = vld [vmem:[%s12780_s1 + $0x68] sm:$0xff] }
 0x545   : > { %5462 = vmatpush.bf16.msrb.mxu3 %v9280_v58  ;;  %5552 = vmatpush.bf16.msrb.mxu0 %v9287_v16 }
 0x546   : > { %v4829_v4 = vadd.f32 %v11607_v22, %v4797_v39 }
 0x547   : > { %v11869_v21 = vpop.f32.mrf.mxu2 }
 0x548   : > { %v4224_v8 = vpop.f32.mrf.mxu3  ;;  %v4861_v49 = vmax.f32 %v4829_v4, 0.0 }
 0x549   : > { %v4225_v51 = vadd.f32 %v4224_v8, %v11659_v43  ;;  %v4633_v20 = vpop.f32.mrf.mxu0  ;;  %v9208_v43 = vld [vmem:[%s9832_s25 + $0x2e4] sm:$0xf0] }
 0x54a   : > { %v4723_v52 = vadd.f32 %v4722_v34, %v4633_v20  ;;  %v4183_v11 = vpop.f32.mrf.mxu1 }
 0x54b   : > { %v11872_v32 = vadd.f32 %v4183_v11, %v11726_v29  ;;  %v8259_v29 = vor.u32 %v9208_v43, %v8258_v47  ;;  %v9213_v47 = vld [vmem:[%s9832_s25 + $0x314] sm:$0xf]  ;;  %v8284_v43 = vld [vmem:[%s9832_s25 + $0x318] sm:$0xf0] }
 0x54c   : > { %v4798_v54 = vadd.f32 %v4723_v52, %v4225_v51  ;;  %8364 = vmatmul.msk.bf16.gmra.mxu2 %vm543_vm0, %v8279_v0 }
 0x54d   : > { %8146 = vmatmul.msk.bf16.gmra.mxu3 %vm543_vm0, %v11304_v13 }
 0x54e   : > { %v4830_v34 = vadd.f32 %v11607_v22, %v4798_v54 }
 0x54f   : > { %v11888_v13 = vpop.f32.mrf.mxu2 }
 0x550   : > { %v4862_v38 = vmax.f32 %v4830_v34, 0.0  ;;  %v4227_v48 = vpop.f32.mrf.mxu3 }
 0x551   : > { %v4636_v39 = vpop.f32.mrf.mxu0  ;;  %v4228_v51 = vadd.f32 %v4227_v48, %v11668_v28  ;;  %v12834_v48 = vld [vmem:[#allocation9_spill] sm:$0xff] }
 0x552   : > { %v11886_v8 = vpop.f32.mrf.mxu1  ;;  %v4892_v24 = vpack.c.bf16 %v4862_v38, %v4861_v49  ;;  %v4726_v20 = vadd.f32 %v11841_v40, %v4636_v39  ;;  %v8287_v38 = vor.u32 %v9213_v47, %v8284_v43 }
 0x554   : > { %4675 = vmatmul.bf16.gmra.mxu0 %v8259_v29  ;;  %8369 = vmatmul.msk.bf16.gmra.mxu1 %vm543_vm0, %v4892_v24  ;;  %v4799_v52 = vadd.f32 %v4726_v20, %v4228_v51  ;;  %v9210_v29 = vld [vmem:[%s9832_s25 + $0x2f4] sm:$0xf0] }
 0x556   : > { %v4831_v34 = vadd.f32 %v11607_v22, %v4799_v52 }
 0x557   : > { %v11898_v28 = vpop.f32.mrf.mxu2 }
 0x558   : > { %v4229_v11 = vpop.f32.mrf.mxu3  ;;  %v4863_v58 = vmax.f32 %v4831_v34, 0.0 }
 0x559   : > { %v4230_v45 = vadd.f32 %v4229_v11, %v11681_v33  ;;  %v4638_v4 = vpop.f32.mrf.mxu0  ;;  %v8266_v33 = vld [vmem:[%s9832_s25 + $0x2f0] sm:$0xf] }
 0x55a   : > { %v4728_v54 = vadd.f32 %v11845_v9, %v4638_v4  ;;  %v4188_v0 = vpop.f32.mrf.mxu1 }
 0x55b   : > { %v11901_v40 = vadd.f32 %v4188_v0, %v11749_v53  ;;  %v8267_v53 = vor.u32 %v9210_v29, %v8266_v33  ;;  %v9268_v0 = vld [vmem:[%s12780_s1 + $0x28] sm:$0xff] }
 0x55c   : > { %v4800_v49 = vadd.f32 %v4728_v54, %v4230_v45  ;;  %8365 = vmatmul.msk.bf16.gmra.mxu2 %vm543_vm0, %v8287_v38  ;;  %v9215_v38 = vld [vmem:[%s9832_s25 + $0x324] sm:$0xf] }
 0x55d   : > { %8147 = vmatmul.msk.bf16.gmra.mxu3 %vm543_vm0, %v12834_v48  ;;  %5732 = vmatpush.bf16.msrb.mxu2 %v9268_v0  ;;  %v8292_v48 = vld [vmem:[%s9832_s25 + $0x328] sm:$0xf0]  ;;  %v4151_v0 = vadd.f32 %v11728_v17, %v11543_v36  ;;  %v8300_v36 = vld [vmem:[%s9832_s25 + $0x338] sm:$0xf0] }
 0x55e   : > { %v4832_v9 = vadd.f32 %v11607_v22, %v4800_v49 }
 0x55f   : > { %v11914_v52 = vpop.f32.mrf.mxu2 }
 0x560   : > { %v4864_v39 = vmax.f32 %v4832_v9, 0.0  ;;  %v4232_v24 = vpop.f32.mrf.mxu3  ;;  %v8295_v9 = vor.u32 %v9215_v38, %v8292_v48 }
 0x561   : > { %v4641_v51 = vpop.f32.mrf.mxu0  ;;  %v4233_v16 = vadd.f32 %v4232_v24, %v11688_v15 }
 0x562   : > { %v11912_v20 = vpop.f32.mrf.mxu1  ;;  %v4893_v11 = vpack.c.bf16 %v4864_v39, %v4863_v58  ;;  %v4731_v45 = vadd.f32 %v11861_v26, %v4641_v51  ;;  %v9212_v58 = vld [vmem:[%s9832_s25 + $0x304] sm:$0xf0]  ;;  %v9279_v51 = vld [vmem:[%s12780_s1 + $0x60] sm:$0xff] }
 0x563   : > { %5463 = vmatpush.bf16.msrb.mxu3 %v9279_v51 }
 0x564   : > { %4680 = vmatmul.bf16.gmra.mxu0 %v8267_v53  ;;  %8370 = vmatmul.msk.bf16.gmra.mxu1 %vm543_vm0, %v4893_v11  ;;  %v4801_v4 = vadd.f32 %v4731_v45, %v4233_v16 }
 0x566   : > { %v4833_v33 = vadd.f32 %v11607_v22, %v4801_v4 }
 0x567   : > { %v11924_v15 = vpop.f32.mrf.mxu2 }
 0x568   : > { %v4234_v54 = vpop.f32.mrf.mxu3  ;;  %v4865_v39 = vmax.f32 %v4833_v33, 0.0 }
 0x569   : > { %v4235_v47 = vadd.f32 %v4234_v54, %v11705_v27  ;;  %v4643_v43 = vpop.f32.mrf.mxu0  ;;  %v8274_v27 = vld [vmem:[%s9832_s25 + $0x300] sm:$0xf] }
 0x56a   : > { %v4733_v34 = vadd.f32 %v11869_v21, %v4643_v43  ;;  %v4193_v49 = vpop.f32.mrf.mxu1 }
 0x56b   : > { %v11927_v26 = vadd.f32 %v4193_v49, %v11769_v18  ;;  %v8275_v18 = vor.u32 %v9212_v58, %v8274_v27  ;;  %v9214_v58 = vld [vmem:[%s9832_s25 + $0x314] sm:$0xf0] }
 0x56c   : > { %v4802_v29 = vadd.f32 %v4733_v34, %v4235_v47  ;;  %8366 = vmatmul.msk.bf16.gmra.mxu2 %vm543_vm0, %v8295_v9 }
 0x56d   : > { %8148 = vmatmul.msk.bf16.gmra.mxu3 %vm543_vm0, %v11374_v61 }
 0x56e   : > { %v4834_v21 = vadd.f32 %v11607_v22, %v4802_v29  ;;  %v9217_v29 = vld [vmem:[%s9832_s25 + $0x334] sm:$0xf] }
 0x56f   : > { %v11943_v61 = vpop.f32.mrf.mxu2  ;;  %v8303_v27 = vor.u32 %v9217_v29, %v8300_v36 }
 0x570   : > { %v4866_v24 = vmax.f32 %v4834_v21, 0.0  ;;  %v4237_v53 = vpop.f32.mrf.mxu3 }
 0x571   : > { %v4646_v11 = vpop.f32.mrf.mxu0  ;;  %v4238_v4 = vadd.f32 %v4237_v53, %v11715_v44 }
 0x572   : > { %v11941_v16 = vpop.f32.mrf.mxu1  ;;  %v4894_v45 = vpack.c.bf16 %v4866_v24, %v4865_v39  ;;  %v4736_v54 = vadd.f32 %v11888_v13, %v4646_v11  ;;  %v9267_v13 = vld [vmem:[%s12780_s1 + $0x20] sm:$0xff] }
 0x573   : > { %5733 = vmatpush.bf16.msrb.mxu2 %v9267_v13 }
 0x574   : > { %4685 = vmatmul.bf16.gmra.mxu0 %v8275_v18  ;;  %8371 = vmatmul.msk.bf16.gmra.mxu1 %vm543_vm0, %v4894_v45  ;;  %v4803_v47 = vadd.f32 %v4736_v54, %v4238_v4  ;;  %v9265_v4 = vld [vmem:[%s12780_s1 + $0x10] sm:$0xff] }
 0x576   : > { %v4835_v17 = vadd.f32 %v11607_v22, %v4803_v47  ;;  %v4156_v47 = vadd.f32 %v11751_v31, %v11578_v2  ;;  %v9263_v2 = vld [vmem:[%s12780_s1] sm:$0xff] }
 0x577   : > { %v11951_v33 = vpop.f32.mrf.mxu2 }
 0x578   : > { %v4239_v43 = vpop.f32.mrf.mxu3  ;;  %v4867_v39 = vmax.f32 %v4835_v17, 0.0  ;;  %v8290_v17 = vld [vmem:[%s9832_s25 + $0x320] sm:$0xf] }
 0x579   : > { %v4240_v34 = vadd.f32 %v4239_v43, %v4151_v0  ;;  %v4648_v49 = vpop.f32.mrf.mxu0  ;;  %v9264_v43 = vld [vmem:[%s12780_s1 + $0x8] sm:$0xff] }
 0x57a   : > { %v4738_v38 = vadd.f32 %v11898_v28, %v4648_v49  ;;  %v4198_v48 = vpop.f32.mrf.mxu1  ;;  %v8282_v28 = vld [vmem:[%s9832_s25 + $0x310] sm:$0xf] }
 0x57b   : > { %v11954_v44 = vadd.f32 %v4198_v48, %v11792_v10  ;;  %v9266_v10 = vld [vmem:[%s12780_s1 + $0x18] sm:$0xff]  ;;  %v8283_v18 = vor.u32 %v9214_v58, %v8282_v28 }
 0x57c   : > { %v4804_v9 = vadd.f32 %v4738_v38, %v4240_v34  ;;  %8367 = vmatmul.msk.bf16.gmra.mxu2 %vm543_vm0, %v8303_v27  ;;  %v9232_v27 = vld [vmem:[%s9832_s25 + $0x304] sm:$0xf0] }
 0x57d   : > { %8149 = vmatmul.msk.bf16.gmra.mxu3 %vm543_vm0, %v11412_v60  ;;  %5734 = vmatpush.bf16.msrb.mxu2 %v9266_v10 }
 0x57e   : > { %v4836_v21 = vadd.f32 %v11607_v22, %v4804_v9  ;;  %v9216_v9 = vld [vmem:[%s9832_s25 + $0x324] sm:$0xf0] }
 0x57f   : > { %v11973_v45 = vpop.f32.mrf.mxu2 }
 0x580   : > { %v4868_v24 = vmax.f32 %v4836_v21, 0.0  ;;  %v4242_v53 = vpop.f32.mrf.mxu3 }
 0x581   : > { %v4651_v51 = vpop.f32.mrf.mxu0  ;;  %v4243_v54 = vadd.f32 %v4242_v53, %v11735_v55  ;;  %5735 = vmatpush.bf16.msrb.mxu2 %v9265_v4 }
 0x582   : > { %v11971_v11 = vpop.f32.mrf.mxu1  ;;  %v4895_v60 = vpack.c.bf16 %v4868_v24, %v4867_v39  ;;  %v4741_v0 = vadd.f32 %v11914_v52, %v4651_v51  ;;  %v8291_v24 = vor.u32 %v9216_v9, %v8290_v17 }
 0x584   : > { %4690 = vmatmul.bf16.gmra.mxu0 %v8283_v18  ;;  %8372 = vmatmul.msk.bf16.gmra.mxu1 %vm543_vm0, %v4895_v60  ;;  %v4805_v34 = vadd.f32 %v4741_v0, %v4243_v54  ;;  %v9738_v60 = vld [vmem:[%s12782_s3 + $0x10] sm:$0xff]  ;;  %v9739_v0 = vld [vmem:[%s12782_s3 + $0x8] sm:$0xff] }
 0x585   : > { %5736 = vmatpush.bf16.msrb.mxu2 %v9264_v43 }
 0x586   : > { %v4837_v31 = vadd.f32 %v11607_v22, %v4805_v34 }
 0x587   : > { %v11987_v13 = vpop.f32.mrf.mxu2 }
 0x588   : > { %v4244_v49 = vpop.f32.mrf.mxu3  ;;  %v4869_v21 = vmax.f32 %v4837_v31, 0.0  ;;  %v9218_v31 = vld [vmem:[%s9832_s25 + $0x334] sm:$0xf0] }
 0x589   : > { %v4245_v55 = vadd.f32 %v4244_v49, %v4156_v47  ;;  %v4653_v38 = vpop.f32.mrf.mxu0  ;;  %5737 = vmatpush.bf16.msrb.mxu2 %v9263_v2  ;;  %v4161_v47 = vadd.f32 %v11771_v42, %v11615_v56  ;;  %v9740_v42 = vld [vmem:[%s12782_s3] sm:$0xff]  ;;  %v8298_v2 = vld [vmem:[%s9832_s25 + $0x330] sm:$0xf] }
 0x58a   : > { %v4743_v52 = vadd.f32 %v11924_v15, %v4653_v38  ;;  %v4203_v48 = vpop.f32.mrf.mxu1  ;;  %v8602_v15 = vld [vmem:[%s9832_s25 + $0x300] sm:$0xf] }
 0x58b   : > { %v11990_v29 = vadd.f32 %v4203_v48, %v11814_v6  ;;  %v8603_v58 = vor.u32 %v9232_v27, %v8602_v15  ;;  %v9737_v6 = vld [vmem:[%s12782_s3 + $0x18] sm:$0xff] }
 0x58c   : > { %v4806_v36 = vadd.f32 %v4743_v52, %v4245_v55 }
 0x58d   : > { %8150 = vmatmul.msk.bf16.gmra.mxu3 %vm543_vm0, %v11447_v1  ;;  %6570 = vmatpush.bf16.msra.mxu2 %v9737_v6  ;;  %v9330_v1 = vld [vmem:[%s12780_s1 + $0xf8] sm:$0xff] }
 0x58e   : > { %v4838_v28 = vadd.f32 %v11607_v22, %v4806_v36  ;;  %5738 = vmatmul.bf16.vlgmr.msrb.gmra.mxu2 %v8603_v58  ;;  %6228 = vmatpush.bf16.msra.mxu3 %v9330_v1  ;;  %v8610_v36 = vld [vmem:[%s9832_s25 + $0x310] sm:$0xf]  ;;  %v8299_v58 = vor.u32 %v9218_v31, %v8298_v2  ;;  %v4166_v1 = vadd.f32 %v11794_v12, %v11639_v19  ;;  %v8412_v19 = vld [vmem:[%s9832_s25 + $0x328] sm:$0xf0] }
 0x58f   : > { %v12009_v51 = vpop.f32.mrf.mxu2  ;;  %v8418_v31 = vld [vmem:[%s9832_s25 + $0x330] sm:$0xf] }
 0x590   : > { %v4870_v10 = vmax.f32 %v4838_v28, 0.0  ;;  %v4247_v39 = vpop.f32.mrf.mxu3 }
 0x591   : > { %v4656_v53 = vpop.f32.mrf.mxu0  ;;  %6571 = vmatpush.bf16.msra.mxu2 %v9738_v60  ;;  %v4248_v4 = vadd.f32 %v4247_v39, %v11758_v7  ;;  %v9274_v7 = vld [vmem:[%s12780_s1 + $0x58] sm:$0xff] }
 0x592   : > { %v4896_v18 = vpack.c.bf16 %v4870_v10, %v4869_v21  ;;  %v4746_v54 = vadd.f32 %v11943_v61, %v4656_v53  ;;  %v9334_v61 = vld [vmem:[%s12780_s1 + $0x118] sm:$0xff]  ;;  %5823 = vmatpush.bf16.msra.mxu1 %v9274_v7 }
 0x593   : > { %6321 = vmatpush.bf16.msra.mxu0 %v9334_v61 }
 0x594   : > { %4695 = vmatmul.bf16.gmra.mxu0 %v8291_v24  ;;  %8373 = vmatmul.msk.bf16.gmra.mxu1 %vm543_vm0, %v4896_v18  ;;  %v4807_v43 = vadd.f32 %v4746_v54, %v4248_v4  ;;  %v9236_v24 = vld [vmem:[%s9832_s25 + $0x324] sm:$0xf0] }
 0x595   : > { %6572 = vmatpush.bf16.msra.mxu2 %v9739_v0 }
 0x596   : > { %v4839_v52 = vadd.f32 %v11607_v22, %v4807_v43 }
 0x597   : > { %v12029_v56 = vpop.f32.mrf.mxu2 }
 0x598   : > { %v4249_v34 = vpop.f32.mrf.mxu3  ;;  %v4871_v15 = vmax.f32 %v4839_v52, 0.0 }
 0x599   : > { %v4250_v49 = vadd.f32 %v4249_v34, %v4161_v47  ;;  %v4658_v55 = vpop.f32.mrf.mxu0  ;;  %6573 = vmatpush.bf16.msra.mxu2 %v9740_v42  ;;  %v9235_v34 = vld [vmem:[%s9832_s25 + $0x324] sm:$0xf] }
 0x59a   : > { %v4748_v38 = vadd.f32 %v11951_v33, %v4658_v55  ;;  %v9234_v33 = vld [vmem:[%s9832_s25 + $0x314] sm:$0xf0]  ;;  %v9329_v55 = vld [vmem:[%s12780_s1 + $0xf0] sm:$0xff] }
 0x59b   : > { %v8611_v9 = vor.u32 %v9234_v33, %v8610_v36  ;;  %6229 = vmatpush.bf16.msra.mxu3 %v9329_v55  ;;  %v9238_v36 = vld [vmem:[%s9832_s25 + $0x334] sm:$0xf0]  ;;  %v4171_v33 = vadd.f32 %v11816_v30, %v11665_v3 }
 0x59c   : > { %v4808_v48 = vadd.f32 %v4748_v38, %v4250_v49  ;;  %v12063_v49 = vor.u32 %v9235_v34, %v8412_v19 }
 0x59d   : > { %8151 = vmatmul.msk.bf16.gmra.mxu3 %vm543_vm0, %v11485_v59 }
 0x59e   : > { %v4840_v17 = vadd.f32 %v11607_v22, %v4808_v48  ;;  %5743 = vmatmul.bf16.gmra.mxu2 %v8611_v9  ;;  %v8410_v22 = vld [vmem:[%s9832_s25 + $0x320] sm:$0xf] }
 0x59f   : > { %v12042_v10 = vpop.f32.mrf.mxu2  ;;  %v8411_v54 = vor.u32 %v9236_v24, %v8410_v22 }
 0x5a0   : > { %v4872_v27 = vmax.f32 %v4840_v17, 0.0  ;;  %v4252_v28 = vpop.f32.mrf.mxu3 }
 0x5a1   : > { %v4661_v6 = vpop.f32.mrf.mxu0  ;;  %v4253_v39 = vadd.f32 %v4252_v28, %v11778_v35  ;;  %v8419_v28 = vor.u32 %v9238_v36, %v8418_v31  ;;  %v8428_v31 = vld [vmem:[%s9832_s25 + $0x348] sm:$0xf0] }
 0x5a2   : > { %v4897_v21 = vpack.c.bf16 %v4872_v27, %v4871_v15  ;;  %v4751_v59 = vadd.f32 %v11973_v45, %v4661_v6  ;;  %v12057_v45 = vld [vmem:[%s12781_s2] ss:$0 sm:$0xff]  ;;  %v12079_v15 = vpop.f32.mrf.mxu1 }
 0x5a4   : > { %4700 = vmatmul.bf16.gmra.mxu0 %v8299_v58  ;;  %8374 = vmatmul.msk.bf16.gmra.mxu1 %vm543_vm0, %v4897_v21  ;;  %v4809_v53 = vadd.f32 %v4751_v59, %v4253_v39  ;;  %v9237_v39 = vld [vmem:[%s9832_s25 + $0x334] sm:$0xf]  ;;  %v8420_v59 = vld [vmem:[%s9832_s25 + $0x338] sm:$0xf0] }
 0x5a6   : > { %v4841_v47 = vadd.f32 %v12057_v45, %v4809_v53 }
 0x5a7   : > { %v12052_v35 = vpop.f32.mrf.mxu2 }
 0x5a8   : > { %v4254_v18 = vpop.f32.mrf.mxu3  ;;  %v4873_v7 = vmax.f32 %v4841_v47, 0.0  ;;  %v9240_v47 = vld [vmem:[%s9832_s25 + $0x344] sm:$0xf0] }
 0x5a9   : > { %v4255_v60 = vadd.f32 %v4254_v18, %v4166_v1  ;;  %v4663_v4 = vpop.f32.mrf.mxu0  ;;  %v12088_v1 = vor.u32 %v9237_v39, %v8420_v59  ;;  %v8434_v59 = vld [vmem:[%s9832_s25 + $0x350] sm:$0xf] }
 0x5aa   : > { %v4753_v0 = vadd.f32 %v11987_v13, %v4663_v4 }
 0x5ac   : > { %v4810_v43 = vadd.f32 %v4753_v0, %v4255_v60  ;;  %v8426_v0 = vld [vmem:[%s9832_s25 + $0x340] sm:$0xf] }
 0x5ad   : > { %5464 = vmatmul.bf16.vlgmr.msrb.gmra.mxu3 %v8411_v54 }
 0x5ae   : > { %v4842_v12 = vadd.f32 %v12057_v45, %v4810_v43  ;;  %5748 = vmatmul.bf16.gmra.mxu2 %v8411_v54  ;;  %v4176_v43 = vadd.f32 %v11839_v62, %v11685_v57 }
 0x5af   : > { %v12068_v52 = vpop.f32.mrf.mxu2 }
 0x5b0   : > { %v4874_v61 = vmax.f32 %v4842_v12, 0.0  ;;  %v4257_v13 = vpop.f32.mrf.mxu3 }
 0x5b1   : > { %v4666_v38 = vpop.f32.mrf.mxu0  ;;  %v4258_v48 = vadd.f32 %v4257_v13, %v11804_v5 }
 0x5b2   : > { %v4898_v42 = vpack.c.bf16 %v4874_v61, %v4873_v7  ;;  %v4756_v2 = vadd.f32 %v12009_v51, %v4666_v38  ;;  %v8427_v61 = vor.u32 %v9240_v47, %v8426_v0 }
 0x5b4   : > { %8375 = vmatmul.msk.bf16.gmra.mxu1 %vm543_vm0, %v4898_v42  ;;  %8584 = vmatmul.msk.bf16.vlgmr.msrb.gmra.mxu0 %vm543_vm0, %v12063_v49  ;;  %v4811_v17 = vadd.f32 %v4756_v2, %v4258_v48  ;;  %v9239_v2 = vld [vmem:[%s9832_s25 + $0x344] sm:$0xf] }
 0x5b6   : > { %v4843_v6 = vadd.f32 %v12057_v45, %v4811_v17 }
 0x5b7   : > { %v12082_v58 = vpop.f32.mrf.mxu2 }
 0x5b8   : > { %v4259_v9 = vpop.f32.mrf.mxu3  ;;  %v4875_v30 = vmax.f32 %v4843_v6, 0.0 }
 0x5b9   : > { %v4260_v27 = vadd.f32 %v4259_v9, %v4171_v33  ;;  %v4668_v5 = vpop.f32.mrf.mxu0 }
 0x5ba   : > { %v4758_v51 = vadd.f32 %v12029_v56, %v4668_v5 }
 0x5bc   : > { %v4812_v21 = vadd.f32 %v4758_v51, %v4260_v27  ;;  %v9328_v27 = vld [vmem:[%s12780_s1 + $0xe8] sm:$0xff] }
 0x5bd   : > { %5469 = vmatmul.bf16.gmra.mxu3 %v8419_v28 }
 0x5be   : > { %v4844_v3 = vadd.f32 %v12057_v45, %v4812_v21  ;;  %5753 = vmatmul.bf16.gmra.mxu2 %v8419_v28  ;;  %6230 = vmatpush.bf16.msra.mxu3 %v9328_v27 }
 0x5bf   : > { %v12090_v60 = vpop.f32.mrf.mxu2 }
 0x5c0   : > { %v4876_v22 = vmax.f32 %v4844_v3, 0.0  ;;  %v4262_v24 = vpop.f32.mrf.mxu3  ;;  %v9242_v3 = vld [vmem:[%s9832_s25 + $0x354] sm:$0xf0] }
 0x5c1   : > { %v4671_v53 = vpop.f32.mrf.mxu0  ;;  %v4964_v56 = vpop.f32.mrf.mxu1  ;;  %v4263_v4 = vadd.f32 %v4262_v24, %v11826_v41 }
 0x5c2   : > { %v4899_v18 = vpack.c.bf16 %v4876_v22, %v4875_v30  ;;  %v4761_v54 = vadd.f32 %v12042_v10, %v4671_v53  ;;  %v12104_v10 = vld [vmem:[%s12783_s4] ss:$0 sm:$0xff]  ;;  %v4181_v30 = vadd.f32 %v11859_v63, %v11712_v46  ;;  %v9273_v53 = vld [vmem:[%s12780_s1 + $0x50] sm:$0xff] }
 0x5c3   : > { %v4965_v13 = vadd.f32 %v12104_v10, %v4964_v56  ;;  %5824 = vmatpush.bf16.msra.mxu1 %v9273_v53 }
 0x5c4   : > { %8376 = vmatmul.msk.bf16.gmra.mxu1 %vm543_vm0, %v4899_v18  ;;  %8585 = vmatmul.msk.bf16.gmra.mxu0 %vm543_vm0, %v12088_v1  ;;  %v4813_v34 = vadd.f32 %v4761_v54, %v4263_v4  ;;  %v8435_v4 = vor.u32 %v9242_v3, %v8434_v59 }
 0x5c6   : > { %v4845_v38 = vadd.f32 %v12057_v45, %v4813_v34 }
 0x5c7   : > { %v12109_v62 = vpop.f32.mrf.mxu2 }
 0x5c8   : > { %v4264_v19 = vpop.f32.mrf.mxu3  ;;  %v4877_v33 = vmax.f32 %v4845_v38, 0.0 }
 0x5c9   : > { %v4265_v12 = vadd.f32 %v4264_v19, %v4176_v43  ;;  %v4673_v7 = vpop.f32.mrf.mxu0  ;;  %v4966_v41 = vpop.f32.mrf.mxu1  ;;  %v9241_v19 = vld [vmem:[%s9832_s25 + $0x354] sm:$0xf] }
 0x5ca   : > { %v4763_v55 = vadd.f32 %v12052_v35, %v4673_v7  ;;  %v4967_v57 = vadd.f32 %v12104_v10, %v4966_v41  ;;  %v12116_v35 = vor.u32 %v9239_v2, %v8428_v31  ;;  %v8442_v31 = vld [vmem:[%s9832_s25 + $0x360] sm:$0xf] }
 0x5cc   : > { %v4814_v42 = vadd.f32 %v4763_v55, %v4265_v12  ;;  %v9498_v48 = vpack.c.bf16 %v4967_v57, %v4965_v13  ;;  %v8436_v12 = vld [vmem:[%s9832_s25 + $0x358] sm:$0xf0] }
 0x5cd   : > { %5474 = vmatmul.bf16.gmra.mxu3 %v8427_v61  ;;  %v12148_v13 = vor.u32 %v9241_v19, %v8436_v12 }
 0x5ce   : > { %v4846_v36 = vadd.f32 %v12057_v45, %v4814_v42  ;;  %9686 = vst [vmem:[%s10423_s12 + $0x100] sm:$0xff] %v9498_v48   ;;  %5758 = vmatmul.bf16.gmra.mxu2 %v8427_v61 }
 0x5cf   : > { %v12121_v6 = vpop.f32.mrf.mxu2 }
 0x5d0   : > { %v4878_v17 = vmax.f32 %v4846_v36, 0.0  ;;  %v4267_v9 = vpop.f32.mrf.mxu3  ;;  %v9244_v36 = vld [vmem:[%s9832_s25 + $0x364] sm:$0xf0] }
 0x5d1   : > { %v4676_v5 = vpop.f32.mrf.mxu0  ;;  %v4969_v28 = vpop.f32.mrf.mxu1  ;;  %v4268_v21 = vadd.f32 %v4267_v9, %v11848_v37  ;;  %v9333_v37 = vld [vmem:[%s12780_s1 + $0x110] sm:$0xff] }
 0x5d2   : > { %v4900_v51 = vpack.c.bf16 %v4878_v17, %v4877_v33  ;;  %v4766_v39 = vadd.f32 %v12068_v52, %v4676_v5  ;;  %v4970_v54 = vadd.f32 %v12104_v10, %v4969_v28  ;;  %6322 = vmatpush.bf16.msra.mxu0 %v9333_v37  ;;  %v4186_v33 = vadd.f32 %v11886_v8, %v11732_v23  ;;  %v9243_v8 = vld [vmem:[%s9832_s25 + $0x364] sm:$0xf] }
 0x5d3   : > { %v8443_v28 = vor.u32 %v9244_v36, %v8442_v31 }
 0x5d4   : > { %8377 = vmatmul.msk.bf16.gmra.mxu1 %vm543_vm0, %v4900_v51  ;;  %8586 = vmatmul.msk.bf16.gmra.mxu0 %vm543_vm0, %v12116_v35  ;;  %v4815_v22 = vadd.f32 %v4766_v39, %v4268_v21 }
 0x5d6   : > { %v4847_v47 = vadd.f32 %v12057_v45, %v4815_v22 }
 0x5d7   : > { %v12141_v0 = vpop.f32.mrf.mxu2 }
 0x5d8   : > { %v4269_v24 = vpop.f32.mrf.mxu3  ;;  %v4879_v41 = vmax.f32 %v4847_v47, 0.0  ;;  %v8450_v47 = vld [vmem:[%s9832_s25 + $0x370] sm:$0xf] }
 0x5d9   : > { %v4270_v52 = vadd.f32 %v4269_v24, %v4181_v30  ;;  %v4678_v56 = vpop.f32.mrf.mxu0  ;;  %v4971_v18 = vpop.f32.mrf.mxu1  ;;  %v8444_v30 = vld [vmem:[%s9832_s25 + $0x368] sm:$0xf0] }
 0x5da   : > { %v4768_v46 = vadd.f32 %v12082_v58, %v4678_v56  ;;  %v4972_v63 = vadd.f32 %v12104_v10, %v4971_v18 }
 0x5dc   : > { %v4816_v43 = vadd.f32 %v4768_v46, %v4270_v52  ;;  %v9503_v34 = vpack.c.bf16 %v4972_v63, %v4970_v54  ;;  %v9327_v52 = vld [vmem:[%s12780_s1 + $0xe0] sm:$0xff] }
 0x5dd   : > { %5479 = vmatmul.bf16.gmra.mxu3 %v8435_v4 }
 0x5de   : > { %v4848_v7 = vadd.f32 %v12057_v45, %v4816_v43  ;;  %9687 = vst [vmem:[%s10423_s12 + $0x108] sm:$0xff] %v9503_v34   ;;  %5763 = vmatmul.bf16.gmra.mxu2 %v8435_v4  ;;  %6231 = vmatpush.bf16.msra.mxu3 %v9327_v52  ;;  %v9246_v43 = vld [vmem:[%s9832_s25 + $0x374] sm:$0xf0]  ;;  %v4191_v34 = vadd.f32 %v11912_v20, %v11755_v25  ;;  %v9245_v20 = vld [vmem:[%s9832_s25 + $0x374] sm:$0xf] }
 0x5df   : > { %v12150_v42 = vpop.f32.mrf.mxu2 }
 0x5e0   : > { %v4880_v58 = vmax.f32 %v4848_v7, 0.0  ;;  %v4272_v61 = vpop.f32.mrf.mxu3 }
 0x5e1   : > { %v4681_v55 = vpop.f32.mrf.mxu0  ;;  %v4974_v57 = vpop.f32.mrf.mxu1  ;;  %v4273_v48 = vadd.f32 %v4272_v61, %v11872_v32 }
 0x5e2   : > { %v4901_v38 = vpack.c.bf16 %v4880_v58, %v4879_v41  ;;  %v4771_v2 = vadd.f32 %v12090_v60, %v4681_v55  ;;  %v4975_v60 = vadd.f32 %v12104_v10, %v4974_v57  ;;  %v8451_v58 = vor.u32 %v9246_v43, %v8450_v47  ;;  %v9326_v43 = vld [vmem:[%s12780_s1 + $0xd8] sm:$0xff] }
 0x5e3   : > { %6232 = vmatpush.bf16.msra.mxu3 %v9326_v43 }
 0x5e4   : > { %8378 = vmatmul.msk.bf16.gmra.mxu1 %vm543_vm0, %v4901_v38  ;;  %8587 = vmatmul.msk.bf16.gmra.mxu0 %vm543_vm0, %v12148_v13  ;;  %v4817_v17 = vadd.f32 %v4771_v2, %v4273_v48  ;;  %v8452_v2 = vld [vmem:[%s9832_s25 + $0x378] sm:$0xf0] }
 0x5e6   : > { %v4849_v59 = vadd.f32 %v12057_v45, %v4817_v17 }
 0x5e7   : > { %v12164_v39 = vpop.f32.mrf.mxu2 }
 0x5e8   : > { %v4274_v9 = vpop.f32.mrf.mxu3  ;;  %v4881_v24 = vmax.f32 %v4849_v59, 0.0  ;;  %v4196_v59 = vadd.f32 %v11941_v16, %v11775_v50  ;;  %v9247_v16 = vld [vmem:[%s9832_s25 + $0x384] sm:$0xf] }
 0x5e9   : > { %v4275_v27 = vadd.f32 %v4274_v9, %v4186_v33  ;;  %v4683_v5 = vpop.f32.mrf.mxu0  ;;  %v4976_v32 = vpop.f32.mrf.mxu1 }
 0x5ea   : > { %v4773_v51 = vadd.f32 %v12109_v62, %v4683_v5  ;;  %v4977_v21 = vadd.f32 %v12104_v10, %v4976_v32  ;;  %v12171_v62 = vor.u32 %v9243_v8, %v8444_v30 }
 0x5ec   : > { %v4818_v3 = vadd.f32 %v4773_v51, %v4275_v27  ;;  %v9508_v23 = vpack.c.bf16 %v4977_v21, %v4975_v60  ;;  %v8458_v51 = vld [vmem:[%s9832_s25 + $0x380] sm:$0xf]  ;;  %v9248_v21 = vld [vmem:[%s9832_s25 + $0x384] sm:$0xf0] }
 0x5ed   : > { %5484 = vmatmul.bf16.gmra.mxu3 %v8443_v28 }
 0x5ee   : > { %v4850_v22 = vadd.f32 %v12057_v45, %v4818_v3  ;;  %9688 = vst [vmem:[%s10423_s12 + $0x110] sm:$0xff] %v9508_v23   ;;  %5768 = vmatmul.bf16.gmra.mxu2 %v8443_v28 }
 0x5ef   : > { %v12176_v54 = vpop.f32.mrf.mxu2 }
 0x5f0   : > { %v4882_v53 = vmax.f32 %v4850_v22, 0.0  ;;  %v4277_v37 = vpop.f32.mrf.mxu3  ;;  %v8459_v22 = vor.u32 %v9248_v21, %v8458_v51 }
 0x5f1   : > { %v4686_v56 = vpop.f32.mrf.mxu0  ;;  %v4979_v18 = vpop.f32.mrf.mxu1  ;;  %v4278_v46 = vadd.f32 %v4277_v37, %v11901_v40 }
 0x5f2   : > { %v4902_v4 = vpack.c.bf16 %v4882_v53, %v4881_v24  ;;  %v4776_v63 = vadd.f32 %v12121_v6, %v4686_v56  ;;  %v4980_v6 = vadd.f32 %v12104_v10, %v4979_v18  ;;  %v8460_v18 = vld [vmem:[%s9832_s25 + $0x388] sm:$0xf0] }
 0x5f4   : > { %8379 = vmatmul.msk.bf16.gmra.mxu1 %vm543_vm0, %v4902_v4  ;;  %8588 = vmatmul.msk.bf16.gmra.mxu0 %vm543_vm0, %v12171_v62  ;;  %v4819_v19 = vadd.f32 %v4776_v63, %v4278_v46 }
 0x5f6   : > { %v4851_v38 = vadd.f32 %v12057_v45, %v4819_v19 }
 0x5f7   : > { %v12190_v57 = vpop.f32.mrf.mxu2 }
 0x5f8   : > { %v4279_v12 = vpop.f32.mrf.mxu3  ;;  %v4883_v36 = vmax.f32 %v4851_v38, 0.0 }
 0x5f9   : > { %v4280_v7 = vadd.f32 %v4279_v12, %v4191_v34  ;;  %v4688_v41 = vpop.f32.mrf.mxu0  ;;  %v4981_v40 = vpop.f32.mrf.mxu1 }
 0x5fa   : > { %v4778_v61 = vadd.f32 %v12141_v0, %v4688_v41  ;;  %v4982_v55 = vadd.f32 %v12104_v10, %v4981_v40  ;;  %v12197_v0 = vor.u32 %v9245_v20, %v8452_v2 }
 0x5fc   : > { %v4820_v48 = vadd.f32 %v4778_v61, %v4280_v7  ;;  %v9513_v25 = vpack.c.bf16 %v4982_v55, %v4980_v6  ;;  %v9332_v6 = vld [vmem:[%s12780_s1 + $0x108] sm:$0xff]  ;;  %v8466_v61 = vld [vmem:[%s9832_s25 + $0x390] sm:$0xf]  ;;  %v9250_v55 = vld [vmem:[%s9832_s25 + $0x394] sm:$0xf0] }
 0x5fd   : > { %5489 = vmatmul.bf16.gmra.mxu3 %v8451_v58  ;;  %6323 = vmatpush.bf16.msra.mxu0 %v9332_v6  ;;  %v8467_v2 = vor.u32 %v9250_v55, %v8466_v61 }
 0x5fe   : > { %v4852_v31 = vadd.f32 %v12057_v45, %v4820_v48  ;;  %9689 = vst [vmem:[%s10423_s12 + $0x118] sm:$0xff] %v9513_v25   ;;  %5773 = vmatmul.bf16.gmra.mxu2 %v8451_v58  ;;  %v9272_v58 = vld [vmem:[%s12780_s1 + $0x48] sm:$0xff] }
 0x5ff   : > { %v12199_v32 = vpop.f32.mrf.mxu2  ;;  %5825 = vmatpush.bf16.msra.mxu1 %v9272_v58 }
 0x600   : > { %v4884_v33 = vmax.f32 %v4852_v31, 0.0  ;;  %v4282_v17 = vpop.f32.mrf.mxu3 }
 0x601   : > { %v4691_v9 = vpop.f32.mrf.mxu0  ;;  %v4984_v27 = vpop.f32.mrf.mxu1  ;;  %v4283_v28 = vadd.f32 %v4282_v17, %v11927_v26 }
 0x602   : > { %v4903_v5 = vpack.c.bf16 %v4884_v33, %v4883_v36  ;;  %v4781_v60 = vadd.f32 %v12150_v42, %v4691_v9  ;;  %v4985_v42 = vadd.f32 %v12104_v10, %v4984_v27 }
 0x604   : > { %8380 = vmatmul.msk.bf16.gmra.mxu1 %vm543_vm0, %v4903_v5  ;;  %8589 = vmatmul.msk.bf16.gmra.mxu0 %vm543_vm0, %v12197_v0  ;;  %v4821_v3 = vadd.f32 %v4781_v60, %v4283_v28  ;;  %v8468_v5 = vld [vmem:[%s9832_s25 + $0x398] sm:$0xf0]  ;;  %v9271_v60 = vld [vmem:[%s12780_s1 + $0x40] sm:$0xff] }
 0x605   : > { %5826 = vmatpush.bf16.msra.mxu1 %v9271_v60  ;;  %v8484_v60 = vld [vmem:[%s9832_s25 + $0x3b8] sm:$0xf0] }
 0x606   : > { %v4853_v52 = vadd.f32 %v12057_v45, %v4821_v3 }
 0x607   : > { %v12213_v37 = vpop.f32.mrf.mxu2 }
 0x608   : > { %v4284_v23 = vpop.f32.mrf.mxu3  ;;  %v4885_v46 = vmax.f32 %v4853_v52, 0.0 }
 0x609   : > { %v4285_v8 = vadd.f32 %v4284_v23, %v4196_v59  ;;  %v4693_v30 = vpop.f32.mrf.mxu0  ;;  %v4986_v26 = vpop.f32.mrf.mxu1 }
 0x60a   : > { %v4783_v24 = vadd.f32 %v12164_v39, %v4693_v30  ;;  %v4987_v53 = vadd.f32 %v12104_v10, %v4986_v26  ;;  %v12220_v39 = vor.u32 %v9247_v16, %v8460_v18 }
 0x60c   : > { %v4822_v56 = vadd.f32 %v4783_v24, %v4285_v8  ;;  %v9518_v50 = vpack.c.bf16 %v4987_v53, %v4985_v42  ;;  %v8474_v42 = vld [vmem:[%s9832_s25 + $0x3a0] sm:$0xf]  ;;  %v9252_v24 = vld [vmem:[%s9832_s25 + $0x3a4] sm:$0xf0]  ;;  %v12835_v53 = vld [vmem:[#allocation12_spill] sm:$0xff] }
 0x60d   : > { %5494 = vmatmul.bf16.gmra.mxu3 %v8459_v22  ;;  %v4206_v52 = vadd.f32 %v12079_v15, %v12835_v53  ;;  %v9256_v53 = vld [vmem:[%s9832_s25 + $0x3c4] sm:$0xf0] }
 0x60e   : > { %v4854_v4 = vadd.f32 %v12057_v45, %v4822_v56  ;;  %9690 = vst [vmem:[%s10423_s12 + $0x120] sm:$0xff] %v9518_v50   ;;  %5778 = vmatmul.bf16.gmra.mxu2 %v8459_v22 }
 0x610   : > { %v4886_v63 = vmax.f32 %v4854_v4, 0.0  ;;  %v4287_v47 = vpop.f32.mrf.mxu3  ;;  %v8475_v4 = vor.u32 %v9252_v24, %v8474_v42  ;;  %v8490_v24 = vld [vmem:[%s9832_s25 + $0x3c0] sm:$0xf] }
 0x611   : > { %v4696_v34 = vpop.f32.mrf.mxu0  ;;  %v4989_v19 = vpop.f32.mrf.mxu1  ;;  %v4288_v41 = vadd.f32 %v4287_v47, %v11954_v44  ;;  %v4201_v44 = vadd.f32 %v11971_v11, %v11801_v14  ;;  %v9249_v11 = vld [vmem:[%s9832_s25 + $0x394] sm:$0xf] }
 0x612   : > { %v4904_v12 = vpack.c.bf16 %v4886_v63, %v4885_v46  ;;  %v12225_v7 = vpop.f32.mrf.mxu2  ;;  %v4786_v40 = vadd.f32 %v12176_v54, %v4696_v34  ;;  %v4990_v31 = vadd.f32 %v12104_v10, %v4989_v19  ;;  %v12255_v59 = vor.u32 %v9249_v11, %v8468_v5  ;;  %v9251_v19 = vld [vmem:[%s9832_s25 + $0x3a4] sm:$0xf] }
 0x614   : > { %8381 = vmatmul.msk.bf16.gmra.mxu1 %vm543_vm0, %v4904_v12  ;;  %8590 = vmatmul.msk.bf16.gmra.mxu0 %vm543_vm0, %v12220_v39  ;;  %v4823_v54 = vadd.f32 %v4786_v40, %v4288_v41  ;;  %v8476_v12 = vld [vmem:[%s9832_s25 + $0x3a8] sm:$0xf0]  ;;  %v9325_v40 = vld [vmem:[%s12780_s1 + $0xd0] sm:$0xff] }
 0x615   : > { %v12281_v61 = vor.u32 %v9251_v19, %v8476_v12  ;;  %6233 = vmatpush.bf16.msra.mxu3 %v9325_v40  ;;  %v9324_v19 = vld [vmem:[%s12780_s1 + $0xc8] sm:$0xff] }
 0x616   : > { %v4855_v9 = vadd.f32 %v12057_v45, %v4823_v54 }
 0x618   : > { %v4289_v38 = vpop.f32.mrf.mxu3 }
 0x619   : > { %v4290_v48 = vadd.f32 %v4289_v38, %v4201_v44  ;;  %v4698_v25 = vpop.f32.mrf.mxu0  ;;  %v4991_v20 = vpop.f32.mrf.mxu1  ;;  %6234 = vmatpush.bf16.msra.mxu3 %v9324_v19 }
 0x61a   : > { %v4788_v36 = vadd.f32 %v12190_v57, %v4698_v25  ;;  %v4992_v33 = vadd.f32 %v12104_v10, %v4991_v20  ;;  %v12245_v17 = vpop.f32.mrf.mxu2  ;;  %v4887_v57 = vmax.f32 %v4855_v9, 0.0  ;;  %v8482_v25 = vld [vmem:[%s9832_s25 + $0x3b0] sm:$0xf]  ;;  %v9254_v20 = vld [vmem:[%s9832_s25 + $0x3b4] sm:$0xf0] }
 0x61c   : > { %v4824_v27 = vadd.f32 %v4788_v36, %v4290_v48  ;;  %v9523_v14 = vpack.c.bf16 %v4992_v33, %v4990_v31  ;;  %v8483_v33 = vor.u32 %v9254_v20, %v8482_v25 }
 0x61d   : > { %5499 = vmatmul.bf16.gmra.mxu3 %v8467_v2 }
 0x61e   : > { %v4856_v28 = vadd.f32 %v12057_v45, %v4824_v27  ;;  %9691 = vst [vmem:[%s10423_s12 + $0x128] sm:$0xff] %v9523_v14   ;;  %5783 = vmatmul.bf16.gmra.mxu2 %v8467_v2 }
 0x620   : > { %v4888_v51 = vmax.f32 %v4856_v28, 0.0  ;;  %v4292_v21 = vpop.f32.mrf.mxu3  ;;  %v9253_v28 = vld [vmem:[%s9832_s25 + $0x3b4] sm:$0xf] }
 0x621   : > { %v4701_v3 = vpop.f32.mrf.mxu0  ;;  %v4994_v23 = vpop.f32.mrf.mxu1  ;;  %v4293_v26 = vadd.f32 %v4292_v21, %v11990_v29 }
 0x622   : > { %v4905_v8 = vpack.c.bf16 %v4888_v51, %v4887_v57  ;;  %v12257_v30 = vpop.f32.mrf.mxu2  ;;  %v4791_v22 = vadd.f32 %v12199_v32, %v4701_v3  ;;  %v4995_v32 = vadd.f32 %v12104_v10, %v4994_v23  ;;  %v9231_v57 = vld [vmem:[%s9832_s25 + $0x304] sm:$0xf]  ;;  %v8604_v51 = vld [vmem:[%s9832_s25 + $0x308] sm:$0xf0]  ;;  %v12303_v3 = vor.u32 %v9253_v28, %v8484_v60  ;;  %v8500_v28 = vld [vmem:[%s9832_s25 + $0x3d8] sm:$0xf0] }
 0x623   : > { %v8607_v23 = vor.u32 %v9231_v57, %v8604_v51 }
 0x624   : > { %8382 = vmatmul.msk.bf16.gmra.mxu1 %vm543_vm0, %v4905_v8  ;;  %8591 = vmatmul.msk.bf16.gmra.mxu0 %vm543_vm0, %v12255_v59  ;;  %v4825_v56 = vadd.f32 %v4791_v22, %v4293_v26 }
 0x626   : > { %v4857_v43 = vadd.f32 %v12057_v45, %v4825_v56 }
 0x628   : > { %v4294_v50 = vpop.f32.mrf.mxu3 }
 0x629   : > { %v4295_v16 = vadd.f32 %v4294_v50, %v4206_v52  ;;  %v4703_v18 = vpop.f32.mrf.mxu0  ;;  %v4996_v29 = vpop.f32.mrf.mxu1 }
 0x62a   : > { %v4793_v46 = vadd.f32 %v12213_v37, %v4703_v18  ;;  %v4997_v63 = vadd.f32 %v12104_v10, %v4996_v29  ;;  %v12271_v47 = vpop.f32.mrf.mxu2  ;;  %v4889_v37 = vmax.f32 %v4857_v43, 0.0  ;;  %v8492_v43 = vld [vmem:[%s9832_s25 + $0x3c8] sm:$0xf0] }
 0x62c   : > { %v4826_v34 = vadd.f32 %v4793_v46, %v4295_v16  ;;  %v9528_v15 = vpack.c.bf16 %v4997_v63, %v4995_v32  ;;  %v8491_v16 = vor.u32 %v9256_v53, %v8490_v24  ;;  %v9255_v63 = vld [vmem:[%s9832_s25 + $0x3c4] sm:$0xf] }
 0x62d   : > { %5504 = vmatmul.bf16.gmra.mxu3 %v8475_v4 }
 0x62e   : > { %v4858_v41 = vadd.f32 %v12057_v45, %v4826_v34  ;;  %9692 = vst [vmem:[%s10423_s12 + $0x130] sm:$0xff] %v9528_v15   ;;  %5788 = vmatmul.bf16.gmra.mxu2 %v8475_v4  ;;  %v9233_v34 = vld [vmem:[%s9832_s25 + $0x314] sm:$0xf]  ;;  %v8612_v15 = vld [vmem:[%s9832_s25 + $0x318] sm:$0xf0] }
 0x62f   : > { %v8615_v40 = vor.u32 %v9233_v34, %v8612_v15 }
 0x630   : > { %v4890_v58 = vmax.f32 %v4858_v41, 0.0  ;;  %v5465_v6 = vpop.f32.mrf.mxu3  ;;  %v12326_v41 = vor.u32 %v9255_v63, %v8492_v43  ;;  %v9323_v63 = vld [vmem:[%s12780_s1 + $0xc0] sm:$0xff] }
 0x631   : > { %v4999_v55 = vpop.f32.mrf.mxu1  ;;  %v5554_v44 = vpop.f32.mrf.mxu0  ;;  %6235 = vmatpush.bf16.msra.mxu3 %v9323_v63 }
 0x632   : > { %v5555_v54 = vadd.f32 %v5554_v44, %v5465_v6  ;;  %v4906_v38 = vpack.c.bf16 %v4890_v58, %v4889_v37  ;;  %v5749_v48 = vpop.f32.mrf.mxu2  ;;  %v5000_v9 = vadd.f32 %v12104_v10, %v4999_v55  ;;  %v9331_v44 = vld [vmem:[%s12780_s1 + $0x100] sm:$0xff] }
 0x633   : > { %6324 = vmatpush.bf16.msra.mxu0 %v9331_v44 }
 0x634   : > { %v12284_v45 = vadd.f32 %v12225_v7, %v5555_v54  ;;  %8383 = vmatmul.msk.bf16.gmra.mxu1 %vm543_vm0, %v4906_v38  ;;  %8592 = vmatmul.msk.bf16.gmra.mxu0 %vm543_vm0, %v12281_v61  ;;  %v8498_v54 = vld [vmem:[%s9832_s25 + $0x3d0] sm:$0xf]  ;;  %v9258_v38 = vld [vmem:[%s9832_s25 + $0x3d4] sm:$0xf0] }
 0x638   : > { %v5467_v2 = vpop.f32.mrf.mxu3 }
 0x639   : > { %v5001_v31 = vpop.f32.mrf.mxu1  ;;  %v5556_v36 = vpop.f32.mrf.mxu0 }
 0x63a   : > { %v5002_v7 = vadd.f32 %v12104_v10, %v5001_v31  ;;  %v5557_v27 = vadd.f32 %v5556_v36, %v5467_v2  ;;  %v12293_v14 = vpop.f32.mrf.mxu2 }
 0x63c   : > { %v9533_v11 = vpack.c.bf16 %v5002_v7, %v5000_v9  ;;  %v12296_v5 = vadd.f32 %v12245_v17, %v5557_v27 }
 0x63d   : > { %5509 = vmatmul.bf16.gmra.mxu3 %v8483_v33 }
 0x63e   : > { %9693 = vst [vmem:[%s10423_s12 + $0x138] sm:$0xff] %v9533_v11   ;;  %5793 = vmatmul.bf16.gmra.mxu2 %v8483_v33  ;;  %v9257_v11 = vld [vmem:[%s9832_s25 + $0x3d4] sm:$0xf] }
 0x63f   : > { %v12348_v57 = vor.u32 %v9257_v11, %v8500_v28 }
 0x640   : > { %v5470_v21 = vpop.f32.mrf.mxu3 }
 0x641   : > { %v5004_v8 = vpop.f32.mrf.mxu1  ;;  %v5559_v26 = vpop.f32.mrf.mxu0 }
 0x642   : > { %v5560_v22 = vadd.f32 %v5559_v26, %v5470_v21  ;;  %v5754_v42 = vpop.f32.mrf.mxu2  ;;  %v5005_v18 = vadd.f32 %v12104_v10, %v5004_v8 }
 0x644   : > { %v12306_v17 = vadd.f32 %v12257_v30, %v5560_v22  ;;  %8593 = vmatmul.msk.bf16.gmra.mxu0 %vm543_vm0, %v12303_v3  ;;  %8664 = vmatmul.msk.bf16.vlgmr.msra.gmra.mxu1 %vm543_vm0, %v8607_v23  ;;  %v9260_v22 = vld [vmem:[%s9832_s25 + $0x3e4] sm:$0xf0] }
 0x648   : > { %v5472_v52 = vpop.f32.mrf.mxu3 }
 0x649   : > { %v5006_v56 = vpop.f32.mrf.mxu1  ;;  %v5561_v50 = vpop.f32.mrf.mxu0 }
 0x64a   : > { %v5007_v30 = vadd.f32 %v12104_v10, %v5006_v56  ;;  %v5562_v29 = vadd.f32 %v5561_v50, %v5472_v52  ;;  %v5756_v4 = vpop.f32.mrf.mxu2 }
 0x64c   : > { %v9538_v32 = vpack.c.bf16 %v5007_v30, %v5005_v18  ;;  %v12316_v46 = vadd.f32 %v12271_v47, %v5562_v29 }
 0x64d   : > { %5514 = vmatmul.bf16.gmra.mxu3 %v8491_v16 }
 0x64e   : > { %9694 = vst [vmem:[%s10423_s12 + $0x140] sm:$0xff] %v9538_v32   ;;  %5798 = vmatmul.bf16.gmra.mxu2 %v8491_v16  ;;  %v8508_v32 = vld [vmem:[%s9832_s25 + $0x3e8] sm:$0xf0] }
 0x650   : > { %v5475_v12 = vpop.f32.mrf.mxu3 }
 0x651   : > { %v5009_v47 = vpop.f32.mrf.mxu1  ;;  %v5564_v37 = vpop.f32.mrf.mxu0 }
 0x652   : > { %v5565_v58 = vadd.f32 %v5564_v37, %v5475_v12  ;;  %v5759_v6 = vpop.f32.mrf.mxu2  ;;  %v5010_v31 = vadd.f32 %v12104_v10, %v5009_v47  ;;  %v8514_v47 = vld [vmem:[%s9832_s25 + $0x3f0] sm:$0xf]  ;;  %v9262_v37 = vld [vmem:[%s9832_s25 + $0x3f4] sm:$0xf0] }
 0x654   : > { %v12328_v55 = vadd.f32 %v5749_v48, %v5565_v58  ;;  %8594 = vmatmul.msk.bf16.gmra.mxu0 %vm543_vm0, %v12326_v41  ;;  %8665 = vmatmul.msk.bf16.gmra.mxu1 %vm543_vm0, %v8615_v40  ;;  %v8499_v48 = vor.u32 %v9258_v38, %v8498_v54  ;;  %v8515_v38 = vor.u32 %v9262_v37, %v8514_v47  ;;  %v9278_v47 = vld [vmem:[%s9832_s25 + $0x414] sm:$0xf0] }
 0x658   : > { %v5477_v25 = vpop.f32.mrf.mxu3 }
 0x659   : > { %v5011_v20 = vpop.f32.mrf.mxu1  ;;  %v5566_v2 = vpop.f32.mrf.mxu0 }
 0x65a   : > { %v5012_v36 = vadd.f32 %v12104_v10, %v5011_v20  ;;  %v5567_v33 = vadd.f32 %v5566_v2, %v5477_v25  ;;  %v12340_v9 = vpop.f32.mrf.mxu2 }
 0x65c   : > { %v9543_v7 = vpack.c.bf16 %v5012_v36, %v5010_v31  ;;  %v12343_v27 = vadd.f32 %v12293_v14, %v5567_v33  ;;  %v8506_v14 = vld [vmem:[%s9832_s25 + $0x3e0] sm:$0xf]  ;;  %v9261_v31 = vld [vmem:[%s9832_s25 + $0x3f4] sm:$0xf] }
 0x65d   : > { %5519 = vmatmul.bf16.gmra.mxu3 %v8499_v48  ;;  %v8507_v56 = vor.u32 %v9260_v22, %v8506_v14 }
 0x65e   : > { %9695 = vst [vmem:[%s10423_s12 + $0x148] sm:$0xff] %v9543_v7   ;;  %5803 = vmatmul.bf16.gmra.mxu2 %v8499_v48 }
 0x660   : > { %v5480_v60 = vpop.f32.mrf.mxu3 }
 0x661   : > { %v5014_v51 = vpop.f32.mrf.mxu1  ;;  %v5569_v21 = vpop.f32.mrf.mxu0 }
 0x662   : > { %v5570_v23 = vadd.f32 %v5569_v21, %v5480_v60  ;;  %v5764_v8 = vpop.f32.mrf.mxu2  ;;  %v5015_v50 = vadd.f32 %v12104_v10, %v5014_v51  ;;  %v8522_v21 = vld [vmem:[%s9832_s25 + $0x400] sm:$0xf] }
 0x664   : > { %v12350_v26 = vadd.f32 %v5754_v42, %v5570_v23  ;;  %8595 = vmatmul.msk.bf16.gmra.mxu0 %vm543_vm0, %v12348_v57  ;;  %8666 = vmatmul.msk.bf16.gmra.mxu1 %vm543_vm0, %v12063_v49  ;;  %v9259_v49 = vld [vmem:[%s9832_s25 + $0x3e4] sm:$0xf]  ;;  %v9276_v23 = vld [vmem:[%s9832_s25 + $0x404] sm:$0xf0] }
 0x665   : > { %v12370_v34 = vor.u32 %v9259_v49, %v8508_v32 }
 0x668   : > { %v5482_v24 = vpop.f32.mrf.mxu3 }
 0x669   : > { %v5016_v53 = vpop.f32.mrf.mxu1  ;;  %v5571_v52 = vpop.f32.mrf.mxu0 }
 0x66a   : > { %v5017_v42 = vadd.f32 %v12104_v10, %v5016_v53  ;;  %v5572_v16 = vadd.f32 %v5571_v52, %v5482_v24  ;;  %v12360_v18 = vpop.f32.mrf.mxu2  ;;  %v8523_v53 = vor.u32 %v9276_v23, %v8522_v21  ;;  %v8706_v23 = vld [vmem:[%s9832_s25 + $0x340] sm:$0xf] }
 0x66c   : > { %v9548_v30 = vpack.c.bf16 %v5017_v42, %v5015_v50  ;;  %v12362_v29 = vadd.f32 %v5756_v4, %v5572_v16  ;;  %v9275_v16 = vld [vmem:[%s9832_s25 + $0x404] sm:$0xf] }
 0x66d   : > { %5524 = vmatmul.bf16.gmra.mxu3 %v8507_v56 }
 0x66e   : > { %9696 = vst [vmem:[%s10423_s12 + $0x150] sm:$0xff] %v9548_v30   ;;  %5808 = vmatmul.bf16.gmra.mxu2 %v8507_v56 }
 0x670   : > { %v5485_v43 = vpop.f32.mrf.mxu3 }
 0x671   : > { %v5019_v15 = vpop.f32.mrf.mxu1  ;;  %v5574_v19 = vpop.f32.mrf.mxu0 }
 0x672   : > { %v5575_v12 = vadd.f32 %v5574_v19, %v5485_v43  ;;  %v5769_v4 = vpop.f32.mrf.mxu2  ;;  %v5020_v25 = vadd.f32 %v12104_v10, %v5019_v15 }
 0x674   : > { %v12372_v40 = vadd.f32 %v5759_v6, %v5575_v12  ;;  %8596 = vmatmul.msk.bf16.gmra.mxu0 %vm543_vm0, %v12370_v34  ;;  %8667 = vmatmul.msk.bf16.gmra.mxu1 %vm543_vm0, %v12088_v1  ;;  %v8516_v1 = vld [vmem:[%s9832_s25 + $0x3f8] sm:$0xf0]  ;;  %v8530_v12 = vld [vmem:[%s9832_s25 + $0x410] sm:$0xf] }
 0x675   : > { %v12389_v33 = vor.u32 %v9261_v31, %v8516_v1  ;;  %v8532_v31 = vld [vmem:[%s9832_s25 + $0x418] sm:$0xf0] }
 0x678   : > { %v5487_v58 = vpop.f32.mrf.mxu3 }
 0x679   : > { %v5021_v44 = vpop.f32.mrf.mxu1  ;;  %v5576_v54 = vpop.f32.mrf.mxu0 }
 0x67a   : > { %v5022_v20 = vadd.f32 %v12104_v10, %v5021_v44  ;;  %v12382_v6 = vadd.f32 %v5576_v54, %v5487_v58  ;;  %v12384_v2 = vpop.f32.mrf.mxu2  ;;  %v8531_v54 = vor.u32 %v9278_v47, %v8530_v12 }
 0x67c   : > { %v9553_v48 = vpack.c.bf16 %v5022_v20, %v5020_v25 }
 0x67d   : > { %5529 = vmatmul.bf16.gmra.mxu3 %v8515_v38 }
 0x67e   : > { %9697 = vst [vmem:[%s10423_s12 + $0x158] sm:$0xff] %v9553_v48   ;;  %5813 = vmatmul.bf16.gmra.mxu2 %v8515_v38  ;;  %v9277_v48 = vld [vmem:[%s9832_s25 + $0x414] sm:$0xf] }
 0x680   : > { %v5490_v36 = vpop.f32.mrf.mxu3 }
 0x681   : > { %v5024_v7 = vpop.f32.mrf.mxu1  ;;  %v5579_v11 = vpop.f32.mrf.mxu0 }
 0x682   : > { %v5580_v28 = vadd.f32 %v5579_v11, %v5490_v36  ;;  %v5774_v60 = vpop.f32.mrf.mxu2  ;;  %v5025_v52 = vadd.f32 %v12104_v10, %v5024_v7  ;;  %v8535_v36 = vor.u32 %v9277_v48, %v8532_v31 }
 0x684   : > { %v12391_v51 = vadd.f32 %v5764_v8, %v5580_v28  ;;  %8597 = vmatmul.msk.bf16.gmra.mxu0 %vm543_vm0, %v12389_v33  ;;  %8668 = vmatmul.msk.bf16.gmra.mxu1 %vm543_vm0, %v12116_v35  ;;  %v8524_v35 = vld [vmem:[%s9832_s25 + $0x408] sm:$0xf0] }
 0x685   : > { %v8527_v49 = vor.u32 %v9275_v16, %v8524_v35 }
 0x688   : > { %v5492_v14 = vpop.f32.mrf.mxu3 }
 0x689   : > { %v5026_v22 = vpop.f32.mrf.mxu1  ;;  %v5581_v24 = vpop.f32.mrf.mxu0 }
 0x68a   : > { %v5027_v56 = vadd.f32 %v12104_v10, %v5026_v22  ;;  %v12401_v8 = vadd.f32 %v5581_v24, %v5492_v14  ;;  %v12403_v50 = vpop.f32.mrf.mxu2  ;;  %v9292_v14 = vld [vmem:[%s9832_s25 + $0x344] sm:$0xf0] }
 0x68c   : > { %v9558_v42 = vpack.c.bf16 %v5027_v56, %v5025_v52  ;;  %v8707_v56 = vor.u32 %v9292_v14, %v8706_v23 }
 0x68d   : > { %5534 = vmatmul.bf16.gmra.mxu3 %v8523_v53 }
 0x68e   : > { %9698 = vst [vmem:[%s10423_s12 + $0x160] sm:$0xff] %v9558_v42  }
 0x690   : > { %v5495_v30 = vpop.f32.mrf.mxu3 }
 0x691   : > { %v5029_v32 = vpop.f32.mrf.mxu1  ;;  %v5584_v63 = vpop.f32.mrf.mxu0 }
 0x692   : > { %v5585_v43 = vadd.f32 %v5584_v63, %v5495_v30  ;;  %v5779_v19 = vpop.f32.mrf.mxu2  ;;  %v5030_v38 = vadd.f32 %v12104_v10, %v5029_v32  ;;  %v9291_v30 = vld [vmem:[%s9832_s25 + $0x344] sm:$0xf] }
 0x694   : > { %v12408_v15 = vadd.f32 %v5769_v4, %v5585_v43  ;;  %8598 = vmatmul.msk.bf16.gmra.mxu0 %vm543_vm0, %v8527_v49  ;;  %8669 = vmatmul.msk.bf16.gmra.mxu1 %vm543_vm0, %v12148_v13  ;;  %v8708_v49 = vld [vmem:[%s9832_s25 + $0x348] sm:$0xf0] }
 0x695   : > { %v8711_v32 = vor.u32 %v9291_v30, %v8708_v49  ;;  %v9295_v30 = vld [vmem:[%s9832_s25 + $0x364] sm:$0xf] }
 0x698   : > { %v5497_v37 = vpop.f32.mrf.mxu3 }
 0x699   : > { %v5031_v58 = vpop.f32.mrf.mxu1  ;;  %v5586_v44 = vpop.f32.mrf.mxu0 }
 0x69a   : > { %v5032_v25 = vadd.f32 %v12104_v10, %v5031_v58  ;;  %v12417_v4 = vadd.f32 %v5586_v44, %v5497_v37  ;;  %v12422_v13 = vpop.f32.mrf.mxu2  ;;  %v8714_v58 = vld [vmem:[%s9832_s25 + $0x350] sm:$0xf]  ;;  %v9294_v44 = vld [vmem:[%s9832_s25 + $0x354] sm:$0xf0] }
 0x69c   : > { %v9563_v20 = vpack.c.bf16 %v5032_v25, %v5030_v38 }
 0x69d   : > { %5539 = vmatmul.bf16.gmra.mxu3 %v8531_v54 }
 0x69e   : > { %9699 = vst [vmem:[%s10423_s12 + $0x168] sm:$0xff] %v9563_v20   ;;  %v8715_v20 = vor.u32 %v9294_v44, %v8714_v58  ;;  %v9298_v58 = vld [vmem:[%s9832_s25 + $0x374] sm:$0xf0] }
 0x6a0   : > { %v5500_v1 = vpop.f32.mrf.mxu3 }
 0x6a1   : > { %v5034_v7 = vpop.f32.mrf.mxu1  ;;  %v5589_v11 = vpop.f32.mrf.mxu0 }
 0x6a2   : > { %v5590_v28 = vadd.f32 %v5589_v11, %v5500_v1  ;;  %v5784_v24 = vpop.f32.mrf.mxu2  ;;  %v5035_v42 = vadd.f32 %v12104_v10, %v5034_v7 }
 0x6a4   : > { %v12424_v21 = vadd.f32 %v5774_v60, %v5590_v28  ;;  %8599 = vmatmul.msk.bf16.gmra.mxu0 %vm543_vm0, %v8535_v36  ;;  %8670 = vmatmul.msk.bf16.gmra.mxu1 %vm543_vm0, %v12171_v62  ;;  %v8716_v36 = vld [vmem:[%s9832_s25 + $0x358] sm:$0xf0] }
 0x6a8   : > { %v5502_v22 = vpop.f32.mrf.mxu3 }
 0x6a9   : > { %v5036_v53 = vpop.f32.mrf.mxu1  ;;  %v5591_v52 = vpop.f32.mrf.mxu0 }
 0x6aa   : > { %v5037_v16 = vadd.f32 %v12104_v10, %v5036_v53  ;;  %v12433_v60 = vadd.f32 %v5591_v52, %v5502_v22  ;;  %v12438_v47 = vpop.f32.mrf.mxu2  ;;  %v9296_v53 = vld [vmem:[%s9832_s25 + $0x364] sm:$0xf0] }
 0x6ac   : > { %v9568_v35 = vpack.c.bf16 %v5037_v16, %v5035_v42 }
 0x6ad   : > { %6236 = vmatmul.bf16.vlgmr.msra.gmra.mxu3 %v8707_v56 }
 0x6ae   : > { %9700 = vst [vmem:[%s10423_s12 + $0x170] sm:$0xff] %v9568_v35  }
 0x6b0   : > { %v5505_v62 = vpop.f32.mrf.mxu3 }
 0x6b1   : > { %v5039_v63 = vpop.f32.mrf.mxu1  ;;  %v5594_v43 = vpop.f32.mrf.mxu0 }
 0x6b2   : > { %v5595_v12 = vadd.f32 %v5594_v43, %v5505_v62  ;;  %v5040_v48 = vadd.f32 %v12104_v10, %v5039_v63  ;;  %v5789_v7 = vpop.f32.mrf.mxu2 }
 0x6b4   : > { %v12440_v37 = vadd.f32 %v5779_v19, %v5595_v12  ;;  %8671 = vmatmul.msk.bf16.gmra.mxu1 %vm543_vm0, %v12197_v0  ;;  %8880 = vmatmul.msk.bf16.vlgmr.msra.gmra.mxu0 %vm543_vm0, %v8711_v32  ;;  %v9293_v0 = vld [vmem:[%s9832_s25 + $0x354] sm:$0xf]  ;;  %v8730_v12 = vld [vmem:[%s9832_s25 + $0x370] sm:$0xf] }
 0x6b5   : > { %v8719_v28 = vor.u32 %v9293_v0, %v8716_v36 }
 0x6b8   : > { %v5507_v54 = vpop.f32.mrf.mxu3 }
 0x6b9   : > { %v5041_v38 = vpop.f32.mrf.mxu1  ;;  %v5596_v25 = vpop.f32.mrf.mxu0 }
 0x6ba   : > { %v5042_v31 = vadd.f32 %v12104_v10, %v5041_v38  ;;  %v12449_v19 = vadd.f32 %v5596_v25, %v5507_v54  ;;  %v8722_v10 = vld [vmem:[%s9832_s25 + $0x360] sm:$0xf]  ;;  %v12461_v52 = vpop.f32.mrf.mxu2  ;;  %v8731_v38 = vor.u32 %v9298_v58, %v8730_v12  ;;  %v9302_v12 = vld [vmem:[%s9832_s25 + $0x394] sm:$0xf0] }
 0x6bb   : > { %v8723_v16 = vor.u32 %v9296_v53, %v8722_v10 }
 0x6bc   : > { %v9573_v1 = vpack.c.bf16 %v5042_v31, %v5040_v48  ;;  %v9297_v48 = vld [vmem:[%s9832_s25 + $0x374] sm:$0xf]  ;;  %v8732_v31 = vld [vmem:[%s9832_s25 + $0x378] sm:$0xf0] }
 0x6bd   : > { %6241 = vmatmul.bf16.gmra.mxu3 %v8715_v20 }
 0x6be   : > { %9701 = vst [vmem:[%s10423_s12 + $0x178] sm:$0xff] %v9573_v1  }
 0x6c0   : > { %v5510_v11 = vpop.f32.mrf.mxu3 }
 0x6c1   : > { %v5599_v23 = vpop.f32.mrf.mxu0 }
 0x6c2   : > { %v5600_v14 = vadd.f32 %v5599_v23, %v5510_v11  ;;  %v5794_v32 = vpop.f32.mrf.mxu2  ;;  %v9300_v23 = vld [vmem:[%s9832_s25 + $0x384] sm:$0xf0] }
 0x6c4   : > { %v12454_v22 = vadd.f32 %v5784_v24, %v5600_v14  ;;  %8672 = vmatmul.msk.bf16.gmra.mxu1 %vm543_vm0, %v12220_v39  ;;  %8881 = vmatmul.msk.bf16.gmra.mxu0 %vm543_vm0, %v8719_v28  ;;  %v8724_v24 = vld [vmem:[%s9832_s25 + $0x368] sm:$0xf0]  ;;  %v8738_v28 = vld [vmem:[%s9832_s25 + $0x380] sm:$0xf] }
 0x6c5   : > { %v8727_v62 = vor.u32 %v9295_v30, %v8724_v24  ;;  %v8739_v53 = vor.u32 %v9300_v23, %v8738_v28  ;;  %v12491_v30 = vpop.f32.mrf.mxu1 }
 0x6c8   : > { %v5512_v56 = vpop.f32.mrf.mxu3 }
 0x6c9   : > { %v5601_v42 = vpop.f32.mrf.mxu0 }
 0x6ca   : > { %v12463_v35 = vadd.f32 %v5601_v42, %v5512_v56  ;;  %v12476_v20 = vpop.f32.mrf.mxu2  ;;  %v9299_v42 = vld [vmem:[%s9832_s25 + $0x384] sm:$0xf] }
 0x6cd   : > { %6246 = vmatmul.bf16.gmra.mxu3 %v8723_v16  ;;  %v8740_v16 = vld [vmem:[%s9832_s25 + $0x388] sm:$0xf0]  ;;  %v12502_v58 = vpop.f32.mrf.mxu1 }
 0x6d0   : > { %v5515_v49 = vpop.f32.mrf.mxu3 }
 0x6d1   : > { %v5604_v39 = vpop.f32.mrf.mxu0 }
 0x6d2   : > { %v5605_v63 = vadd.f32 %v5604_v39, %v5515_v49  ;;  %v5799_v11 = vpop.f32.mrf.mxu2  ;;  %v8743_v49 = vor.u32 %v9299_v42, %v8740_v16 }
 0x6d4   : > { %v12467_v43 = vadd.f32 %v5789_v7, %v5605_v63  ;;  %8673 = vmatmul.msk.bf16.gmra.mxu1 %vm543_vm0, %v12255_v59  ;;  %8882 = vmatmul.msk.bf16.gmra.mxu0 %vm543_vm0, %v8727_v62  ;;  %v8735_v59 = vor.u32 %v9297_v48, %v8732_v31  ;;  %v8746_v63 = vld [vmem:[%s9832_s25 + $0x390] sm:$0xf] }
 0x6d8   : > { %v5517_v44 = vpop.f32.mrf.mxu3 }
 0x6d9   : > { %v5606_v54 = vpop.f32.mrf.mxu0 }
 0x6da   : > { %v12474_v25 = vadd.f32 %v5606_v54, %v5517_v44  ;;  %v12493_v24 = vpop.f32.mrf.mxu2 }
 0x6dd   : > { %6251 = vmatmul.bf16.gmra.mxu3 %v8731_v38  ;;  %v8747_v38 = vor.u32 %v9302_v12, %v8746_v63  ;;  %v9303_v63 = vld [vmem:[%s9832_s25 + $0x3a4] sm:$0xf]  ;;  %v8756_v12 = vld [vmem:[%s9832_s25 + $0x3a8] sm:$0xf0] }
 0x6e0   : > { %v5520_v1 = vpop.f32.mrf.mxu3 }
 0x6e1   : > { %v5609_v0 = vpop.f32.mrf.mxu0 }
 0x6e2   : > { %v5610_v36 = vadd.f32 %v5609_v0, %v5520_v1  ;;  %v5804_v48 = vpop.f32.mrf.mxu2  ;;  %v9301_v1 = vld [vmem:[%s9832_s25 + $0x394] sm:$0xf] }
 0x6e4   : > { %v12480_v7 = vadd.f32 %v5794_v32, %v5610_v36  ;;  %8674 = vmatmul.msk.bf16.gmra.mxu1 %vm543_vm0, %v12281_v61  ;;  %8883 = vmatmul.msk.bf16.gmra.mxu0 %vm543_vm0, %v8735_v59  ;;  %v8748_v59 = vld [vmem:[%s9832_s25 + $0x398] sm:$0xf0] }
 0x6e5   : > { %v8751_v36 = vor.u32 %v9301_v1, %v8748_v59  ;;  %v8762_v59 = vld [vmem:[%s9832_s25 + $0x3b0] sm:$0xf] }
 0x6e8   : > { %v5522_v14 = vpop.f32.mrf.mxu3 }
 0x6e9   : > { %v5611_v10 = vpop.f32.mrf.mxu0 }
 0x6ea   : > { %v12487_v56 = vadd.f32 %v5611_v10, %v5522_v14  ;;  %v12510_v23 = vpop.f32.mrf.mxu2  ;;  %v8754_v10 = vld [vmem:[%s9832_s25 + $0x3a0] sm:$0xf] }
 0x6ed   : > { %6256 = vmatmul.bf16.gmra.mxu3 %v8739_v53  ;;  %v9304_v53 = vld [vmem:[%s9832_s25 + $0x3a4] sm:$0xf0] }
 0x6f0   : > { %v5525_v61 = vpop.f32.mrf.mxu3 }
 0x6f1   : > { %v5614_v62 = vpop.f32.mrf.mxu0 }
 0x6f2   : > { %v5615_v39 = vadd.f32 %v5614_v62, %v5525_v61  ;;  %v8755_v61 = vor.u32 %v9304_v53, %v8754_v10 }
 0x6f4   : > { %v12495_v32 = vadd.f32 %v5799_v11, %v5615_v39  ;;  %8675 = vmatmul.msk.bf16.gmra.mxu1 %vm543_vm0, %v12303_v3  ;;  %8884 = vmatmul.msk.bf16.gmra.mxu0 %vm543_vm0, %v8743_v49  ;;  %v12508_v11 = vpop.f32.mrf.mxu1  ;;  %v5809_v39 = vpop.f32.mrf.mxu2 }
 0x6f8   : > { %v5527_v44 = vpop.f32.mrf.mxu3 }
 0x6f9   : > { %v5616_v54 = vpop.f32.mrf.mxu0 }
 0x6fa   : > { %v12504_v31 = vadd.f32 %v5616_v54, %v5527_v44 }
 0x6fc   : > { %v12521_v62 = vpop.f32.mrf.mxu1 }
 0x6fd   : > { %6261 = vmatmul.bf16.gmra.mxu3 %v8747_v38 }
 0x700   : > { %v5530_v0 = vpop.f32.mrf.mxu3 }
 0x701   : > { %v5619_v3 = vpop.f32.mrf.mxu0 }
 0x702   : > { %v5620_v28 = vadd.f32 %v5619_v3, %v5530_v0  ;;  %v9306_v0 = vld [vmem:[%s9832_s25 + $0x3b4] sm:$0xf0] }
 0x703   : > { %v8763_v10 = vor.u32 %v9306_v0, %v8762_v59 }
 0x704   : > { %v12512_v14 = vadd.f32 %v5804_v48, %v5620_v28  ;;  %8676 = vmatmul.msk.bf16.gmra.mxu1 %vm543_vm0, %v12326_v41  ;;  %8885 = vmatmul.msk.bf16.gmra.mxu0 %vm543_vm0, %v8751_v36  ;;  %v8759_v41 = vor.u32 %v9303_v63, %v8756_v12  ;;  %v12530_v1 = vpop.f32.mrf.mxu1  ;;  %v12534_v36 = vpop.f32.mrf.mxu2 }
 0x708   : > { %v5532_v42 = vpop.f32.mrf.mxu3 }
 0x709   : > { %v5621_v16 = vpop.f32.mrf.mxu0 }
 0x70a   : > { %v12519_v49 = vadd.f32 %v5621_v16, %v5532_v42  ;;  %v9305_v42 = vld [vmem:[%s9832_s25 + $0x3b4] sm:$0xf]  ;;  %v8764_v16 = vld [vmem:[%s9832_s25 + $0x3b8] sm:$0xf0] }
 0x70c   : > { %v5814_v12 = vpop.f32.mrf.mxu2 }
 0x70d   : > { %6266 = vmatmul.bf16.gmra.mxu3 %v8755_v61  ;;  %v12540_v61 = vpop.f32.mrf.mxu1 }
 0x710   : > { %v5535_v44 = vpop.f32.mrf.mxu3 }
 0x711   : > { %v5624_v54 = vpop.f32.mrf.mxu0 }
 0x712   : > { %v5625_v38 = vadd.f32 %v5624_v54, %v5535_v44  ;;  %v8770_v54 = vld [vmem:[%s9832_s25 + $0x3c0] sm:$0xf] }
 0x714   : > { %v12525_v48 = vadd.f32 %v5809_v39, %v5625_v38  ;;  %8677 = vmatmul.msk.bf16.gmra.mxu1 %vm543_vm0, %v12348_v57  ;;  %8886 = vmatmul.msk.bf16.gmra.mxu0 %vm543_vm0, %v8759_v41  ;;  %v8767_v39 = vor.u32 %v9305_v42, %v8764_v16  ;;  %v9308_v38 = vld [vmem:[%s9832_s25 + $0x3c4] sm:$0xf0]  ;;  %v9307_v42 = vld [vmem:[%s9832_s25 + $0x3c4] sm:$0xf]  ;;  %v8772_v16 = vld [vmem:[%s9832_s25 + $0x3c8] sm:$0xf0] }
 0x718   : > { %v5537_v3 = vpop.f32.mrf.mxu3 }
 0x719   : > { %v5626_v28 = vpop.f32.mrf.mxu0 }
 0x71a   : > { %v12536_v53 = vadd.f32 %v5626_v28, %v5537_v3  ;;  %v8771_v3 = vor.u32 %v9308_v38, %v8770_v54  ;;  %v12549_v28 = vpop.f32.mrf.mxu1  ;;  %v8778_v54 = vld [vmem:[%s9832_s25 + $0x3d0] sm:$0xf]  ;;  %v9310_v38 = vld [vmem:[%s9832_s25 + $0x3d4] sm:$0xf0] }
 0x71d   : > { %6271 = vmatmul.bf16.gmra.mxu3 %v8763_v10 }
 0x720   : > { %v5540_v57 = vpop.f32.mrf.mxu3 }
 0x721   : > { %v5629_v63 = vpop.f32.mrf.mxu0 }
 0x722   : > { %v5630_v44 = vadd.f32 %v5629_v63, %v5540_v57  ;;  %v8775_v63 = vor.u32 %v9307_v42, %v8772_v16  ;;  %v8779_v42 = vor.u32 %v9310_v38, %v8778_v54  ;;  %v5831_v16 = vadd.f32 %v12502_v58, %v12296_v5 }
 0x724   : > { %v12542_v41 = vadd.f32 %v5814_v12, %v5630_v44  ;;  %8678 = vmatmul.msk.bf16.gmra.mxu1 %vm543_vm0, %v12370_v34  ;;  %8887 = vmatmul.msk.bf16.gmra.mxu0 %vm543_vm0, %v8767_v39  ;;  %v12555_v34 = vpop.f32.mrf.mxu1  ;;  %v5829_v44 = vadd.f32 %v12491_v30, %v12284_v45  ;;  %v9309_v45 = vld [vmem:[%s9832_s25 + $0x3d4] sm:$0xf]  ;;  %v8780_v30 = vld [vmem:[%s9832_s25 + $0x3d8] sm:$0xf0] }
 0x725   : > { %v8783_v5 = vor.u32 %v9309_v45, %v8780_v30  ;;  %v5836_v30 = vadd.f32 %v12521_v62, %v12316_v46 }
 0x728   : > { %v5542_v59 = vpop.f32.mrf.mxu3 }
 0x729   : > { %v5631_v0 = vpop.f32.mrf.mxu0 }
 0x72a   : > { %v12551_v10 = vadd.f32 %v5631_v0, %v5542_v59 }
 0x72c   : > { %12836 = vst [vmem:[#allocation3_spill] sm:$0xff] %v12551_v10  ;;  %v12575_v58 = vpop.f32.mrf.mxu1 }
 0x72d   : > { %6276 = vmatmul.bf16.gmra.mxu3 %v8771_v3 }
 0x730   : > { %v6237_v57 = vpop.f32.mrf.mxu3 }
 0x731   : > { %v6326_v12 = vpop.f32.mrf.mxu0 }
 0x732   : > { %v6327_v39 = vadd.f32 %v6326_v12, %v6237_v57 }
 0x734   : > { %8679 = vmatmul.msk.bf16.gmra.mxu1 %vm543_vm0, %v12389_v33  ;;  %8888 = vmatmul.msk.bf16.gmra.mxu0 %vm543_vm0, %v8775_v63  ;;  %v6406_v59 = vadd.f32 %v6327_v39, %v5829_v44  ;;  %v12569_v33 = vld [vmem:[%s12781_s2] ss:$0 sm:$0xff] }
 0x736   : > { %v6438_v63 = vadd.f32 %v12569_v33, %v6406_v59  ;;  %v5834_v59 = vadd.f32 %v12508_v11, %v12306_v17  ;;  %v8788_v17 = vld [vmem:[%s9832_s25 + $0x3e8] sm:$0xf0] }
 0x738   : > { %v6239_v0 = vpop.f32.mrf.mxu3  ;;  %v6470_v44 = vmax.f32 %v6438_v63, 0.0 }
 0x739   : > { %v6328_v3 = vpop.f32.mrf.mxu0 }
 0x73a   : > { %v6329_v57 = vadd.f32 %v6328_v3, %v6239_v0 }
 0x73c   : > { %v6407_v12 = vadd.f32 %v6329_v57, %v5831_v16  ;;  %v9312_v16 = vld [vmem:[%s9832_s25 + $0x3e4] sm:$0xf0] }
 0x73d   : > { %6281 = vmatmul.bf16.gmra.mxu3 %v8779_v42  ;;  %v8786_v42 = vld [vmem:[%s9832_s25 + $0x3e0] sm:$0xf] }
 0x73e   : > { %v6439_v39 = vadd.f32 %v12569_v33, %v6407_v12  ;;  %v8787_v45 = vor.u32 %v9312_v16, %v8786_v42 }
 0x740   : > { %v6471_v54 = vmax.f32 %v6439_v39, 0.0  ;;  %v6242_v38 = vpop.f32.mrf.mxu3 }
 0x741   : > { %v6331_v0 = vpop.f32.mrf.mxu0 }
 0x742   : > { %v6502_v3 = vpack.c.bf16 %v6471_v54, %v6470_v44  ;;  %v6332_v10 = vadd.f32 %v6331_v0, %v6242_v38  ;;  %v12585_v44 = vpop.f32.mrf.mxu1 }
 0x744   : > { %8889 = vmatmul.msk.bf16.gmra.mxu0 %vm543_vm0, %v8783_v5  ;;  %8896 = vmatmul.msk.bf16.vlgmr.msra.gmra.mxu2 %vm543_vm0, %v6502_v3  ;;  %v6408_v57 = vadd.f32 %v6332_v10, %v5834_v59  ;;  %v9311_v5 = vld [vmem:[%s9832_s25 + $0x3e4] sm:$0xf] }
 0x745   : > { %v8791_v59 = vor.u32 %v9311_v5, %v8788_v17 }
 0x746   : > { %v6440_v54 = vadd.f32 %v12569_v33, %v6408_v57  ;;  %v5839_v57 = vadd.f32 %v12530_v1, %v12328_v55 }
 0x748   : > { %v6244_v63 = vpop.f32.mrf.mxu3  ;;  %v6472_v10 = vmax.f32 %v6440_v54, 0.0 }
 0x749   : > { %v6333_v12 = vpop.f32.mrf.mxu0 }
 0x74a   : > { %v6334_v39 = vadd.f32 %v6333_v12, %v6244_v63  ;;  %v12593_v62 = vpop.f32.mrf.mxu1  ;;  %v8794_v63 = vld [vmem:[%s9832_s25 + $0x3f0] sm:$0xf]  ;;  %v9314_v12 = vld [vmem:[%s9832_s25 + $0x3f4] sm:$0xf0] }
 0x74b   : > { %v8795_v54 = vor.u32 %v9314_v12, %v8794_v63  ;;  %v8802_v63 = vld [vmem:[%s9832_s25 + $0x400] sm:$0xf]  ;;  %v9316_v12 = vld [vmem:[%s9832_s25 + $0x404] sm:$0xf0] }
 0x74c   : > { %v6409_v38 = vadd.f32 %v6334_v39, %v5836_v30 }
 0x74d   : > { %6286 = vmatmul.bf16.gmra.mxu3 %v8787_v45 }
 0x74e   : > { %v6441_v11 = vadd.f32 %v12569_v33, %v6409_v38  ;;  %v5841_v38 = vadd.f32 %v12540_v61, %v12343_v27  ;;  %v5844_v61 = vadd.f32 %v12549_v28, %v12350_v26  ;;  %v8804_v26 = vld [vmem:[%s9832_s25 + $0x408] sm:$0xf0] }
 0x750   : > { %v6473_v0 = vmax.f32 %v6441_v11, 0.0  ;;  %v6247_v3 = vpop.f32.mrf.mxu3 }
 0x751   : > { %v6336_v42 = vpop.f32.mrf.mxu0 }
 0x752   : > { %v6503_v16 = vpack.c.bf16 %v6473_v0, %v6472_v10  ;;  %v6337_v46 = vadd.f32 %v6336_v42, %v6247_v3  ;;  %v9313_v10 = vld [vmem:[%s9832_s25 + $0x3f4] sm:$0xf]  ;;  %v8796_v0 = vld [vmem:[%s9832_s25 + $0x3f8] sm:$0xf0]  ;;  %v12605_v1 = vpop.f32.mrf.mxu1 }
 0x754   : > { %8890 = vmatmul.msk.bf16.gmra.mxu0 %vm543_vm0, %v8791_v59  ;;  %8897 = vmatmul.msk.bf16.gmra.mxu2 %vm543_vm0, %v6503_v16  ;;  %v6410_v45 = vadd.f32 %v6337_v46, %v5839_v57  ;;  %v8799_v16 = vor.u32 %v9313_v10, %v8796_v0  ;;  %v9315_v0 = vld [vmem:[%s9832_s25 + $0x404] sm:$0xf] }
 0x756   : > { %v6442_v17 = vadd.f32 %v12569_v33, %v6410_v45 }
 0x758   : > { %v6249_v30 = vpop.f32.mrf.mxu3  ;;  %v6474_v3 = vmax.f32 %v6442_v17, 0.0 }
 0x759   : > { %v6338_v39 = vpop.f32.mrf.mxu0 }
 0x75a   : > { %v6339_v5 = vadd.f32 %v6338_v39, %v6249_v30  ;;  %v12613_v39 = vpop.f32.mrf.mxu1 }
 0x75c   : > { %v6411_v11 = vadd.f32 %v6339_v5, %v5841_v38  ;;  %v8803_v38 = vor.u32 %v9316_v12, %v8802_v63  ;;  %v5846_v5 = vadd.f32 %v12555_v34, %v12362_v29  ;;  %v5849_v34 = vadd.f32 %v12575_v58, %v12372_v40  ;;  %v9317_v40 = vld [vmem:[%s9832_s25 + $0x414] sm:$0xf]  ;;  %v8812_v58 = vld [vmem:[%s9832_s25 + $0x418] sm:$0xf0] }
 0x75d   : > { %6291 = vmatmul.bf16.gmra.mxu3 %v8795_v54  ;;  %v5762_v63 = vadd.f32 %v12340_v9, %v12382_v6 }
 0x75e   : > { %v6443_v55 = vadd.f32 %v12569_v33, %v6411_v11 }
 0x760   : > { %v6475_v59 = vmax.f32 %v6443_v55, 0.0  ;;  %v6252_v42 = vpop.f32.mrf.mxu3 }
 0x761   : > { %v6341_v46 = vpop.f32.mrf.mxu0 }
 0x762   : > { %v6504_v57 = vpack.c.bf16 %v6475_v59, %v6474_v3  ;;  %v6342_v27 = vadd.f32 %v6341_v46, %v6252_v42  ;;  %v8807_v42 = vor.u32 %v9315_v0, %v8804_v26 }
 0x764   : > { %8891 = vmatmul.msk.bf16.gmra.mxu0 %vm543_vm0, %v8799_v16  ;;  %8898 = vmatmul.msk.bf16.gmra.mxu2 %vm543_vm0, %v6504_v57  ;;  %v6412_v45 = vadd.f32 %v6342_v27, %v5844_v61  ;;  %v12621_v57 = vpop.f32.mrf.mxu1  ;;  %v8810_v27 = vld [vmem:[%s9832_s25 + $0x410] sm:$0xf]  ;;  %v9318_v61 = vld [vmem:[%s9832_s25 + $0x414] sm:$0xf0] }
 0x766   : > { %v6444_v11 = vadd.f32 %v12569_v33, %v6412_v45 }
 0x768   : > { %v6254_v30 = vpop.f32.mrf.mxu3  ;;  %v6476_v55 = vmax.f32 %v6444_v11, 0.0 }
 0x769   : > { %v6343_v54 = vpop.f32.mrf.mxu0 }
 0x76a   : > { %v6344_v17 = vadd.f32 %v6343_v54, %v6254_v30  ;;  %v8811_v54 = vor.u32 %v9318_v61, %v8810_v27 }
 0x76c   : > { %v6413_v10 = vadd.f32 %v6344_v17, %v5846_v5 }
 0x76d   : > { %6296 = vmatmul.bf16.gmra.mxu3 %v8803_v38  ;;  %v5851_v38 = vadd.f32 %v12585_v44, %v5762_v63 }
 0x76e   : > { %v6445_v28 = vadd.f32 %v12569_v33, %v6413_v10  ;;  %v12633_v10 = vpop.f32.mrf.mxu1 }
 0x770   : > { %v6477_v3 = vmax.f32 %v6445_v28, 0.0  ;;  %v6257_v59 = vpop.f32.mrf.mxu3  ;;  %v8815_v28 = vor.u32 %v9317_v40, %v8812_v58 }
 0x771   : > { %v6346_v16 = vpop.f32.mrf.mxu0 }
 0x772   : > { %v6505_v46 = vpack.c.bf16 %v6477_v3, %v6476_v55  ;;  %v6347_v29 = vadd.f32 %v6346_v16, %v6257_v59  ;;  %v5854_v59 = vadd.f32 %v12593_v62, %v12391_v51  ;;  %v9320_v16 = vld [vmem:[%s9832_s25 + $0x424] sm:$0xf0]  ;;  %v9319_v51 = vld [vmem:[%s9832_s25 + $0x424] sm:$0xf]  ;;  %v8820_v62 = vld [vmem:[%s9832_s25 + $0x428] sm:$0xf0] }
 0x774   : > { %8892 = vmatmul.msk.bf16.gmra.mxu0 %vm543_vm0, %v8807_v42  ;;  %8899 = vmatmul.msk.bf16.gmra.mxu2 %vm543_vm0, %v6505_v46  ;;  %v6414_v12 = vadd.f32 %v6347_v29, %v5849_v34  ;;  %v8818_v42 = vld [vmem:[%s9832_s25 + $0x420] sm:$0xf]  ;;  %v5767_v29 = vadd.f32 %v12360_v18, %v12401_v8  ;;  %v8823_v8 = vor.u32 %v9319_v51, %v8820_v62 }
 0x775   : > { %v8819_v63 = vor.u32 %v9320_v16, %v8818_v42  ;;  %v5777_v51 = vadd.f32 %v12403_v50, %v12433_v60  ;;  %v5782_v60 = vadd.f32 %v12422_v13, %v12449_v19 }
 0x776   : > { %v6446_v17 = vadd.f32 %v12569_v33, %v6414_v12  ;;  %v5865_v46 = vpop.f32.mrf.mxu1  ;;  %v5856_v12 = vadd.f32 %v12605_v1, %v5767_v29  ;;  %v5859_v1 = vadd.f32 %v12613_v39, %v12408_v15 }
 0x778   : > { %v6259_v45 = vpop.f32.mrf.mxu3  ;;  %v6478_v9 = vmax.f32 %v6446_v17, 0.0 }
 0x779   : > { %v6348_v30 = vpop.f32.mrf.mxu0 }
 0x77a   : > { %v6349_v5 = vadd.f32 %v6348_v30, %v6259_v45 }
 0x77c   : > { %v6415_v11 = vadd.f32 %v6349_v5, %v5851_v38 }
 0x77d   : > { %6301 = vmatmul.bf16.gmra.mxu3 %v8811_v54 }
 0x77e   : > { %v6447_v0 = vadd.f32 %v12569_v33, %v6415_v11  ;;  %v5868_v11 = vpop.f32.mrf.mxu1 }
 0x77f   : > { %v5869_v50 = vadd.f32 %v5868_v11, %v12440_v37 }
 0x780   : > { %v6479_v6 = vmax.f32 %v6447_v0, 0.0  ;;  %v6262_v26 = vpop.f32.mrf.mxu3 }
 0x781   : > { %v6351_v55 = vpop.f32.mrf.mxu0 }
 0x782   : > { %v6506_v3 = vpack.c.bf16 %v6479_v6, %v6478_v9  ;;  %v6352_v44 = vadd.f32 %v6351_v55, %v6262_v26  ;;  %v8826_v9 = vld [vmem:[%s9832_s25 + $0x430] sm:$0xf]  ;;  %v9322_v6 = vld [vmem:[%s9832_s25 + $0x434] sm:$0xf0]  ;;  %v5772_v26 = vadd.f32 %v12384_v2, %v12417_v4 }
 0x784   : > { %8893 = vmatmul.msk.bf16.gmra.mxu0 %vm543_vm0, %v8815_v28  ;;  %8900 = vmatmul.msk.bf16.gmra.mxu2 %vm543_vm0, %v6506_v3  ;;  %v6416_v34 = vadd.f32 %v6352_v44, %v5854_v59  ;;  %v8827_v44 = vor.u32 %v9322_v6, %v8826_v9  ;;  %v5861_v59 = vadd.f32 %v12621_v57, %v5772_v26 }
 0x786   : > { %v6448_v30 = vadd.f32 %v12569_v33, %v6416_v34  ;;  %v5870_v16 = vpop.f32.mrf.mxu1 }
 0x788   : > { %v6264_v27 = vpop.f32.mrf.mxu3  ;;  %v6480_v5 = vmax.f32 %v6448_v30, 0.0 }
 0x789   : > { %v6353_v61 = vpop.f32.mrf.mxu0 }
 0x78a   : > { %v6354_v45 = vadd.f32 %v6353_v61, %v6264_v27  ;;  %v9321_v27 = vld [vmem:[%s9832_s25 + $0x434] sm:$0xf]  ;;  %v8828_v61 = vld [vmem:[%s9832_s25 + $0x438] sm:$0xf0] }
 0x78b   : > { %v8831_v2 = vor.u32 %v9321_v27, %v8828_v61  ;;  %v12678_v27 = vpop.f32.mrf.mxu2 }
 0x78c   : > { %v6417_v54 = vadd.f32 %v6354_v45, %v5856_v12 }
 0x78d   : > { %6306 = vmatmul.bf16.gmra.mxu3 %v8819_v63 }
 0x78e   : > { %v6449_v38 = vadd.f32 %v12569_v33, %v6417_v54  ;;  %v5873_v57 = vpop.f32.mrf.mxu1  ;;  %v5864_v54 = vadd.f32 %v12633_v10, %v12424_v21 }
 0x78f   : > { %v5874_v19 = vadd.f32 %v5873_v57, %v12454_v22  ;;  %v12689_v22 = vld [vmem:[%s12783_s4] ss:$0 sm:$0xff] }
 0x790   : > { %v6481_v17 = vmax.f32 %v6449_v38, 0.0  ;;  %v6267_v18 = vpop.f32.mrf.mxu3 }
 0x791   : > { %v6356_v40 = vpop.f32.mrf.mxu0 }
 0x792   : > { %v6507_v58 = vpack.c.bf16 %v6481_v17, %v6480_v5  ;;  %v6357_v0 = vadd.f32 %v6356_v40, %v6267_v18  ;;  %v5866_v17 = vadd.f32 %v5865_v46, %v5777_v51 }
 0x794   : > { %8894 = vmatmul.msk.bf16.gmra.mxu0 %vm543_vm0, %v8823_v8  ;;  %8901 = vmatmul.msk.bf16.gmra.mxu2 %vm543_vm0, %v6507_v58  ;;  %v6418_v28 = vadd.f32 %v6357_v0, %v5859_v1 }
 0x796   : > { %v6450_v29 = vadd.f32 %v12569_v33, %v6418_v28  ;;  %v5875_v0 = vpop.f32.mrf.mxu1 }
 0x798   : > { %v6269_v55 = vpop.f32.mrf.mxu3  ;;  %v6482_v39 = vmax.f32 %v6450_v29, 0.0 }
 0x799   : > { %v6358_v3 = vpop.f32.mrf.mxu0 }
 0x79a   : > { %v6359_v42 = vadd.f32 %v6358_v3, %v6269_v55 }
 0x79c   : > { %v6419_v34 = vadd.f32 %v6359_v42, %v5861_v59 }
 0x79d   : > { %6311 = vmatmul.bf16.gmra.mxu3 %v8827_v44  ;;  %v5871_v44 = vadd.f32 %v5870_v16, %v5782_v60 }
 0x79e   : > { %v6451_v15 = vadd.f32 %v12569_v33, %v6419_v34  ;;  %v5878_v55 = vpop.f32.mrf.mxu1 }
 0x7a0   : > { %v6483_v63 = vmax.f32 %v6451_v15, 0.0  ;;  %v6272_v12 = vpop.f32.mrf.mxu3 }
 0x7a1   : > { %v6361_v4 = vpop.f32.mrf.mxu0 }
 0x7a2   : > { %v6508_v45 = vpack.c.bf16 %v6483_v63, %v6482_v39  ;;  %v6362_v30 = vadd.f32 %v6361_v4, %v6272_v12  ;;  %v5787_v12 = vadd.f32 %v12438_v47, %v12463_v35 }
 0x7a4   : > { %8895 = vmatmul.msk.bf16.gmra.mxu0 %vm543_vm0, %v8831_v2  ;;  %8902 = vmatmul.msk.bf16.gmra.mxu2 %vm543_vm0, %v6508_v45  ;;  %v6420_v62 = vadd.f32 %v6362_v30, %v5864_v54  ;;  %v5876_v30 = vadd.f32 %v5875_v0, %v5787_v12 }
 0x7a6   : > { %v6452_v8 = vadd.f32 %v12569_v33, %v6420_v62  ;;  %v5880_v63 = vpop.f32.mrf.mxu1 }
 0x7a8   : > { %v6274_v38 = vpop.f32.mrf.mxu3  ;;  %v6484_v1 = vmax.f32 %v6452_v8, 0.0 }
 0x7a9   : > { %v6363_v5 = vpop.f32.mrf.mxu0 }
 0x7aa   : > { %v6364_v18 = vadd.f32 %v6363_v5, %v6274_v38 }
 0x7ac   : > { %v6421_v40 = vadd.f32 %v6364_v18, %v5866_v17 }
 0x7ae   : > { %v6453_v58 = vadd.f32 %v12569_v33, %v6421_v40  ;;  %v5883_v38 = vpop.f32.mrf.mxu1 }
 0x7b0   : > { %v6485_v9 = vmax.f32 %v6453_v58, 0.0  ;;  %v6277_v6 = vpop.f32.mrf.mxu3 }
 0x7b1   : > { %v6366_v26 = vpop.f32.mrf.mxu0 }
 0x7b2   : > { %v6509_v28 = vpack.c.bf16 %v6485_v9, %v6484_v1  ;;  %v6367_v21 = vadd.f32 %v6366_v26, %v6277_v6  ;;  %v5879_v9 = vadd.f32 %v5878_v55, %v12467_v43 }
 0x7b4   : > { %8903 = vmatmul.msk.bf16.gmra.mxu2 %vm543_vm0, %v6509_v28  ;;  %v6422_v10 = vadd.f32 %v6367_v21, %v5869_v50  ;;  %v5792_v28 = vadd.f32 %v12461_v52, %v12474_v25 }
 0x7b6   : > { %v6454_v42 = vadd.f32 %v12569_v33, %v6422_v10  ;;  %v5885_v6 = vpop.f32.mrf.mxu1  ;;  %v5881_v10 = vadd.f32 %v5880_v63, %v5792_v28 }
 0x7b8   : > { %v6279_v46 = vpop.f32.mrf.mxu3  ;;  %v6486_v61 = vmax.f32 %v6454_v42, 0.0 }
 0x7b9   : > { %v6368_v3 = vpop.f32.mrf.mxu0 }
 0x7ba   : > { %v6369_v59 = vadd.f32 %v6368_v3, %v6279_v46 }
 0x7bc   : > { %v6423_v29 = vadd.f32 %v6369_v59, %v5871_v44 }
 0x7be   : > { %v6455_v34 = vadd.f32 %v12569_v33, %v6423_v29  ;;  %v5888_v52 = vpop.f32.mrf.mxu1 }
 0x7c0   : > { %v6487_v15 = vmax.f32 %v6455_v34, 0.0  ;;  %v6282_v39 = vpop.f32.mrf.mxu3 }
 0x7c1   : > { %v6371_v37 = vpop.f32.mrf.mxu0 }
 0x7c2   : > { %v6510_v11 = vpack.c.bf16 %v6487_v15, %v6486_v61  ;;  %v6372_v13 = vadd.f32 %v6371_v37, %v6282_v39 }
 0x7c4   : > { %8904 = vmatmul.msk.bf16.gmra.mxu2 %vm543_vm0, %v6510_v11  ;;  %v6424_v2 = vadd.f32 %v6372_v13, %v5874_v19  ;;  %v5884_v11 = vadd.f32 %v5883_v38, %v12480_v7  ;;  %v5797_v13 = vadd.f32 %v12476_v20, %v12487_v56 }
 0x7c6   : > { %v6456_v51 = vadd.f32 %v12569_v33, %v6424_v2  ;;  %v5886_v2 = vadd.f32 %v5885_v6, %v5797_v13 }
 0x7c7   : > { %v6575_v16 = vpop.f32.mrf.mxu2 }
 0x7c8   : > { %v6284_v4 = vpop.f32.mrf.mxu3  ;;  %v6488_v18 = vmax.f32 %v6456_v51, 0.0  ;;  %v6576_v47 = vadd.f32 %v12689_v22, %v6575_v16 }
 0x7c9   : > { %v6373_v45 = vpop.f32.mrf.mxu0 }
 0x7ca   : > { %v6374_v54 = vadd.f32 %v6373_v45, %v6284_v4  ;;  %v5890_v45 = vpop.f32.mrf.mxu1 }
 0x7cc   : > { %v6425_v62 = vadd.f32 %v6374_v54, %v5876_v30 }
 0x7ce   : > { %v6457_v5 = vadd.f32 %v12569_v33, %v6425_v62 }
 0x7cf   : > { %v6577_v17 = vpop.f32.mrf.mxu2 }
 0x7d0   : > { %v6489_v35 = vmax.f32 %v6457_v5, 0.0  ;;  %v6578_v57 = vadd.f32 %v12689_v22, %v6577_v17  ;;  %v6287_v8 = vpop.f32.mrf.mxu3 }
 0x7d1   : > { %v6376_v40 = vpop.f32.mrf.mxu0 }
 0x7d2   : > { %v6511_v58 = vpack.c.bf16 %v6489_v35, %v6488_v18  ;;  %v9578_v0 = vpack.c.bf16 %v6578_v57, %v6576_v47  ;;  %v6377_v1 = vadd.f32 %v6376_v40, %v6287_v8  ;;  %v5893_v57 = vpop.f32.mrf.mxu1  ;;  %v5889_v8 = vadd.f32 %v5888_v52, %v12495_v32 }
 0x7d4   : > { %9702 = vst [vmem:[%s10423_s12 + $0x180] sm:$0xff] %v9578_v0   ;;  %8905 = vmatmul.msk.bf16.gmra.mxu2 %vm543_vm0, %v6511_v58  ;;  %v6426_v21 = vadd.f32 %v6377_v1, %v5879_v9  ;;  %v5802_v58 = vadd.f32 %v12493_v24, %v12504_v31 }
 0x7d6   : > { %v6458_v3 = vadd.f32 %v12569_v33, %v6426_v21  ;;  %v5891_v6 = vadd.f32 %v5890_v45, %v5802_v58 }
 0x7d7   : > { %v6580_v26 = vpop.f32.mrf.mxu2 }
 0x7d8   : > { %v6289_v50 = vpop.f32.mrf.mxu3  ;;  %v6490_v29 = vmax.f32 %v6458_v3, 0.0  ;;  %v6581_v43 = vadd.f32 %v12689_v22, %v6580_v26 }
 0x7d9   : > { %v6378_v60 = vpop.f32.mrf.mxu0 }
 0x7da   : > { %v6379_v46 = vadd.f32 %v6378_v60, %v6289_v50  ;;  %v5895_v60 = vpop.f32.mrf.mxu1 }
 0x7dc   : > { %v6427_v44 = vadd.f32 %v6379_v46, %v5881_v10 }
 0x7de   : > { %v6459_v59 = vadd.f32 %v12569_v33, %v6427_v44 }
 0x7df   : > { %v6582_v42 = vpop.f32.mrf.mxu2 }
 0x7e0   : > { %v6491_v55 = vmax.f32 %v6459_v59, 0.0  ;;  %v6583_v34 = vadd.f32 %v12689_v22, %v6582_v42  ;;  %v6292_v61 = vpop.f32.mrf.mxu3 }
 0x7e1   : > { %v6381_v25 = vpop.f32.mrf.mxu0 }
 0x7e2   : > { %v6512_v15 = vpack.c.bf16 %v6491_v55, %v6490_v29  ;;  %v9583_v39 = vpack.c.bf16 %v6583_v34, %v6581_v43  ;;  %v6382_v37 = vadd.f32 %v6381_v25, %v6292_v61  ;;  %v5894_v43 = vadd.f32 %v5893_v57, %v12512_v14  ;;  %v5898_v25 = vpop.f32.mrf.mxu1 }
 0x7e3   : > { %v5807_v34 = vadd.f32 %v12510_v23, %v12519_v49 }
 0x7e4   : > { %9703 = vst [vmem:[%s10423_s12 + $0x188] sm:$0xff] %v9583_v39   ;;  %8906 = vmatmul.msk.bf16.gmra.mxu2 %vm543_vm0, %v6512_v15  ;;  %v6428_v19 = vadd.f32 %v6382_v37, %v5884_v11 }
 0x7e5   : > { %v5896_v39 = vadd.f32 %v5895_v60, %v5807_v34 }
 0x7e6   : > { %v6460_v30 = vadd.f32 %v12569_v33, %v6428_v19 }
 0x7e7   : > { %v6585_v63 = vpop.f32.mrf.mxu2 }
 0x7e8   : > { %v6294_v16 = vpop.f32.mrf.mxu3  ;;  %v6492_v5 = vmax.f32 %v6460_v30, 0.0  ;;  %v6586_v7 = vadd.f32 %v12689_v22, %v6585_v63 }
 0x7e9   : > { %v6383_v12 = vpop.f32.mrf.mxu0 }
 0x7ea   : > { %v6384_v4 = vadd.f32 %v6383_v12, %v6294_v16  ;;  %v5900_v30 = vpop.f32.mrf.mxu1 }
 0x7ec   : > { %v6429_v54 = vadd.f32 %v6384_v4, %v5886_v2 }
 0x7ee   : > { %v6461_v51 = vadd.f32 %v12569_v33, %v6429_v54 }
 0x7ef   : > { %v6587_v62 = vpop.f32.mrf.mxu2 }
 0x7f0   : > { %v6493_v38 = vmax.f32 %v6461_v51, 0.0  ;;  %v6588_v17 = vadd.f32 %v12689_v22, %v6587_v62  ;;  %v6297_v20 = vpop.f32.mrf.mxu3  ;;  %v5899_v51 = vadd.f32 %v5898_v25, %v12525_v48 }
 0x7f1   : > { %v6386_v56 = vpop.f32.mrf.mxu0 }
 0x7f2   : > { %v6513_v18 = vpack.c.bf16 %v6493_v38, %v6492_v5  ;;  %v9588_v47 = vpack.c.bf16 %v6588_v17, %v6586_v7  ;;  %v6387_v35 = vadd.f32 %v6386_v56, %v6297_v20  ;;  %v5812_v5 = vadd.f32 %v12534_v36, %v12536_v53 }
 0x7f4   : > { %9704 = vst [vmem:[%s10423_s12 + $0x190] sm:$0xff] %v9588_v47   ;;  %8907 = vmatmul.msk.bf16.gmra.mxu2 %vm543_vm0, %v6513_v18  ;;  %v6430_v0 = vadd.f32 %v6387_v35, %v5889_v8  ;;  %v5901_v20 = vadd.f32 %v5900_v30, %v5812_v5  ;;  %v5903_v35 = vpop.f32.mrf.mxu1 }
 0x7f6   : > { %v6462_v28 = vadd.f32 %v12569_v33, %v6430_v0 }
 0x7f7   : > { %v6590_v40 = vpop.f32.mrf.mxu2 }
 0x7f8   : > { %v6299_v1 = vpop.f32.mrf.mxu3  ;;  %v6494_v46 = vmax.f32 %v6462_v28, 0.0  ;;  %v6591_v32 = vadd.f32 %v12689_v22, %v6590_v40 }
 0x7f9   : > { %v6388_v9 = vpop.f32.mrf.mxu0 }
 0x7fa   : > { %v6389_v26 = vadd.f32 %v6388_v9, %v6299_v1 }
 0x7fc   : > { %v6431_v21 = vadd.f32 %v6389_v26, %v5891_v6  ;;  %v5904_v26 = vadd.f32 %v5903_v35, %v12542_v41  ;;  %v5905_v28 = vpop.f32.mrf.mxu1 }
 0x7fe   : > { %v6463_v50 = vadd.f32 %v12569_v33, %v6431_v21 }
 0x7ff   : > { %v6592_v10 = vpop.f32.mrf.mxu2 }
 0x800   : > { %v6495_v3 = vmax.f32 %v6463_v50, 0.0  ;;  %v6593_v44 = vadd.f32 %v12689_v22, %v6592_v10  ;;  %v6302_v24 = vpop.f32.mrf.mxu3  ;;  %v12837_v50 = vld [vmem:[#allocation3_spill] sm:$0xff] }
 0x801   : > { %v6391_v31 = vpop.f32.mrf.mxu0  ;;  %v5817_v60 = vadd.f32 %v12678_v27, %v12837_v50 }
 0x802   : > { %v6514_v59 = vpack.c.bf16 %v6495_v3, %v6494_v46  ;;  %v9593_v42 = vpack.c.bf16 %v6593_v44, %v6591_v32  ;;  %v6392_v29 = vadd.f32 %v6391_v31, %v6302_v24 }
 0x803   : > { %v5906_v3 = vadd.f32 %v5905_v28, %v5817_v60 }
 0x804   : > { %9705 = vst [vmem:[%s10423_s12 + $0x198] sm:$0xff] %v9593_v42   ;;  %8908 = vmatmul.msk.bf16.gmra.mxu2 %vm543_vm0, %v6514_v59  ;;  %v6432_v61 = vadd.f32 %v6392_v29, %v5894_v43 }
 0x806   : > { %v6464_v11 = vadd.f32 %v12569_v33, %v6432_v61 }
 0x807   : > { %v6595_v55 = vpop.f32.mrf.mxu2 }
 0x808   : > { %v6304_v52 = vpop.f32.mrf.mxu3  ;;  %v6496_v16 = vmax.f32 %v6464_v11, 0.0  ;;  %v6596_v14 = vadd.f32 %v12689_v22, %v6595_v55 }
 0x809   : > { %v6393_v15 = vpop.f32.mrf.mxu0 }
 0x80a   : > { %v6394_v37 = vadd.f32 %v6393_v15, %v6304_v52 }
 0x80c   : > { %v6433_v63 = vadd.f32 %v6394_v37, %v5896_v39 }
 0x80e   : > { %v6465_v13 = vadd.f32 %v12569_v33, %v6433_v63 }
 0x80f   : > { %v6597_v19 = vpop.f32.mrf.mxu2 }
 0x810   : > { %v6497_v12 = vmax.f32 %v6465_v13, 0.0  ;;  %v6598_v2 = vadd.f32 %v12689_v22, %v6597_v19  ;;  %v6307_v23 = vpop.f32.mrf.mxu3 }
 0x811   : > { %v6396_v49 = vpop.f32.mrf.mxu0 }
 0x812   : > { %v6515_v4 = vpack.c.bf16 %v6497_v12, %v6496_v16  ;;  %v9598_v45 = vpack.c.bf16 %v6598_v2, %v6596_v14  ;;  %v6397_v54 = vadd.f32 %v6396_v49, %v6307_v23 }
 0x814   : > { %9706 = vst [vmem:[%s10423_s12 + $0x1a0] sm:$0xff] %v9598_v45   ;;  %8909 = vmatmul.msk.bf16.gmra.mxu2 %vm543_vm0, %v6515_v4  ;;  %v6434_v7 = vadd.f32 %v6397_v54, %v5899_v51 }
 0x816   : > { %v6466_v18 = vadd.f32 %v12569_v33, %v6434_v7 }
 0x817   : > { %v6600_v62 = vpop.f32.mrf.mxu2 }
 0x818   : > { %v6309_v38 = vpop.f32.mrf.mxu3  ;;  %v6498_v40 = vmax.f32 %v6466_v18, 0.0  ;;  %v6601_v48 = vadd.f32 %v12689_v22, %v6600_v62 }
 0x819   : > { %v6398_v17 = vpop.f32.mrf.mxu0 }
 0x81a   : > { %v6399_v56 = vadd.f32 %v6398_v17, %v6309_v38 }
 0x81c   : > { %v6435_v47 = vadd.f32 %v6399_v56, %v5901_v20 }
 0x81e   : > { %v6467_v57 = vadd.f32 %v12569_v33, %v6435_v47 }
 0x81f   : > { %v6602_v8 = vpop.f32.mrf.mxu2 }
 0x820   : > { %v6499_v58 = vmax.f32 %v6467_v57, 0.0  ;;  %v6603_v0 = vadd.f32 %v12689_v22, %v6602_v8  ;;  %v6312_v36 = vpop.f32.mrf.mxu3 }
 0x821   : > { %v6401_v53 = vpop.f32.mrf.mxu0 }
 0x822   : > { %v6516_v1 = vpack.c.bf16 %v6499_v58, %v6498_v40  ;;  %v9603_v9 = vpack.c.bf16 %v6603_v0, %v6601_v48  ;;  %v6402_v6 = vadd.f32 %v6401_v53, %v6312_v36 }
 0x824   : > { %9707 = vst [vmem:[%s10423_s12 + $0x1a8] sm:$0xff] %v9603_v9   ;;  %8910 = vmatmul.msk.bf16.gmra.mxu2 %vm543_vm0, %v6516_v1  ;;  %v6436_v10 = vadd.f32 %v6402_v6, %v5904_v26 }
 0x826   : > { %v6468_v24 = vadd.f32 %v12569_v33, %v6436_v10 }
 0x827   : > { %v6605_v21 = vpop.f32.mrf.mxu2 }
 0x828   : > { %v6314_v46 = vpop.f32.mrf.mxu3  ;;  %v6500_v29 = vmax.f32 %v6468_v24, 0.0  ;;  %v6606_v41 = vadd.f32 %v12689_v22, %v6605_v21 }
 0x829   : > { %v6403_v32 = vpop.f32.mrf.mxu0 }
 0x82a   : > { %v6404_v44 = vadd.f32 %v6403_v32, %v6314_v46 }
 0x82c   : > { %v6437_v31 = vadd.f32 %v6404_v44, %v5906_v3 }
 0x82e   : > { %v6469_v59 = vadd.f32 %v12569_v33, %v6437_v31 }
 0x82f   : > { %v6607_v42 = vpop.f32.mrf.mxu2 }
 0x830   : > { %v6501_v43 = vmax.f32 %v6469_v59, 0.0  ;;  %v6608_v55 = vadd.f32 %v12689_v22, %v6607_v42 }
 0x832   : > { %v6517_v27 = vpack.c.bf16 %v6501_v43, %v6500_v29  ;;  %v9608_v34 = vpack.c.bf16 %v6608_v55, %v6606_v41 }
 0x834   : > { %9708 = vst [vmem:[%s10423_s12 + $0x1b0] sm:$0xff] %v9608_v34   ;;  %8911 = vmatmul.msk.bf16.gmra.mxu2 %vm543_vm0, %v6517_v27 }
 0x837   : > { %v6610_v61 = vpop.f32.mrf.mxu2 }
 0x838   : > { %v6611_v25 = vadd.f32 %v12689_v22, %v6610_v61 }
 0x83f   : > { %v6612_v52 = vpop.f32.mrf.mxu2 }
 0x840   : > { %v6613_v33 = vadd.f32 %v12689_v22, %v6612_v52 }
 0x842   : > { %v9613_v15 = vpack.c.bf16 %v6613_v33, %v6611_v25 }
 0x844   : > { %9709 = vst [vmem:[%s10423_s12 + $0x1b8] sm:$0xff] %v9613_v15  }
 0x847   : > { %v6615_v39 = vpop.f32.mrf.mxu2 }
 0x848   : > { %v6616_v11 = vadd.f32 %v12689_v22, %v6615_v39 }
 0x84f   : > { %v6617_v37 = vpop.f32.mrf.mxu2 }
 0x850   : > { %v6618_v63 = vadd.f32 %v12689_v22, %v6617_v37 }
 0x852   : > { %v9618_v13 = vpack.c.bf16 %v6618_v63, %v6616_v11 }
 0x854   : > { %9710 = vst [vmem:[%s10423_s12 + $0x1c0] sm:$0xff] %v9618_v13  }
 0x857   : > { %v6620_v19 = vpop.f32.mrf.mxu2 }
 0x858   : > { %v6621_v14 = vadd.f32 %v12689_v22, %v6620_v19 }
 0x85f   : > { %v6622_v16 = vpop.f32.mrf.mxu2 }
 0x860   : > { %v6623_v12 = vadd.f32 %v12689_v22, %v6622_v16 }
 0x862   : > { %v9623_v2 = vpack.c.bf16 %v6623_v12, %v6621_v14 }
 0x864   : > { %9711 = vst [vmem:[%s10423_s12 + $0x1c8] sm:$0xff] %v9623_v2  }
 0x867   : > { %v6625_v23 = vpop.f32.mrf.mxu2 }
 0x868   : > { %v6626_v4 = vadd.f32 %v12689_v22, %v6625_v23 }
 0x86f   : > { %v6627_v49 = vpop.f32.mrf.mxu2 }
 0x870   : > { %v6628_v45 = vadd.f32 %v12689_v22, %v6627_v49 }
 0x872   : > { %v9628_v30 = vpack.c.bf16 %v6628_v45, %v6626_v4 }
 0x874   : > { %9712 = vst [vmem:[%s10423_s12 + $0x1d0] sm:$0xff] %v9628_v30  }
 0x877   : > { %v6630_v54 = vpop.f32.mrf.mxu2 }
 0x878   : > { %v6631_v62 = vadd.f32 %v12689_v22, %v6630_v54 }
 0x87f   : > { %v6632_v51 = vpop.f32.mrf.mxu2 }
 0x880   : > { %v6633_v5 = vadd.f32 %v12689_v22, %v6632_v51 }
 0x882   : > { %v9633_v7 = vpack.c.bf16 %v6633_v5, %v6631_v62 }
 0x884   : > { %9713 = vst [vmem:[%s10423_s12 + $0x1d8] sm:$0xff] %v9633_v7  }
 0x887   : > { %v6635_v38 = vpop.f32.mrf.mxu2 }
 0x888   : > { %v6636_v20 = vadd.f32 %v12689_v22, %v6635_v38 }
 0x88f   : > { %v6637_v17 = vpop.f32.mrf.mxu2 }
 0x890   : > { %v6638_v56 = vadd.f32 %v12689_v22, %v6637_v17 }
 0x892   : > { %v9638_v18 = vpack.c.bf16 %v6638_v56, %v6636_v20 }
 0x894   : > { %9714 = vst [vmem:[%s10423_s12 + $0x1e0] sm:$0xff] %v9638_v18  }
 0x897   : > { %v6640_v47 = vpop.f32.mrf.mxu2 }
 0x898   : > { %v6641_v57 = vadd.f32 %v12689_v22, %v6640_v47 }
 0x89f   : > { %v6642_v35 = vpop.f32.mrf.mxu2 }
 0x8a0   : > { %v6643_v8 = vadd.f32 %v12689_v22, %v6642_v35 }
 0x8a2   : > { %v9643_v40 = vpack.c.bf16 %v6643_v8, %v6641_v57 }
 0x8a4   : > { %9715 = vst [vmem:[%s10423_s12 + $0x1e8] sm:$0xff] %v9643_v40  }
 0x8a7   : > { %v6645_v48 = vpop.f32.mrf.mxu2 }
 0x8a8   : > { %v6646_v0 = vadd.f32 %v12689_v22, %v6645_v48 }
 0x8af   : > { %v6647_v58 = vpop.f32.mrf.mxu2 }
 0x8b0   : > { %v6648_v36 = vadd.f32 %v12689_v22, %v6647_v58 }
 0x8b2   : > { %v9648_v53 = vpack.c.bf16 %v6648_v36, %v6646_v0 }
 0x8b4   : > { %9716 = vst [vmem:[%s10423_s12 + $0x1f0] sm:$0xff] %v9648_v53  }
 0x8b7   : > { %v6650_v1 = vpop.f32.mrf.mxu2 }
 0x8b8   : > { %v6651_v6 = vadd.f32 %v12689_v22, %v6650_v1 }
 0x8bf   : > { %v6652_v9 = vpop.f32.mrf.mxu2 }
 0x8c0   : > { %v6653_v26 = vadd.f32 %v12689_v22, %v6652_v9 }
 0x8c2   : > { %v9653_v28 = vpack.c.bf16 %v6653_v26, %v6651_v6 }
 0x8c4   : > { %9717 = vst [vmem:[%s10423_s12 + $0x1f8] sm:$0xff] %v9653_v28  }
 0x8c5 PF: > { %s15_s18 = sadd.s32 1, %s9751_s18  }
 0x8c6   : > { %p12_p5 = scmp.ge.s32.totalorder %s15_s18, 4  }
 0x8c8   :  { %14 = sbr.rel (!%p12_p5) target bundleno = 1 (0x1), region = 72 }

// kernel: faster_rcnn_forward.5
= control target key start
LH: loop header
LB: loop body
LE: loop exit
PB: predicated region body
PF: predicated region fallthrough
CT: control target
= control target key end

     0   :  { %vm1699_vm0 = vcmask 523264   ;;  %s3990_s1 = inlined_call_operand.vmem [shape: bf16[3136,128], index: 1, kind: input, shape index: {}]   ;;  %s3991_s0 = inlined_call_operand.vmem [shape: bf16[8,3136], index: 0, kind: input, shape index: {}]   ;;  %s3992_s2 = inlined_call_operand.vmem [shape: f32[1,128], index: 2, kind: input, shape index: {}]   ;;  %s3993_s4 = inlined_call_operand.vmem [shape: f32[1,128], index: 4, kind: input, shape index: {}]   ;;  %s3994_s3 = inlined_call_operand.vmem [shape: bf16[128,128], index: 3, kind: input, shape index: {}]   ;;  %s3995_s5 = inlined_call_operand.vmem [shape: bf16[128,128], index: 5, kind: input, shape index: {}]   ;;  %s3996_s6 = inlined_call_operand.vmem [shape: f32[1,128], index: 6, kind: input, shape index: {}]   ;;  %s3997_s7 = inlined_call_operand.vmem [shape: f32[8,128], index: 7, kind: output, shape index: {}]  }
   0x1   :  { %v3055_v0 = vld [vmem:[%s3990_s1 + $0x38] sm:$0xff]  ;;  %v3054_v4 = vld [vmem:[%s3990_s1 + $0x30] sm:$0xff]  ;;  %v3053_v8 = vld [vmem:[%s3990_s1 + $0x28] sm:$0xff] }
   0x2   :  { %v3071_v1 = vld [vmem:[%s3990_s1 + $0xb8] sm:$0xff]  ;;  %1703 = vmatpush.bf16.msra.mxu0 %v3055_v0  ;;  %v3070_v5 = vld [vmem:[%s3990_s1 + $0xb0] sm:$0xff]  ;;  %v3069_v9 = vld [vmem:[%s3990_s1 + $0xa8] sm:$0xff] }
   0x3   :  { %v3079_v2 = vld [vmem:[%s3990_s1 + $0xf8] sm:$0xff]  ;;  %1729 = vmatpush.bf16.msra.mxu2 %v3071_v1  ;;  %v3078_v6 = vld [vmem:[%s3990_s1 + $0xf0] sm:$0xff]  ;;  %v3077_v10 = vld [vmem:[%s3990_s1 + $0xe8] sm:$0xff] }
   0x4   :  { %v3063_v3 = vld [vmem:[%s3990_s1 + $0x78] sm:$0xff]  ;;  %1742 = vmatpush.bf16.msra.mxu3 %v3079_v2  ;;  %v3062_v7 = vld [vmem:[%s3990_s1 + $0x70] sm:$0xff]  ;;  %v3061_v11 = vld [vmem:[%s3990_s1 + $0x68] sm:$0xff] }
   0x5   :  { %1716 = vmatpush.bf16.msra.mxu1 %v3063_v3  ;;  %v3052_v12 = vld [vmem:[%s3990_s1 + $0x20] sm:$0xff]  ;;  %v3051_v16 = vld [vmem:[%s3990_s1 + $0x18] sm:$0xff]  ;;  %v3050_v20 = vld [vmem:[%s3990_s1 + $0x10] sm:$0xff] }
   0x6   :  { %1704 = vmatpush.bf16.msra.mxu0 %v3054_v4  ;;  %v3068_v13 = vld [vmem:[%s3990_s1 + $0xa0] sm:$0xff]  ;;  %v3067_v17 = vld [vmem:[%s3990_s1 + $0x98] sm:$0xff]  ;;  %v3066_v21 = vld [vmem:[%s3990_s1 + $0x90] sm:$0xff] }
   0x7   :  { %1730 = vmatpush.bf16.msra.mxu2 %v3070_v5  ;;  %v3076_v14 = vld [vmem:[%s3990_s1 + $0xe0] sm:$0xff]  ;;  %v3075_v18 = vld [vmem:[%s3990_s1 + $0xd8] sm:$0xff]  ;;  %v3074_v22 = vld [vmem:[%s3990_s1 + $0xd0] sm:$0xff] }
   0x8   :  { %1743 = vmatpush.bf16.msra.mxu3 %v3078_v6  ;;  %v3060_v15 = vld [vmem:[%s3990_s1 + $0x60] sm:$0xff]  ;;  %v3059_v19 = vld [vmem:[%s3990_s1 + $0x58] sm:$0xff]  ;;  %v3058_v23 = vld [vmem:[%s3990_s1 + $0x50] sm:$0xff] }
   0x9   :  { %1717 = vmatpush.bf16.msra.mxu1 %v3062_v7  ;;  %v3049_v24 = vld [vmem:[%s3990_s1 + $0x8] sm:$0xff]  ;;  %v27_v29 = vld [vmem:[%s3991_s0] sm:$0xff]  ;;  %v3087_v35 = vld [vmem:[%s3990_s1 + $0x138] sm:$0xff] }
   0xa   :  { %1705 = vmatpush.bf16.msra.mxu0 %v3053_v8  ;;  %v3065_v25 = vld [vmem:[%s3990_s1 + $0x88] sm:$0xff]  ;;  %v3048_v31 = vld [vmem:[%s3990_s1] sm:$0xff]  ;;  %v449_v33 = vunpack.c.l.b16 %v27_v29  ;;  %v3103_v37 = vld [vmem:[%s3990_s1 + $0x1b8] sm:$0xff]  ;;  %v450_v41 = vunpack.c.h.b16 %v27_v29 }
   0xb   :  { %1731 = vmatpush.bf16.msra.mxu2 %v3069_v9  ;;  %v28_v26 = vld [vmem:[%s3991_s0 + $0x8] sm:$0xff]  ;;  %v3064_v32 = vld [vmem:[%s3990_s1 + $0x80] sm:$0xff]  ;;  %v3111_v38 = vld [vmem:[%s3990_s1 + $0x1f8] sm:$0xff] }
   0xc   :  { %1744 = vmatpush.bf16.msra.mxu3 %v3077_v10  ;;  %v3073_v27 = vld [vmem:[%s3990_s1 + $0xc8] sm:$0xff]  ;;  %v451_v30 = vunpack.c.l.b16 %v28_v26  ;;  %v3072_v34 = vld [vmem:[%s3990_s1 + $0xc0] sm:$0xff]  ;;  %v452_v36 = vunpack.c.h.b16 %v28_v26  ;;  %v3095_v42 = vld [vmem:[%s3990_s1 + $0x178] sm:$0xff]  ;;  %v474_v43 = vpack.c.b16 %v449_v33, %v449_v33  ;;  %v475_v48 = vpack.c.b16 %v450_v41, %v450_v41 }
   0xd   :  { %1718 = vmatpush.bf16.msra.mxu1 %v3061_v11  ;;  %v3057_v28 = vld [vmem:[%s3990_s1 + $0x48] sm:$0xff]  ;;  %v3056_v39 = vld [vmem:[%s3990_s1 + $0x40] sm:$0xff]  ;;  %v3086_v44 = vld [vmem:[%s3990_s1 + $0x130] sm:$0xff] }
   0xe   :  { %1706 = vmatpush.bf16.msra.mxu0 %v3052_v12  ;;  %v476_v40 = vpack.c.b16 %v451_v30, %v451_v30  ;;  %v477_v45 = vpack.c.b16 %v452_v36, %v452_v36  ;;  %v3102_v46 = vld [vmem:[%s3990_s1 + $0x1b0] sm:$0xff]  ;;  %v3085_v50 = vld [vmem:[%s3990_s1 + $0x128] sm:$0xff]  ;;  %v3084_v54 = vld [vmem:[%s3990_s1 + $0x120] sm:$0xff] }
   0xf   :  { %1732 = vmatpush.bf16.msra.mxu2 %v3068_v13  ;;  %v3110_v47 = vld [vmem:[%s3990_s1 + $0x1f0] sm:$0xff]  ;;  %v3101_v51 = vld [vmem:[%s3990_s1 + $0x1a8] sm:$0xff]  ;;  %v3100_v55 = vld [vmem:[%s3990_s1 + $0x1a0] sm:$0xff] }
  0x10   :  { %1745 = vmatpush.bf16.msra.mxu3 %v3076_v14  ;;  %v3094_v49 = vld [vmem:[%s3990_s1 + $0x170] sm:$0xff]  ;;  %v3109_v52 = vld [vmem:[%s3990_s1 + $0x1e8] sm:$0xff]  ;;  %v3108_v56 = vld [vmem:[%s3990_s1 + $0x1e0] sm:$0xff] }
  0x11   :  { %1719 = vmatpush.bf16.msra.mxu1 %v3060_v15  ;;  %v3093_v53 = vld [vmem:[%s3990_s1 + $0x168] sm:$0xff]  ;;  %v3092_v57 = vld [vmem:[%s3990_s1 + $0x160] sm:$0xff]  ;;  %v3083_v58 = vld [vmem:[%s3990_s1 + $0x118] sm:$0xff] }
  0x12   :  { %1707 = vmatpush.bf16.msra.mxu0 %v3051_v16  ;;  %v3099_v59 = vld [vmem:[%s3990_s1 + $0x198] sm:$0xff]  ;;  %v3082_v62 = vld [vmem:[%s3990_s1 + $0x110] sm:$0xff]  ;;  %v3081_v2 = vld [vmem:[%s3990_s1 + $0x108] sm:$0xff] }
  0x13   :  { %1733 = vmatpush.bf16.msra.mxu2 %v3067_v17  ;;  %v3107_v60 = vld [vmem:[%s3990_s1 + $0x1d8] sm:$0xff]  ;;  %v3098_v63 = vld [vmem:[%s3990_s1 + $0x190] sm:$0xff]  ;;  %v3097_v3 = vld [vmem:[%s3990_s1 + $0x188] sm:$0xff] }
  0x14   :  { %1746 = vmatpush.bf16.msra.mxu3 %v3075_v18  ;;  %v3091_v61 = vld [vmem:[%s3990_s1 + $0x158] sm:$0xff]  ;;  %v3106_v0 = vld [vmem:[%s3990_s1 + $0x1d0] sm:$0xff]  ;;  %v3105_v4 = vld [vmem:[%s3990_s1 + $0x1c8] sm:$0xff] }
  0x15   :  { %1720 = vmatpush.bf16.msra.mxu1 %v3059_v19  ;;  %v3090_v1 = vld [vmem:[%s3990_s1 + $0x150] sm:$0xff]  ;;  %v30_v5 = vld [vmem:[%s3991_s0 + $0x18] sm:$0xff]  ;;  %v3089_v7 = vld [vmem:[%s3990_s1 + $0x148] sm:$0xff] }
  0x16   :  { %1708 = vmatpush.bf16.msra.mxu0 %v3050_v20  ;;  %v29_v6 = vld [vmem:[%s3991_s0 + $0x10] sm:$0xff]  ;;  %v3080_v8 = vld [vmem:[%s3990_s1 + $0x100] sm:$0xff]  ;;  %v455_v9 = vunpack.c.l.b16 %v30_v5  ;;  %v456_v13 = vunpack.c.h.b16 %v30_v5  ;;  %v3119_v14 = vld [vmem:[%s3990_s1 + $0x238] sm:$0xff] }
  0x17   :  { %1734 = vmatpush.bf16.msra.mxu2 %v3066_v21  ;;  %v3096_v10 = vld [vmem:[%s3990_s1 + $0x180] sm:$0xff]  ;;  %v453_v12 = vunpack.c.l.b16 %v29_v6  ;;  %v3135_v15 = vld [vmem:[%s3990_s1 + $0x2b8] sm:$0xff]  ;;  %v454_v18 = vunpack.c.h.b16 %v29_v6  ;;  %v3133_v29 = vld [vmem:[%s3990_s1 + $0x2a8] sm:$0xff] }
  0x18   :  { %1747 = vmatpush.bf16.msra.mxu3 %v3074_v22  ;;  %v3104_v11 = vld [vmem:[%s3990_s1 + $0x1c0] sm:$0xff]  ;;  %v3143_v16 = vld [vmem:[%s3990_s1 + $0x2f8] sm:$0xff]  ;;  %v480_v20 = vpack.c.b16 %v455_v9, %v455_v9  ;;  %v481_v22 = vpack.c.b16 %v456_v13, %v456_v13  ;;  %v3141_v30 = vld [vmem:[%s3990_s1 + $0x2e8] sm:$0xff] }
  0x19   :  { %1721 = vmatpush.bf16.msra.mxu1 %v3058_v23  ;;  %v3088_v17 = vld [vmem:[%s3990_s1 + $0x140] sm:$0xff]  ;;  %v3127_v19 = vld [vmem:[%s3990_s1 + $0x278] sm:$0xff]  ;;  %v478_v21 = vpack.c.b16 %v453_v12, %v453_v12  ;;  %v3118_v23 = vld [vmem:[%s3990_s1 + $0x230] sm:$0xff]  ;;  %v479_v26 = vpack.c.b16 %v454_v18, %v454_v18 }
  0x1a   :  { %1709 = vmatpush.bf16.msra.mxu0 %v3049_v24  ;;  %v3134_v24 = vld [vmem:[%s3990_s1 + $0x2b0] sm:$0xff]  ;;  %v3132_v33 = vld [vmem:[%s3990_s1 + $0x2a0] sm:$0xff]  ;;  %v3115_v36 = vld [vmem:[%s3990_s1 + $0x218] sm:$0xff] }
  0x1b   :  { %1735 = vmatpush.bf16.msra.mxu2 %v3065_v25  ;;  %v3142_v25 = vld [vmem:[%s3990_s1 + $0x2f0] sm:$0xff]  ;;  %v3149_v6 = vld [vmem:[%s3990_s1 + $0x328] sm:$0xff]  ;;  %v3172_v12 = vld [vmem:[%s3990_s1 + $0x3e0] sm:$0xff] }
  0x1c   :  { %1748 = vmatpush.bf16.msra.mxu3 %v3073_v27  ;;  %v3126_v27 = vld [vmem:[%s3990_s1 + $0x270] sm:$0xff]  ;;  %v3157_v9 = vld [vmem:[%s3990_s1 + $0x368] sm:$0xff]  ;;  %v3156_v13 = vld [vmem:[%s3990_s1 + $0x360] sm:$0xff] }
  0x1d   :  { %1722 = vmatpush.bf16.msra.mxu1 %v3057_v28  ;;  %v3117_v28 = vld [vmem:[%s3990_s1 + $0x228] sm:$0xff]  ;;  %v3130_v41 = vld [vmem:[%s3990_s1 + $0x290] sm:$0xff] }
  0x1e   :  { %1710 = vmatpush.bf16.msra.mxu0 %v3048_v31  ;;  %v3125_v31 = vld [vmem:[%s3990_s1 + $0x268] sm:$0xff]  ;;  %v3158_v5 = vld [vmem:[%s3990_s1 + $0x370] sm:$0xff] }
  0x1f   :  { %1736 = vmatpush.bf16.msra.mxu2 %v3064_v32  ;;  %v3116_v32 = vld [vmem:[%s3990_s1 + $0x220] sm:$0xff]  ;;  %v3146_v18 = vld [vmem:[%s3990_s1 + $0x310] sm:$0xff] }
  0x20   :  { %1749 = vmatpush.bf16.msra.mxu3 %v3072_v34  ;;  %v3140_v34 = vld [vmem:[%s3990_s1 + $0x2e0] sm:$0xff] }
  0x21   :  { %1723 = vmatpush.bf16.msra.mxu1 %v3056_v39  ;;  %1711 = vmatmul.bf16.vlgmr.msra.gmra.mxu0 %v474_v43  ;;  %v3123_v39 = vld [vmem:[%s3990_s1 + $0x258] sm:$0xff]  ;;  %v3122_v43 = vld [vmem:[%s3990_s1 + $0x250] sm:$0xff] }
  0x22   :  { %1755 = vmatpush.bf16.msrb.mxu0 %v3087_v35  ;;  %1737 = vmatmul.bf16.vlgmr.msra.gmra.mxu2 %v476_v40  ;;  %v3124_v35 = vld [vmem:[%s3990_s1 + $0x260] sm:$0xff]  ;;  %v3114_v40 = vld [vmem:[%s3990_s1 + $0x210] sm:$0xff] }
  0x23   :  { %1781 = vmatpush.bf16.msrb.mxu2 %v3103_v37  ;;  %1750 = vmatmul.bf16.vlgmr.msra.gmra.mxu3 %v477_v45  ;;  %v3131_v37 = vld [vmem:[%s3990_s1 + $0x298] sm:$0xff]  ;;  %v3129_v45 = vld [vmem:[%s3990_s1 + $0x288] sm:$0xff] }
  0x24   :  { %1794 = vmatpush.bf16.msrb.mxu3 %v3111_v38  ;;  %1724 = vmatmul.bf16.vlgmr.msra.gmra.mxu1 %v475_v48  ;;  %v3139_v38 = vld [vmem:[%s3990_s1 + $0x2d8] sm:$0xff]  ;;  %v32_v48 = vld [vmem:[%s3991_s0 + $0x28] sm:$0xff] }
  0x25   :  { %1768 = vmatpush.bf16.msrb.mxu1 %v3095_v42  ;;  %v3138_v42 = vld [vmem:[%s3990_s1 + $0x2d0] sm:$0xff] }
  0x26   :  { %1756 = vmatpush.bf16.msrb.mxu0 %v3086_v44  ;;  %v3113_v44 = vld [vmem:[%s3990_s1 + $0x208] sm:$0xff] }
  0x27   :  { %1782 = vmatpush.bf16.msrb.mxu2 %v3102_v46  ;;  %v31_v46 = vld [vmem:[%s3991_s0 + $0x20] sm:$0xff] }
  0x28   :  { %1795 = vmatpush.bf16.msrb.mxu3 %v3110_v47  ;;  %v3137_v47 = vld [vmem:[%s3990_s1 + $0x2c8] sm:$0xff] }
  0x29   :  { %1769 = vmatpush.bf16.msrb.mxu1 %v3094_v49  ;;  %v3121_v49 = vld [vmem:[%s3990_s1 + $0x248] sm:$0xff] }
  0x2a   :  { %1757 = vmatpush.bf16.msrb.mxu0 %v3085_v50  ;;  %v457_v50 = vunpack.c.l.b16 %v31_v46 }
  0x2b   :  { %1783 = vmatpush.bf16.msrb.mxu2 %v3101_v51  ;;  %v3112_v51 = vld [vmem:[%s3990_s1 + $0x200] sm:$0xff] }
  0x2c   :  { %1796 = vmatpush.bf16.msrb.mxu3 %v3109_v52  ;;  %v3128_v52 = vld [vmem:[%s3990_s1 + $0x280] sm:$0xff] }
  0x2d   :  { %1770 = vmatpush.bf16.msrb.mxu1 %v3093_v53  ;;  %v459_v53 = vunpack.c.l.b16 %v32_v48 }
  0x2e   :  { %1758 = vmatpush.bf16.msrb.mxu0 %v3084_v54  ;;  %v3136_v54 = vld [vmem:[%s3990_s1 + $0x2c0] sm:$0xff] }
  0x2f   :  { %1784 = vmatpush.bf16.msrb.mxu2 %v3100_v55  ;;  %v3151_v55 = vld [vmem:[%s3990_s1 + $0x338] sm:$0xff] }
  0x30   :  { %1797 = vmatpush.bf16.msrb.mxu3 %v3108_v56  ;;  %v460_v56 = vunpack.c.h.b16 %v32_v48  ;;  %v3181_v48 = vld [vmem:[%s3990_s1 + $0x428] sm:$0xff] }
  0x31   :  { %1771 = vmatpush.bf16.msrb.mxu1 %v3092_v57  ;;  %v3167_v57 = vld [vmem:[%s3990_s1 + $0x3b8] sm:$0xff] }
  0x32   :  { %1759 = vmatpush.bf16.msrb.mxu0 %v3083_v58  ;;  %v3175_v58 = vld [vmem:[%s3990_s1 + $0x3f8] sm:$0xff] }
  0x33   :  { %1785 = vmatpush.bf16.msrb.mxu2 %v3099_v59  ;;  %v458_v59 = vunpack.c.h.b16 %v31_v46  ;;  %v3206_v46 = vld [vmem:[%s3990_s1 + $0x4f0] sm:$0xff] }
  0x34   :  { %1798 = vmatpush.bf16.msrb.mxu3 %v3107_v60  ;;  %v3120_v60 = vld [vmem:[%s3990_s1 + $0x240] sm:$0xff] }
  0x35   :  { %1772 = vmatpush.bf16.msrb.mxu1 %v3091_v61  ;;  %v482_v61 = vpack.c.b16 %v457_v50, %v457_v50  ;;  %v3205_v50 = vld [vmem:[%s3990_s1 + $0x4e8] sm:$0xff] }
  0x36   :  { %1760 = vmatpush.bf16.msrb.mxu0 %v3082_v62  ;;  %v484_v62 = vpack.c.b16 %v459_v53, %v459_v53  ;;  %v3196_v53 = vld [vmem:[%s3990_s1 + $0x4a0] sm:$0xff] }
  0x37   :  { %1786 = vmatpush.bf16.msrb.mxu2 %v3098_v63  ;;  %v3159_v63 = vld [vmem:[%s3990_s1 + $0x378] sm:$0xff] }
  0x38   :  { %1799 = vmatpush.bf16.msrb.mxu3 %v3106_v0  ;;  %v485_v0 = vpack.c.b16 %v460_v56, %v460_v56  ;;  %v3179_v56 = vld [vmem:[%s3990_s1 + $0x418] sm:$0xff] }
  0x39   :  { %1773 = vmatpush.bf16.msrb.mxu1 %v3090_v1  ;;  %v3150_v1 = vld [vmem:[%s3990_s1 + $0x330] sm:$0xff] }
  0x3a   :  { %1761 = vmatpush.bf16.msrb.mxu0 %v3081_v2  ;;  %v483_v2 = vpack.c.b16 %v458_v59, %v458_v59  ;;  %v3187_v59 = vld [vmem:[%s3990_s1 + $0x458] sm:$0xff] }
  0x3b   :  { %1787 = vmatpush.bf16.msrb.mxu2 %v3097_v3  ;;  %v3166_v3 = vld [vmem:[%s3990_s1 + $0x3b0] sm:$0xff] }
  0x3c   :  { %1800 = vmatpush.bf16.msrb.mxu3 %v3105_v4  ;;  %v3174_v4 = vld [vmem:[%s3990_s1 + $0x3f0] sm:$0xff] }
  0x3d   :  { %1774 = vmatpush.bf16.msrb.mxu1 %v3089_v7  ;;  %v3165_v7 = vld [vmem:[%s3990_s1 + $0x3a8] sm:$0xff] }
  0x3e   :  { %1762 = vmatpush.bf16.msrb.mxu0 %v3080_v8  ;;  %v3173_v8 = vld [vmem:[%s3990_s1 + $0x3e8] sm:$0xff] }
  0x3f   :  { %1788 = vmatpush.bf16.msrb.mxu2 %v3096_v10  ;;  %v3148_v10 = vld [vmem:[%s3990_s1 + $0x320] sm:$0xff] }
  0x40   :  { %1801 = vmatpush.bf16.msrb.mxu3 %v3104_v11  ;;  %v3164_v11 = vld [vmem:[%s3990_s1 + $0x3a0] sm:$0xff] }
  0x41   :  { %1775 = vmatpush.bf16.msrb.mxu1 %v3088_v17  ;;  %1763 = vmatmul.bf16.vlgmr.msrb.gmra.mxu0 %v478_v21  ;;  %v3155_v17 = vld [vmem:[%s3990_s1 + $0x358] sm:$0xff]  ;;  %v3154_v21 = vld [vmem:[%s3990_s1 + $0x350] sm:$0xff] }
  0x42   :  { %1807 = vmatpush.bf16.msra.mxu0 %v3119_v14  ;;  %1789 = vmatmul.bf16.vlgmr.msrb.gmra.mxu2 %v480_v20  ;;  %v3147_v14 = vld [vmem:[%s3990_s1 + $0x318] sm:$0xff]  ;;  %v3170_v20 = vld [vmem:[%s3990_s1 + $0x3d0] sm:$0xff] }
  0x43   :  { %1833 = vmatpush.bf16.msra.mxu2 %v3135_v15  ;;  %1802 = vmatmul.bf16.vlgmr.msrb.gmra.mxu3 %v481_v22  ;;  %v3163_v15 = vld [vmem:[%s3990_s1 + $0x398] sm:$0xff]  ;;  %v3145_v22 = vld [vmem:[%s3990_s1 + $0x308] sm:$0xff] }
  0x44   :  { %1846 = vmatpush.bf16.msra.mxu3 %v3143_v16  ;;  %1776 = vmatmul.bf16.vlgmr.msrb.gmra.mxu1 %v479_v26  ;;  %v3171_v16 = vld [vmem:[%s3990_s1 + $0x3d8] sm:$0xff]  ;;  %v3169_v26 = vld [vmem:[%s3990_s1 + $0x3c8] sm:$0xff] }
  0x45   :  { %1820 = vmatpush.bf16.msra.mxu1 %v3127_v19  ;;  %v3162_v19 = vld [vmem:[%s3990_s1 + $0x390] sm:$0xff] }
  0x46   :  { %1808 = vmatpush.bf16.msra.mxu0 %v3118_v23  ;;  %v3161_v23 = vld [vmem:[%s3990_s1 + $0x388] sm:$0xff] }
  0x47   :  { %1834 = vmatpush.bf16.msra.mxu2 %v3134_v24  ;;  %v33_v24 = vld [vmem:[%s3991_s0 + $0x30] sm:$0xff] }
  0x48   :  { %1847 = vmatpush.bf16.msra.mxu3 %v3142_v25  ;;  %v34_v25 = vld [vmem:[%s3991_s0 + $0x38] sm:$0xff] }
  0x49   :  { %1821 = vmatpush.bf16.msra.mxu1 %v3126_v27  ;;  %v3153_v27 = vld [vmem:[%s3990_s1 + $0x348] sm:$0xff] }
  0x4a   :  { %1809 = vmatpush.bf16.msra.mxu0 %v3117_v28  ;;  %v3144_v28 = vld [vmem:[%s3990_s1 + $0x300] sm:$0xff] }
  0x4b   :  { %1835 = vmatpush.bf16.msra.mxu2 %v3133_v29  ;;  %v461_v29 = vunpack.c.l.b16 %v33_v24 }
  0x4c   :  { %1848 = vmatpush.bf16.msra.mxu3 %v3141_v30  ;;  %v463_v30 = vunpack.c.l.b16 %v34_v25 }
  0x4d   :  { %1822 = vmatpush.bf16.msra.mxu1 %v3125_v31  ;;  %v3160_v31 = vld [vmem:[%s3990_s1 + $0x380] sm:$0xff] }
  0x4e   :  { %1810 = vmatpush.bf16.msra.mxu0 %v3116_v32  ;;  %v3183_v32 = vld [vmem:[%s3990_s1 + $0x438] sm:$0xff] }
  0x4f   :  { %1836 = vmatpush.bf16.msra.mxu2 %v3132_v33  ;;  %v464_v33 = vunpack.c.h.b16 %v34_v25  ;;  %v3222_v25 = vld [vmem:[%s3990_s1 + $0x570] sm:$0xff] }
  0x50   :  { %1849 = vmatpush.bf16.msra.mxu3 %v3140_v34  ;;  %v3168_v34 = vld [vmem:[%s3990_s1 + $0x3c0] sm:$0xff] }
  0x51   :  { %1823 = vmatpush.bf16.msra.mxu1 %v3124_v35  ;;  %v3199_v35 = vld [vmem:[%s3990_s1 + $0x4b8] sm:$0xff] }
  0x52   :  { %1811 = vmatpush.bf16.msra.mxu0 %v3115_v36  ;;  %v462_v36 = vunpack.c.h.b16 %v33_v24  ;;  %v3238_v24 = vld [vmem:[%s3990_s1 + $0x5f0] sm:$0xff] }
  0x53   :  { %1837 = vmatpush.bf16.msra.mxu2 %v3131_v37  ;;  %v3207_v37 = vld [vmem:[%s3990_s1 + $0x4f8] sm:$0xff] }
  0x54   :  { %1850 = vmatpush.bf16.msra.mxu3 %v3139_v38  ;;  %v3152_v38 = vld [vmem:[%s3990_s1 + $0x340] sm:$0xff] }
  0x55   :  { %1824 = vmatpush.bf16.msra.mxu1 %v3123_v39  ;;  %v486_v39 = vpack.c.b16 %v461_v29, %v461_v29  ;;  %v3260_v29 = vld [vmem:[%s3992_s2] ss:$0 sm:$0xff] }
  0x56   :  { %1812 = vmatpush.bf16.msra.mxu0 %v3114_v40  ;;  %v488_v40 = vpack.c.b16 %v463_v30, %v463_v30  ;;  %v3221_v30 = vld [vmem:[%s3990_s1 + $0x568] sm:$0xff] }
  0x57   :  { %1838 = vmatpush.bf16.msra.mxu2 %v3130_v41  ;;  %v3191_v41 = vld [vmem:[%s3990_s1 + $0x478] sm:$0xff] }
  0x58   :  { %1851 = vmatpush.bf16.msra.mxu3 %v3138_v42  ;;  %v489_v42 = vpack.c.b16 %v464_v33, %v464_v33  ;;  %v3236_v33 = vld [vmem:[%s3990_s1 + $0x5e0] sm:$0xff] }
  0x59   :  { %1825 = vmatpush.bf16.msra.mxu1 %v3122_v43  ;;  %v487_v43 = vpack.c.b16 %v462_v36, %v462_v36  ;;  %v3220_v36 = vld [vmem:[%s3990_s1 + $0x560] sm:$0xff] }
  0x5a   :  { %1813 = vmatpush.bf16.msra.mxu0 %v3113_v44  ;;  %v3182_v44 = vld [vmem:[%s3990_s1 + $0x430] sm:$0xff] }
  0x5b   :  { %1839 = vmatpush.bf16.msra.mxu2 %v3129_v45  ;;  %v3198_v45 = vld [vmem:[%s3990_s1 + $0x4b0] sm:$0xff] }
  0x5c   :  { %1852 = vmatpush.bf16.msra.mxu3 %v3137_v47  ;;  %v3190_v47 = vld [vmem:[%s3990_s1 + $0x470] sm:$0xff] }
  0x5d   :  { %1826 = vmatpush.bf16.msra.mxu1 %v3121_v49  ;;  %v3197_v49 = vld [vmem:[%s3990_s1 + $0x4a8] sm:$0xff] }
  0x5e   :  { %1814 = vmatpush.bf16.msra.mxu0 %v3112_v51  ;;  %v3189_v51 = vld [vmem:[%s3990_s1 + $0x468] sm:$0xff] }
  0x5f   :  { %1840 = vmatpush.bf16.msra.mxu2 %v3128_v52  ;;  %v3180_v52 = vld [vmem:[%s3990_s1 + $0x420] sm:$0xff] }
  0x60   :  { %1853 = vmatpush.bf16.msra.mxu3 %v3136_v54  ;;  %v3204_v54 = vld [vmem:[%s3990_s1 + $0x4e0] sm:$0xff] }
  0x61   :  { %1827 = vmatpush.bf16.msra.mxu1 %v3120_v60  ;;  %1815 = vmatmul.bf16.vlgmr.msra.gmra.mxu0 %v482_v61  ;;  %v3178_v60 = vld [vmem:[%s3990_s1 + $0x410] sm:$0xff] }
  0x62   :  { %1859 = vmatpush.bf16.msrb.mxu0 %v3151_v55  ;;  %1841 = vmatmul.bf16.vlgmr.msra.gmra.mxu2 %v484_v62  ;;  %v3188_v55 = vld [vmem:[%s3990_s1 + $0x460] sm:$0xff]  ;;  %v3194_v61 = vld [vmem:[%s3990_s1 + $0x490] sm:$0xff] }
  0x63   :  { %1885 = vmatpush.bf16.msrb.mxu2 %v3167_v57  ;;  %1854 = vmatmul.bf16.vlgmr.msra.gmra.mxu3 %v485_v0  ;;  %v3195_v57 = vld [vmem:[%s3990_s1 + $0x498] sm:$0xff]  ;;  %v3202_v62 = vld [vmem:[%s3990_s1 + $0x4d0] sm:$0xff]  ;;  %v3177_v0 = vld [vmem:[%s3990_s1 + $0x408] sm:$0xff] }
  0x64   :  { %1898 = vmatpush.bf16.msrb.mxu3 %v3175_v58  ;;  %1828 = vmatmul.bf16.vlgmr.msra.gmra.mxu1 %v483_v2  ;;  %v3203_v58 = vld [vmem:[%s3990_s1 + $0x4d8] sm:$0xff]  ;;  %v3201_v2 = vld [vmem:[%s3990_s1 + $0x4c8] sm:$0xff] }
  0x65   :  { %1872 = vmatpush.bf16.msrb.mxu1 %v3159_v63  ;;  %v3186_v63 = vld [vmem:[%s3990_s1 + $0x450] sm:$0xff] }
  0x66   :  { %1860 = vmatpush.bf16.msrb.mxu0 %v3150_v1  ;;  %v3193_v1 = vld [vmem:[%s3990_s1 + $0x488] sm:$0xff] }
  0x67   :  { %1886 = vmatpush.bf16.msrb.mxu2 %v3166_v3  ;;  %v35_v3 = vld [vmem:[%s3991_s0 + $0x40] sm:$0xff] }
  0x68   :  { %1899 = vmatpush.bf16.msrb.mxu3 %v3174_v4  ;;  %v36_v4 = vld [vmem:[%s3991_s0 + $0x48] sm:$0xff] }
  0x69   :  { %1873 = vmatpush.bf16.msrb.mxu1 %v3158_v5  ;;  %v3185_v5 = vld [vmem:[%s3990_s1 + $0x448] sm:$0xff] }
  0x6a   :  { %1861 = vmatpush.bf16.msrb.mxu0 %v3149_v6  ;;  %v3176_v6 = vld [vmem:[%s3990_s1 + $0x400] sm:$0xff] }
  0x6b   :  { %1887 = vmatpush.bf16.msrb.mxu2 %v3165_v7  ;;  %v465_v7 = vunpack.c.l.b16 %v35_v3 }
  0x6c   :  { %1900 = vmatpush.bf16.msrb.mxu3 %v3173_v8  ;;  %v467_v8 = vunpack.c.l.b16 %v36_v4 }
  0x6d   :  { %1874 = vmatpush.bf16.msrb.mxu1 %v3157_v9  ;;  %v3192_v9 = vld [vmem:[%s3990_s1 + $0x480] sm:$0xff] }
  0x6e   :  { %1862 = vmatpush.bf16.msrb.mxu0 %v3148_v10  ;;  %v3200_v10 = vld [vmem:[%s3990_s1 + $0x4c0] sm:$0xff] }
  0x6f   :  { %1888 = vmatpush.bf16.msrb.mxu2 %v3164_v11  ;;  %v468_v11 = vunpack.c.h.b16 %v36_v4 }
  0x70   :  { %1901 = vmatpush.bf16.msrb.mxu3 %v3172_v12  ;;  %v3215_v12 = vld [vmem:[%s3990_s1 + $0x538] sm:$0xff] }
  0x71   :  { %1875 = vmatpush.bf16.msrb.mxu1 %v3156_v13  ;;  %v3231_v13 = vld [vmem:[%s3990_s1 + $0x5b8] sm:$0xff] }
  0x72   :  { %1863 = vmatpush.bf16.msrb.mxu0 %v3147_v14  ;;  %v466_v14 = vunpack.c.h.b16 %v35_v3  ;;  %v3243_v3 = vld [vmem:[%s3990_s1 + $0x618] sm:$0xff] }
  0x73   :  { %1889 = vmatpush.bf16.msrb.mxu2 %v3163_v15  ;;  %v3239_v15 = vld [vmem:[%s3990_s1 + $0x5f8] sm:$0xff] }
  0x74   :  { %1902 = vmatpush.bf16.msrb.mxu3 %v3171_v16  ;;  %v3184_v16 = vld [vmem:[%s3990_s1 + $0x440] sm:$0xff] }
  0x75   :  { %1876 = vmatpush.bf16.msrb.mxu1 %v3155_v17  ;;  %v490_v17 = vpack.c.b16 %v465_v7, %v465_v7 }
  0x76   :  { %1864 = vmatpush.bf16.msrb.mxu0 %v3146_v18  ;;  %v492_v18 = vpack.c.b16 %v467_v8, %v467_v8 }
  0x77   :  { %1890 = vmatpush.bf16.msrb.mxu2 %v3162_v19  ;;  %v3223_v19 = vld [vmem:[%s3990_s1 + $0x578] sm:$0xff] }
  0x78   :  { %1903 = vmatpush.bf16.msrb.mxu3 %v3170_v20  ;;  %v493_v20 = vpack.c.b16 %v468_v11, %v468_v11  ;;  %v3241_v11 = vld [vmem:[%s3990_s1 + $0x608] sm:$0xff] }
  0x79   :  { %1877 = vmatpush.bf16.msrb.mxu1 %v3154_v21  ;;  %v491_v21 = vpack.c.b16 %v466_v14, %v466_v14 }
  0x7a   :  { %1865 = vmatpush.bf16.msrb.mxu0 %v3145_v22  ;;  %v3214_v22 = vld [vmem:[%s3990_s1 + $0x530] sm:$0xff] }
  0x7b   :  { %1891 = vmatpush.bf16.msrb.mxu2 %v3161_v23  ;;  %v3230_v23 = vld [vmem:[%s3990_s1 + $0x5b0] sm:$0xff] }
  0x7c   :  { %1904 = vmatpush.bf16.msrb.mxu3 %v3169_v26  ;;  %v3213_v26 = vld [vmem:[%s3990_s1 + $0x528] sm:$0xff] }
  0x7d   :  { %1878 = vmatpush.bf16.msrb.mxu1 %v3153_v27  ;;  %v3229_v27 = vld [vmem:[%s3990_s1 + $0x5a8] sm:$0xff] }
  0x7e   :  { %1866 = vmatpush.bf16.msrb.mxu0 %v3144_v28  ;;  %v3237_v28 = vld [vmem:[%s3990_s1 + $0x5e8] sm:$0xff] }
  0x7f   :  { %1892 = vmatpush.bf16.msrb.mxu2 %v3160_v31  ;;  %v3212_v31 = vld [vmem:[%s3990_s1 + $0x520] sm:$0xff] }
  0x80   :  { %1905 = vmatpush.bf16.msrb.mxu3 %v3168_v34 }
  0x81   :  { %1879 = vmatpush.bf16.msrb.mxu1 %v3152_v38  ;;  %1867 = vmatmul.bf16.vlgmr.msrb.gmra.mxu0 %v486_v39  ;;  %v3227_v39 = vld [vmem:[%s3990_s1 + $0x598] sm:$0xff] }
  0x82   :  { %1911 = vmatpush.bf16.msra.mxu0 %v3183_v32  ;;  %1893 = vmatmul.bf16.vlgmr.msrb.gmra.mxu2 %v488_v40  ;;  %v3228_v32 = vld [vmem:[%s3990_s1 + $0x5a0] sm:$0xff]  ;;  %v3235_v40 = vld [vmem:[%s3990_s1 + $0x5d8] sm:$0xff] }
  0x83   :  { %1937 = vmatpush.bf16.msra.mxu2 %v3199_v35  ;;  %1906 = vmatmul.bf16.vlgmr.msrb.gmra.mxu3 %v489_v42 }
  0x84   :  { %1950 = vmatpush.bf16.msra.mxu3 %v3207_v37  ;;  %1880 = vmatmul.bf16.vlgmr.msrb.gmra.mxu1 %v487_v43  ;;  %v3211_v37 = vld [vmem:[%s3990_s1 + $0x518] sm:$0xff] }
  0x85   :  { %1924 = vmatpush.bf16.msra.mxu1 %v3191_v41  ;;  %v3219_v43 = vld [vmem:[%s3990_s1 + $0x558] sm:$0xff] }
  0x86   :  { %1912 = vmatpush.bf16.msra.mxu0 %v3182_v44 }
  0x87   :  { %1938 = vmatpush.bf16.msra.mxu2 %v3198_v45  ;;  %v3210_v45 = vld [vmem:[%s3990_s1 + $0x510] sm:$0xff] }
  0x88   :  { %1951 = vmatpush.bf16.msra.mxu3 %v3206_v46 }
  0x89   :  { %1925 = vmatpush.bf16.msra.mxu1 %v3190_v47  ;;  %v3226_v47 = vld [vmem:[%s3990_s1 + $0x590] sm:$0xff] }
  0x8a   :  { %1913 = vmatpush.bf16.msra.mxu0 %v3181_v48  ;;  %v3234_v48 = vld [vmem:[%s3990_s1 + $0x5d0] sm:$0xff] }
  0x8b   :  { %1939 = vmatpush.bf16.msra.mxu2 %v3197_v49 }
  0x8c   :  { %1952 = vmatpush.bf16.msra.mxu3 %v3205_v50 }
  0x8d   :  { %1926 = vmatpush.bf16.msra.mxu1 %v3189_v51  ;;  %v3218_v51 = vld [vmem:[%s3990_s1 + $0x550] sm:$0xff] }
  0x8e   :  { %1914 = vmatpush.bf16.msra.mxu0 %v3180_v52  ;;  %v3209_v52 = vld [vmem:[%s3990_s1 + $0x508] sm:$0xff] }
  0x8f   :  { %1940 = vmatpush.bf16.msra.mxu2 %v3196_v53  ;;  %v37_v53 = vld [vmem:[%s3991_s0 + $0x50] sm:$0xff] }
  0x90   :  { %1953 = vmatpush.bf16.msra.mxu3 %v3204_v54  ;;  %v470_v4 = vunpack.c.h.b16 %v37_v53 }
  0x91   :  { %1927 = vmatpush.bf16.msra.mxu1 %v3188_v55  ;;  %v3225_v55 = vld [vmem:[%s3990_s1 + $0x588] sm:$0xff] }
  0x92   :  { %1915 = vmatpush.bf16.msra.mxu0 %v3179_v56  ;;  %v3233_v56 = vld [vmem:[%s3990_s1 + $0x5c8] sm:$0xff] }
  0x93   :  { %1941 = vmatpush.bf16.msra.mxu2 %v3195_v57  ;;  %v38_v57 = vld [vmem:[%s3991_s0 + $0x58] sm:$0xff] }
  0x94   :  { %1954 = vmatpush.bf16.msra.mxu3 %v3203_v58 }
  0x95   :  { %1928 = vmatpush.bf16.msra.mxu1 %v3187_v59  ;;  %v3217_v59 = vld [vmem:[%s3990_s1 + $0x548] sm:$0xff] }
  0x96   :  { %1916 = vmatpush.bf16.msra.mxu0 %v3178_v60  ;;  %v469_v60 = vunpack.c.l.b16 %v37_v53 }
  0x97   :  { %1942 = vmatpush.bf16.msra.mxu2 %v3194_v61  ;;  %v3208_v61 = vld [vmem:[%s3990_s1 + $0x500] sm:$0xff] }
  0x98   :  { %1955 = vmatpush.bf16.msra.mxu3 %v3202_v62  ;;  %v471_v62 = vunpack.c.l.b16 %v38_v57 }
  0x99   :  { %1929 = vmatpush.bf16.msra.mxu1 %v3186_v63  ;;  %v472_v63 = vunpack.c.h.b16 %v38_v57 }
  0x9a   :  { %1917 = vmatpush.bf16.msra.mxu0 %v3177_v0  ;;  %v496_v7 = vpack.c.b16 %v471_v62, %v471_v62 }
  0x9b   :  { %1943 = vmatpush.bf16.msra.mxu2 %v3193_v1  ;;  %v3224_v1 = vld [vmem:[%s3990_s1 + $0x580] sm:$0xff]  ;;  %v497_v8 = vpack.c.b16 %v472_v63, %v472_v63 }
  0x9c   :  { %1956 = vmatpush.bf16.msra.mxu3 %v3201_v2  ;;  %v3232_v2 = vld [vmem:[%s3990_s1 + $0x5c0] sm:$0xff] }
  0x9d   :  { %1930 = vmatpush.bf16.msra.mxu1 %v3185_v5  ;;  %v3216_v5 = vld [vmem:[%s3990_s1 + $0x540] sm:$0xff] }
  0x9e   :  { %1918 = vmatpush.bf16.msra.mxu0 %v3176_v6  ;;  %v1712_v34 = vpop.f32.mrf.mxu0  ;;  %v494_v6 = vpack.c.b16 %v469_v60, %v469_v60 }
  0x9f   :  { %1944 = vmatpush.bf16.msra.mxu2 %v3192_v9  ;;  %v1713_v35 = vadd.f32 %v3260_v29, %v1712_v34  ;;  %v495_v9 = vpack.c.b16 %v470_v4, %v470_v4  ;;  %v3259_v4 = vld [vmem:[%s3995_s5 + $0x38] sm:$0xff] }
  0xa0   :  { %1957 = vmatpush.bf16.msra.mxu3 %v3200_v10  ;;  %v3242_v10 = vld [vmem:[%s3990_s1 + $0x610] sm:$0xff] }
  0xa1   :  { %1931 = vmatpush.bf16.msra.mxu1 %v3184_v16  ;;  %1919 = vmatmul.bf16.vlgmr.msra.gmra.mxu0 %v490_v17  ;;  %v1725_v38 = vpop.f32.mrf.mxu1 }
  0xa2   :  { %1963 = vmatpush.bf16.msrb.mxu0 %v3215_v12  ;;  %1945 = vmatmul.bf16.vlgmr.msra.gmra.mxu2 %v492_v18  ;;  %v1726_v41 = vadd.f32 %v1725_v38, %v1713_v35  ;;  %v39_v12 = vld [vmem:[%s3991_s0 + $0x60] sm:$0xf] }
  0xa3   :  { %1989 = vmatpush.bf16.msrb.mxu2 %v3231_v13  ;;  %1958 = vmatmul.bf16.vlgmr.msra.gmra.mxu3 %v493_v20  ;;  %v3240_v13 = vld [vmem:[%s3990_s1 + $0x600] sm:$0xff] }
  0xa4   :  { %2002 = vmatpush.bf16.msrb.mxu3 %v3239_v15  ;;  %1932 = vmatmul.bf16.vlgmr.msra.gmra.mxu1 %v491_v21  ;;  %v473_v15 = vunpack.c.l.b16 %v39_v12 }
  0xa5   :  { %1976 = vmatpush.bf16.msrb.mxu1 %v3223_v19  ;;  %v1738_v42 = vpop.f32.mrf.mxu2 }
  0xa6   :  { %1964 = vmatpush.bf16.msrb.mxu0 %v3214_v22  ;;  %v1739_v44 = vadd.f32 %v1738_v42, %v1726_v41  ;;  %v1751_v46 = vpop.f32.mrf.mxu3  ;;  %v1714_v50 = vpop.f32.mrf.mxu0  ;;  %v498_v19 = vpack.c.b16 %v473_v15, %v473_v15  ;;  %v3255_v15 = vld [vmem:[%s3995_s5 + $0x18] sm:$0xff] }
  0xa7   :  { %1990 = vmatpush.bf16.msrb.mxu2 %v3230_v23  ;;  %v3249_v50 = vld [vmem:[%s3994_s3 + $0x28] sm:$0xff] }
  0xa8   :  { %2003 = vmatpush.bf16.msrb.mxu3 %v3238_v24  ;;  %v1752_v49 = vadd.f32 %v1751_v46, %v1739_v44  ;;  %v3251_v44 = vld [vmem:[%s3994_s3 + $0x38] sm:$0xff] }
  0xa9   :  { %1977 = vmatpush.bf16.msrb.mxu1 %v3222_v25  ;;  %v1727_v54 = vpop.f32.mrf.mxu1 }
  0xaa   :  { %1965 = vmatpush.bf16.msrb.mxu0 %v3213_v26  ;;  %v3247_v54 = vld [vmem:[%s3994_s3 + $0x18] sm:$0xff] }
  0xab   :  { %1991 = vmatpush.bf16.msrb.mxu2 %v3229_v27 }
  0xac   :  { %2004 = vmatpush.bf16.msrb.mxu3 %v3237_v28 }
  0xad   :  { %1978 = vmatpush.bf16.msrb.mxu1 %v3221_v30  ;;  %v1740_v58 = vpop.f32.mrf.mxu2 }
  0xae   :  { %1966 = vmatpush.bf16.msrb.mxu0 %v3212_v31  ;;  %v1753_v0 = vpop.f32.mrf.mxu3  ;;  %v3246_v58 = vld [vmem:[%s3994_s3 + $0x10] sm:$0xff] }
  0xaf   :  { %1992 = vmatpush.bf16.msrb.mxu2 %v3228_v32 }
  0xb0   :  { %2005 = vmatpush.bf16.msrb.mxu3 %v3236_v33 }
  0xb1   :  { %1979 = vmatpush.bf16.msrb.mxu1 %v3220_v36 }
  0xb2   :  { %1967 = vmatpush.bf16.msrb.mxu0 %v3211_v37 }
  0xb3   :  { %1993 = vmatpush.bf16.msrb.mxu2 %v3227_v39 }
  0xb4   :  { %2006 = vmatpush.bf16.msrb.mxu3 %v3235_v40 }
  0xb5   :  { %1980 = vmatpush.bf16.msrb.mxu1 %v3219_v43 }
  0xb6   :  { %1968 = vmatpush.bf16.msrb.mxu0 %v3210_v45 }
  0xb7   :  { %1994 = vmatpush.bf16.msrb.mxu2 %v3226_v47  ;;  %v3250_v47 = vld [vmem:[%s3994_s3 + $0x30] sm:$0xff] }
  0xb8   :  { %2007 = vmatpush.bf16.msrb.mxu3 %v3234_v48 }
  0xb9   :  { %1981 = vmatpush.bf16.msrb.mxu1 %v3218_v51 }
  0xba   :  { %1969 = vmatpush.bf16.msrb.mxu0 %v3209_v52  ;;  %v3248_v52 = vld [vmem:[%s3994_s3 + $0x20] sm:$0xff] }
  0xbb   :  { %1995 = vmatpush.bf16.msrb.mxu2 %v3225_v55 }
  0xbc   :  { %2008 = vmatpush.bf16.msrb.mxu3 %v3233_v56 }
  0xbd   :  { %1982 = vmatpush.bf16.msrb.mxu1 %v3217_v59 }
  0xbe   :  { %1970 = vmatpush.bf16.msrb.mxu0 %v3208_v61  ;;  %v1764_v14 = vpop.f32.mrf.mxu0  ;;  %v3245_v61 = vld [vmem:[%s3994_s3 + $0x8] sm:$0xff] }
  0xbf   :  { %1996 = vmatpush.bf16.msrb.mxu2 %v3224_v1  ;;  %v1765_v16 = vadd.f32 %v1764_v14, %v1752_v49 }
  0xc0   :  { %2009 = vmatpush.bf16.msrb.mxu3 %v3232_v2  ;;  %v3244_v2 = vld [vmem:[%s3994_s3] sm:$0xff] }
  0xc1   :  { %1983 = vmatpush.bf16.msrb.mxu1 %v3216_v5  ;;  %1971 = vmatmul.bf16.vlgmr.msrb.gmra.mxu0 %v494_v6  ;;  %v1777_v17 = vpop.f32.mrf.mxu1  ;;  %v3258_v6 = vld [vmem:[%s3995_s5 + $0x30] sm:$0xff] }
  0xc2   :  { %2019 = vmatpush.bf16.msra.mxu0 %v3243_v3  ;;  %1997 = vmatmul.bf16.vlgmr.msrb.gmra.mxu2 %v496_v7  ;;  %v1778_v18 = vadd.f32 %v1777_v17, %v1765_v16 }
  0xc3   :  { %2010 = vmatmul.bf16.vlgmr.msrb.gmra.mxu3 %v497_v8  ;;  %2181 = vmatpush.bf16.msra.mxu2 %v3259_v4  ;;  %v3257_v8 = vld [vmem:[%s3995_s5 + $0x28] sm:$0xff] }
  0xc4   :  { %1984 = vmatmul.bf16.vlgmr.msrb.gmra.mxu1 %v495_v9 }
  0xc5   :  { %v1790_v20 = vpop.f32.mrf.mxu2  ;;  %2098 = vmatpush.bf16.msra.mxu1 %v3251_v44 }
  0xc6   :  { %2020 = vmatpush.bf16.msra.mxu0 %v3242_v10  ;;  %v1791_v21 = vadd.f32 %v1790_v20, %v1778_v18  ;;  %v1803_v22 = vpop.f32.mrf.mxu3  ;;  %v1766_v24 = vpop.f32.mrf.mxu0  ;;  %v3254_v20 = vld [vmem:[%s3995_s5 + $0x10] sm:$0xff] }
  0xc7   :  { %2182 = vmatpush.bf16.msra.mxu2 %v3258_v6 }
  0xc8   :  { %v1804_v23 = vadd.f32 %v1803_v22, %v1791_v21 }
  0xc9   :  { %v1779_v25 = vpop.f32.mrf.mxu1  ;;  %2099 = vmatpush.bf16.msra.mxu1 %v3250_v47 }
  0xca   :  { %2021 = vmatpush.bf16.msra.mxu0 %v3241_v11  ;;  %v3256_v11 = vld [vmem:[%s3995_s5 + $0x20] sm:$0xff] }
  0xcb   :  { %2183 = vmatpush.bf16.msra.mxu2 %v3257_v8 }
  0xcd   :  { %v1792_v26 = vpop.f32.mrf.mxu2  ;;  %2100 = vmatpush.bf16.msra.mxu1 %v3249_v50 }
  0xce   :  { %2022 = vmatpush.bf16.msra.mxu0 %v3240_v13  ;;  %v1805_v27 = vpop.f32.mrf.mxu3 }
  0xcf   :  { %2184 = vmatpush.bf16.msra.mxu2 %v3256_v11 }
  0xd1   :  { %2983 = vmatmul.msk.bf16.vlgmr.msra.gmra.mxu0 %vm1699_vm0, %v498_v19  ;;  %2101 = vmatpush.bf16.msra.mxu1 %v3248_v52 }
  0xd3   :  { %2185 = vmatpush.bf16.msra.mxu2 %v3255_v15 }
  0xd5   :  { %2102 = vmatpush.bf16.msra.mxu1 %v3247_v54 }
  0xd7   :  { %2186 = vmatpush.bf16.msra.mxu2 %v3254_v20 }
  0xd9   :  { %2103 = vmatpush.bf16.msra.mxu1 %v3246_v58 }
  0xdd   :  { %2104 = vmatpush.bf16.msra.mxu1 %v3245_v61 }
  0xde   :  { %v1816_v28 = vpop.f32.mrf.mxu0 }
  0xdf   :  { %v1817_v29 = vadd.f32 %v1816_v28, %v1804_v23 }
  0xe1   :  { %v1829_v30 = vpop.f32.mrf.mxu1  ;;  %2105 = vmatpush.bf16.msra.mxu1 %v3244_v2 }
  0xe2   :  { %v1830_v31 = vadd.f32 %v1829_v30, %v1817_v29 }
  0xe5   :  { %v1842_v32 = vpop.f32.mrf.mxu2 }
  0xe6   :  { %v1843_v33 = vadd.f32 %v1842_v32, %v1830_v31  ;;  %v1855_v34 = vpop.f32.mrf.mxu3  ;;  %v1818_v35 = vpop.f32.mrf.mxu0  ;;  %v3253_v31 = vld [vmem:[%s3995_s5 + $0x8] sm:$0xff]  ;;  %v3252_v32 = vld [vmem:[%s3995_s5] sm:$0xff] }
  0xe7   :  { %2187 = vmatpush.bf16.msra.mxu2 %v3253_v31 }
  0xe8   :  { %v1856_v36 = vadd.f32 %v1855_v34, %v1843_v33  ;;  %v3261_v33 = vld [vmem:[%s3993_s4] ss:$0 sm:$0xff] }
  0xe9   :  { %v1831_v37 = vpop.f32.mrf.mxu1 }
  0xeb   :  { %2188 = vmatpush.bf16.msra.mxu2 %v3252_v32 }
  0xed   :  { %v1844_v38 = vpop.f32.mrf.mxu2 }
  0xee   :  { %v1857_v39 = vpop.f32.mrf.mxu3 }
  0xef   :  { %v3262_v39 = vld [vmem:[%s3996_s6] ss:$0 sm:$0xff] }
  0xfe   :  { %v1868_v40 = vpop.f32.mrf.mxu0 }
  0xff   :  { %v1869_v59 = vadd.f32 %v1868_v40, %v1856_v36 }
 0x101   :  { %v1881_v41 = vpop.f32.mrf.mxu1 }
 0x102   :  { %v1882_v62 = vadd.f32 %v1881_v41, %v1869_v59 }
 0x105   :  { %v1894_v42 = vpop.f32.mrf.mxu2 }
 0x106   :  { %v1907_v43 = vpop.f32.mrf.mxu3  ;;  %v1870_v45 = vpop.f32.mrf.mxu0  ;;  %v1895_v1 = vadd.f32 %v1894_v42, %v1882_v62 }
 0x108   :  { %v1908_v3 = vadd.f32 %v1907_v43, %v1895_v1 }
 0x109   :  { %v1883_v46 = vpop.f32.mrf.mxu1 }
 0x10d   :  { %v1896_v48 = vpop.f32.mrf.mxu2 }
 0x10e   :  { %v1909_v49 = vpop.f32.mrf.mxu3 }
 0x11e   :  { %v1920_v51 = vpop.f32.mrf.mxu0 }
 0x11f   :  { %v1921_v5 = vadd.f32 %v1920_v51, %v1908_v3 }
 0x121   :  { %v1933_v53 = vpop.f32.mrf.mxu1 }
 0x122   :  { %v1934_v7 = vadd.f32 %v1933_v53, %v1921_v5 }
 0x125   :  { %v1946_v55 = vpop.f32.mrf.mxu2 }
 0x126   :  { %v1959_v56 = vpop.f32.mrf.mxu3  ;;  %v1922_v57 = vpop.f32.mrf.mxu0  ;;  %v1947_v9 = vadd.f32 %v1946_v55, %v1934_v7 }
 0x128   :  { %v1960_v12 = vadd.f32 %v1959_v56, %v1947_v9 }
 0x129   :  { %v1935_v60 = vpop.f32.mrf.mxu1 }
 0x12d   :  { %v1948_v63 = vpop.f32.mrf.mxu2 }
 0x12e   :  { %v1961_v0 = vpop.f32.mrf.mxu3 }
 0x13e   :  { %v1972_v10 = vpop.f32.mrf.mxu0 }
 0x13f   :  { %v1973_v14 = vadd.f32 %v1972_v10, %v1960_v12 }
 0x141   :  { %v1985_v13 = vpop.f32.mrf.mxu1 }
 0x142   :  { %v1986_v19 = vadd.f32 %v1985_v13, %v1973_v14 }
 0x145   :  { %v1998_v16 = vpop.f32.mrf.mxu2 }
 0x146   :  { %v2011_v17 = vpop.f32.mrf.mxu3  ;;  %v1974_v18 = vpop.f32.mrf.mxu0  ;;  %v1999_v21 = vadd.f32 %v1998_v16, %v1986_v19 }
 0x148   :  { %v2012_v23 = vadd.f32 %v2011_v17, %v1999_v21 }
 0x149   :  { %v1987_v22 = vpop.f32.mrf.mxu1 }
 0x14d   :  { %v2000_v24 = vpop.f32.mrf.mxu2 }
 0x14e   :  { %v2013_v25 = vpop.f32.mrf.mxu3  ;;  %v2024_v26 = vpop.f32.mrf.mxu0 }
 0x14f   :  { %v2025_v27 = vadd.f32 %v2024_v26, %v2012_v23 }
 0x151   :  { %v2028_v28 = vmax.f32 %v2025_v27, 0.0 }
 0x153   :  { %v2029_v29 = vpack.c.bf16 %v2028_v28, %v2028_v28 }
 0x155   :  { %2106 = vmatmul.bf16.vlgmr.msra.gmra.mxu1 %v2029_v29 }
 0x156   :  { %v2026_v30 = vpop.f32.mrf.mxu0 }
 0x1d2   :  { %v2107_v34 = vpop.f32.mrf.mxu1 }
 0x1d3   :  { %v2108_v35 = vadd.f32 %v3261_v33, %v2107_v34 }
 0x1d5   :  { %v2111_v36 = vmax.f32 %v2108_v35, 0.0 }
 0x1d7   :  { %v2112_v37 = vpack.c.bf16 %v2111_v36, %v2111_v36 }
 0x1d9   :  { %2189 = vmatmul.bf16.vlgmr.msra.gmra.mxu2 %v2112_v37 }
 0x1da   :  { %v2109_v38 = vpop.f32.mrf.mxu1 }
 0x25c   :  { %v2190_v40 = vpop.f32.mrf.mxu2 }
 0x25d   :  { %v2191_v41 = vadd.f32 %v3262_v39, %v2190_v40 }
 0x25f   :  { %2194 = vst [vmem:[%s3997_s7] sm:$0xff] %v2191_v41 }
 0x264   :  { %v2192_v42 = vpop.f32.mrf.mxu2 }

</bundles_post_ra>
